<compile_context>
chip_gen: v7x
topology: tpu7x:2x2x1
jax: 0.10.0
libtpu: 0.0.40
codegen_flags: <defaults>
</compile_context>

<pallas_src>
import functools

import jax
import jax.numpy as jnp
from jax.experimental import pallas as pl
from jax.experimental.pallas import tpu as pltpu


def _round_up(n, m):
    return ((n + m - 1) // m) * m


# --------------------------------------------------------------------------- #
# Pallas kernel
# --------------------------------------------------------------------------- #
def bilstm_head_kernel(x_seq_ref, x_last_ref,
                       wih_f_ref, b_f_ref, whh_f_ref,
                       wih_b_ref, b_b_ref,
                       w1_ref, b1_ref, w2_ref, b2_ref, w3_ref, b3_ref,
                       o_ref, *, seq_len):
    T = seq_len
    Bt, _D = x_last_ref.shape
    Dp = whh_f_ref.shape[0]                 # hidden size padded to a 128-lane multiple

    # ---- Forward LSTM: hoisted input projection --------------------------------
    # One (Bt*T, D) x (D, 4*Dp) matmul with the bias folded in; only h @ whh stays
    # on the serial (latency-bound) recurrence path.
    x_seq = x_seq_ref[...]                                          # (Bt*T, D) bf16
    gx = (jnp.dot(x_seq, wih_f_ref[...],
                  preferred_element_type=jnp.float32)
          + b_f_ref[...])                                           # (Bt*T, 4*Dp) f32
    gx = gx.reshape(Bt, T, 4 * Dp)          # tile-aligned: minor dim 4*Dp, 8-row groups

    whh = whh_f_ref[...]                    # (Dp, 4*Dp) bf16, constant across all steps

    h = jnp.zeros((Bt, Dp), jnp.float32)
    c = jnp.zeros((Bt, Dp), jnp.float32)
    # Static unroll: T is small here.  For T >~ 16, switch to
    # lax.fori_loop(..., unroll=2..4) carrying (h, c) to bound vreg live ranges.
    for t in range(T):
        gates = gx[:, t, :] + jnp.dot(h.astype(jnp.bfloat16), whh,
                                      preferred_element_type=jnp.float32)
        # Gate blocks are Dp(=128)-lane wide -> lane-aligned slices, no cross-lane work.
        i = jax.nn.sigmoid(gates[:, 0 * Dp:1 * Dp])
        f = jax.nn.sigmoid(gates[:, 1 * Dp:2 * Dp])
        g = jnp.tanh(gates[:, 2 * Dp:3 * Dp])
        o = jax.nn.sigmoid(gates[:, 3 * Dp:4 * Dp])
        c = f * c + i * g
        h = o * jnp.tanh(c)

    # ---- Backward LSTM output at position T-1 ----------------------------------
    # It is the backward cell's FIRST step from a zero state, so h0 @ whh_b == 0 and
    # f_gate * c0 == 0: whh_b and the forget gate are mathematically unnecessary.
    gb = (jnp.dot(x_last_ref[...], wih_b_ref[...],
                  preferred_element_type=jnp.float32) + b_b_ref[...])
    i_b = jax.nn.sigmoid(gb[:, 0 * Dp:1 * Dp])
    g_b = jnp.tanh(gb[:, 2 * Dp:3 * Dp])
    o_b = jax.nn.sigmoid(gb[:, 3 * Dp:4 * Dp])
    h_b = o_b * jnp.tanh(i_b * g_b)

    last = jnp.concatenate([h, h_b], axis=-1)                       # (Bt, 2*Dp) f32

    # ---- MLP head (dropout = identity at inference); dims padded to 128 lanes ---
    d1 = jnp.tanh(jnp.dot(last.astype(jnp.bfloat16), w1_ref[...],
                          preferred_element_type=jnp.float32) + b1_ref[...])
    d2 = jnp.tanh(jnp.dot(d1.astype(jnp.bfloat16), w2_ref[...],
                          preferred_element_type=jnp.float32) + b2_ref[...])
    out = (jnp.dot(d2.astype(jnp.bfloat16), w3_ref[...],
                   preferred_element_type=jnp.float32) + b3_ref[...])
    o_ref[...] = out.astype(o_ref.dtype)                            # lane-dense (Bt, 128)


# --------------------------------------------------------------------------- #
# Wrapper
# --------------------------------------------------------------------------- #
def bilstm_classifier_forward(sent_id, kp, *, b_tile=128):
    """sent_id: (B, T) int32 token ids; kp: packed params. Returns (B, 1) f32 logits."""
    B, T = sent_id.shape
    D = kp["wih_f"].shape[0]
    OUTp = kp["w3"].shape[1]

    # Batch tiling: keep tiles a multiple of 16 rows (bf16 sublane packing).
    b_tile = max(16, min(b_tile, _round_up(B, 16)))
    Bp = _round_up(B, b_tile)
    nb = Bp // b_tile

    # Embedding gather + batch pad (padding_idx = 0 rows) -- plain JAX glue.
    ids = jnp.zeros((Bp, T), sent_id.dtype).at[:B].set(sent_id)
    x = jnp.take(kp["embedding"], ids, axis=0).astype(jnp.bfloat16)     # (Bp, T, D)
    x_seq = x.reshape(Bp * T, D)                                        # batch-major rows
    x_last = x[:, T - 1, :]                                             # (Bp, D)

    kernel = functools.partial(bilstm_head_kernel, seq_len=T)

    const2 = lambda i: (0, 0)
    grid_spec = pltpu.PrefetchScalarGridSpec(
        num_scalar_prefetch=0,
        grid=(nb,),
        in_specs=[
            pl.BlockSpec((b_tile * T, D), lambda i: (i, 0)),    # x_seq  (per batch tile)
            pl.BlockSpec((b_tile, D), lambda i: (i, 0)),        # x_last (per batch tile)
            pl.BlockSpec(kp["wih_f"].shape, const2),            # weights: VMEM-resident
            pl.BlockSpec(kp["b_f"].shape, const2),
            pl.BlockSpec(kp["whh_f"].shape, const2),
            pl.BlockSpec(kp["wih_b"].shape, const2),
            pl.BlockSpec(kp["b_b"].shape, const2),
            pl.BlockSpec(kp["w1"].shape, const2),
            pl.BlockSpec(kp["b1"].shape, const2),
            pl.BlockSpec(kp["w2"].shape, const2),
            pl.BlockSpec(kp["b2"].shape, const2),
            pl.BlockSpec(kp["w3"].shape, const2),
            pl.BlockSpec(kp["b3"].shape, const2),
        ],
        out_specs=pl.BlockSpec((b_tile, OUTp), lambda i: (i, 0)),
    )

    out = pl.pallas_call(
        kernel,
        out_shape=jax.ShapeDtypeStruct((Bp, OUTp), jnp.float32),
        grid_spec=grid_spec,
        compiler_params=pltpu.CompilerParams(
            dimension_semantics=("parallel",)),   # shards batch tiles across v7x's 2 TCs
    )(x_seq, x_last,
      kp["wih_f"], kp["b_f"], kp["whh_f"],
      kp["wih_b"], kp["b_b"],
      kp["w1"], kp["b1"], kp["w2"], kp["b2"], kp["w3"], kp["b3"])

    return out[:B, :1]                        # real logit lives in lane 0


# --------------------------------------------------------------------------- #
# Parameter init (logical / PyTorch-like layout) and packing (padded, bf16)
# --------------------------------------------------------------------------- #
def init_params(key, vocab_size, d_features):
    D = d_features
    ks = jax.random.split(key, 16)

    def u(k, shape, scale):
        return jax.random.uniform(k, shape, jnp.float32, -scale, scale)

    lstm_scale = 1.0 / jnp.sqrt(D)
    emb = jax.random.normal(ks[0], (vocab_size, D), jnp.float32)
    emb = emb.at[0].set(0.0)                  # padding_idx=0 row zeroed, like nn.Embedding
    return {
        "embedding": emb,
        # weights stored transposed as (in, 4D); gate order i,f,g,o; bias = b_ih + b_hh
        "wih_f": u(ks[1], (D, 4 * D), lstm_scale),
        "whh_f": u(ks[2], (D, 4 * D), lstm_scale),
        "b_f": u(ks[3], (1, 4 * D), lstm_scale) + u(ks[4], (1, 4 * D), lstm_scale),
        "wih_b": u(ks[5], (D, 4 * D), lstm_scale),
        "whh_b": u(ks[6], (D, 4 * D), lstm_scale),   # unused: zero contribution at t=T-1
        "b_b": u(ks[7], (1, 4 * D), lstm_scale) + u(ks[8], (1, 4 * D), lstm_scale),
        "w1": u(ks[9], (2 * D, 100), 1.0 / jnp.sqrt(2 * D)),
        "b1": u(ks[10], (1, 100), 1.0 / jnp.sqrt(2 * D)),
        "w2": u(ks[11], (100, 20), 1.0 / jnp.sqrt(100.0)),
        "b2": u(ks[12], (1, 20), 1.0 / jnp.sqrt(100.0)),
        "w3": u(ks[13], (20, 1), 1.0 / jnp.sqrt(20.0)),
        "b3": u(ks[14], (1, 1), 1.0 / jnp.sqrt(20.0)),
    }


def pack_params(p):
    """Zero-pad every gate / feature dim to a 128-lane multiple, cast weights to bf16."""
    f32, bf16 = jnp.float32, jnp.bfloat16
    D = p["wih_f"].shape[0]
    Dp = _round_up(D, 128)
    H1, H2, NO = p["w1"].shape[1], p["w2"].shape[1], p["w3"].shape[1]
    H1p, H2p, NOp = _round_up(H1, 128), _round_up(H2, 128), _round_up(NO, 128)

    def pad_ih(w):   # (D, 4D) -> (D, 4*Dp) bf16
        w4 = w.reshape(D, 4, D)
        return (jnp.zeros((D, 4, Dp), f32).at[:, :, :D].set(w4)
                .reshape(D, 4 * Dp).astype(bf16))

    def pad_hh(w):   # (D, 4D) -> (Dp, 4*Dp) bf16
        w4 = w.reshape(D, 4, D)
        return (jnp.zeros((Dp, 4, Dp), f32).at[:D, :, :D].set(w4)
                .reshape(Dp, 4 * Dp).astype(bf16))

    def pad_gb(b):   # (1, 4D) -> (1, 4*Dp) f32
        b4 = b.reshape(1, 4, D)
        return jnp.zeros((1, 4, Dp), f32).at[:, :, :D].set(b4).reshape(1, 4 * Dp)

    w1p = (jnp.zeros((2 * Dp, H1p), f32)
           .at[:D, :H1].set(p["w1"][:D])
           .at[Dp:Dp + D, :H1].set(p["w1"][D:])
           .astype(bf16))
    return {
        "embedding": p["embedding"],
        "wih_f": pad_ih(p["wih_f"]), "whh_f": pad_hh(p["whh_f"]), "b_f": pad_gb(p["b_f"]),
        "wih_b": pad_ih(p["wih_b"]), "b_b": pad_gb(p["b_b"]),     # whh_b dropped (== 0 use)
        "w1": w1p,
        "b1": jnp.zeros((1, H1p), f32).at[:, :H1].set(p["b1"]),
        "w2": jnp.zeros((H1p, H2p), f32).at[:H1, :H2].set(p["w2"]).astype(bf16),
        "b2": jnp.zeros((1, H2p), f32).at[:, :H2].set(p["b2"]),
        "w3": jnp.zeros((H2p, NOp), f32).at[:H2, :NO].set(p["w3"]).astype(bf16),
        "b3": jnp.zeros((1, NOp), f32).at[:, :NO].set(p["b3"]),
    }


# --------------------------------------------------------------------------- #
# Pure-JAX reference (same math / same bf16-matmul+f32-accumulate precision)
# --------------------------------------------------------------------------- #
def reference_forward(sent_id, params):
    D = params["wih_f"].shape[0]
    x = jnp.take(params["embedding"], sent_id, axis=0).astype(jnp.bfloat16)
    B, T, _ = x.shape

    def bdot(a, b):
        return jnp.dot(a.astype(jnp.bfloat16), b.astype(jnp.bfloat16),
                       preferred_element_type=jnp.float32)

    gx = (bdot(x.reshape(B * T, D), params["wih_f"]).reshape(B, T, 4 * D)
          + params["b_f"])
    h = jnp.zeros((B, D), jnp.float32)
    c = jnp.zeros((B, D), jnp.float32)
    for t in range(T):
        gates = gx[:, t] + bdot(h, params["whh_f"])
        i = jax.nn.sigmoid(gates[:, 0 * D:1 * D])
        f = jax.nn.sigmoid(gates[:, 1 * D:2 * D])
        g = jnp.tanh(gates[:, 2 * D:3 * D])
        o = jax.nn.sigmoid(gates[:, 3 * D:4 * D])
        c = f * c + i * g
        h = o * jnp.tanh(c)

    gb = bdot(x[:, T - 1], params["wih_b"]) + params["b_b"]
    i_b = jax.nn.sigmoid(gb[:, 0 * D:1 * D])
    g_b = jnp.tanh(gb[:, 2 * D:3 * D])
    o_b = jax.nn.sigmoid(gb[:, 3 * D:4 * D])
    h_b = o_b * jnp.tanh(i_b * g_b)          # h0 = c0 = 0 -> whh_b contributes nothing

    last = jnp.concatenate([h, h_b], axis=-1)
    d1 = jnp.tanh(bdot(last, params["w1"]) + params["b1"])
    d2 = jnp.tanh(bdot(d1, params["w2"]) + params["b2"])
    return bdot(d2, params["w3"]) + params["b3"]


# --------------------------------------------------------------------------- #
if __name__ == "__main__":
    B, T, D, VOCAB = 2, 8, 32, 50

    key = jax.random.PRNGKey(0)
    k_ids, k_params = jax.random.split(key)
    params = init_params(k_params, VOCAB, D)
    sent_id = jax.random.randint(k_ids, (B, T), 0, VOCAB, dtype=jnp.int32)

    kparams = pack_params(params)
    fwd = jax.jit(bilstm_classifier_forward)
    out = jax.block_until_ready(fwd(sent_id, kparams))

    ref = reference_forward(sent_id, params)
    assert out.shape == (B, 1), out.shape
    assert jnp.allclose(out, ref, atol=2e-3, rtol=2e-3), (out, ref)
    print("KERNEL_OK")
</pallas_src>

<mosaic_0001>
module attributes {stable_mosaic.version = 11 : i64} {
  func.func @bilstm_head_kernel(%arg0: i32, %arg1: memref<128x32xbf16, #tpu.memory_space<vmem>>, %arg2: memref<16x32xbf16, #tpu.memory_space<vmem>>, %arg3: memref<32x512xbf16, #tpu.memory_space<vmem>>, %arg4: memref<1x512xf32, #tpu.memory_space<vmem>>, %arg5: memref<128x512xbf16, #tpu.memory_space<vmem>>, %arg6: memref<32x512xbf16, #tpu.memory_space<vmem>>, %arg7: memref<1x512xf32, #tpu.memory_space<vmem>>, %arg8: memref<256x128xbf16, #tpu.memory_space<vmem>>, %arg9: memref<1x128xf32, #tpu.memory_space<vmem>>, %arg10: memref<128x128xbf16, #tpu.memory_space<vmem>>, %arg11: memref<1x128xf32, #tpu.memory_space<vmem>>, %arg12: memref<128x128xbf16, #tpu.memory_space<vmem>>, %arg13: memref<1x128xf32, #tpu.memory_space<vmem>>, %arg14: memref<16x128xf32, #tpu.memory_space<vmem>>) attributes {dimension_semantics = [#tpu.dimension_semantics<parallel>], iteration_bounds = array<i64: 1>, scalar_prefetch = 0 : i64, scratch_operands = 0 : i64, tpu.core_type = #tpu.core_type<tc>, window_params = [{transform_indices = @transform_0, window_bounds = array<i64: 128, 32>}, {transform_indices = @transform_1, window_bounds = array<i64: 16, 32>}, {pipeline_mode = #tpu.pipeline_mode<synchronous>, transform_indices = @transform_2, window_bounds = array<i64: 32, 512>}, {pipeline_mode = #tpu.pipeline_mode<synchronous>, transform_indices = @transform_3, window_bounds = array<i64: 1, 512>}, {pipeline_mode = #tpu.pipeline_mode<synchronous>, transform_indices = @transform_4, window_bounds = array<i64: 128, 512>}, {pipeline_mode = #tpu.pipeline_mode<synchronous>, transform_indices = @transform_5, window_bounds = array<i64: 32, 512>}, {pipeline_mode = #tpu.pipeline_mode<synchronous>, transform_indices = @transform_6, window_bounds = array<i64: 1, 512>}, {pipeline_mode = #tpu.pipeline_mode<synchronous>, transform_indices = @transform_7, window_bounds = array<i64: 256, 128>}, {pipeline_mode = #tpu.pipeline_mode<synchronous>, transform_indices = @transform_8, window_bounds = array<i64: 1, 128>}, {pipeline_mode = #tpu.pipeline_mode<synchronous>, transform_indices = @transform_9, window_bounds = array<i64: 128, 128>}, {pipeline_mode = #tpu.pipeline_mode<synchronous>, transform_indices = @transform_10, window_bounds = array<i64: 1, 128>}, {pipeline_mode = #tpu.pipeline_mode<synchronous>, transform_indices = @transform_11, window_bounds = array<i64: 128, 128>}, {pipeline_mode = #tpu.pipeline_mode<synchronous>, transform_indices = @transform_12, window_bounds = array<i64: 1, 128>}, {transform_indices = @transform_13, window_bounds = array<i64: 16, 128>}]} {
    %c0 = arith.constant 0 : index
    %c0_0 = arith.constant 0 : index
    %0 = vector.load %arg1[%c0, %c0_0] : memref<128x32xbf16, #tpu.memory_space<vmem>>, vector<128x32xbf16>
    %c0_1 = arith.constant 0 : index
    %c0_2 = arith.constant 0 : index
    %1 = vector.load %arg3[%c0_1, %c0_2] : memref<32x512xbf16, #tpu.memory_space<vmem>>, vector<32x512xbf16>
    %cst = arith.constant dense<0.000000e+00> : vector<128x512xf32>
    %2 = tpu.matmul %0, %1, %cst {dimension_numbers = #tpu.dot_dimension_numbers<[1], [0], [0], [1], [0, 0, 1, 1], [], []>} : vector<128x32xbf16>, vector<32x512xbf16>, vector<128x512xf32> -> vector<128x512xf32>
    %c0_3 = arith.constant 0 : index
    %c0_4 = arith.constant 0 : index
    %3 = vector.load %arg4[%c0_3, %c0_4] : memref<1x512xf32, #tpu.memory_space<vmem>>, vector<1x512xf32>
    %4 = vector.broadcast %3 : vector<1x512xf32> to vector<128x512xf32>
    %5 = arith.addf %2, %4 : vector<128x512xf32>
    %6 = vector.shape_cast %5 : vector<128x512xf32> to vector<16x8x512xf32>
    %c0_5 = arith.constant 0 : index
    %c0_6 = arith.constant 0 : index
    %7 = vector.load %arg5[%c0_5, %c0_6] : memref<128x512xbf16, #tpu.memory_space<vmem>>, vector<128x512xbf16>
    %cst_7 = arith.constant 0.000000e+00 : f32
    %8 = vector.broadcast %cst_7 : f32 to vector<16x128xf32>
    %cst_8 = arith.constant 0.000000e+00 : f32
    %9 = vector.broadcast %cst_8 : f32 to vector<16x128xf32>
    %10 = vector.extract_strided_slice %6 {offsets = [0, 0, 0], sizes = [16, 1, 512], strides = [1, 1, 1]} : vector<16x8x512xf32> to vector<16x1x512xf32>
    %11 = vector.shape_cast %10 : vector<16x1x512xf32> to vector<16x512xf32>
    %12 = arith.truncf %8 : vector<16x128xf32> to vector<16x128xbf16>
    %cst_9 = arith.constant dense<0.000000e+00> : vector<16x512xf32>
    %13 = tpu.matmul %12, %7, %cst_9 {dimension_numbers = #tpu.dot_dimension_numbers<[1], [0], [0], [1], [0, 0, 1, 1], [], []>} : vector<16x128xbf16>, vector<128x512xbf16>, vector<16x512xf32> -> vector<16x512xf32>
    %14 = arith.addf %11, %13 : vector<16x512xf32>
    %15 = vector.extract_strided_slice %14 {offsets = [0, 0], sizes = [16, 128], strides = [1, 1]} : vector<16x512xf32> to vector<16x128xf32>
    %16 = arith.negf %15 : vector<16x128xf32>
    %17 = math.exp %16 : vector<16x128xf32>
    %cst_10 = arith.constant 1.000000e+00 : f32
    %18 = vector.broadcast %cst_10 : f32 to vector<16x128xf32>
    %19 = arith.addf %18, %17 : vector<16x128xf32>
    %20 = arith.divf %18, %19 : vector<16x128xf32>
    %21 = vector.extract_strided_slice %14 {offsets = [0, 128], sizes = [16, 128], strides = [1, 1]} : vector<16x512xf32> to vector<16x128xf32>
    %22 = arith.negf %21 : vector<16x128xf32>
    %23 = math.exp %22 : vector<16x128xf32>
    %cst_11 = arith.constant 1.000000e+00 : f32
    %24 = vector.broadcast %cst_11 : f32 to vector<16x128xf32>
    %25 = arith.addf %24, %23 : vector<16x128xf32>
    %26 = arith.divf %24, %25 : vector<16x128xf32>
    %27 = vector.extract_strided_slice %14 {offsets = [0, 256], sizes = [16, 128], strides = [1, 1]} : vector<16x512xf32> to vector<16x128xf32>
    %28 = math.tanh %27 : vector<16x128xf32>
    %29 = vector.extract_strided_slice %14 {offsets = [0, 384], sizes = [16, 128], strides = [1, 1]} : vector<16x512xf32> to vector<16x128xf32>
    %30 = arith.negf %29 : vector<16x128xf32>
    %31 = math.exp %30 : vector<16x128xf32>
    %cst_12 = arith.constant 1.000000e+00 : f32
    %32 = vector.broadcast %cst_12 : f32 to vector<16x128xf32>
    %33 = arith.addf %32, %31 : vector<16x128xf32>
    %34 = arith.divf %32, %33 : vector<16x128xf32>
    %35 = arith.mulf %26, %9 : vector<16x128xf32>
    %36 = arith.mulf %20, %28 : vector<16x128xf32>
    %37 = arith.addf %35, %36 : vector<16x128xf32>
    %38 = math.tanh %37 : vector<16x128xf32>
    %39 = arith.mulf %34, %38 : vector<16x128xf32>
    %40 = vector.extract_strided_slice %6 {offsets = [0, 1, 0], sizes = [16, 1, 512], strides = [1, 1, 1]} : vector<16x8x512xf32> to vector<16x1x512xf32>
    %41 = vector.shape_cast %40 : vector<16x1x512xf32> to vector<16x512xf32>
    %42 = arith.truncf %39 : vector<16x128xf32> to vector<16x128xbf16>
    %cst_13 = arith.constant dense<0.000000e+00> : vector<16x512xf32>
    %43 = tpu.matmul %42, %7, %cst_13 {dimension_numbers = #tpu.dot_dimension_numbers<[1], [0], [0], [1], [0, 0, 1, 1], [], []>} : vector<16x128xbf16>, vector<128x512xbf16>, vector<16x512xf32> -> vector<16x512xf32>
    %44 = arith.addf %41, %43 : vector<16x512xf32>
    %45 = vector.extract_strided_slice %44 {offsets = [0, 0], sizes = [16, 128], strides = [1, 1]} : vector<16x512xf32> to vector<16x128xf32>
    %46 = arith.negf %45 : vector<16x128xf32>
    %47 = math.exp %46 : vector<16x128xf32>
    %cst_14 = arith.constant 1.000000e+00 : f32
    %48 = vector.broadcast %cst_14 : f32 to vector<16x128xf32>
    %49 = arith.addf %48, %47 : vector<16x128xf32>
    %50 = arith.divf %48, %49 : vector<16x128xf32>
    %51 = vector.extract_strided_slice %44 {offsets = [0, 128], sizes = [16, 128], strides = [1, 1]} : vector<16x512xf32> to vector<16x128xf32>
    %52 = arith.negf %51 : vector<16x128xf32>
    %53 = math.exp %52 : vector<16x128xf32>
    %cst_15 = arith.constant 1.000000e+00 : f32
    %54 = vector.broadcast %cst_15 : f32 to vector<16x128xf32>
    %55 = arith.addf %54, %53 : vector<16x128xf32>
    %56 = arith.divf %54, %55 : vector<16x128xf32>
    %57 = vector.extract_strided_slice %44 {offsets = [0, 256], sizes = [16, 128], strides = [1, 1]} : vector<16x512xf32> to vector<16x128xf32>
    %58 = math.tanh %57 : vector<16x128xf32>
    %59 = vector.extract_strided_slice %44 {offsets = [0, 384], sizes = [16, 128], strides = [1, 1]} : vector<16x512xf32> to vector<16x128xf32>
    %60 = arith.negf %59 : vector<16x128xf32>
    %61 = math.exp %60 : vector<16x128xf32>
    %cst_16 = arith.constant 1.000000e+00 : f32
    %62 = vector.broadcast %cst_16 : f32 to vector<16x128xf32>
    %63 = arith.addf %62, %61 : vector<16x128xf32>
    %64 = arith.divf %62, %63 : vector<16x128xf32>
    %65 = arith.mulf %56, %37 : vector<16x128xf32>
    %66 = arith.mulf %50, %58 : vector<16x128xf32>
    %67 = arith.addf %65, %66 : vector<16x128xf32>
    %68 = math.tanh %67 : vector<16x128xf32>
    %69 = arith.mulf %64, %68 : vector<16x128xf32>
    %70 = vector.extract_strided_slice %6 {offsets = [0, 2, 0], sizes = [16, 1, 512], strides = [1, 1, 1]} : vector<16x8x512xf32> to vector<16x1x512xf32>
    %71 = vector.shape_cast %70 : vector<16x1x512xf32> to vector<16x512xf32>
    %72 = arith.truncf %69 : vector<16x128xf32> to vector<16x128xbf16>
    %cst_17 = arith.constant dense<0.000000e+00> : vector<16x512xf32>
    %73 = tpu.matmul %72, %7, %cst_17 {dimension_numbers = #tpu.dot_dimension_numbers<[1], [0], [0], [1], [0, 0, 1, 1], [], []>} : vector<16x128xbf16>, vector<128x512xbf16>, vector<16x512xf32> -> vector<16x512xf32>
    %74 = arith.addf %71, %73 : vector<16x512xf32>
    %75 = vector.extract_strided_slice %74 {offsets = [0, 0], sizes = [16, 128], strides = [1, 1]} : vector<16x512xf32> to vector<16x128xf32>
    %76 = arith.negf %75 : vector<16x128xf32>
    %77 = math.exp %76 : vector<16x128xf32>
    %cst_18 = arith.constant 1.000000e+00 : f32
    %78 = vector.broadcast %cst_18 : f32 to vector<16x128xf32>
    %79 = arith.addf %78, %77 : vector<16x128xf32>
    %80 = arith.divf %78, %79 : vector<16x128xf32>
    %81 = vector.extract_strided_slice %74 {offsets = [0, 128], sizes = [16, 128], strides = [1, 1]} : vector<16x512xf32> to vector<16x128xf32>
    %82 = arith.negf %81 : vector<16x128xf32>
    %83 = math.exp %82 : vector<16x128xf32>
    %cst_19 = arith.constant 1.000000e+00 : f32
    %84 = vector.broadcast %cst_19 : f32 to vector<16x128xf32>
    %85 = arith.addf %84, %83 : vector<16x128xf32>
    %86 = arith.divf %84, %85 : vector<16x128xf32>
    %87 = vector.extract_strided_slice %74 {offsets = [0, 256], sizes = [16, 128], strides = [1, 1]} : vector<16x512xf32> to vector<16x128xf32>
    %88 = math.tanh %87 : vector<16x128xf32>
    %89 = vector.extract_strided_slice %74 {offsets = [0, 384], sizes = [16, 128], strides = [1, 1]} : vector<16x512xf32> to vector<16x128xf32>
    %90 = arith.negf %89 : vector<16x128xf32>
    %91 = math.exp %90 : vector<16x128xf32>
    %cst_20 = arith.constant 1.000000e+00 : f32
    %92 = vector.broadcast %cst_20 : f32 to vector<16x128xf32>
    %93 = arith.addf %92, %91 : vector<16x128xf32>
    %94 = arith.divf %92, %93 : vector<16x128xf32>
    %95 = arith.mulf %86, %67 : vector<16x128xf32>
    %96 = arith.mulf %80, %88 : vector<16x128xf32>
    %97 = arith.addf %95, %96 : vector<16x128xf32>
    %98 = math.tanh %97 : vector<16x128xf32>
    %99 = arith.mulf %94, %98 : vector<16x128xf32>
    %100 = vector.extract_strided_slice %6 {offsets = [0, 3, 0], sizes = [16, 1, 512], strides = [1, 1, 1]} : vector<16x8x512xf32> to vector<16x1x512xf32>
    %101 = vector.shape_cast %100 : vector<16x1x512xf32> to vector<16x512xf32>
    %102 = arith.truncf %99 : vector<16x128xf32> to vector<16x128xbf16>
    %cst_21 = arith.constant dense<0.000000e+00> : vector<16x512xf32>
    %103 = tpu.matmul %102, %7, %cst_21 {dimension_numbers = #tpu.dot_dimension_numbers<[1], [0], [0], [1], [0, 0, 1, 1], [], []>} : vector<16x128xbf16>, vector<128x512xbf16>, vector<16x512xf32> -> vector<16x512xf32>
    %104 = arith.addf %101, %103 : vector<16x512xf32>
    %105 = vector.extract_strided_slice %104 {offsets = [0, 0], sizes = [16, 128], strides = [1, 1]} : vector<16x512xf32> to vector<16x128xf32>
    %106 = arith.negf %105 : vector<16x128xf32>
    %107 = math.exp %106 : vector<16x128xf32>
    %cst_22 = arith.constant 1.000000e+00 : f32
    %108 = vector.broadcast %cst_22 : f32 to vector<16x128xf32>
    %109 = arith.addf %108, %107 : vector<16x128xf32>
    %110 = arith.divf %108, %109 : vector<16x128xf32>
    %111 = vector.extract_strided_slice %104 {offsets = [0, 128], sizes = [16, 128], strides = [1, 1]} : vector<16x512xf32> to vector<16x128xf32>
    %112 = arith.negf %111 : vector<16x128xf32>
    %113 = math.exp %112 : vector<16x128xf32>
    %cst_23 = arith.constant 1.000000e+00 : f32
    %114 = vector.broadcast %cst_23 : f32 to vector<16x128xf32>
    %115 = arith.addf %114, %113 : vector<16x128xf32>
    %116 = arith.divf %114, %115 : vector<16x128xf32>
    %117 = vector.extract_strided_slice %104 {offsets = [0, 256], sizes = [16, 128], strides = [1, 1]} : vector<16x512xf32> to vector<16x128xf32>
    %118 = math.tanh %117 : vector<16x128xf32>
    %119 = vector.extract_strided_slice %104 {offsets = [0, 384], sizes = [16, 128], strides = [1, 1]} : vector<16x512xf32> to vector<16x128xf32>
    %120 = arith.negf %119 : vector<16x128xf32>
    %121 = math.exp %120 : vector<16x128xf32>
    %cst_24 = arith.constant 1.000000e+00 : f32
    %122 = vector.broadcast %cst_24 : f32 to vector<16x128xf32>
    %123 = arith.addf %122, %121 : vector<16x128xf32>
    %124 = arith.divf %122, %123 : vector<16x128xf32>
    %125 = arith.mulf %116, %97 : vector<16x128xf32>
    %126 = arith.mulf %110, %118 : vector<16x128xf32>
    %127 = arith.addf %125, %126 : vector<16x128xf32>
    %128 = math.tanh %127 : vector<16x128xf32>
    %129 = arith.mulf %124, %128 : vector<16x128xf32>
    %130 = vector.extract_strided_slice %6 {offsets = [0, 4, 0], sizes = [16, 1, 512], strides = [1, 1, 1]} : vector<16x8x512xf32> to vector<16x1x512xf32>
    %131 = vector.shape_cast %130 : vector<16x1x512xf32> to vector<16x512xf32>
    %132 = arith.truncf %129 : vector<16x128xf32> to vector<16x128xbf16>
    %cst_25 = arith.constant dense<0.000000e+00> : vector<16x512xf32>
    %133 = tpu.matmul %132, %7, %cst_25 {dimension_numbers = #tpu.dot_dimension_numbers<[1], [0], [0], [1], [0, 0, 1, 1], [], []>} : vector<16x128xbf16>, vector<128x512xbf16>, vector<16x512xf32> -> vector<16x512xf32>
    %134 = arith.addf %131, %133 : vector<16x512xf32>
    %135 = vector.extract_strided_slice %134 {offsets = [0, 0], sizes = [16, 128], strides = [1, 1]} : vector<16x512xf32> to vector<16x128xf32>
    %136 = arith.negf %135 : vector<16x128xf32>
    %137 = math.exp %136 : vector<16x128xf32>
    %cst_26 = arith.constant 1.000000e+00 : f32
    %138 = vector.broadcast %cst_26 : f32 to vector<16x128xf32>
    %139 = arith.addf %138, %137 : vector<16x128xf32>
    %140 = arith.divf %138, %139 : vector<16x128xf32>
    %141 = vector.extract_strided_slice %134 {offsets = [0, 128], sizes = [16, 128], strides = [1, 1]} : vector<16x512xf32> to vector<16x128xf32>
    %142 = arith.negf %141 : vector<16x128xf32>
    %143 = math.exp %142 : vector<16x128xf32>
    %cst_27 = arith.constant 1.000000e+00 : f32
    %144 = vector.broadcast %cst_27 : f32 to vector<16x128xf32>
    %145 = arith.addf %144, %143 : vector<16x128xf32>
    %146 = arith.divf %144, %145 : vector<16x128xf32>
    %147 = vector.extract_strided_slice %134 {offsets = [0, 256], sizes = [16, 128], strides = [1, 1]} : vector<16x512xf32> to vector<16x128xf32>
    %148 = math.tanh %147 : vector<16x128xf32>
    %149 = vector.extract_strided_slice %134 {offsets = [0, 384], sizes = [16, 128], strides = [1, 1]} : vector<16x512xf32> to vector<16x128xf32>
    %150 = arith.negf %149 : vector<16x128xf32>
    %151 = math.exp %150 : vector<16x128xf32>
    %cst_28 = arith.constant 1.000000e+00 : f32
    %152 = vector.broadcast %cst_28 : f32 to vector<16x128xf32>
    %153 = arith.addf %152, %151 : vector<16x128xf32>
    %154 = arith.divf %152, %153 : vector<16x128xf32>
    %155 = arith.mulf %146, %127 : vector<16x128xf32>
    %156 = arith.mulf %140, %148 : vector<16x128xf32>
    %157 = arith.addf %155, %156 : vector<16x128xf32>
    %158 = math.tanh %157 : vector<16x128xf32>
    %159 = arith.mulf %154, %158 : vector<16x128xf32>
    %160 = vector.extract_strided_slice %6 {offsets = [0, 5, 0], sizes = [16, 1, 512], strides = [1, 1, 1]} : vector<16x8x512xf32> to vector<16x1x512xf32>
    %161 = vector.shape_cast %160 : vector<16x1x512xf32> to vector<16x512xf32>
    %162 = arith.truncf %159 : vector<16x128xf32> to vector<16x128xbf16>
    %cst_29 = arith.constant dense<0.000000e+00> : vector<16x512xf32>
    %163 = tpu.matmul %162, %7, %cst_29 {dimension_numbers = #tpu.dot_dimension_numbers<[1], [0], [0], [1], [0, 0, 1, 1], [], []>} : vector<16x128xbf16>, vector<128x512xbf16>, vector<16x512xf32> -> vector<16x512xf32>
    %164 = arith.addf %161, %163 : vector<16x512xf32>
    %165 = vector.extract_strided_slice %164 {offsets = [0, 0], sizes = [16, 128], strides = [1, 1]} : vector<16x512xf32> to vector<16x128xf32>
    %166 = arith.negf %165 : vector<16x128xf32>
    %167 = math.exp %166 : vector<16x128xf32>
    %cst_30 = arith.constant 1.000000e+00 : f32
    %168 = vector.broadcast %cst_30 : f32 to vector<16x128xf32>
    %169 = arith.addf %168, %167 : vector<16x128xf32>
    %170 = arith.divf %168, %169 : vector<16x128xf32>
    %171 = vector.extract_strided_slice %164 {offsets = [0, 128], sizes = [16, 128], strides = [1, 1]} : vector<16x512xf32> to vector<16x128xf32>
    %172 = arith.negf %171 : vector<16x128xf32>
    %173 = math.exp %172 : vector<16x128xf32>
    %cst_31 = arith.constant 1.000000e+00 : f32
    %174 = vector.broadcast %cst_31 : f32 to vector<16x128xf32>
    %175 = arith.addf %174, %173 : vector<16x128xf32>
    %176 = arith.divf %174, %175 : vector<16x128xf32>
    %177 = vector.extract_strided_slice %164 {offsets = [0, 256], sizes = [16, 128], strides = [1, 1]} : vector<16x512xf32> to vector<16x128xf32>
    %178 = math.tanh %177 : vector<16x128xf32>
    %179 = vector.extract_strided_slice %164 {offsets = [0, 384], sizes = [16, 128], strides = [1, 1]} : vector<16x512xf32> to vector<16x128xf32>
    %180 = arith.negf %179 : vector<16x128xf32>
    %181 = math.exp %180 : vector<16x128xf32>
    %cst_32 = arith.constant 1.000000e+00 : f32
    %182 = vector.broadcast %cst_32 : f32 to vector<16x128xf32>
    %183 = arith.addf %182, %181 : vector<16x128xf32>
    %184 = arith.divf %182, %183 : vector<16x128xf32>
    %185 = arith.mulf %176, %157 : vector<16x128xf32>
    %186 = arith.mulf %170, %178 : vector<16x128xf32>
    %187 = arith.addf %185, %186 : vector<16x128xf32>
    %188 = math.tanh %187 : vector<16x128xf32>
    %189 = arith.mulf %184, %188 : vector<16x128xf32>
    %190 = vector.extract_strided_slice %6 {offsets = [0, 6, 0], sizes = [16, 1, 512], strides = [1, 1, 1]} : vector<16x8x512xf32> to vector<16x1x512xf32>
    %191 = vector.shape_cast %190 : vector<16x1x512xf32> to vector<16x512xf32>
    %192 = arith.truncf %189 : vector<16x128xf32> to vector<16x128xbf16>
    %cst_33 = arith.constant dense<0.000000e+00> : vector<16x512xf32>
    %193 = tpu.matmul %192, %7, %cst_33 {dimension_numbers = #tpu.dot_dimension_numbers<[1], [0], [0], [1], [0, 0, 1, 1], [], []>} : vector<16x128xbf16>, vector<128x512xbf16>, vector<16x512xf32> -> vector<16x512xf32>
    %194 = arith.addf %191, %193 : vector<16x512xf32>
    %195 = vector.extract_strided_slice %194 {offsets = [0, 0], sizes = [16, 128], strides = [1, 1]} : vector<16x512xf32> to vector<16x128xf32>
    %196 = arith.negf %195 : vector<16x128xf32>
    %197 = math.exp %196 : vector<16x128xf32>
    %cst_34 = arith.constant 1.000000e+00 : f32
    %198 = vector.broadcast %cst_34 : f32 to vector<16x128xf32>
    %199 = arith.addf %198, %197 : vector<16x128xf32>
    %200 = arith.divf %198, %199 : vector<16x128xf32>
    %201 = vector.extract_strided_slice %194 {offsets = [0, 128], sizes = [16, 128], strides = [1, 1]} : vector<16x512xf32> to vector<16x128xf32>
    %202 = arith.negf %201 : vector<16x128xf32>
    %203 = math.exp %202 : vector<16x128xf32>
    %cst_35 = arith.constant 1.000000e+00 : f32
    %204 = vector.broadcast %cst_35 : f32 to vector<16x128xf32>
    %205 = arith.addf %204, %203 : vector<16x128xf32>
    %206 = arith.divf %204, %205 : vector<16x128xf32>
    %207 = vector.extract_strided_slice %194 {offsets = [0, 256], sizes = [16, 128], strides = [1, 1]} : vector<16x512xf32> to vector<16x128xf32>
    %208 = math.tanh %207 : vector<16x128xf32>
    %209 = vector.extract_strided_slice %194 {offsets = [0, 384], sizes = [16, 128], strides = [1, 1]} : vector<16x512xf32> to vector<16x128xf32>
    %210 = arith.negf %209 : vector<16x128xf32>
    %211 = math.exp %210 : vector<16x128xf32>
    %cst_36 = arith.constant 1.000000e+00 : f32
    %212 = vector.broadcast %cst_36 : f32 to vector<16x128xf32>
    %213 = arith.addf %212, %211 : vector<16x128xf32>
    %214 = arith.divf %212, %213 : vector<16x128xf32>
    %215 = arith.mulf %206, %187 : vector<16x128xf32>
    %216 = arith.mulf %200, %208 : vector<16x128xf32>
    %217 = arith.addf %215, %216 : vector<16x128xf32>
    %218 = math.tanh %217 : vector<16x128xf32>
    %219 = arith.mulf %214, %218 : vector<16x128xf32>
    %220 = vector.extract_strided_slice %6 {offsets = [0, 7, 0], sizes = [16, 1, 512], strides = [1, 1, 1]} : vector<16x8x512xf32> to vector<16x1x512xf32>
    %221 = vector.shape_cast %220 : vector<16x1x512xf32> to vector<16x512xf32>
    %222 = arith.truncf %219 : vector<16x128xf32> to vector<16x128xbf16>
    %cst_37 = arith.constant dense<0.000000e+00> : vector<16x512xf32>
    %223 = tpu.matmul %222, %7, %cst_37 {dimension_numbers = #tpu.dot_dimension_numbers<[1], [0], [0], [1], [0, 0, 1, 1], [], []>} : vector<16x128xbf16>, vector<128x512xbf16>, vector<16x512xf32> -> vector<16x512xf32>
    %224 = arith.addf %221, %223 : vector<16x512xf32>
    %225 = vector.extract_strided_slice %224 {offsets = [0, 0], sizes = [16, 128], strides = [1, 1]} : vector<16x512xf32> to vector<16x128xf32>
    %226 = arith.negf %225 : vector<16x128xf32>
    %227 = math.exp %226 : vector<16x128xf32>
    %cst_38 = arith.constant 1.000000e+00 : f32
    %228 = vector.broadcast %cst_38 : f32 to vector<16x128xf32>
    %229 = arith.addf %228, %227 : vector<16x128xf32>
    %230 = arith.divf %228, %229 : vector<16x128xf32>
    %231 = vector.extract_strided_slice %224 {offsets = [0, 128], sizes = [16, 128], strides = [1, 1]} : vector<16x512xf32> to vector<16x128xf32>
    %232 = arith.negf %231 : vector<16x128xf32>
    %233 = math.exp %232 : vector<16x128xf32>
    %cst_39 = arith.constant 1.000000e+00 : f32
    %234 = vector.broadcast %cst_39 : f32 to vector<16x128xf32>
    %235 = arith.addf %234, %233 : vector<16x128xf32>
    %236 = arith.divf %234, %235 : vector<16x128xf32>
    %237 = vector.extract_strided_slice %224 {offsets = [0, 256], sizes = [16, 128], strides = [1, 1]} : vector<16x512xf32> to vector<16x128xf32>
    %238 = math.tanh %237 : vector<16x128xf32>
    %239 = vector.extract_strided_slice %224 {offsets = [0, 384], sizes = [16, 128], strides = [1, 1]} : vector<16x512xf32> to vector<16x128xf32>
    %240 = arith.negf %239 : vector<16x128xf32>
    %241 = math.exp %240 : vector<16x128xf32>
    %cst_40 = arith.constant 1.000000e+00 : f32
    %242 = vector.broadcast %cst_40 : f32 to vector<16x128xf32>
    %243 = arith.addf %242, %241 : vector<16x128xf32>
    %244 = arith.divf %242, %243 : vector<16x128xf32>
    %245 = arith.mulf %236, %217 : vector<16x128xf32>
    %246 = arith.mulf %230, %238 : vector<16x128xf32>
    %247 = arith.addf %245, %246 : vector<16x128xf32>
    %248 = math.tanh %247 : vector<16x128xf32>
    %249 = arith.mulf %244, %248 : vector<16x128xf32>
    %c0_41 = arith.constant 0 : index
    %c0_42 = arith.constant 0 : index
    %250 = vector.load %arg2[%c0_41, %c0_42] : memref<16x32xbf16, #tpu.memory_space<vmem>>, vector<16x32xbf16>
    %c0_43 = arith.constant 0 : index
    %c0_44 = arith.constant 0 : index
    %251 = vector.load %arg6[%c0_43, %c0_44] : memref<32x512xbf16, #tpu.memory_space<vmem>>, vector<32x512xbf16>
    %cst_45 = arith.constant dense<0.000000e+00> : vector<16x512xf32>
    %252 = tpu.matmul %250, %251, %cst_45 {dimension_numbers = #tpu.dot_dimension_numbers<[1], [0], [0], [1], [0, 0, 1, 1], [], []>} : vector<16x32xbf16>, vector<32x512xbf16>, vector<16x512xf32> -> vector<16x512xf32>
    %c0_46 = arith.constant 0 : index
    %c0_47 = arith.constant 0 : index
    %253 = vector.load %arg7[%c0_46, %c0_47] : memref<1x512xf32, #tpu.memory_space<vmem>>, vector<1x512xf32>
    %254 = vector.broadcast %253 : vector<1x512xf32> to vector<16x512xf32>
    %255 = arith.addf %252, %254 : vector<16x512xf32>
    %256 = vector.extract_strided_slice %255 {offsets = [0, 0], sizes = [16, 128], strides = [1, 1]} : vector<16x512xf32> to vector<16x128xf32>
    %257 = arith.negf %256 : vector<16x128xf32>
    %258 = math.exp %257 : vector<16x128xf32>
    %cst_48 = arith.constant 1.000000e+00 : f32
    %259 = vector.broadcast %cst_48 : f32 to vector<16x128xf32>
    %260 = arith.addf %259, %258 : vector<16x128xf32>
    %261 = arith.divf %259, %260 : vector<16x128xf32>
    %262 = vector.extract_strided_slice %255 {offsets = [0, 256], sizes = [16, 128], strides = [1, 1]} : vector<16x512xf32> to vector<16x128xf32>
    %263 = math.tanh %262 : vector<16x128xf32>
    %264 = vector.extract_strided_slice %255 {offsets = [0, 384], sizes = [16, 128], strides = [1, 1]} : vector<16x512xf32> to vector<16x128xf32>
    %265 = arith.negf %264 : vector<16x128xf32>
    %266 = math.exp %265 : vector<16x128xf32>
    %cst_49 = arith.constant 1.000000e+00 : f32
    %267 = vector.broadcast %cst_49 : f32 to vector<16x128xf32>
    %268 = arith.addf %267, %266 : vector<16x128xf32>
    %269 = arith.divf %267, %268 : vector<16x128xf32>
    %270 = arith.mulf %261, %263 : vector<16x128xf32>
    %271 = math.tanh %270 : vector<16x128xf32>
    %272 = arith.mulf %269, %271 : vector<16x128xf32>
    %273 = tpu.concatenate %249, %272 in 1 : vector<16x128xf32>, vector<16x128xf32> -> vector<16x256xf32>
    %274 = arith.truncf %273 : vector<16x256xf32> to vector<16x256xbf16>
    %c0_50 = arith.constant 0 : index
    %c0_51 = arith.constant 0 : index
    %275 = vector.load %arg8[%c0_50, %c0_51] : memref<256x128xbf16, #tpu.memory_space<vmem>>, vector<256x128xbf16>
    %cst_52 = arith.constant dense<0.000000e+00> : vector<16x128xf32>
    %276 = tpu.matmul %274, %275, %cst_52 {dimension_numbers = #tpu.dot_dimension_numbers<[1], [0], [0], [1], [0, 0, 1, 1], [], []>} : vector<16x256xbf16>, vector<256x128xbf16>, vector<16x128xf32> -> vector<16x128xf32>
    %c0_53 = arith.constant 0 : index
    %c0_54 = arith.constant 0 : index
    %277 = vector.load %arg9[%c0_53, %c0_54] : memref<1x128xf32, #tpu.memory_space<vmem>>, vector<1x128xf32>
    %278 = vector.broadcast %277 : vector<1x128xf32> to vector<16x128xf32>
    %279 = arith.addf %276, %278 : vector<16x128xf32>
    %280 = math.tanh %279 : vector<16x128xf32>
    %281 = arith.truncf %280 : vector<16x128xf32> to vector<16x128xbf16>
    %c0_55 = arith.constant 0 : index
    %c0_56 = arith.constant 0 : index
    %282 = vector.load %arg10[%c0_55, %c0_56] : memref<128x128xbf16, #tpu.memory_space<vmem>>, vector<128x128xbf16>
    %cst_57 = arith.constant dense<0.000000e+00> : vector<16x128xf32>
    %283 = tpu.matmul %281, %282, %cst_57 {dimension_numbers = #tpu.dot_dimension_numbers<[1], [0], [0], [1], [0, 0, 1, 1], [], []>} : vector<16x128xbf16>, vector<128x128xbf16>, vector<16x128xf32> -> vector<16x128xf32>
    %c0_58 = arith.constant 0 : index
    %c0_59 = arith.constant 0 : index
    %284 = vector.load %arg11[%c0_58, %c0_59] : memref<1x128xf32, #tpu.memory_space<vmem>>, vector<1x128xf32>
    %285 = vector.broadcast %284 : vector<1x128xf32> to vector<16x128xf32>
    %286 = arith.addf %283, %285 : vector<16x128xf32>
    %287 = math.tanh %286 : vector<16x128xf32>
    %288 = arith.truncf %287 : vector<16x128xf32> to vector<16x128xbf16>
    %c0_60 = arith.constant 0 : index
    %c0_61 = arith.constant 0 : index
    %289 = vector.load %arg12[%c0_60, %c0_61] : memref<128x128xbf16, #tpu.memory_space<vmem>>, vector<128x128xbf16>
    %cst_62 = arith.constant dense<0.000000e+00> : vector<16x128xf32>
    %290 = tpu.matmul %288, %289, %cst_62 {dimension_numbers = #tpu.dot_dimension_numbers<[1], [0], [0], [1], [0, 0, 1, 1], [], []>} : vector<16x128xbf16>, vector<128x128xbf16>, vector<16x128xf32> -> vector<16x128xf32>
    %c0_63 = arith.constant 0 : index
    %c0_64 = arith.constant 0 : index
    %291 = vector.load %arg13[%c0_63, %c0_64] : memref<1x128xf32, #tpu.memory_space<vmem>>, vector<1x128xf32>
    %292 = vector.broadcast %291 : vector<1x128xf32> to vector<16x128xf32>
    %293 = arith.addf %290, %292 : vector<16x128xf32>
    %c0_65 = arith.constant 0 : index
    %c0_66 = arith.constant 0 : index
    %294 = vector.load %arg14[%c0_65, %c0_66] : memref<16x128xf32, #tpu.memory_space<vmem>>, vector<16x128xf32>
    tpu.vector_store %arg14[%c0_65, %c0_66], %293 {strides = array<i32>} : memref<16x128xf32, #tpu.memory_space<vmem>>, vector<16x128xf32>,
    return
  }
  func.func @transform_0(%arg0: i32) -> (i32, i32) {
    %c0_i32 = arith.constant 0 : i32
    %c0_i32_0 = arith.constant 0 : i32
    return %arg0, %c0_i32 : i32, i32
  }
  func.func @transform_1(%arg0: i32) -> (i32, i32) {
    %c0_i32 = arith.constant 0 : i32
    %c0_i32_0 = arith.constant 0 : i32
    return %arg0, %c0_i32 : i32, i32
  }
  func.func @transform_2(%arg0: i32) -> (i32, i32) {
    %c0_i32 = arith.constant 0 : i32
    %c0_i32_0 = arith.constant 0 : i32
    %c0_i32_1 = arith.constant 0 : i32
    return %c0_i32, %c0_i32_0 : i32, i32
  }
  func.func @transform_3(%arg0: i32) -> (i32, i32) {
    %c0_i32 = arith.constant 0 : i32
    %c0_i32_0 = arith.constant 0 : i32
    %c0_i32_1 = arith.constant 0 : i32
    return %c0_i32, %c0_i32_0 : i32, i32
  }
  func.func @transform_4(%arg0: i32) -> (i32, i32) {
    %c0_i32 = arith.constant 0 : i32
    %c0_i32_0 = arith.constant 0 : i32
    %c0_i32_1 = arith.constant 0 : i32
    return %c0_i32, %c0_i32_0 : i32, i32
  }
  func.func @transform_5(%arg0: i32) -> (i32, i32) {
    %c0_i32 = arith.constant 0 : i32
    %c0_i32_0 = arith.constant 0 : i32
    %c0_i32_1 = arith.constant 0 : i32
    return %c0_i32, %c0_i32_0 : i32, i32
  }
  func.func @transform_6(%arg0: i32) -> (i32, i32) {
    %c0_i32 = arith.constant 0 : i32
    %c0_i32_0 = arith.constant 0 : i32
    %c0_i32_1 = arith.constant 0 : i32
    return %c0_i32, %c0_i32_0 : i32, i32
  }
  func.func @transform_7(%arg0: i32) -> (i32, i32) {
    %c0_i32 = arith.constant 0 : i32
    %c0_i32_0 = arith.constant 0 : i32
    %c0_i32_1 = arith.constant 0 : i32
    return %c0_i32, %c0_i32_0 : i32, i32
  }
  func.func @transform_8(%arg0: i32) -> (i32, i32) {
    %c0_i32 = arith.constant 0 : i32
    %c0_i32_0 = arith.constant 0 : i32
    %c0_i32_1 = arith.constant 0 : i32
    return %c0_i32, %c0_i32_0 : i32, i32
  }
  func.func @transform_9(%arg0: i32) -> (i32, i32) {
    %c0_i32 = arith.constant 0 : i32
    %c0_i32_0 = arith.constant 0 : i32
    %c0_i32_1 = arith.constant 0 : i32
    return %c0_i32, %c0_i32_0 : i32, i32
  }
  func.func @transform_10(%arg0: i32) -> (i32, i32) {
    %c0_i32 = arith.constant 0 : i32
    %c0_i32_0 = arith.constant 0 : i32
    %c0_i32_1 = arith.constant 0 : i32
    return %c0_i32, %c0_i32_0 : i32, i32
  }
  func.func @transform_11(%arg0: i32) -> (i32, i32) {
    %c0_i32 = arith.constant 0 : i32
    %c0_i32_0 = arith.constant 0 : i32
    %c0_i32_1 = arith.constant 0 : i32
    return %c0_i32, %c0_i32_0 : i32, i32
  }
  func.func @transform_12(%arg0: i32) -> (i32, i32) {
    %c0_i32 = arith.constant 0 : i32
    %c0_i32_0 = arith.constant 0 : i32
    %c0_i32_1 = arith.constant 0 : i32
    return %c0_i32, %c0_i32_0 : i32, i32
  }
  func.func @transform_13(%arg0: i32) -> (i32, i32) {
    %c0_i32 = arith.constant 0 : i32
    %c0_i32_0 = arith.constant 0 : i32
    return %arg0, %c0_i32 : i32, i32
  }
}

</mosaic_0001>

<bundles_post_ra>
// kernel: bilstm_classifier_forward.1
= control target key start
LH: loop header
LB: loop body
LE: loop exit
PB: predicated region body
PF: predicated region fallthrough
CT: control target
= control target key end

     0   :  { %v14364_v1 = vmov 0   ;;  %vm171_vm0 = vcmask 261120   ;;  %vm1325_vm1 = vcmask 1041409   ;;  %vm1328_vm2 = vcmask 1042434   ;;  %s14349_s2 = inlined_call_operand.vmem [shape: bf16[32,512], index: 2, kind: input, shape index: {}]   ;;  %s14350_s0 = inlined_call_operand.vmem [shape: bf16[128,32], index: 0, kind: input, shape index: {}]   ;;  %s14351_s4 = inlined_call_operand.vmem [shape: bf16[128,512], index: 4, kind: input, shape index: {}]   ;;  %s14352_s3 = inlined_call_operand.vmem [shape: f32[1,512], index: 3, kind: input, shape index: {}]   ;;  %s14353_s5 = inlined_call_operand.vmem [shape: bf16[32,512], index: 5, kind: input, shape index: {}]   ;;  %s14354_s1 = inlined_call_operand.vmem [shape: bf16[16,32], index: 1, kind: input, shape index: {}]   ;;  %s14355_s7 = inlined_call_operand.vmem [shape: bf16[256,128], index: 7, kind: input, shape index: {}]   ;;  %s14356_s9 = inlined_call_operand.vmem [shape: bf16[128,128], index: 9, kind: input, shape index: {}]   ;;  %s14357_s6 = inlined_call_operand.vmem [shape: f32[1,512], index: 6, kind: input, shape index: {}]   ;;  %s14358_s11 = inlined_call_operand.vmem [shape: bf16[128,128], index: 11, kind: input, shape index: {}]   ;;  %s14359_s8 = inlined_call_operand.vmem [shape: f32[1,128], index: 8, kind: input, shape index: {}]   ;;  %s14360_s10 = inlined_call_operand.vmem [shape: f32[1,128], index: 10, kind: input, shape index: {}]   ;;  %s14361_s12 = inlined_call_operand.vmem [shape: f32[1,128], index: 12, kind: input, shape index: {}]   ;;  %s14362_s13 = inlined_call_operand.vmem [shape: f32[16,128], index: 13, kind: output, shape index: {}]  }
   0x1   :  { %v8083_v0 = vld [vmem:[%s14349_s2 + $0x4] ss:$16 sps:$4 sm:$0xff]   ;;  %228 = vmatprep.mubr.bf16.mxu0 %v14364_v1  ;;  %288 = vmatprep.mubr.bf16.mxu1 %v14364_v1  ;;  %v8085_v2 = vld [vmem:[%s14349_s2] ss:$16 sps:$4 sm:$0xff]   ;;  %v8093_v6 = vld [vmem:[%s14349_s2 + $0xc] ss:$16 sps:$4 sm:$0xff]  }
   0x2   :  { %196 = vmatprep.subr.bf16.mxu0 %v8083_v0  ;;  %8076 = vmatprep.subr.bf16.mxu1 %v8083_v0  ;;  %v8086_v3 = vld [vmem:[%s14349_s2 + $0x24] ss:$16 sps:$4 sm:$0xff]   ;;  %v8088_v4 = vld [vmem:[%s14349_s2 + $0x20] ss:$16 sps:$4 sm:$0xff]   ;;  %v8091_v8 = vld [vmem:[%s14349_s2 + $0x8] ss:$16 sps:$4 sm:$0xff]  }
   0x3   :  { %197 = vmatpush1.bf16.msra.mxu0 %v8085_v2  ;;  %8078 = vmatpush1.bf16.msra.mxu1 %v8085_v2  ;;  %v8089_v5 = vld [vmem:[%s14350_s0] sm:$0xff]   ;;  %v10562_v7 = vld [vmem:[%s14350_s0 + $0x30] sm:$0xff]   ;;  %v8098_v9 = vld [vmem:[%s14349_s2 + $0x2c] ss:$16 sps:$4 sm:$0xff]   ;;  %vm1331_vm3 = vcmask 1043459   ;;  %vm1334_vm4 = vcmask 1044484  }
   0x4   :  { %198 = vmatprep.subr.bf16.mxu0 %v8086_v3  ;;  %8077 = vmatprep.subr.bf16.mxu1 %v8086_v3  ;;  %v8096_v10 = vld [vmem:[%s14349_s2 + $0x28] ss:$16 sps:$4 sm:$0xff]   ;;  %v10580_v11 = vld [vmem:[%s14351_s4 + $0x4] ss:$16 sps:$4 sm:$0xff]   ;;  %v10589_v13 = vld [vmem:[%s14351_s4 + $0xc] ss:$16 sps:$4 sm:$0xff]  }
   0x5   :  { %v8094_v12 = vld [vmem:[%s14350_s0 + $0x8] sm:$0xff]   ;;  %v10594_v14 = vld [vmem:[%s14351_s4] ss:$16 sps:$4 sm:$0xff]   ;;  %v10600_v15 = vld [vmem:[%s14351_s4 + $0x24] ss:$16 sps:$4 sm:$0xff]   ;;  %vm1337_vm5 = vcmask 1045509  }
   0x6   :  { %v10605_v16 = vld [vmem:[%s14350_s0 + $0x38] sm:$0xff]   ;;  %v10613_v17 = vld [vmem:[%s14351_s4 + $0x20] ss:$16 sps:$4 sm:$0xff]   ;;  %v10618_v18 = vld [vmem:[%s14351_s4 + $0x44] ss:$16 sps:$4 sm:$0xff]   ;;  %vm1340_vm6 = vcmask 1046534  }
   0x7   :  { %199 = vmatpush1.bf16.msra.mxu0 %v8088_v4  ;;  %8079 = vmatpush1.bf16.msra.mxu1 %v8088_v4  ;;  %v10629_v19 = vld [vmem:[%s14351_s4 + $0x40] ss:$16 sps:$4 sm:$0xff]   ;;  %v10635_v20 = vld [vmem:[%s14351_s4 + $0x64] ss:$16 sps:$4 sm:$0xff]   ;;  %v10643_v22 = vld [vmem:[%s14351_s4 + $0x8] ss:$16 sps:$4 sm:$0xff]  }
   0x8   :  { %309 = vmatprep.subr.bf16.mxu1 %v8093_v6  ;;  %614 = vmatprep.subr.bf16.mxu0 %v10580_v11  ;;  %v8099_v21 = vld [vmem:[%s14350_s0 + $0x10] sm:$0xff]   ;;  %v10648_v23 = vld [vmem:[%s14351_s4 + $0x2c] ss:$16 sps:$4 sm:$0xff]   ;;  %v10669_v26 = vld [vmem:[%s14351_s4 + $0x28] ss:$16 sps:$4 sm:$0xff]   ;;  %vm1343_vm7 = vcmask 1047559  }
   0x9   :  { %v10655_v24 = vld [vmem:[%s14351_s4 + $0x60] ss:$16 sps:$4 sm:$0xff]   ;;  %v10662_v25 = vld [vmem:[%s14351_s4 + $0x84] ss:$16 sps:$4 sm:$0xff]   ;;  %v10676_v27 = vld [vmem:[%s14351_s4 + $0x4c] ss:$16 sps:$4 sm:$0xff]  }
   0xa   :  { %7514 = vmatmul.mubr.msk.bf16.vlgmr.msra.gmra.mrb[0].mxu0 %vm171_vm0, %v8089_v5  ;;  %7520 = vmatmul.mubr.msk.bf16.vlgmr.msra.gmra.mrb[0].mxu1 %vm171_vm0, %v10562_v7  ;;  %v10682_v28 = vld [vmem:[%s14351_s4 + $0x80] ss:$16 sps:$4 sm:$0xff]   ;;  %v8109_v29 = vld [vmem:[%s14350_s0 + $0x18] sm:$0xff]   ;;  %v10697_v31 = vld [vmem:[%s14351_s4 + $0xa4] ss:$16 sps:$4 sm:$0xff]   ;;  %vm7038_vm8 = vcmask 1046528  }
   0xb   :  { %310 = vmatpush1.bf16.msra.mxu1 %v8091_v8  ;;  %238 = vmatprep.mubr.bf16.mxu0 %v14364_v1  ;;  %v10692_v30 = vld [vmem:[%s14351_s4 + $0x48] ss:$16 sps:$4 sm:$0xff]   ;;  %v10703_v32 = vld [vmem:[%s14351_s4 + $0xa0] ss:$16 sps:$4 sm:$0xff]   ;;  %v10709_v33 = vld [vmem:[%s14351_s4 + $0x6c] ss:$16 sps:$4 sm:$0xff]  }
   0xc   :  { %298 = vmatprep.mubr.bf16.mxu1 %v14364_v1  ;;  %311 = vmatprep.subr.bf16.mxu1 %v8098_v9  ;;  %v8130_v34 = vld [vmem:[%s14351_s4 + $0xc4] ss:$16 sps:$4 sm:$0xff]   ;;  %v10723_v35 = vld [vmem:[%s14351_s4 + $0x68] ss:$16 sps:$4 sm:$0xff]   ;;  %v8134_v36 = vld [vmem:[%s14351_s4 + $0xc0] ss:$16 sps:$4 sm:$0xff]  }
   0xd   :  { %615 = vmatpush1.bf16.msra.mxu0 %v10594_v14  ;;  %v10733_v37 = vld [vmem:[%s14351_s4 + $0x8c] ss:$16 sps:$4 sm:$0xff]   ;;  %v8119_v38 = vld [vmem:[%s14350_s0 + $0x20] sm:$0xff]   ;;  %v10745_v40 = vld [vmem:[%s14351_s4 + $0x88] ss:$16 sps:$4 sm:$0xff]   ;;  %vm10468_vm10 = vmmov 0  }
   0xe   :  { %616 = vmatprep.subr.bf16.mxu0 %v10600_v15  ;;  %v8136_v39 = vld [vmem:[%s14351_s4 + $0xe4] ss:$16 sps:$4 sm:$0xff]   ;;  %v8138_v41 = vld [vmem:[%s14351_s4 + $0xe0] ss:$16 sps:$4 sm:$0xff]   ;;  %v8142_v42 = vld [vmem:[%s14351_s4 + $0xac] ss:$16 sps:$4 sm:$0xff]  }
   0xf   :  { %312 = vmatpush1.bf16.msra.mxu1 %v8096_v10  ;;  %v8144_v43 = vld [vmem:[%s14351_s4 + $0xa8] ss:$16 sps:$4 sm:$0xff]   ;;  %v8145_v44 = vld [vmem:[%s14351_s4 + $0xcc] ss:$16 sps:$4 sm:$0xff]   ;;  %vm7088_vm9 = vsmask.f32 4352 }
  0x10   :  { %657 = vmatprep.subr.bf16.mxu1 %v10589_v13  ;;  %v8129_v45 = vld [vmem:[%s14350_s0 + $0x28] sm:$0xff]  }
  0x11   :  { %617 = vmatpush1.bf16.msra.mxu0 %v10613_v17  ;;  %v8147_v46 = vld [vmem:[%s14351_s4 + $0xc8] ss:$16 sps:$4 sm:$0xff]   ;;  %v8148_v47 = vld [vmem:[%s14351_s4 + $0xec] ss:$16 sps:$4 sm:$0xff]  }
  0x12   :  { %7515 = vmatmul.mubr.msk.bf16.gmra.mrb[4].mxu0 %vm171_vm0, %v8094_v12  ;;  %7521 = vmatmul.mubr.msk.bf16.gmra.mrb[4].mxu1 %vm171_vm0, %v10605_v16  ;;  %v8150_v48 = vld [vmem:[%s14351_s4 + $0xe8] ss:$16 sps:$4 sm:$0xff]  }
  0x13   :  { %248 = vmatprep.mubr.bf16.mxu0 %v14364_v1  ;;  %341 = vmatprep.mubr.bf16.mxu1 %v14364_v1 }
  0x14   :  { %618 = vmatprep.subr.bf16.mxu0 %v10618_v18 }
  0x15   :  { %619 = vmatpush1.bf16.msra.mxu0 %v10629_v19 }
  0x16   :  { %620 = vmatprep.subr.bf16.mxu0 %v10635_v20 }
  0x19   :  { %621 = vmatpush1.bf16.msra.mxu0 %v10655_v24 }
  0x1a   :  { %7516 = vmatmul.mubr.msk.bf16.gmra.mrb[8].mxu0 %vm171_vm0, %v8099_v21  ;;  %7522 = vmatmul.mubr.msk.bf16.vlgmr.msra.gmra.mrb[8].mxu1 %vm171_vm0, %v8089_v5 }
  0x1b   :  { %658 = vmatpush1.bf16.msra.mxu1 %v10643_v22  ;;  %258 = vmatprep.mubr.bf16.mxu0 %v14364_v1 }
  0x1c   :  { %351 = vmatprep.mubr.bf16.mxu1 %v14364_v1  ;;  %659 = vmatprep.subr.bf16.mxu1 %v10648_v23 }
  0x1d   :  { %622 = vmatprep.subr.bf16.mxu0 %v10662_v25 }
  0x1e   :  { %623 = vmatpush1.bf16.msra.mxu0 %v10682_v28 }
  0x1f   :  { %660 = vmatpush1.bf16.msra.mxu1 %v10669_v26  ;;  %624 = vmatprep.subr.bf16.mxu0 %v10697_v31 }
  0x20   :  { %661 = vmatprep.subr.bf16.mxu1 %v10676_v27 }
  0x22   :  { %7517 = vmatmul.mubr.msk.bf16.gmra.mrb[12].mxu0 %vm171_vm0, %v8109_v29  ;;  %7523 = vmatmul.mubr.msk.bf16.gmra.mrb[12].mxu1 %vm171_vm0, %v8094_v12 }
  0x23   :  { %268 = vmatprep.mubr.bf16.mxu0 %v14364_v1  ;;  %361 = vmatprep.mubr.bf16.mxu1 %v14364_v1 }
  0x24   :  { %662 = vmatpush1.bf16.msra.mxu1 %v10692_v30  ;;  %625 = vmatpush1.bf16.msra.mxu0 %v10703_v32 }
  0x25   :  { %663 = vmatprep.subr.bf16.mxu1 %v10709_v33  ;;  %626 = vmatprep.subr.bf16.mxu0 %v8130_v34 }
  0x28   :  { %664 = vmatpush1.bf16.msra.mxu1 %v10723_v35  ;;  %627 = vmatpush1.bf16.msra.mxu0 %v8134_v36 }
  0x29   :  { %665 = vmatprep.subr.bf16.mxu1 %v10733_v37  ;;  %628 = vmatprep.subr.bf16.mxu0 %v8136_v39 }
  0x2a   :  { %7518 = vmatmul.mubr.msk.bf16.gmra.mrb[16].mxu0 %vm171_vm0, %v8119_v38  ;;  %7524 = vmatmul.mubr.msk.bf16.gmra.mrb[16].mxu1 %vm171_vm0, %v8099_v21 }
  0x2b   :  { %278 = vmatprep.mubr.bf16.mxu0 %v14364_v1  ;;  %371 = vmatprep.mubr.bf16.mxu1 %v14364_v1 }
  0x2c   :  { %666 = vmatpush1.bf16.msra.mxu1 %v10745_v40  ;;  %629 = vmatpush1.bf16.msra.mxu0 %v8138_v41 }
  0x2d   :  { %667 = vmatprep.subr.bf16.mxu1 %v8142_v42  ;;  %1361 = vmatprep.subr.bf16.mxu0 %v10580_v11 }
  0x30   :  { %668 = vmatpush1.bf16.msra.mxu1 %v8144_v43 }
  0x31   :  { %669 = vmatprep.subr.bf16.mxu1 %v8145_v44 }
  0x32   :  { %7519 = vmatmul.mubr.msk.bf16.gmra.mrb[20].mxu0 %vm171_vm0, %v8129_v45  ;;  %7525 = vmatmul.mubr.msk.bf16.gmra.mrb[20].mxu1 %vm171_vm0, %v8109_v29 }
  0x33   :  { %381 = vmatprep.mubr.bf16.mxu1 %v14364_v1  ;;  %646 = vmatprep.mubr.bf16.mxu0 %v14364_v1 }
  0x34   :  { %670 = vmatpush1.bf16.msra.mxu1 %v8147_v46 }
  0x35   :  { %671 = vmatprep.subr.bf16.mxu1 %v8148_v47 }
  0x38   :  { %672 = vmatpush1.bf16.msra.mxu1 %v8150_v48 }
  0x39   :  { %1404 = vmatprep.subr.bf16.mxu1 %v10589_v13 }
  0x3a   :  { %7526 = vmatmul.mubr.msk.bf16.gmra.mrb[24].mxu1 %vm171_vm0, %v8119_v38  ;;  %647 = vmatmul.mubr.bf16.vlgmr.msra.gmra.mrb[24].mxu0 %v14364_v1 }
  0x3b   :  { %391 = vmatprep.mubr.bf16.mxu1 %v14364_v1  ;;  %1362 = vmatpush1.bf16.msra.mxu0 %v10594_v14 }
  0x3c   :  { %1363 = vmatprep.subr.bf16.mxu0 %v10600_v15  ;;  %1393 = vmatprep.mubr.bf16.mxu0 %v14364_v1 }
  0x3f   :  { %1364 = vmatpush1.bf16.msra.mxu0 %v10613_v17 }
  0x40   :  { %1365 = vmatprep.subr.bf16.mxu0 %v10618_v18 }
  0x42   :  { %7527 = vmatmul.mubr.msk.bf16.gmra.mrb[28].mxu1 %vm171_vm0, %v8129_v45 }
  0x43   :  { %401 = vmatprep.mubr.bf16.mxu1 %v14364_v1  ;;  %1366 = vmatpush1.bf16.msra.mxu0 %v10629_v19 }
  0x44   :  { %1367 = vmatprep.subr.bf16.mxu0 %v10635_v20  ;;  %v71_v20 = vlaneseq }
  0x47   :  { %1368 = vmatpush1.bf16.msra.mxu0 %v10655_v24 }
  0x48   :  { %1369 = vmatprep.subr.bf16.mxu0 %v10662_v25 }
  0x4a   :  { %7528 = vmatmul.mubr.msk.bf16.gmra.mrb[32].mxu1 %vm171_vm0, %v10562_v7 }
  0x4b   :  { %411 = vmatprep.mubr.bf16.mxu1 %v14364_v1  ;;  %1370 = vmatpush1.bf16.msra.mxu0 %v10682_v28 }
  0x4c   :  { %1371 = vmatprep.subr.bf16.mxu0 %v10697_v31 }
  0x4f   :  { %1372 = vmatpush1.bf16.msra.mxu0 %v10703_v32 }
  0x50   :  { %1373 = vmatprep.subr.bf16.mxu0 %v8130_v34  ;;  %v10896_v34 = vld [vmem:[%s14352_s3] sm:$0xf] }
  0x52   :  { %7529 = vmatmul.mubr.msk.bf16.gmra.mrb[36].mxu1 %vm171_vm0, %v10605_v16 }
  0x53   :  { %689 = vmatprep.mubr.bf16.mxu1 %v14364_v1  ;;  %1374 = vmatpush1.bf16.msra.mxu0 %v8134_v36 }
  0x54   :  { %1375 = vmatprep.subr.bf16.mxu0 %v8136_v39 }
  0x57   :  { %1376 = vmatpush1.bf16.msra.mxu0 %v8138_v41 }
  0x58   :  { %2149 = vmatprep.subr.bf16.mxu0 %v10580_v11 }
  0x5a   :  { %690 = vmatmul.mubr.bf16.vlgmr.msra.gmra.mrb[40].mxu1 %v14364_v1 }
  0x5b   :  { %1405 = vmatpush1.bf16.msra.mxu1 %v10643_v22  ;;  %1436 = vmatprep.mubr.bf16.mxu1 %v14364_v1 }
  0x5c   :  { %1406 = vmatprep.subr.bf16.mxu1 %v10648_v23 }
  0x5f   :  { %1407 = vmatpush1.bf16.msra.mxu1 %v10669_v26 }
  0x60   :  { %1408 = vmatprep.subr.bf16.mxu1 %v10676_v27  ;;  %v10881_v27 = vshrl.u32 %v71_v20, 7 }
  0x62   :  { %14559 = vst [vmem:[#allocation5_spill] sm:$0xff] %v10881_v27  ;;  %v77_v31 = vsub.s32 1, %v10881_v27 }
  0x63   :  { %1409 = vmatpush1.bf16.msra.mxu1 %v10692_v30  ;;  %v14363_v30 = vsub.s32 0, %v10881_v27 }
  0x64   :  { %1410 = vmatprep.subr.bf16.mxu1 %v10709_v33 }
  0x65   :  { %v10909_v39 = vrot.slane %v10896_v34, %v14363_v30 }
  0x67   :  { %1411 = vmatpush1.bf16.msra.mxu1 %v10723_v35 }
  0x68   :  { %1412 = vmatprep.subr.bf16.mxu1 %v10733_v37 }
  0x6b   :  { %1413 = vmatpush1.bf16.msra.mxu1 %v10745_v40  ;;  %v10912_v40 = vrot.slane %v10896_v34, %v77_v31 }
  0x6c   :  { %1414 = vmatprep.subr.bf16.mxu1 %v8142_v42 }
  0x6f   :  { %1415 = vmatpush1.bf16.msra.mxu1 %v8144_v43 }
  0x70   :  { %1416 = vmatprep.subr.bf16.mxu1 %v8145_v44 }
  0x73   :  { %1417 = vmatpush1.bf16.msra.mxu1 %v8147_v46 }
  0x74   :  { %1418 = vmatprep.subr.bf16.mxu1 %v8148_v47 }
  0x77   :  { %1419 = vmatpush1.bf16.msra.mxu1 %v8150_v48 }
  0x78   :  { %2192 = vmatprep.subr.bf16.mxu1 %v10589_v13 }
  0xdd   :  { %v10819_v49 = vpop.f32.mrb[0].mxu1  ;;  %v230_v50 = vpop.f32.mrb[0].mxu0 }
  0xde   :  { %v10821_v51 = vpop.f32.mrb[1].mxu1  ;;  %v232_v52 = vpop.f32.mrb[1].mxu0  ;;  %v10915_v41 = vadd.f32 %v230_v50, %v10909_v39 }
  0xdf   :  { %v10823_v53 = vpop.f32.mrb[2].mxu1  ;;  %v234_v54 = vpop.f32.mrb[2].mxu0  ;;  %v10918_v42 = vadd.f32 %v232_v52, %v10912_v40 }
  0xe0   :  { %v10825_v55 = vpop.f32.mrb[3].mxu1  ;;  %v10827_v56 = vpop.f32.mrb[3].mxu0  ;;  %14564 = vst [vmem:[#allocation10_spill] sm:$0xff] %v10915_v41  ;;  %v10921_v43 = vadd.f32 %v234_v54, %v10909_v39 }
  0xe1   :  { %14565 = vst [vmem:[#allocation11_spill] sm:$0xff] %v10918_v42 }
  0xe2   :  { %14566 = vst [vmem:[#allocation12_spill] sm:$0xff] %v10921_v43 }
  0xe5   :  { %v10829_v57 = vpop.f32.mrb[4].mxu1  ;;  %v240_v58 = vpop.f32.mrb[4].mxu0 }
  0xe6   :  { %v10831_v59 = vpop.f32.mrb[5].mxu1  ;;  %v10833_v60 = vpop.f32.mrb[5].mxu0  ;;  %v10924_v44 = vadd.f32 %v240_v58, %v10909_v39 }
  0xe7   :  { %v10835_v61 = vpop.f32.mrb[6].mxu1  ;;  %v244_v62 = vpop.f32.mrb[6].mxu0 }
  0xe8   :  { %v10837_v63 = vpop.f32.mrb[7].mxu1  ;;  %v10839_v0 = vpop.f32.mrb[7].mxu0  ;;  %14567 = vst [vmem:[#allocation13_spill] sm:$0xff] %v10924_v44  ;;  %v10927_v45 = vadd.f32 %v244_v62, %v10909_v39 }
  0xea   :  { %14568 = vst [vmem:[#allocation14_spill] sm:$0xff] %v10927_v45 }
  0xed   :  { %v10841_v2 = vpop.f32.mrb[8].mxu1  ;;  %v250_v3 = vpop.f32.mrb[8].mxu0 }
  0xee   :  { %v10843_v4 = vpop.f32.mrb[9].mxu1  ;;  %v10845_v5 = vpop.f32.mrb[9].mxu0  ;;  %v10930_v46 = vadd.f32 %v250_v3, %v10909_v39 }
  0xef   :  { %v10847_v6 = vpop.f32.mrb[10].mxu1  ;;  %v254_v7 = vpop.f32.mrb[10].mxu0 }
  0xf0   :  { %v10849_v8 = vpop.f32.mrb[11].mxu1  ;;  %v10851_v9 = vpop.f32.mrb[11].mxu0  ;;  %14569 = vst [vmem:[#allocation15_spill] sm:$0xff] %v10930_v46  ;;  %v10933_v47 = vadd.f32 %v254_v7, %v10909_v39 }
  0xf2   :  { %14570 = vst [vmem:[#allocation16_spill] sm:$0xff] %v10933_v47 }
  0xf5   :  { %v10853_v10 = vpop.f32.mrb[12].mxu1  ;;  %v260_v11 = vpop.f32.mrb[12].mxu0 }
  0xf6   :  { %v10855_v12 = vpop.f32.mrb[13].mxu1  ;;  %v10857_v13 = vpop.f32.mrb[13].mxu0  ;;  %v10936_v48 = vadd.f32 %v260_v11, %v10909_v39 }
  0xf7   :  { %v10859_v14 = vpop.f32.mrb[14].mxu1  ;;  %v264_v15 = vpop.f32.mrb[14].mxu0 }
  0xf8   :  { %v10861_v16 = vpop.f32.mrb[15].mxu1  ;;  %v10863_v17 = vpop.f32.mrb[15].mxu0  ;;  %14571 = vst [vmem:[#allocation17_spill] sm:$0xff] %v10936_v48  ;;  %v10941_v54 = vadd.f32 %v264_v15, %v10909_v39 }
  0xfa   :  { %14573 = vst [vmem:[#allocation19_spill] sm:$0xff] %v10941_v54 }
  0xfd   :  { %v10865_v18 = vpop.f32.mrb[16].mxu1  ;;  %v10867_v19 = vpop.f32.mrb[16].mxu0 }
  0xfe   :  { %v10869_v21 = vpop.f32.mrb[17].mxu1  ;;  %v10871_v22 = vpop.f32.mrb[17].mxu0 }
  0xff   :  { %14556 = vst [vmem:[#allocation2_spill] sm:$0xff] %v10869_v21  ;;  %v10873_v23 = vpop.f32.mrb[18].mxu1  ;;  %v10875_v24 = vpop.f32.mrb[18].mxu0 }
 0x100   :  { %14557 = vst [vmem:[#allocation3_spill] sm:$0xff] %v10873_v23  ;;  %v10877_v25 = vpop.f32.mrb[19].mxu1  ;;  %v10879_v26 = vpop.f32.mrb[19].mxu0  ;;  %v10961_v23 = vadd.f32 %v10827_v56, %v10912_v40 }
 0x101   :  { %14558 = vst [vmem:[#allocation4_spill] sm:$0xff] %v10877_v25 }
 0x102   :  { %14576 = vst [vmem:[#allocation22_spill] sm:$0xff] %v10961_v23 }
 0x105   :  { %v10883_v28 = vpop.f32.mrb[20].mxu1  ;;  %v10885_v29 = vpop.f32.mrb[20].mxu0 }
 0x106   :  { %14560 = vst [vmem:[#allocation6_spill] sm:$0xff] %v10883_v28  ;;  %v10889_v32 = vpop.f32.mrb[21].mxu1  ;;  %v10891_v33 = vpop.f32.mrb[21].mxu0 }
 0x107   :  { %14561 = vst [vmem:[#allocation7_spill] sm:$0xff] %v10889_v32  ;;  %v10898_v35 = vpop.f32.mrb[22].mxu1  ;;  %v10900_v36 = vpop.f32.mrb[22].mxu0 }
 0x108   :  { %14562 = vst [vmem:[#allocation8_spill] sm:$0xff] %v10898_v35  ;;  %v10902_v37 = vpop.f32.mrb[23].mxu1  ;;  %v10904_v38 = vpop.f32.mrb[23].mxu0 }
 0x109   :  { %14563 = vst [vmem:[#allocation9_spill] sm:$0xff] %v10902_v37 }
 0x10d   :  { %v10938_v50 = vpop.f32.mrb[24].mxu1  ;;  %v648_v52 = vpop.f32.mrb[24].mxu0 }
 0x10e   :  { %14572 = vst [vmem:[#allocation18_spill] sm:$0xff] %v10938_v50  ;;  %v708_v58 = vrot.slane %v648_v52, 1  ;;  %v712_v20 = vrot.slane %v648_v52, 2  ;;  %v716_v31 = vrot.slane %v648_v52, 3  ;;  %v10943_v62 = vpop.f32.mrb[25].mxu1  ;;  %v10945_v30 = vpop.f32.mrb[25].mxu0  ;;  %v828_v50 = vadd.f32 %v648_v52, %v10915_v41 }
 0x10f   :  { %14574 = vst [vmem:[#allocation20_spill] sm:$0xff] %v10943_v62  ;;  %v720_v3 = vrot.slane %v648_v52, 4  ;;  %v724_v1 = vrot.slane %v648_v52, 5  ;;  %v728_v7 = vrot.slane %v648_v52, 6  ;;  %v732_v37 = vrot.slane %v648_v52, 7  ;;  %v10947_v35 = vpop.f32.mrb[26].mxu1 }
 0x110   :  { %14575 = vst [vmem:[#allocation21_spill] sm:$0xff] %v10947_v35  ;;  %v10949_v11 = vpop.f32.mrb[26].mxu0  ;;  %v832_v15 = vadd.f32 %v708_v58, %v10921_v43  ;;  %v836_v32 = vadd.f32 %v712_v20, %v10924_v44  ;;  %v840_v28 = vadd.f32 %v716_v31, %v10927_v45  ;;  %v10955_v25 = vpop.f32.mrb[27].mxu1  ;;  %v7562_v41 = vmul.f32 -1.442695, %v828_v50 }
 0x111   :  { %v10957_v62 = vpop.f32.mrb[27].mxu0  ;;  %v844_v35 = vadd.f32 %v720_v3, %v10930_v46  ;;  %v848_v21 = vadd.f32 %v724_v1, %v10933_v47  ;;  %v852_v52 = vadd.f32 %v728_v7, %v10936_v48  ;;  %v856_v58 = vadd.f32 %v732_v37, %v10941_v54 }
 0x112   :  { %v7563_v20 = vmul.f32 -1.442695, %v832_v15  ;;  %v7564_v44 = vmul.f32 -1.442695, %v836_v32  ;;  %v10969_v31 = vadd.f32 %v10833_v60, %v10912_v40  ;;  %v10973_v45 = vadd.f32 %v10839_v0, %v10912_v40 }
 0x113   :  { %v7565_v56 = vmul.f32 -1.442695, %v840_v28  ;;  %v7566_v43 = vmul.f32 -1.442695, %v844_v35  ;;  %8196 = vpow2.f32 %v7562_v41  ;;  %v7567_v3 = vmul.f32 -1.442695, %v848_v21 }
 0x114   :  { %14577 = vst [vmem:[#allocation23_spill] sm:$0xff] %v10969_v31  ;;  %14578 = vst [vmem:[#allocation24_spill] sm:$0xff] %v10973_v45  ;;  %v709_v1 = vrot.slane %v10945_v30, 1  ;;  %v829_v37 = vadd.f32 %v10945_v30, %v10918_v42  ;;  %8198 = vpow2.f32 %v7563_v20  ;;  %v713_v32 = vrot.slane %v10945_v30, 2 }
 0x115   :  { %v717_v50 = vrot.slane %v10945_v30, 3  ;;  %v721_v60 = vrot.slane %v10945_v30, 4  ;;  %v10981_v7 = vpop.f32.mrb[28].mxu1  ;;  %v10985_v0 = vadd.f32 %v10845_v5, %v10912_v40  ;;  %8200 = vpow2.f32 %v7564_v44 }
 0x116   :  { %v7568_v21 = vmul.f32 -1.442695, %v852_v52  ;;  %v7569_v28 = vmul.f32 -1.442695, %v856_v58  ;;  %v10987_v35 = vpop.f32.mrb[29].mxu1  ;;  %8202 = vpow2.f32 %v7565_v56  ;;  %v833_v41 = vadd.f32 %v709_v1, %v10961_v23 }
 0x117   :  { %14579 = vst [vmem:[#allocation25_spill] sm:$0xff] %v10985_v0  ;;  %v837_v15 = vadd.f32 %v713_v32, %v10969_v31  ;;  %v841_v20 = vadd.f32 %v717_v50, %v10973_v45  ;;  %v10992_v42 = vpop.f32.mrb[30].mxu1  ;;  %8204 = vpow2.f32 %v7566_v43  ;;  %v845_v54 = vadd.f32 %v721_v60, %v10985_v0 }
 0x118   :  { %v10995_v48 = vpop.f32.mrb[31].mxu1  ;;  %8206 = vpow2.f32 %v7567_v3  ;;  %v7578_v5 = vmul.f32 -1.442695, %v829_v37  ;;  %v7579_v44 = vmul.f32 -1.442695, %v833_v41  ;;  %v725_v1 = vrot.slane %v10945_v30, 5 }
 0x119   :  { %8208 = vpow2.f32 %v7568_v21  ;;  %v7580_v52 = vmul.f32 -1.442695, %v837_v15  ;;  %v7581_v58 = vmul.f32 -1.442695, %v841_v20  ;;  %v7582_v56 = vmul.f32 -1.442695, %v845_v54 }
 0x11a   :  { %8210 = vpow2.f32 %v7569_v28  ;;  %v729_v43 = vrot.slane %v10945_v30, 6  ;;  %v11005_v37 = vadd.f32 %v10851_v9, %v10912_v40  ;;  %v733_v28 = vrot.slane %v10945_v30, 7 }
 0x11b   :  { %8212 = vpow2.f32 %v7578_v5  ;;  %v11012_v15 = vadd.f32 %v10857_v13, %v10912_v40  ;;  %v11018_v9 = vadd.f32 %v10863_v17, %v10912_v40  ;;  %v11025_v31 = vadd.f32 %v10867_v19, %v10909_v39 }
 0x11c   :  { %8214 = vpow2.f32 %v7579_v44  ;;  %14580 = vst [vmem:[#allocation26_spill] sm:$0xff] %v11005_v37  ;;  %v849_v30 = vadd.f32 %v725_v1, %v11005_v37  ;;  %v11029_v1 = vadd.f32 %v10875_v24, %v10909_v39 }
 0x11d   :  { %v10998_v32 = vpop.f32.mrb[32].mxu1  ;;  %v8197_v50 = vpop.eup %8196  ;;  %8216 = vpow2.f32 %v7580_v52  ;;  %14581 = vst [vmem:[#allocation27_spill] sm:$0xff] %v11012_v15  ;;  %14582 = vst [vmem:[#allocation28_spill] sm:$0xff] %v11018_v9  ;;  %v853_v0 = vadd.f32 %v729_v43, %v11012_v15 }
 0x11e   :  { %v11001_v60 = vpop.f32.mrb[33].mxu1  ;;  %v8199_v3 = vpop.eup %8198  ;;  %v940_v21 = vadd.f32 1.0, %v8197_v50  ;;  %8218 = vpow2.f32 %v7581_v58  ;;  %14583 = vst [vmem:[#allocation29_spill] sm:$0xff] %v11025_v31  ;;  %14584 = vst [vmem:[#allocation30_spill] sm:$0xff] %v11029_v1  ;;  %v7583_v43 = vmul.f32 -1.442695, %v849_v30 }
 0x11f   :  { %v11008_v54 = vpop.f32.mrb[34].mxu1  ;;  %v8201_v41 = vpop.eup %8200  ;;  %v941_v20 = vadd.f32 1.0, %v8199_v3  ;;  %8220 = vpow2.f32 %v7582_v56  ;;  %v857_v56 = vadd.f32 %v733_v28, %v11018_v9  ;;  %v7584_v28 = vmul.f32 -1.442695, %v853_v0 }
 0x120   :  { %v11014_v5 = vpop.f32.mrb[35].mxu1  ;;  %v8203_v44 = vpop.eup %8202  ;;  %v942_v52 = vadd.f32 1.0, %v8201_v41  ;;  %8222 = vrcp.f32 %v940_v21 }
 0x121   :  { %v8205_v58 = vpop.eup %8204  ;;  %v943_v50 = vadd.f32 1.0, %v8203_v44  ;;  %8224 = vrcp.f32 %v941_v20  ;;  %v7585_v24 = vmul.f32 -1.442695, %v857_v56  ;;  %v748_v56 = vrot.slane %v10949_v11, 4 }
 0x122   :  { %v8207_v13 = vpop.eup %8206  ;;  %v944_v45 = vadd.f32 1.0, %v8205_v58  ;;  %8226 = vrcp.f32 %v942_v52  ;;  %v736_v58 = vrot.slane %v10949_v11, 1 }
 0x123   :  { %v8209_v3 = vpop.eup %8208  ;;  %v945_v17 = vadd.f32 1.0, %v8207_v13  ;;  %8228 = vrcp.f32 %v943_v50  ;;  %v11038_v50 = vadd.f32 %v10885_v29, %v10909_v39 }
 0x124   :  { %v8211_v21 = vpop.eup %8210  ;;  %v946_v41 = vadd.f32 1.0, %v8209_v3  ;;  %8230 = vrcp.f32 %v944_v45  ;;  %v740_v45 = vrot.slane %v10949_v11, 2 }
 0x125   :  { %v11031_v20 = vpop.f32.mrb[36].mxu1  ;;  %v8213_v44 = vpop.eup %8212  ;;  %v947_v52 = vadd.f32 1.0, %v8211_v21  ;;  %8232 = vrcp.f32 %v945_v17  ;;  %14585 = vst [vmem:[#allocation31_spill] sm:$0xff] %v11038_v50  ;;  %v11045_v17 = vadd.f32 %v10900_v36, %v10909_v39  ;;  %v744_v21 = vrot.slane %v10949_v11, 3 }
 0x126   :  { %v11034_v19 = vpop.f32.mrb[37].mxu1  ;;  %v8215_v13 = vpop.eup %8214  ;;  %8234 = vrcp.f32 %v946_v41  ;;  %v1036_v0 = vadd.f32 1.0, %v8213_v44  ;;  %v860_v41 = vadd.f32 %v10949_v11, %v11025_v31  ;;  %v864_v36 = vadd.f32 %v736_v58, %v11029_v1 }
 0x127   :  { %v11041_v30 = vpop.f32.mrb[38].mxu1  ;;  %v8217_v3 = vpop.eup %8216  ;;  %14586 = vst [vmem:[#allocation32_spill] sm:$0xff] %v11045_v17  ;;  %8236 = vrcp.f32 %v947_v52  ;;  %v1037_v29 = vadd.f32 1.0, %v8215_v13  ;;  %v11058_v44 = vadd.f32 %v10819_v49, %v10909_v39  ;;  %v752_v58 = vrot.slane %v10949_v11, 5 }
 0x128   :  { %v11048_v9 = vpop.f32.mrb[39].mxu1  ;;  %v8219_v15 = vpop.eup %8218  ;;  %8238 = vpow2.f32 %v7583_v43  ;;  %v1038_v23 = vadd.f32 1.0, %v8217_v3  ;;  %v868_v43 = vadd.f32 %v740_v45, %v11038_v50  ;;  %v7570_v1 = vmul.f32 -1.442695, %v860_v41 }
 0x129   :  { %14587 = vst [vmem:[#allocation33_spill] sm:$0xff] %v11048_v9  ;;  %v8221_v37 = vpop.eup %8220  ;;  %8240 = vpow2.f32 %v7584_v28  ;;  %14588 = vst [vmem:[#allocation34_spill] sm:$0xff] %v11058_v44  ;;  %v1039_v52 = vadd.f32 1.0, %v8219_v15  ;;  %v872_v28 = vadd.f32 %v744_v21, %v11045_v17  ;;  %v876_v49 = vadd.f32 %v748_v56, %v11058_v44 }
 0x12a   :  { %v11054_v47 = vpop.eup %8222  ;;  %8242 = vpow2.f32 %v7585_v24  ;;  %v1040_v31 = vadd.f32 1.0, %v8221_v37  ;;  %v11075_v45 = vadd.f32 %v10823_v53, %v10909_v39  ;;  %v756_v37 = vrot.slane %v10949_v11, 6 }
 0x12b   :  { %v11061_v13 = vpop.eup %8224  ;;  %8244 = vrcp.f32 %v1036_v0  ;;  %v7571_v0 = vmul.f32 -1.442695, %v864_v36  ;;  %v760_v56 = vrot.slane %v10949_v11, 7  ;;  %v7572_v41 = vmul.f32 -1.442695, %v868_v43 }
 0x12c   :  { %v11065_v3 = vpop.eup %8226  ;;  %8246 = vrcp.f32 %v1037_v29  ;;  %14589 = vst [vmem:[#allocation35_spill] sm:$0xff] %v11075_v45  ;;  %v11082_v29 = vadd.f32 %v10829_v57, %v10909_v39  ;;  %v11089_v53 = vadd.f32 %v10835_v61, %v10909_v39  ;;  %v7573_v36 = vmul.f32 -1.442695, %v872_v28 }
 0x12d   :  { %v11069_v24 = vpop.f32.mrb[40].mxu1  ;;  %v11071_v15 = vpop.eup %8228  ;;  %8248 = vrcp.f32 %v1038_v23  ;;  %v11093_v23 = vadd.f32 %v10871_v22, %v10912_v40  ;;  %v7574_v11 = vmul.f32 -1.442695, %v876_v49  ;;  %v737_v43 = vrot.slane %v10957_v62, 1 }
 0x12e   :  { %v11078_v21 = vpop.eup %8230  ;;  %14590 = vst [vmem:[#allocation36_spill] sm:$0xff] %v11082_v29  ;;  %8250 = vrcp.f32 %v1039_v52  ;;  %14591 = vst [vmem:[#allocation37_spill] sm:$0xff] %v11089_v53  ;;  %v11095_v44 = vpop.f32.mrb[41].mxu1  ;;  %v880_v52 = vadd.f32 %v752_v58, %v11075_v45  ;;  %v884_v22 = vadd.f32 %v756_v37, %v11082_v29  ;;  %v11111_v50 = vadd.f32 %v10879_v26, %v10912_v40 }
 0x12f   :  { %v11085_v46 = vpop.eup %8232  ;;  %14592 = vst [vmem:[#allocation38_spill] sm:$0xff] %v11093_v23  ;;  %8252 = vrcp.f32 %v1040_v31  ;;  %v11101_v17 = vpop.f32.mrb[42].mxu1  ;;  %v14597_v49 = vsub.s32 2, %v10881_v27  ;;  %v861_v37 = vadd.f32 %v10957_v62, %v11093_v23  ;;  %v11133_v23 = vadd.f32 %v10891_v33, %v10912_v40 }
 0x130   :  { %v11097_v57 = vpop.eup %8234  ;;  %8254 = vpow2.f32 %v7570_v1  ;;  %v11107_v31 = vpop.f32.mrb[43].mxu1  ;;  %14596 = vst [vmem:[#allocation42_spill] sm:$0xff] %v11111_v50  ;;  %v888_v1 = vadd.f32 %v760_v56, %v11089_v53  ;;  %v865_v26 = vadd.f32 %v737_v43, %v11111_v50  ;;  %v14598_v56 = vsub.s32 3, %v10881_v27 }
 0x131   :  { %14593 = vst [vmem:[#allocation39_spill] sm:$0xff] %v11097_v57  ;;  %v11103_v61 = vpop.eup %8236  ;;  %8256 = vpow2.f32 %v7571_v0  ;;  %14595 = vst [vmem:[#allocation41_spill] sm:$0xff] %v11107_v31  ;;  %v11117_v45 = vrot.slane %v10896_v34, %v14597_v49  ;;  %v7575_v31 = vmul.f32 -1.442695, %v880_v52  ;;  %v11147_v33 = vadd.f32 %v10821_v51, %v10912_v40 }
 0x132   :  { %14594 = vst [vmem:[#allocation40_spill] sm:$0xff] %v11103_v61  ;;  %v8239_v28 = vpop.eup %8238  ;;  %8258 = vpow2.f32 %v7572_v41  ;;  %v11127_v41 = vrot.slane %v10896_v34, %v14598_v56  ;;  %14599 = vst [vmem:[#allocation43_spill] sm:$0xff] %v11133_v23  ;;  %v7577_v52 = vmul.f32 -1.442695, %v888_v1  ;;  %v745_v34 = vrot.slane %v10957_v62, 3 }
 0x133   :  { %v8241_v58 = vpop.eup %8240  ;;  %v1041_v39 = vadd.f32 1.0, %v8239_v28  ;;  %8260 = vpow2.f32 %v7573_v36  ;;  %v7576_v28 = vmul.f32 -1.442695, %v884_v22  ;;  %14601 = vst [vmem:[#allocation45_spill] sm:$0xff] %v11147_v33  ;;  %v7587_v1 = vmul.f32 -1.442695, %v865_v26 }
 0x134   :  { %v8243_v0 = vpop.eup %8242  ;;  %v1042_v29 = vadd.f32 1.0, %v8241_v58  ;;  %8262 = vpow2.f32 %v7574_v11  ;;  %v741_v11 = vrot.slane %v10957_v62, 2  ;;  %v11140_v58 = vadd.f32 %v10904_v38, %v10912_v40 }
 0x135   :  { %v11122_v9 = vpop.eup %8244  ;;  %v1043_v49 = vadd.f32 1.0, %v8243_v0  ;;  %8264 = vrcp.f32 %v1041_v39  ;;  %v7586_v39 = vmul.f32 -1.442695, %v861_v37  ;;  %v11154_v38 = vadd.f32 %v10825_v55, %v10912_v40 }
 0x136   :  { %v11129_v36 = vpop.eup %8246  ;;  %8266 = vrcp.f32 %v1042_v29  ;;  %14600 = vst [vmem:[#allocation44_spill] sm:$0xff] %v11140_v58  ;;  %v749_v29 = vrot.slane %v10957_v62, 4  ;;  %v11158_v56 = vadd.f32 %v10831_v59, %v10912_v40  ;;  %v11162_v37 = vadd.f32 %v10837_v63, %v10912_v40 }
 0x137   :  { %v11136_v43 = vpop.eup %8248  ;;  %8268 = vrcp.f32 %v1043_v49  ;;  %14602 = vst [vmem:[#allocation46_spill] sm:$0xff] %v11154_v38  ;;  %v11170_v26 = vadd.f32 %v10843_v4, %v11127_v41  ;;  %v869_v55 = vadd.f32 %v741_v11, %v11133_v23  ;;  %v11175_v59 = vadd.f32 %v10847_v6, %v11117_v45 }
 0x138   :  { %v11143_v22 = vpop.eup %8250  ;;  %8270 = vpow2.f32 %v7575_v31  ;;  %14603 = vst [vmem:[#allocation47_spill] sm:$0xff] %v11158_v56  ;;  %14604 = vst [vmem:[#allocation48_spill] sm:$0xff] %v11162_v37  ;;  %v11166_v31 = vadd.f32 %v10841_v2, %v11117_v45  ;;  %v873_v40 = vadd.f32 %v745_v34, %v11140_v58  ;;  %v753_v2 = vrot.slane %v10957_v62, 5 }
 0x139   :  { %v11150_v0 = vpop.eup %8252  ;;  %8272 = vpow2.f32 %v7576_v28  ;;  %14606 = vst [vmem:[#allocation50_spill] sm:$0xff] %v11170_v26  ;;  %14607 = vst [vmem:[#allocation51_spill] sm:$0xff] %v11175_v59  ;;  %v877_v50 = vadd.f32 %v749_v29, %v11147_v33  ;;  %v757_v6 = vrot.slane %v10957_v62, 6  ;;  %v761_v34 = vrot.slane %v10957_v62, 7 }
 0x13a   :  { %v8255_v51 = vpop.eup %8254  ;;  %14605 = vst [vmem:[#allocation49_spill] sm:$0xff] %v11166_v31  ;;  %8274 = vpow2.f32 %v7577_v52  ;;  %v11182_v52 = vadd.f32 %v10849_v8, %v11127_v41  ;;  %v11190_v29 = vadd.f32 %v10853_v10, %v11117_v45  ;;  %v7589_v8 = vmul.f32 -1.442695, %v873_v40 }
 0x13b   :  { %v8257_v49 = vpop.eup %8256  ;;  %v948_v63 = vadd.f32 1.0, %v8255_v51  ;;  %8276 = vpow2.f32 %v7586_v39  ;;  %v7588_v39 = vmul.f32 -1.442695, %v869_v55  ;;  %v7590_v62 = vmul.f32 -1.442695, %v877_v50  ;;  %v14614_v50 = vld [vmem:[#allocation2_spill] sm:$0xff] }
 0x13c   :  { %v8259_v28 = vpop.eup %8258  ;;  %v949_v27 = vadd.f32 1.0, %v8257_v49  ;;  %8278 = vpow2.f32 %v7587_v1  ;;  %14608 = vst [vmem:[#allocation52_spill] sm:$0xff] %v11182_v52  ;;  %14609 = vst [vmem:[#allocation53_spill] sm:$0xff] %v11190_v29  ;;  %v11207_v10 = vadd.f32 %v10861_v16, %v11127_v41  ;;  %v885_v40 = vadd.f32 %v757_v6, %v11158_v56  ;;  %v14620_v56 = vld [vmem:[#allocation6_spill] sm:$0xff] }
 0x13d   :  { %v8261_v4 = vpop.eup %8260  ;;  %v950_v11 = vadd.f32 1.0, %v8259_v28  ;;  %8280 = vrcp.f32 %v948_v63  ;;  %v11196_v63 = vadd.f32 %v10855_v12, %v11127_v41  ;;  %v11203_v28 = vadd.f32 %v10859_v14, %v11117_v45 }
 0x13e   :  { %v8263_v51 = vpop.eup %8262  ;;  %v951_v23 = vadd.f32 1.0, %v8261_v4  ;;  %8282 = vrcp.f32 %v949_v27  ;;  %v881_v27 = vadd.f32 %v753_v2, %v11154_v38  ;;  %14612 = vst [vmem:[#allocation56_spill] sm:$0xff] %v11207_v10  ;;  %v11212_v12 = vadd.f32 %v10865_v18, %v11117_v45 }
 0x13f   :  { %v11186_v49 = vpop.eup %8264  ;;  %v952_v1 = vadd.f32 1.0, %v8263_v51  ;;  %8284 = vrcp.f32 %v950_v11  ;;  %14610 = vst [vmem:[#allocation54_spill] sm:$0xff] %v11196_v63  ;;  %14611 = vst [vmem:[#allocation55_spill] sm:$0xff] %v11203_v28  ;;  %v889_v2 = vadd.f32 %v761_v34, %v11162_v37  ;;  %v14616_v11 = vld [vmem:[#allocation3_spill] sm:$0xff]  ;;  %v14618_v51 = vld [vmem:[#allocation4_spill] sm:$0xff]  ;;  %v11229_v38 = vadd.f32 %v14620_v56, %v11117_v45 }
 0x140   :  { %v11192_v33 = vpop.eup %8266  ;;  %8286 = vrcp.f32 %v951_v23  ;;  %14613 = vst [vmem:[#allocation57_spill] sm:$0xff] %v11212_v12  ;;  %v11216_v23 = vadd.f32 %v14614_v50, %v11127_v41  ;;  %v11221_v16 = vadd.f32 %v14616_v11, %v11117_v45  ;;  %v11225_v6 = vadd.f32 %v14618_v51, %v11127_v41  ;;  %v14622_v37 = vld [vmem:[#allocation7_spill] sm:$0xff] }
 0x141   :  { %v11199_v55 = vpop.eup %8268  ;;  %8288 = vrcp.f32 %v952_v1  ;;  %14621 = vst [vmem:[#allocation6_spill] sm:$0xff] %v11229_v38  ;;  %v7591_v34 = vmul.f32 -1.442695, %v881_v27  ;;  %v11233_v58 = vadd.f32 %v14622_v37, %v11127_v41  ;;  %v7592_v53 = vmul.f32 -1.442695, %v885_v40  ;;  %v14627_v27 = vld [vmem:[#allocation9_spill] sm:$0xff] }
 0x142   :  { %v8271_v4 = vpop.eup %8270  ;;  %14615 = vst [vmem:[#allocation2_spill] sm:$0xff] %v11216_v23  ;;  %8290 = vpow2.f32 %v7588_v39  ;;  %14617 = vst [vmem:[#allocation3_spill] sm:$0xff] %v11221_v16  ;;  %v7593_v61 = vmul.f32 -1.442695, %v889_v2  ;;  %v710_v56 = vrot.slane %v11069_v24, 1  ;;  %v14629_v37 = vld [vmem:[#allocation18_spill] sm:$0xff] }
 0x143   :  { %v8273_v14 = vpop.eup %8272  ;;  %14619 = vst [vmem:[#allocation4_spill] sm:$0xff] %v11225_v6  ;;  %v953_v1 = vadd.f32 1.0, %v8271_v4  ;;  %8292 = vpow2.f32 %v7589_v8  ;;  %14623 = vst [vmem:[#allocation7_spill] sm:$0xff] %v11233_v58  ;;  %v14624_v4 = vld [vmem:[#allocation8_spill] sm:$0xff]  ;;  %v14633_v2 = vld [vmem:[#allocation21_spill] sm:$0xff] }
 0x144   :  { %v8275_v18 = vpop.eup %8274  ;;  %v954_v50 = vadd.f32 1.0, %v8273_v14  ;;  %8294 = vpow2.f32 %v7590_v62  ;;  %v11237_v8 = vadd.f32 %v14624_v4, %v11117_v45  ;;  %v11244_v62 = vadd.f32 %v14627_v27, %v11127_v41  ;;  %v14631_v4 = vld [vmem:[#allocation20_spill] sm:$0xff] }
 0x145   :  { %v8277_v39 = vpop.eup %8276  ;;  %v955_v11 = vadd.f32 1.0, %v8275_v18  ;;  %8296 = vrcp.f32 %v953_v1  ;;  %v11248_v18 = vadd.f32 %v14629_v37, %v11117_v45  ;;  %v11258_v57 = vadd.f32 %v14633_v2, %v11117_v45 }
 0x146   :  { %v8279_v51 = vpop.eup %8278  ;;  %14625 = vst [vmem:[#allocation8_spill] sm:$0xff] %v11237_v8  ;;  %8298 = vrcp.f32 %v954_v50  ;;  %14628 = vst [vmem:[#allocation9_spill] sm:$0xff] %v11244_v62  ;;  %v1044_v40 = vadd.f32 1.0, %v8277_v39  ;;  %v11254_v50 = vadd.f32 %v14631_v4, %v11127_v41  ;;  %v11264_v37 = vadd.f32 %v10955_v25, %v11127_v41 }
 0x147   :  { %v11240_v14 = vpop.eup %8280  ;;  %8300 = vrcp.f32 %v955_v11  ;;  %v11268_v39 = vadd.f32 %v10981_v7, %v11117_v45  ;;  %v830_v11 = vadd.f32 %v11069_v24, %v11166_v31  ;;  %v834_v25 = vadd.f32 %v710_v56, %v11175_v59 }
 0x148   :  { %14626 = vst [vmem:[#allocation58_spill] sm:$0xff] %v11240_v14  ;;  %v11250_v1 = vpop.eup %8282  ;;  %14632 = vst [vmem:[#allocation20_spill] sm:$0xff] %v11254_v50  ;;  %8302 = vpow2.f32 %v7591_v34  ;;  %v1045_v14 = vadd.f32 1.0, %v8279_v51  ;;  %v11276_v34 = vadd.f32 %v10987_v35, %v11127_v41  ;;  %v714_v51 = vrot.slane %v11069_v24, 2 }
 0x149   :  { %14630 = vst [vmem:[#allocation18_spill] sm:$0xff] %v11250_v1  ;;  %v11260_v27 = vpop.eup %8284  ;;  %14635 = vst [vmem:[#allocation59_spill] sm:$0xff] %v11264_v37  ;;  %8304 = vpow2.f32 %v7592_v53  ;;  %v11284_v7 = vadd.f32 %v10992_v42, %v11117_v45  ;;  %v11288_v53 = vadd.f32 %v10995_v48, %v11127_v41  ;;  %v11293_v35 = vadd.f32 %v10998_v32, %v11117_v45 }
 0x14a   :  { %14634 = vst [vmem:[#allocation21_spill] sm:$0xff] %v11260_v27  ;;  %14636 = vst [vmem:[#allocation60_spill] sm:$0xff] %v11268_v39  ;;  %v11272_v4 = vpop.eup %8286  ;;  %8306 = vpow2.f32 %v7593_v61  ;;  %v718_v61 = vrot.slane %v11069_v24, 3  ;;  %v11297_v56 = vadd.f32 %v11001_v60, %v11127_v41  ;;  %v11302_v48 = vadd.f32 %v11008_v54, %v11117_v45 }
 0x14b   :  { %14637 = vst [vmem:[#allocation61_spill] sm:$0xff] %v11272_v4  ;;  %14638 = vst [vmem:[#allocation62_spill] sm:$0xff] %v11276_v34  ;;  %v11280_v2 = vpop.eup %8288  ;;  %8308 = vrcp.f32 %v1044_v40  ;;  %v722_v40 = vrot.slane %v11069_v24, 4  ;;  %v726_v4 = vrot.slane %v11069_v24, 5  ;;  %v838_v60 = vadd.f32 %v714_v51, %v11190_v29 }
 0x14c   :  { %14639 = vst [vmem:[#allocation63_spill] sm:$0xff] %v11280_v2  ;;  %14640 = vst [vmem:[#allocation64_spill] sm:$0xff] %v11284_v7  ;;  %v8291_v31 = vpop.eup %8290  ;;  %8310 = vrcp.f32 %v1045_v14  ;;  %v11306_v2 = vadd.f32 %v11014_v5, %v11127_v41  ;;  %v11314_v54 = vadd.f32 %v11031_v20, %v11117_v45  ;;  %v730_v51 = vrot.slane %v11069_v24, 6 }
 0x14d   :  { %14641 = vst [vmem:[#allocation65_spill] sm:$0xff] %v11288_v53  ;;  %14642 = vst [vmem:[#allocation66_spill] sm:$0xff] %v11293_v35  ;;  %v8293_v42 = vpop.eup %8292  ;;  %v1046_v59 = vadd.f32 1.0, %v8291_v31  ;;  %8312 = vtanh.f32 %v830_v11  ;;  %v842_v31 = vadd.f32 %v718_v61, %v11203_v28  ;;  %v11321_v11 = vadd.f32 %v11034_v19, %v11127_v41 }
 0x14e   :  { %14643 = vst [vmem:[#allocation67_spill] sm:$0xff] %v11297_v56  ;;  %14644 = vst [vmem:[#allocation68_spill] sm:$0xff] %v11302_v48  ;;  %v8295_v14 = vpop.eup %8294  ;;  %v1047_v32 = vadd.f32 1.0, %v8293_v42  ;;  %8314 = vtanh.f32 %v834_v25  ;;  %v846_v25 = vadd.f32 %v722_v40, %v11212_v12  ;;  %v11330_v20 = vadd.f32 %v11041_v30, %v11117_v45 }
 0x14f   :  { %14645 = vst [vmem:[#allocation69_spill] sm:$0xff] %v11306_v2  ;;  %v11310_v27 = vpop.eup %8296  ;;  %v1048_v1 = vadd.f32 1.0, %v8295_v14  ;;  %8316 = vrcp.f32 %v1046_v59  ;;  %14646 = vst [vmem:[#allocation70_spill] sm:$0xff] %v11314_v54  ;;  %v1196_v59 = vmul.f32 0.0, %v11122_v9  ;;  %v734_v61 = vrot.slane %v11069_v24, 7 }
 0x150   :  { %v11317_v5 = vpop.eup %8298  ;;  %8318 = vrcp.f32 %v1047_v32  ;;  %14648 = vst [vmem:[#allocation72_spill] sm:$0xff] %v11321_v11  ;;  %14650 = vst [vmem:[#allocation74_spill] sm:$0xff] %v11330_v20  ;;  %v1197_v32 = vmul.f32 0.0, %v11129_v36  ;;  %v850_v19 = vadd.f32 %v726_v4, %v11221_v16  ;;  %v711_v28 = vrot.slane %v11095_v44, 1 }
 0x151   :  { %14647 = vst [vmem:[#allocation71_spill] sm:$0xff] %v11317_v5  ;;  %v11325_v42 = vpop.eup %8300  ;;  %8320 = vrcp.f32 %v1048_v1  ;;  %v715_v9 = vrot.slane %v11095_v44, 2  ;;  %v831_v1 = vadd.f32 %v11095_v44, %v11170_v26  ;;  %v854_v24 = vadd.f32 %v730_v51, %v11229_v38 }
 0x152   :  { %14649 = vst [vmem:[#allocation73_spill] sm:$0xff] %v11325_v42  ;;  %v8303_v14 = vpop.eup %8302  ;;  %8322 = vtanh.f32 %v838_v60  ;;  %v719_v36 = vrot.slane %v11095_v44, 3  ;;  %v723_v60 = vrot.slane %v11095_v44, 4  ;;  %v858_v26 = vadd.f32 %v734_v61, %v11237_v8 }
 0x153   :  { %v8305_v40 = vpop.eup %8304  ;;  %v1049_v12 = vadd.f32 1.0, %v8303_v14  ;;  %8324 = vtanh.f32 %v842_v31  ;;  %v727_v31 = vrot.slane %v11095_v44, 5  ;;  %v835_v51 = vadd.f32 %v711_v28, %v11182_v52 }
 0x154   :  { %v8307_v30 = vpop.eup %8306  ;;  %v1050_v45 = vadd.f32 1.0, %v8305_v40  ;;  %8326 = vtanh.f32 %v846_v25  ;;  %v731_v40 = vrot.slane %v11095_v44, 6  ;;  %v1198_v38 = vmul.f32 0.0, %v11136_v43 }
 0x155   :  { %v11341_v29 = vpop.eup %8308  ;;  %v1051_v4 = vadd.f32 1.0, %v8307_v30  ;;  %8328 = vrcp.f32 %v1049_v12  ;;  %v839_v30 = vadd.f32 %v715_v9, %v11196_v63  ;;  %v7594_v12 = vmul.f32 -1.442695, %v831_v1 }
 0x156   :  { %v11345_v14 = vpop.eup %8310  ;;  %8330 = vrcp.f32 %v1050_v45  ;;  %v735_v5 = vrot.slane %v11095_v44, 7  ;;  %v843_v45 = vadd.f32 %v719_v36, %v11207_v10  ;;  %v847_v52 = vadd.f32 %v723_v60, %v11216_v23 }
 0x157   :  { %v8313_v25 = vpop.eup %8312  ;;  %8332 = vrcp.f32 %v1051_v4  ;;  %v851_v43 = vadd.f32 %v727_v31, %v11225_v6  ;;  %v1199_v1 = vmul.f32 0.0, %v11143_v22 }
 0x158   :  { %v8315_v16 = vpop.eup %8314  ;;  %8334 = vtanh.f32 %v850_v19  ;;  %v1212_v42 = vmul.f32 %v8313_v25, %v11054_v47  ;;  %v855_v47 = vadd.f32 %v731_v40, %v11233_v58  ;;  %v7595_v19 = vmul.f32 -1.442695, %v835_v51 }
 0x159   :  { %v11355_v61 = vpop.eup %8316  ;;  %8336 = vtanh.f32 %v854_v24  ;;  %v1213_v28 = vmul.f32 %v8315_v16, %v11061_v13  ;;  %v7596_v13 = vmul.f32 -1.442695, %v839_v30  ;;  %v1200_v24 = vmul.f32 0.0, %v11150_v0 }
 0x15a   :  { %v11360_v4 = vpop.eup %8318  ;;  %8338 = vtanh.f32 %v858_v26  ;;  %v11362_v9 = vadd.f32 %v1212_v42, %v1196_v59  ;;  %v859_v26 = vadd.f32 %v735_v5, %v11244_v62  ;;  %v7597_v42 = vmul.f32 -1.442695, %v843_v45 }
 0x15b   :  { %v11365_v44 = vpop.eup %8320  ;;  %v11368_v36 = vadd.f32 %v1213_v28, %v1197_v32  ;;  %8340 = vpow2.f32 %v7594_v12  ;;  %v7598_v31 = vmul.f32 -1.442695, %v847_v52  ;;  %v7599_v40 = vmul.f32 -1.442695, %v851_v43 }
 0x15c   :  { %v8323_v16 = vpop.eup %8322  ;;  %8342 = vtanh.f32 %v11362_v9  ;;  %v7600_v51 = vmul.f32 -1.442695, %v855_v47  ;;  %v738_v25 = vrot.slane %v11101_v17, 1  ;;  %v1201_v52 = vmul.f32 0.0, %v11186_v49 }
 0x15d   :  { %v8325_v59 = vpop.eup %8324  ;;  %v1214_v60 = vmul.f32 %v8323_v16, %v11065_v3  ;;  %8344 = vtanh.f32 %v11368_v36  ;;  %v742_v3 = vrot.slane %v11101_v17, 2  ;;  %v746_v43 = vrot.slane %v11101_v17, 3 }
 0x15e   :  { %v8327_v22 = vpop.eup %8326  ;;  %v1215_v32 = vmul.f32 %v8325_v59, %v11071_v15  ;;  %8346 = vpow2.f32 %v7595_v19  ;;  %v7601_v15 = vmul.f32 -1.442695, %v859_v26  ;;  %v1202_v19 = vmul.f32 0.0, %v11192_v33  ;;  %v14651_v33 = vld [vmem:[#allocation39_spill] sm:$0xff] }
 0x15f   :  { %v11377_v0 = vpop.eup %8328  ;;  %v1216_v30 = vmul.f32 %v8327_v22, %v11078_v21  ;;  %v11380_v5 = vadd.f32 %v1214_v60, %v1198_v38  ;;  %8348 = vpow2.f32 %v7596_v13  ;;  %v862_v21 = vadd.f32 %v11101_v17, %v11248_v18 }
 0x160   :  { %v11383_v12 = vpop.eup %8330  ;;  %v11386_v45 = vadd.f32 %v1215_v32, %v1199_v1  ;;  %8350 = vpow2.f32 %v7597_v42  ;;  %v750_v49 = vrot.slane %v11101_v17, 4  ;;  %v866_v1 = vadd.f32 %v738_v25, %v11258_v57  ;;  %v14652_v32 = vld [vmem:[#allocation40_spill] sm:$0xff] }
 0x161   :  { %v11388_v28 = vpop.eup %8332  ;;  %8352 = vpow2.f32 %v7598_v31  ;;  %v11393_v38 = vadd.f32 %v1216_v30, %v1200_v24  ;;  %v1203_v16 = vmul.f32 0.0, %v11199_v55  ;;  %v870_v42 = vadd.f32 %v742_v3, %v11268_v39 }
 0x162   :  { %v8335_v47 = vpop.eup %8334  ;;  %8354 = vpow2.f32 %v7599_v40  ;;  %v754_v24 = vrot.slane %v11101_v17, 5  ;;  %v758_v60 = vrot.slane %v11101_v17, 6  ;;  %v874_v22 = vadd.f32 %v746_v43, %v11284_v7 }
 0x163   :  { %v8337_v13 = vpop.eup %8336  ;;  %v1217_v26 = vmul.f32 %v8335_v47, %v11085_v46  ;;  %8356 = vpow2.f32 %v7600_v51  ;;  %v878_v30 = vadd.f32 %v750_v49, %v11293_v35  ;;  %v14653_v47 = vld [vmem:[#allocation33_spill] sm:$0xff]  ;;  %v762_v43 = vrot.slane %v11101_v17, 7 }
 0x164   :  { %v8339_v59 = vpop.eup %8338  ;;  %8358 = vpow2.f32 %v7601_v15  ;;  %v1218_v31 = vmul.f32 %v8337_v13, %v14651_v33  ;;  %v11417_v13 = vadd.f32 %v14653_v47, %v11127_v41  ;;  %v886_v49 = vadd.f32 %v758_v60, %v11314_v54 }
 0x165   :  { %v8341_v40 = vpop.eup %8340  ;;  %8360 = vtanh.f32 %v862_v21  ;;  %v1219_v25 = vmul.f32 %v8339_v59, %v14652_v32  ;;  %v11406_v55 = vadd.f32 %v1217_v26, %v1201_v52  ;;  %v882_v26 = vadd.f32 %v754_v24, %v11302_v48 }
 0x166   :  { %v11408_v46 = vpop.eup %8342  ;;  %v1148_v51 = vadd.f32 1.0, %v8341_v40  ;;  %8362 = vtanh.f32 %v866_v1  ;;  %v11411_v3 = vadd.f32 %v1218_v31, %v1202_v19  ;;  %14654 = vst [vmem:[#allocation39_spill] sm:$0xff] %v11417_v13  ;;  %v14655_v1 = vld [vmem:[#allocation41_spill] sm:$0xff]  ;;  %v890_v47 = vadd.f32 %v762_v43, %v11330_v20 }
 0x167   :  { %v11413_v15 = vpop.eup %8344  ;;  %8364 = vtanh.f32 %v870_v42  ;;  %v11420_v21 = vadd.f32 %v1219_v25, %v1203_v16  ;;  %v739_v19 = vrot.slane %v14655_v1, 1  ;;  %v743_v31 = vrot.slane %v14655_v1, 2 }
 0x168   :  { %v8347_v52 = vpop.eup %8346  ;;  %8366 = vrcp.f32 %v1148_v51  ;;  %v747_v41 = vrot.slane %v14655_v1, 3  ;;  %v751_v16 = vrot.slane %v14655_v1, 4  ;;  %v755_v42 = vrot.slane %v14655_v1, 5 }
 0x169   :  { %v8349_v59 = vpop.eup %8348  ;;  %v1149_v33 = vadd.f32 1.0, %v8347_v52  ;;  %8368 = vtanh.f32 %v874_v22  ;;  %v759_v60 = vrot.slane %v14655_v1, 6  ;;  %v763_v25 = vrot.slane %v14655_v1, 7 }
 0x16a   :  { %v8351_v40 = vpop.eup %8350  ;;  %v1150_v17 = vadd.f32 1.0, %v8349_v59  ;;  %8370 = vtanh.f32 %v878_v30  ;;  %v863_v52 = vadd.f32 %v14655_v1, %v11254_v50  ;;  %v867_v54 = vadd.f32 %v739_v19, %v11264_v37 }
 0x16b   :  { %v8353_v32 = vpop.eup %8352  ;;  %v1151_v24 = vadd.f32 1.0, %v8351_v40  ;;  %8372 = vrcp.f32 %v1149_v33  ;;  %v871_v40 = vadd.f32 %v743_v31, %v11276_v34  ;;  %v875_v35 = vadd.f32 %v747_v41, %v11288_v53  ;;  %v14656_v31 = vld [vmem:[#allocation58_spill] sm:$0xff] }
 0x16c   :  { %v8355_v51 = vpop.eup %8354  ;;  %v1152_v22 = vadd.f32 1.0, %v8353_v32  ;;  %8374 = vrcp.f32 %v1150_v17  ;;  %v879_v32 = vadd.f32 %v751_v16, %v11297_v56  ;;  %v883_v43 = vadd.f32 %v755_v42, %v11306_v2  ;;  %v14657_v16 = vld [vmem:[#allocation18_spill] sm:$0xff] }
 0x16d   :  { %v8357_v30 = vpop.eup %8356  ;;  %v1153_v59 = vadd.f32 1.0, %v8355_v51  ;;  %8376 = vrcp.f32 %v1151_v24  ;;  %v887_v1 = vadd.f32 %v759_v60, %v11321_v11  ;;  %v891_v51 = vadd.f32 %v763_v25, %v11417_v13  ;;  %v14658_v60 = vld [vmem:[#allocation21_spill] sm:$0xff] }
 0x16e   :  { %v8359_v33 = vpop.eup %8358  ;;  %v1154_v48 = vadd.f32 1.0, %v8357_v30  ;;  %8378 = vrcp.f32 %v1152_v22  ;;  %v1204_v19 = vmul.f32 0.0, %v11341_v29  ;;  %v7602_v30 = vmul.f32 -1.442695, %v863_v52 }
 0x16f   :  { %v8361_v17 = vpop.eup %8360  ;;  %8380 = vrcp.f32 %v1153_v59  ;;  %v1205_v41 = vmul.f32 0.0, %v11345_v14  ;;  %v7603_v59 = vmul.f32 -1.442695, %v867_v54  ;;  %v1206_v42 = vmul.f32 0.0, %v11355_v61 }
 0x170   :  { %v8363_v24 = vpop.eup %8362  ;;  %8382 = vrcp.f32 %v1154_v48  ;;  %v1220_v34 = vmul.f32 %v8361_v17, %v14656_v31  ;;  %v7604_v52 = vmul.f32 -1.442695, %v871_v40 }
 0x171   :  { %v8365_v22 = vpop.eup %8364  ;;  %8384 = vtanh.f32 %v882_v26  ;;  %v1221_v56 = vmul.f32 %v8363_v24, %v14657_v16  ;;  %v1207_v26 = vmul.f32 0.0, %v11360_v4  ;;  %v14659_v24 = vld [vmem:[#allocation61_spill] sm:$0xff]  ;;  %v7606_v4 = vmul.f32 -1.442695, %v879_v32 }
 0x172   :  { %v8367_v53 = vpop.eup %8366  ;;  %8386 = vtanh.f32 %v886_v49  ;;  %v1222_v25 = vmul.f32 %v8365_v22, %v14658_v60  ;;  %v11447_v13 = vadd.f32 %v1220_v34, %v1204_v19  ;;  %v1208_v34 = vmul.f32 0.0, %v11365_v44  ;;  %v14660_v49 = vld [vmem:[#allocation63_spill] sm:$0xff] }
 0x173   :  { %v8369_v29 = vpop.eup %8368  ;;  %8388 = vtanh.f32 %v890_v47  ;;  %v11449_v48 = vadd.f32 %v1221_v56, %v1205_v41  ;;  %v1260_v17 = vmul.f32 %v8367_v53, %v11408_v46  ;;  %v7605_v56 = vmul.f32 -1.442695, %v875_v35 }
 0x174   :  { %v8371_v14 = vpop.eup %8370  ;;  %v1223_v54 = vmul.f32 %v8369_v29, %v14659_v24  ;;  %v11454_v31 = vadd.f32 %v1222_v25, %v1206_v42  ;;  %8390 = vtanh.f32 %v11447_v13  ;;  %v7607_v22 = vmul.f32 -1.442695, %v883_v43 }
 0x175   :  { %v8373_v61 = vpop.eup %8372  ;;  %v1224_v19 = vmul.f32 %v8371_v14, %v14660_v49  ;;  %8392 = vtanh.f32 %v11449_v48  ;;  %v7608_v16 = vmul.f32 -1.442695, %v887_v1  ;;  %v1276_v42 = vpack.c.bf16 %v1260_v17, %v1260_v17 }
 0x176   :  { %v11460_v47 = vpop.eup %8374  ;;  %v11462_v53 = vadd.f32 %v1223_v54, %v1207_v26  ;;  %8394 = vpow2.f32 %v7602_v30  ;;  %v1261_v46 = vmul.f32 %v8373_v61, %v11413_v15  ;;  %v7609_v25 = vmul.f32 -1.442695, %v891_v51  ;;  %v14664_v61 = vld [vmem:[#allocation73_spill] sm:$0xff] }
 0x177   :  { %v11465_v40 = vpop.eup %8376  ;;  %8396 = vpow2.f32 %v7603_v59  ;;  %v11467_v41 = vadd.f32 %v1224_v19, %v1208_v34  ;;  %v1155_v32 = vadd.f32 1.0, %v8359_v33  ;;  %v1209_v43 = vmul.f32 0.0, %v11377_v0  ;;  %v14663_v33 = vld [vmem:[#allocation71_spill] sm:$0xff] }
 0x178   :  { %14661 = vst [vmem:[#allocation40_spill] sm:$0xff] %v11462_v53  ;;  %v11469_v44 = vpop.eup %8378  ;;  %8398 = vpow2.f32 %v7604_v52  ;;  %v1277_v35 = vpack.c.bf16 %v1261_v46, %v1261_v46  ;;  %v1308_v1 = vunpack.c.l.b16 %v1276_v42  ;;  %v1210_v26 = vmul.f32 0.0, %v11383_v12 }
 0x179   :  { %14662 = vst [vmem:[#allocation33_spill] sm:$0xff] %v11467_v41  ;;  %v11471_v60 = vpop.eup %8380  ;;  %8400 = vpow2.f32 %v7605_v56  ;;  %v1211_v51 = vmul.f32 0.0, %v11388_v28 }
 0x17a   :  { %v11473_v30 = vpop.eup %8382  ;;  %8402 = vpow2.f32 %v7606_v4  ;;  %v1309_v15 = vunpack.c.l.b16 %v1277_v35 }
 0x17b   :  { %v8385_v29 = vpop.eup %8384  ;;  %8404 = vpow2.f32 %v7607_v22 }
 0x17c   :  { %v8387_v59 = vpop.eup %8386  ;;  %v1225_v52 = vmul.f32 %v8385_v29, %v11310_v27  ;;  %8406 = vpow2.f32 %v7608_v16  ;;  %v1324_v17 = vrot.slane %v1309_v15, 7 }
 0x17d   :  { %v8389_v14 = vpop.eup %8388  ;;  %8408 = vpow2.f32 %v7609_v25  ;;  %v1226_v24 = vmul.f32 %v8387_v59, %v14663_v33 }
 0x17e   :  { %v8391_v54 = vpop.eup %8390  ;;  %8410 = vrcp.f32 %v1155_v32  ;;  %v1227_v0 = vmul.f32 %v8389_v14, %v14664_v61  ;;  %v11481_v34 = vadd.f32 %v1225_v52, %v1209_v43  ;;  %v11484_v49 = vsel %vm1325_vm1, %v1324_v17, %v1308_v1 }
 0x17f   :  { %v8393_v27 = vpop.eup %8392  ;;  %v11486_v19 = vadd.f32 %v1226_v24, %v1210_v26  ;;  %8412 = vtanh.f32 %v11380_v5 }
 0x180   :  { %14665 = vst [vmem:[#allocation41_spill] sm:$0xff] %v11481_v34  ;;  %v8395_v12 = vpop.eup %8394  ;;  %v11489_v56 = vadd.f32 %v1227_v0, %v1211_v51  ;;  %8414 = vtanh.f32 %v11386_v45 }
 0x181   :  { %14666 = vst [vmem:[#allocation58_spill] sm:$0xff] %v11486_v19  ;;  %v8397_v28 = vpop.eup %8396  ;;  %v1156_v4 = vadd.f32 1.0, %v8395_v12  ;;  %8416 = vtanh.f32 %v11393_v38 }
 0x182   :  { %14667 = vst [vmem:[#allocation18_spill] sm:$0xff] %v11489_v56  ;;  %v8399_v46 = vpop.eup %8398  ;;  %v1157_v22 = vadd.f32 1.0, %v8397_v28  ;;  %8418 = vtanh.f32 %v11406_v55 }
 0x183   :  { %v8401_v16 = vpop.eup %8400  ;;  %v1158_v42 = vadd.f32 1.0, %v8399_v46  ;;  %8420 = vrcp.f32 %v1156_v4 }
 0x184   :  { %v8403_v35 = vpop.eup %8402  ;;  %v1159_v25 = vadd.f32 1.0, %v8401_v16  ;;  %8422 = vrcp.f32 %v1157_v22 }
 0x185   :  { %v8405_v32 = vpop.eup %8404  ;;  %v1160_v15 = vadd.f32 1.0, %v8403_v35  ;;  %8424 = vrcp.f32 %v1158_v42 }
 0x186   :  { %v8407_v29 = vpop.eup %8406  ;;  %v1161_v43 = vadd.f32 1.0, %v8405_v32  ;;  %8426 = vrcp.f32 %v1159_v25 }
 0x187   :  { %v8409_v59 = vpop.eup %8408  ;;  %v1162_v52 = vadd.f32 1.0, %v8407_v29  ;;  %8428 = vrcp.f32 %v1160_v15 }
 0x188   :  { %v8411_v1 = vpop.eup %8410  ;;  %v1163_v17 = vadd.f32 1.0, %v8409_v59  ;;  %8430 = vrcp.f32 %v1161_v43 }
 0x189   :  { %v8413_v14 = vpop.eup %8412  ;;  %8432 = vrcp.f32 %v1162_v52 }
 0x18a   :  { %v8415_v26 = vpop.eup %8414  ;;  %8434 = vrcp.f32 %v1163_v17  ;;  %v1262_v51 = vmul.f32 %v8413_v14, %v11460_v47 }
 0x18b   :  { %v8417_v33 = vpop.eup %8416  ;;  %8436 = vtanh.f32 %v11411_v3  ;;  %v1263_v24 = vmul.f32 %v8415_v26, %v11465_v40 }
 0x18c   :  { %v8419_v61 = vpop.eup %8418  ;;  %8438 = vtanh.f32 %v11420_v21  ;;  %v1264_v0 = vmul.f32 %v8417_v33, %v11469_v44  ;;  %v1278_v12 = vpack.c.bf16 %v1262_v51, %v1262_v51 }
 0x18d   :  { %v8421_v28 = vpop.eup %8420  ;;  %8440 = vtanh.f32 %v11454_v31  ;;  %v1265_v4 = vmul.f32 %v8419_v61, %v11471_v60  ;;  %v1279_v46 = vpack.c.bf16 %v1263_v24, %v1263_v24 }
 0x18e   :  { %v8423_v47 = vpop.eup %8422  ;;  %8442 = vtanh.f32 %v11462_v53  ;;  %v1268_v22 = vmul.f32 %v8421_v28, %v8391_v54  ;;  %v1280_v40 = vpack.c.bf16 %v1264_v0, %v1264_v0  ;;  %v1310_v16 = vunpack.c.l.b16 %v1278_v12 }
 0x18f   :  { %v8425_v42 = vpop.eup %8424  ;;  %8444 = vtanh.f32 %v11467_v41  ;;  %v1269_v35 = vmul.f32 %v8423_v47, %v8393_v27  ;;  %v1281_v44 = vpack.c.bf16 %v1265_v4, %v1265_v4  ;;  %v1311_v25 = vunpack.c.l.b16 %v1279_v46 }
 0x190   :  { %v8427_v32 = vpop.eup %8426  ;;  %8446 = vtanh.f32 %v11481_v34  ;;  %v1284_v15 = vpack.c.bf16 %v1268_v22, %v1268_v22  ;;  %v1312_v29 = vunpack.c.l.b16 %v1280_v40  ;;  %v1327_v60 = vrot.slane %v1310_v16, 6 }
 0x191   :  { %v8429_v43 = vpop.eup %8428  ;;  %8448 = vtanh.f32 %v11486_v19  ;;  %v1285_v59 = vpack.c.bf16 %v1269_v35, %v1269_v35  ;;  %v1313_v52 = vunpack.c.l.b16 %v1281_v44  ;;  %v1330_v54 = vrot.slane %v1311_v25, 5 }
 0x192   :  { %v8431_v17 = vpop.eup %8430  ;;  %8450 = vtanh.f32 %v11489_v56  ;;  %v1329_v27 = vsel %vm1328_vm2, %v1327_v60, %v11484_v49  ;;  %v1333_v14 = vrot.slane %v1312_v29, 4  ;;  %v1316_v28 = vunpack.c.l.b16 %v1284_v15 }
 0x193   :  { %v8433_v26 = vpop.eup %8432  ;;  %v1317_v51 = vunpack.c.l.b16 %v1285_v59  ;;  %v1332_v33 = vsel %vm1331_vm3, %v1330_v54, %v1329_v27  ;;  %v1336_v24 = vrot.slane %v1313_v52, 3 }
 0x194   :  { %v8435_v61 = vpop.eup %8434  ;;  %v1335_v0 = vsel %vm1334_vm4, %v1333_v14, %v1332_v33 }
 0x195   :  { %v8437_v12 = vpop.eup %8436  ;;  %v1338_v4 = vsel %vm1337_vm5, %v1336_v24, %v1335_v0  ;;  %v1345_v46 = vrot.slane %v1317_v51, 7 }
 0x196   :  { %v8439_v47 = vpop.eup %8438  ;;  %v1266_v22 = vmul.f32 %v8437_v12, %v11473_v30 }
 0x197   :  { %v8441_v40 = vpop.eup %8440  ;;  %v1267_v49 = vmul.f32 %v8439_v47, %v8411_v1  ;;  %v1346_v16 = vsel %vm1325_vm1, %v1345_v46, %v1316_v28 }
 0x198   :  { %v8443_v35 = vpop.eup %8442  ;;  %v1270_v44 = vmul.f32 %v8441_v40, %v8425_v42  ;;  %v1282_v25 = vpack.c.bf16 %v1266_v22, %v1266_v22 }
 0x199   :  { %v8445_v29 = vpop.eup %8444  ;;  %v1271_v60 = vmul.f32 %v8443_v35, %v8427_v32  ;;  %v1283_v59 = vpack.c.bf16 %v1267_v49, %v1267_v49 }
 0x19a   :  { %v8447_v52 = vpop.eup %8446  ;;  %v1272_v54 = vmul.f32 %v8445_v29, %v8429_v43  ;;  %v1286_v27 = vpack.c.bf16 %v1270_v44, %v1270_v44  ;;  %v1314_v15 = vunpack.c.l.b16 %v1282_v25 }
 0x19b   :  { %v8449_v14 = vpop.eup %8448  ;;  %v1273_v51 = vmul.f32 %v8447_v52, %v8431_v17  ;;  %v1287_v33 = vpack.c.bf16 %v1271_v60, %v1271_v60  ;;  %v1315_v24 = vunpack.c.l.b16 %v1283_v59 }
 0x19c   :  { %v8451_v30 = vpop.eup %8450  ;;  %v1274_v1 = vmul.f32 %v8449_v14, %v8433_v26  ;;  %v1288_v0 = vpack.c.bf16 %v1272_v54, %v1272_v54  ;;  %v1318_v12 = vunpack.c.l.b16 %v1286_v27  ;;  %v1339_v28 = vrot.slane %v1314_v15, 2 }
 0x19d   :  { %v1275_v42 = vmul.f32 %v8451_v30, %v8435_v61  ;;  %v1289_v46 = vpack.c.bf16 %v1273_v51, %v1273_v51  ;;  %v1319_v47 = vunpack.c.l.b16 %v1287_v33  ;;  %v1342_v32 = vrot.slane %v1315_v24, 1  ;;  %v10277_v24 = vld [vmem:[%s14351_s4 + $0x8] ss:$16 sps:$4 sm:$0xff]   ;;  %v10278_v30 = vld [vmem:[%s14351_s4 + $0x24] ss:$16 sps:$4 sm:$0xff]  }
 0x19e   :  { %v1290_v22 = vpack.c.bf16 %v1274_v1, %v1274_v1  ;;  %v1320_v40 = vunpack.c.l.b16 %v1288_v0  ;;  %v1341_v43 = vsel %vm1340_vm6, %v1339_v28, %v1338_v4  ;;  %v1347_v49 = vrot.slane %v1318_v12, 6  ;;  %v10279_v1 = vld [vmem:[%s14351_s4 + $0x2c] ss:$16 sps:$4 sm:$0xff]   ;;  %v10280_v12 = vld [vmem:[%s14351_s4 + $0x20] ss:$16 sps:$4 sm:$0xff]  }
 0x19f   :  { %v1291_v35 = vpack.c.bf16 %v1275_v42, %v1275_v42  ;;  %v1321_v44 = vunpack.c.l.b16 %v1289_v46  ;;  %v1344_v17 = vsel %vm1343_vm7, %v1342_v32, %v1341_v43  ;;  %v1349_v25 = vrot.slane %v1319_v47, 5  ;;  %v10281_v28 = vld [vmem:[%s14351_s4 + $0x28] ss:$16 sps:$4 sm:$0xff]   ;;  %v10282_v42 = vld [vmem:[%s14351_s4 + $0x44] ss:$16 sps:$4 sm:$0xff]  }
 0x1a0   :  { %v1322_v29 = vunpack.c.l.b16 %v1290_v22  ;;  %v1348_v26 = vsel %vm1328_vm2, %v1347_v49, %v1346_v16  ;;  %v1351_v60 = vrot.slane %v1320_v40, 4  ;;  %v10276_v16 = vld [vmem:[%s14351_s4] ss:$16 sps:$4 sm:$0xff]   ;;  %v14668_v0 = vmov 0   ;;  %v10283_v46 = vld [vmem:[%s14351_s4 + $0x4c] ss:$16 sps:$4 sm:$0xff]  }
 0x1a1   :  { %v1323_v59 = vunpack.c.l.b16 %v1291_v35  ;;  %v1350_v61 = vsel %vm1331_vm3, %v1349_v25, %v1348_v26  ;;  %v1353_v52 = vrot.slane %v1321_v44, 3  ;;  %v10284_v47 = vld [vmem:[%s14351_s4 + $0x40] ss:$16 sps:$4 sm:$0xff]   ;;  %v10285_v32 = vld [vmem:[%s14351_s4 + $0x48] ss:$16 sps:$4 sm:$0xff]  }
 0x1a2   :  { %v1352_v54 = vsel %vm1334_vm4, %v1351_v60, %v1350_v61  ;;  %v1355_v27 = vrot.slane %v1322_v29, 2  ;;  %v10286_v22 = vld [vmem:[%s14351_s4 + $0x64] ss:$16 sps:$4 sm:$0xff]   ;;  %v10287_v40 = vld [vmem:[%s14351_s4 + $0x6c] ss:$16 sps:$4 sm:$0xff]  }
 0x1a3   :  { %v1354_v15 = vsel %vm1337_vm5, %v1353_v52, %v1352_v54  ;;  %v1357_v4 = vrot.slane %v1323_v59, 1  ;;  %v10288_v43 = vld [vmem:[%s14351_s4 + $0x60] ss:$16 sps:$4 sm:$0xff]   ;;  %v10289_v49 = vld [vmem:[%s14351_s4 + $0x68] ss:$16 sps:$4 sm:$0xff]  }
 0x1a4   :  { %v1356_v14 = vsel %vm1340_vm6, %v1355_v27, %v1354_v15  ;;  %v10290_v35 = vld [vmem:[%s14351_s4 + $0x84] ss:$16 sps:$4 sm:$0xff]   ;;  %v10291_v44 = vld [vmem:[%s14351_s4 + $0x8c] ss:$16 sps:$4 sm:$0xff]   ;;  %v10293_v25 = vld [vmem:[%s14351_s4 + $0x88] ss:$16 sps:$4 sm:$0xff]  }
 0x1a5   :  { %v1358_v51 = vsel %vm1343_vm7, %v1357_v4, %v1356_v14  ;;  %v10294_v29 = vld [vmem:[%s14351_s4 + $0xa4] ss:$16 sps:$4 sm:$0xff]   ;;  %v10295_v26 = vld [vmem:[%s14351_s4 + $0xac] ss:$16 sps:$4 sm:$0xff]   ;;  %v10296_v60 = vld [vmem:[%s14351_s4 + $0xa0] ss:$16 sps:$4 sm:$0xff]  }
 0x1a6   :  { %v1359_v33 = vpack.c.b16 %v1358_v51, %v1344_v17  ;;  %v10292_v17 = vld [vmem:[%s14351_s4 + $0x80] ss:$16 sps:$4 sm:$0xff]   ;;  %v10297_v59 = vld [vmem:[%s14351_s4 + $0xa8] ss:$16 sps:$4 sm:$0xff]   ;;  %v10298_v61 = vld [vmem:[%s14351_s4 + $0xc4] ss:$16 sps:$4 sm:$0xff]  }
 0x1a7   :  { %v10299_v52 = vld [vmem:[%s14351_s4 + $0xcc] ss:$16 sps:$4 sm:$0xff]   ;;  %v10300_v54 = vld [vmem:[%s14351_s4 + $0xc0] ss:$16 sps:$4 sm:$0xff]   ;;  %v10301_v27 = vld [vmem:[%s14351_s4 + $0xc8] ss:$16 sps:$4 sm:$0xff]  }
 0x1a8   :  { %1394 = vmatmul.mubr.bf16.vlgmr.msra.gmra.mrb[28].mxu0 %v1359_v33  ;;  %1437 = vmatmul.mubr.bf16.vlgmr.msra.gmra.mrb[44].mxu1 %v1359_v33  ;;  %v10302_v15 = vld [vmem:[%s14351_s4 + $0xe4] ss:$16 sps:$4 sm:$0xff]   ;;  %v10303_v4 = vld [vmem:[%s14351_s4 + $0xec] ss:$16 sps:$4 sm:$0xff]   ;;  %v10304_v14 = vld [vmem:[%s14351_s4 + $0xe0] ss:$16 sps:$4 sm:$0xff]  }
 0x1a9   :  { %2150 = vmatpush1.bf16.msra.mxu0 %v10276_v16  ;;  %2193 = vmatpush1.bf16.msra.mxu1 %v10277_v24  ;;  %v10305_v51 = vld [vmem:[%s14351_s4 + $0xe8] ss:$16 sps:$4 sm:$0xff]   ;;  %v10306_v33 = vld [vmem:[%s14351_s4 + $0x4] ss:$16 sps:$4 sm:$0xff]   ;;  %v10307_v16 = vld [vmem:[%s14351_s4 + $0xc] ss:$16 sps:$4 sm:$0xff]  }
 0x1aa   :  { %2151 = vmatprep.subr.bf16.mxu0 %v10278_v30  ;;  %2194 = vmatprep.subr.bf16.mxu1 %v10279_v1 }
 0x1ab   :  { %2181 = vmatprep.mubr.bf16.mxu0 %v14668_v0  ;;  %2224 = vmatprep.mubr.bf16.mxu1 %v14668_v0 }
 0x1ad   :  { %2152 = vmatpush1.bf16.msra.mxu0 %v10280_v12  ;;  %2195 = vmatpush1.bf16.msra.mxu1 %v10281_v28 }
 0x1ae   :  { %2153 = vmatprep.subr.bf16.mxu0 %v10282_v42  ;;  %2196 = vmatprep.subr.bf16.mxu1 %v10283_v46 }
 0x1b1   :  { %2154 = vmatpush1.bf16.msra.mxu0 %v10284_v47  ;;  %2197 = vmatpush1.bf16.msra.mxu1 %v10285_v32 }
 0x1b2   :  { %2155 = vmatprep.subr.bf16.mxu0 %v10286_v22  ;;  %2198 = vmatprep.subr.bf16.mxu1 %v10287_v40 }
 0x1b5   :  { %2156 = vmatpush1.bf16.msra.mxu0 %v10288_v43  ;;  %2199 = vmatpush1.bf16.msra.mxu1 %v10289_v49  ;;  %v14669_v43 = vld [vmem:[#allocation12_spill] sm:$0xff] }
 0x1b6   :  { %2157 = vmatprep.subr.bf16.mxu0 %v10290_v35  ;;  %2200 = vmatprep.subr.bf16.mxu1 %v10291_v44 }
 0x1b9   :  { %2158 = vmatpush1.bf16.msra.mxu0 %v10292_v17  ;;  %2201 = vmatpush1.bf16.msra.mxu1 %v10293_v25  ;;  %v14670_v17 = vld [vmem:[#allocation10_spill] sm:$0xff] }
 0x1ba   :  { %2159 = vmatprep.subr.bf16.mxu0 %v10294_v29  ;;  %2202 = vmatprep.subr.bf16.mxu1 %v10295_v26  ;;  %v14671_v29 = vld [vmem:[#allocation13_spill] sm:$0xff] }
 0x1bd   :  { %2160 = vmatpush1.bf16.msra.mxu0 %v10296_v60  ;;  %2203 = vmatpush1.bf16.msra.mxu1 %v10297_v59  ;;  %v14672_v60 = vld [vmem:[#allocation14_spill] sm:$0xff] }
 0x1be   :  { %2161 = vmatprep.subr.bf16.mxu0 %v10298_v61  ;;  %2204 = vmatprep.subr.bf16.mxu1 %v10299_v52  ;;  %v14673_v61 = vld [vmem:[#allocation15_spill] sm:$0xff] }
 0x1c1   :  { %2162 = vmatpush1.bf16.msra.mxu0 %v10300_v54  ;;  %2205 = vmatpush1.bf16.msra.mxu1 %v10301_v27 }
 0x1c2   :  { %2163 = vmatprep.subr.bf16.mxu0 %v10302_v15  ;;  %2206 = vmatprep.subr.bf16.mxu1 %v10303_v4  ;;  %v14674_v15 = vld [vmem:[#allocation16_spill] sm:$0xff] }
 0x1c5   :  { %2164 = vmatpush1.bf16.msra.mxu0 %v10304_v14  ;;  %2207 = vmatpush1.bf16.msra.mxu1 %v10305_v51  ;;  %v14675_v14 = vld [vmem:[#allocation17_spill] sm:$0xff] }
 0x1c6   :  { %2937 = vmatprep.subr.bf16.mxu0 %v10306_v33  ;;  %2980 = vmatprep.subr.bf16.mxu1 %v10307_v16  ;;  %v14676_v16 = vld [vmem:[#allocation19_spill] sm:$0xff] }
 0x27b   :  { %v1395_v24 = vpop.f32.mrb[28].mxu0  ;;  %v11619_v30 = vpop.f32.mrb[44].mxu1 }
 0x27c   :  { %v1455_v1 = vrot.slane %v1395_v24, 7  ;;  %v1459_v12 = vrot.slane %v1395_v24, 1  ;;  %v1463_v28 = vrot.slane %v1395_v24, 2  ;;  %v1467_v42 = vrot.slane %v1395_v24, 3  ;;  %v11621_v46 = vpop.f32.mrb[29].mxu0  ;;  %v11623_v47 = vpop.f32.mrb[45].mxu1 }
 0x27d   :  { %v1471_v32 = vrot.slane %v1395_v24, 4  ;;  %v1475_v22 = vrot.slane %v1395_v24, 5  ;;  %v1479_v40 = vrot.slane %v1395_v24, 6  ;;  %v1579_v49 = vadd.f32 %v1395_v24, %v14669_v43  ;;  %v11626_v35 = vpop.f32.mrb[30].mxu0  ;;  %v11628_v44 = vpop.f32.mrb[46].mxu1 }
 0x27e   :  { %v1575_v25 = vadd.f32 %v1455_v1, %v14670_v17  ;;  %v1583_v26 = vadd.f32 %v1459_v12, %v14671_v29  ;;  %v1587_v59 = vadd.f32 %v1463_v28, %v14672_v60  ;;  %v1591_v52 = vadd.f32 %v1467_v42, %v14673_v61  ;;  %v11634_v54 = vpop.f32.mrb[31].mxu0  ;;  %v11636_v27 = vpop.f32.mrb[47].mxu1 }
 0x27f   :  { %v1595_v4 = vadd.f32 %v1471_v32, %v14674_v15  ;;  %v1599_v51 = vadd.f32 %v1475_v22, %v14675_v14  ;;  %v7611_v33 = vmul.f32 -1.442695, %v1579_v49  ;;  %v1603_v24 = vadd.f32 %v1479_v40, %v14676_v16  ;;  %v14677_v49 = vld [vmem:[#allocation49_spill] sm:$0xff]  ;;  %v14686_v15 = vld [vmem:[#allocation23_spill] sm:$0xff] }
 0x280   :  { %v7610_v43 = vmul.f32 -1.442695, %v1575_v25  ;;  %v7612_v0 = vmul.f32 -1.442695, %v1583_v26  ;;  %v7613_v1 = vmul.f32 -1.442695, %v1587_v59 }
 0x281   :  { %8452 = vpow2.f32 %v7611_v33  ;;  %v7614_v12 = vmul.f32 -1.442695, %v1591_v52  ;;  %v7615_v28 = vmul.f32 -1.442695, %v1595_v4  ;;  %v1457_v42 = vrot.slane %v11619_v30, 7  ;;  %v14678_v26 = vld [vmem:[#allocation51_spill] sm:$0xff] }
 0x282   :  { %8454 = vpow2.f32 %v7610_v43  ;;  %v7616_v61 = vmul.f32 -1.442695, %v1599_v51  ;;  %v1461_v60 = vrot.slane %v11619_v30, 1  ;;  %v7617_v32 = vmul.f32 -1.442695, %v1603_v24  ;;  %v14679_v59 = vld [vmem:[#allocation53_spill] sm:$0xff] }
 0x283   :  { %8456 = vpow2.f32 %v7612_v0  ;;  %v1465_v22 = vrot.slane %v11619_v30, 2  ;;  %v1469_v40 = vrot.slane %v11619_v30, 3  ;;  %v1577_v25 = vadd.f32 %v1457_v42, %v14677_v49  ;;  %v14680_v0 = vld [vmem:[#allocation55_spill] sm:$0xff]  ;;  %v14681_v51 = vld [vmem:[#allocation57_spill] sm:$0xff] }
 0x284   :  { %8458 = vpow2.f32 %v7613_v1  ;;  %v1581_v43 = vadd.f32 %v11619_v30, %v14678_v26  ;;  %v1585_v52 = vadd.f32 %v1461_v60, %v14679_v59  ;;  %v1473_v24 = vrot.slane %v11619_v30, 4  ;;  %v14683_v59 = vld [vmem:[#allocation6_spill] sm:$0xff] }
 0x285   :  { %8460 = vpow2.f32 %v7614_v12  ;;  %v1589_v4 = vadd.f32 %v1465_v22, %v14680_v0  ;;  %v1593_v33 = vadd.f32 %v1469_v40, %v14681_v51  ;;  %v1477_v12 = vrot.slane %v11619_v30, 5 }
 0x286   :  { %8462 = vpow2.f32 %v7615_v28  ;;  %v1456_v60 = vrot.slane %v11621_v46, 7  ;;  %v1481_v40 = vrot.slane %v11619_v30, 6  ;;  %v1472_v30 = vrot.slane %v11621_v46, 4 }
 0x287   :  { %8464 = vpow2.f32 %v7616_v61  ;;  %v1480_v14 = vrot.slane %v11621_v46, 6 }
 0x288   :  { %8466 = vpow2.f32 %v7617_v32  ;;  %v1605_v17 = vadd.f32 %v1481_v40, %v11237_v8 }
 0x289   :  { %8468 = vtanh.f32 %v1577_v25  ;;  %v14682_v25 = vld [vmem:[#allocation3_spill] sm:$0xff] }
 0x28a   :  { %8470 = vtanh.f32 %v1581_v43  ;;  %v1597_v51 = vadd.f32 %v1473_v24, %v14682_v25  ;;  %v14684_v24 = vld [vmem:[#allocation11_spill] sm:$0xff] }
 0x28b   :  { %v8453_v1 = vpop.eup %8452  ;;  %8472 = vtanh.f32 %v1585_v52  ;;  %v1601_v52 = vadd.f32 %v1477_v12, %v14683_v59  ;;  %v1576_v25 = vadd.f32 %v1456_v60, %v14684_v24  ;;  %v1476_v12 = vrot.slane %v11621_v46, 5  ;;  %v14685_v59 = vld [vmem:[#allocation22_spill] sm:$0xff]  ;;  %v14687_v60 = vld [vmem:[#allocation24_spill] sm:$0xff] }
 0x28c   :  { %v8455_v28 = vpop.eup %8454  ;;  %v1688_v42 = vadd.f32 1.0, %v8453_v1  ;;  %8474 = vtanh.f32 %v1589_v4  ;;  %v1460_v1 = vrot.slane %v11621_v46, 1 }
 0x28d   :  { %v8457_v26 = vpop.eup %8456  ;;  %v1687_v61 = vadd.f32 1.0, %v8455_v28  ;;  %8476 = vtanh.f32 %v1593_v33  ;;  %v1464_v33 = vrot.slane %v11621_v46, 2  ;;  %v1468_v28 = vrot.slane %v11621_v46, 3 }
 0x28e   :  { %v8459_v32 = vpop.eup %8458  ;;  %v1689_v22 = vadd.f32 1.0, %v8457_v26  ;;  %8478 = vrcp.f32 %v1688_v42  ;;  %v7626_v56 = vmul.f32 -1.442695, %v1576_v25 }
 0x28f   :  { %v8461_v43 = vpop.eup %8460  ;;  %v1690_v0 = vadd.f32 1.0, %v8459_v32  ;;  %8480 = vrcp.f32 %v1687_v61  ;;  %v1588_v24 = vadd.f32 %v1464_v33, %v14687_v60  ;;  %v1462_v33 = vrot.slane %v11623_v47, 1 }
 0x290   :  { %v8463_v4 = vpop.eup %8462  ;;  %v1691_v49 = vadd.f32 1.0, %v8461_v43  ;;  %8482 = vrcp.f32 %v1689_v22  ;;  %v1580_v43 = vadd.f32 %v11621_v46, %v14685_v59  ;;  %v1458_v59 = vrot.slane %v11623_v47, 7  ;;  %v14690_v46 = vld [vmem:[#allocation27_spill] sm:$0xff] }
 0x291   :  { %v8465_v26 = vpop.eup %8464  ;;  %v1692_v42 = vadd.f32 1.0, %v8463_v4  ;;  %8484 = vrcp.f32 %v1690_v0  ;;  %v1584_v4 = vadd.f32 %v1460_v1, %v14686_v15  ;;  %v1600_v34 = vadd.f32 %v1476_v12, %v14690_v46  ;;  %v14692_v12 = vld [vmem:[#allocation50_spill] sm:$0xff] }
 0x292   :  { %v8467_v32 = vpop.eup %8466  ;;  %v1693_v61 = vadd.f32 1.0, %v8465_v26  ;;  %8486 = vrcp.f32 %v1691_v49  ;;  %v14688_v26 = vld [vmem:[#allocation25_spill] sm:$0xff]  ;;  %v7627_v1 = vmul.f32 -1.442695, %v1580_v43  ;;  %v1578_v43 = vadd.f32 %v1458_v59, %v14692_v12  ;;  %v14698_v12 = vld [vmem:[#allocation34_spill] sm:$0xff] }
 0x293   :  { %v8469_v22 = vpop.eup %8468  ;;  %v1694_v16 = vadd.f32 1.0, %v8467_v32  ;;  %8488 = vrcp.f32 %v1692_v42  ;;  %v1592_v49 = vadd.f32 %v1468_v28, %v14688_v26  ;;  %v14689_v42 = vld [vmem:[#allocation26_spill] sm:$0xff]  ;;  %v7628_v8 = vmul.f32 -1.442695, %v1584_v4  ;;  %v14693_v4 = vld [vmem:[#allocation52_spill] sm:$0xff] }
 0x294   :  { %v8471_v0 = vpop.eup %8470  ;;  %8490 = vrcp.f32 %v1693_v61  ;;  %v1596_v32 = vadd.f32 %v1472_v30, %v14689_v42  ;;  %v14691_v61 = vld [vmem:[#allocation28_spill] sm:$0xff]  ;;  %v1466_v26 = vrot.slane %v11623_v47, 2  ;;  %v1470_v30 = vrot.slane %v11623_v47, 3 }
 0x295   :  { %v8473_v29 = vpop.eup %8472  ;;  %8492 = vrcp.f32 %v1694_v16  ;;  %v1604_v40 = vadd.f32 %v1480_v14, %v14691_v61  ;;  %v7629_v16 = vmul.f32 -1.442695, %v1588_v24  ;;  %v7630_v25 = vmul.f32 -1.442695, %v1592_v49 }
 0x296   :  { %v8475_v19 = vpop.eup %8474  ;;  %8494 = vtanh.f32 %v1597_v51  ;;  %v7631_v14 = vmul.f32 -1.442695, %v1596_v32  ;;  %v7632_v61 = vmul.f32 -1.442695, %v1600_v34  ;;  %v1594_v32 = vadd.f32 %v1470_v30, %v11216_v23  ;;  %v14696_v23 = vld [vmem:[#allocation31_spill] sm:$0xff] }
 0x297   :  { %v8477_v15 = vpop.eup %8476  ;;  %8496 = vtanh.f32 %v1601_v52  ;;  %v7633_v59 = vmul.f32 -1.442695, %v1604_v40  ;;  %v1474_v30 = vrot.slane %v11623_v47, 4 }
 0x298   :  { %v8479_v28 = vpop.eup %8478  ;;  %8498 = vtanh.f32 %v1605_v17  ;;  %v1582_v17 = vadd.f32 %v11623_v47, %v14693_v4  ;;  %v7642_v4 = vmul.f32 -1.442695, %v1578_v43 }
 0x299   :  { %v8481_v60 = vpop.eup %8480  ;;  %v11676_v51 = vmul.f32 %v8479_v28, %v8471_v0  ;;  %8500 = vpow2.f32 %v7626_v56  ;;  %v1586_v0 = vadd.f32 %v1462_v33, %v11196_v63 }
 0x29a   :  { %v8483_v52 = vpop.eup %8482  ;;  %v11680_v46 = vmul.f32 %v8481_v60, %v8469_v22  ;;  %8502 = vpow2.f32 %v7627_v1  ;;  %v1590_v22 = vadd.f32 %v1466_v26, %v11207_v10 }
 0x29b   :  { %v8485_v24 = vpop.eup %8484  ;;  %v11684_v49 = vmul.f32 %v8483_v52, %v8473_v29  ;;  %8504 = vpow2.f32 %v7628_v8  ;;  %v7643_v8 = vmul.f32 -1.442695, %v1582_v17  ;;  %v1478_v52 = vrot.slane %v11623_v47, 5 }
 0x29c   :  { %v8487_v56 = vpop.eup %8486  ;;  %v11687_v28 = vmul.f32 %v8485_v24, %v8475_v19  ;;  %8506 = vpow2.f32 %v7629_v16  ;;  %v7644_v19 = vmul.f32 -1.442695, %v1586_v0  ;;  %v7645_v40 = vmul.f32 -1.442695, %v1590_v22 }
 0x29d   :  { %v8489_v60 = vpop.eup %8488  ;;  %v11690_v1 = vmul.f32 %v8487_v56, %v8477_v15  ;;  %8508 = vpow2.f32 %v7630_v25  ;;  %v7646_v15 = vmul.f32 -1.442695, %v1594_v32  ;;  %v1482_v17 = vrot.slane %v11623_v47, 6 }
 0x29e   :  { %v11693_v29 = vpop.eup %8490  ;;  %8510 = vpow2.f32 %v7631_v14  ;;  %v1602_v32 = vadd.f32 %v1478_v52, %v11233_v58  ;;  %v1961_v52 = vrot.slane %v11380_v5, 7 }
 0x29f   :  { %v11695_v34 = vpop.eup %8492  ;;  %8512 = vpow2.f32 %v7632_v61 }
 0x2a0   :  { %v8495_v33 = vpop.eup %8494  ;;  %8514 = vpow2.f32 %v7633_v59  ;;  %v1598_v59 = vadd.f32 %v1474_v30, %v11225_v6  ;;  %v1507_v6 = vrot.slane %v11626_v35, 6 }
 0x2a1   :  { %v11697_v16 = vpop.eup %8496  ;;  %v11699_v26 = vmul.f32 %v8495_v33, %v8489_v60  ;;  %8516 = vpow2.f32 %v7642_v4  ;;  %v1606_v33 = vadd.f32 %v1482_v17, %v11244_v62 }
 0x2a2   :  { %v11701_v25 = vpop.eup %8498  ;;  %8518 = vpow2.f32 %v7643_v8  ;;  %v7647_v30 = vmul.f32 -1.442695, %v1598_v59  ;;  %v1491_v59 = vrot.slane %v11626_v35, 2 }
 0x2a3   :  { %v8501_v43 = vpop.eup %8500  ;;  %8520 = vpow2.f32 %v7644_v19 }
 0x2a4   :  { %v8503_v61 = vpop.eup %8502  ;;  %v1783_v14 = vadd.f32 1.0, %v8501_v43  ;;  %8522 = vpow2.f32 %v7645_v40  ;;  %v1959_v40 = vrot.slane %v11362_v9, 7  ;;  %v7649_v9 = vmul.f32 -1.442695, %v1606_v33 }
 0x2a5   :  { %v8505_v24 = vpop.eup %8504  ;;  %v1784_v0 = vadd.f32 1.0, %v8503_v61  ;;  %8524 = vpow2.f32 %v7646_v15  ;;  %v1960_v15 = vrot.slane %v11368_v36, 7  ;;  %v1503_v33 = vrot.slane %v11626_v35, 5 }
 0x2a6   :  { %v8507_v56 = vpop.eup %8506  ;;  %v1785_v4 = vadd.f32 1.0, %v8505_v24  ;;  %8526 = vrcp.f32 %v1783_v14  ;;  %v1483_v24 = vrot.slane %v11626_v35, 7 }
 0x2a7   :  { %v8509_v22 = vpop.eup %8508  ;;  %v1786_v60 = vadd.f32 1.0, %v8507_v56  ;;  %8528 = vrcp.f32 %v1784_v0 }
 0x2a8   :  { %v8511_v8 = vpop.eup %8510  ;;  %v1787_v19 = vadd.f32 1.0, %v8509_v22  ;;  %8530 = vrcp.f32 %v1785_v4  ;;  %v7648_v4 = vmul.f32 -1.442695, %v1602_v32  ;;  %v1962_v22 = vrot.slane %v11386_v45, 7  ;;  %v14694_v32 = vld [vmem:[#allocation29_spill] sm:$0xff] }
 0x2a9   :  { %v8513_v47 = vpop.eup %8512  ;;  %v1788_v43 = vadd.f32 1.0, %v8511_v8  ;;  %8532 = vrcp.f32 %v1786_v60  ;;  %v1487_v60 = vrot.slane %v11626_v35, 1 }
 0x2aa   :  { %v8515_v61 = vpop.eup %8514  ;;  %v1789_v14 = vadd.f32 1.0, %v8513_v47  ;;  %8534 = vrcp.f32 %v1787_v19  ;;  %v1495_v19 = vrot.slane %v11626_v35, 3 }
 0x2ab   :  { %v8517_v0 = vpop.eup %8516  ;;  %v1790_v56 = vadd.f32 1.0, %v8515_v61  ;;  %8536 = vrcp.f32 %v1788_v43  ;;  %v1499_v43 = vrot.slane %v11626_v35, 4  ;;  %v1607_v61 = vadd.f32 %v1483_v24, %v14694_v32  ;;  %v14697_v24 = vld [vmem:[#allocation32_spill] sm:$0xff] }
 0x2ac   :  { %v8519_v17 = vpop.eup %8518  ;;  %8538 = vrcp.f32 %v1789_v14  ;;  %v1895_v8 = vadd.f32 1.0, %v8517_v0  ;;  %v14695_v14 = vld [vmem:[#allocation30_spill] sm:$0xff]  ;;  %v1619_v32 = vadd.f32 %v1491_v59, %v14697_v24  ;;  %v1623_v42 = vadd.f32 %v1495_v19, %v14698_v12 }
 0x2ad   :  { %v8521_v36 = vpop.eup %8520  ;;  %8540 = vrcp.f32 %v1790_v56  ;;  %v1896_v5 = vadd.f32 1.0, %v8519_v17  ;;  %v1611_v56 = vadd.f32 %v11626_v35, %v14695_v14  ;;  %v7618_v41 = vmul.f32 -1.442695, %v1607_v61  ;;  %v14700_v61 = vld [vmem:[#allocation36_spill] sm:$0xff] }
 0x2ae   :  { %v8523_v47 = vpop.eup %8522  ;;  %8542 = vpow2.f32 %v7647_v30  ;;  %v1897_v45 = vadd.f32 1.0, %v8521_v36  ;;  %v1615_v30 = vadd.f32 %v1487_v60, %v14696_v23  ;;  %v7621_v19 = vmul.f32 -1.442695, %v1619_v32 }
 0x2af   :  { %v8525_v62 = vpop.eup %8524  ;;  %8544 = vpow2.f32 %v7648_v4  ;;  %v1898_v58 = vadd.f32 1.0, %v8523_v47  ;;  %v7619_v35 = vmul.f32 -1.442695, %v1611_v56 }
 0x2b0   :  { %v8527_v0 = vpop.eup %8526  ;;  %8546 = vpow2.f32 %v7649_v9  ;;  %v1899_v63 = vadd.f32 1.0, %v8525_v62 }
 0x2b1   :  { %v8529_v17 = vpop.eup %8528  ;;  %v1991_v10 = vmul.f32 %v8527_v0, %v1959_v40  ;;  %8548 = vrcp.f32 %v1895_v8  ;;  %v7620_v40 = vmul.f32 -1.442695, %v1615_v30  ;;  %v1965_v30 = vrot.slane %v11411_v3, 7 }
 0x2b2   :  { %v8531_v4 = vpop.eup %8530  ;;  %v1992_v36 = vmul.f32 %v8529_v17, %v1960_v15  ;;  %8550 = vrcp.f32 %v1896_v5  ;;  %v14699_v15 = vld [vmem:[#allocation35_spill] sm:$0xff]  ;;  %v1613_v3 = vadd.f32 %v11628_v44, %v11258_v57 }
 0x2b3   :  { %v8533_v14 = vpop.eup %8532  ;;  %v1993_v53 = vmul.f32 %v8531_v4, %v1961_v52  ;;  %v11727_v9 = vadd.f32 %v11680_v46, %v1991_v10  ;;  %8552 = vrcp.f32 %v1897_v45  ;;  %v1627_v59 = vadd.f32 %v1499_v43, %v14699_v15  ;;  %v14701_v45 = vld [vmem:[#allocation37_spill] sm:$0xff] }
 0x2b4   :  { %v8535_v60 = vpop.eup %8534  ;;  %v1994_v47 = vmul.f32 %v8533_v14, %v1962_v22  ;;  %v11730_v62 = vadd.f32 %v11676_v51, %v1992_v36  ;;  %8554 = vrcp.f32 %v1898_v58  ;;  %v1631_v52 = vadd.f32 %v1503_v33, %v14700_v61 }
 0x2b5   :  { %v8537_v8 = vpop.eup %8536  ;;  %8556 = vrcp.f32 %v1899_v63  ;;  %v7622_v10 = vmul.f32 -1.442695, %v1623_v42  ;;  %v1635_v56 = vadd.f32 %v1507_v6, %v14701_v45  ;;  %v1485_v51 = vrot.slane %v11628_v44, 7 }
 0x2b6   :  { %v8539_v5 = vpop.eup %8538  ;;  %8558 = vpow2.f32 %v7618_v41  ;;  %v1963_v14 = vrot.slane %v11393_v38, 7  ;;  %v7623_v43 = vmul.f32 -1.442695, %v1627_v59  ;;  %v7624_v41 = vmul.f32 -1.442695, %v1631_v52 }
 0x2b7   :  { %v8541_v46 = vpop.eup %8540  ;;  %8560 = vpow2.f32 %v7619_v35  ;;  %v1489_v42 = vrot.slane %v11628_v44, 1  ;;  %v1964_v6 = vrot.slane %v11406_v55, 7  ;;  %v7625_v17 = vmul.f32 -1.442695, %v1635_v56 }
 0x2b8   :  { %v8543_v22 = vpop.eup %8542  ;;  %8562 = vpow2.f32 %v7620_v40  ;;  %v1966_v38 = vrot.slane %v11420_v21, 7  ;;  %v1493_v36 = vrot.slane %v11628_v44, 2  ;;  %v1609_v35 = vadd.f32 %v1485_v51, %v11248_v18 }
 0x2b9   :  { %v8545_v58 = vpop.eup %8544  ;;  %v1900_v63 = vadd.f32 1.0, %v8543_v22  ;;  %8564 = vpow2.f32 %v7621_v19  ;;  %v1497_v59 = vrot.slane %v11628_v44, 3  ;;  %v1501_v55 = vrot.slane %v11628_v44, 4 }
 0x2ba   :  { %v11737_v32 = vpop.eup %8546  ;;  %v1901_v0 = vadd.f32 1.0, %v8545_v58  ;;  %8566 = vpow2.f32 %v7622_v10  ;;  %v1617_v21 = vadd.f32 %v1489_v42, %v11268_v39  ;;  %v1995_v52 = vmul.f32 %v8535_v60, %v1963_v14 }
 0x2bb   :  { %v11740_v33 = vpop.eup %8548  ;;  %8568 = vrcp.f32 %v1900_v63  ;;  %v1996_v10 = vmul.f32 %v8537_v8, %v1964_v6  ;;  %v1997_v22 = vmul.f32 %v8539_v5, %v1965_v30  ;;  %v1998_v51 = vmul.f32 %v8541_v46, %v1966_v38  ;;  %v14702_v30 = vld [vmem:[#allocation66_spill] sm:$0xff] }
 0x2bc   :  { %v11744_v4 = vpop.eup %8550  ;;  %8570 = vrcp.f32 %v1901_v0  ;;  %v2013_v58 = vmul.f32 %v11697_v16, %v11693_v29  ;;  %v11765_v0 = vadd.f32 %v11684_v49, %v1993_v53  ;;  %v11771_v5 = vadd.f32 %v11690_v1, %v1995_v52 }
 0x2bd   :  { %v11749_v40 = vpop.eup %8552  ;;  %8572 = vpow2.f32 %v7623_v43  ;;  %v2014_v43 = vmul.f32 %v11701_v25, %v11695_v34  ;;  %v11774_v46 = vadd.f32 %v11699_v26, %v1996_v10  ;;  %v1621_v1 = vadd.f32 %v1493_v36, %v11284_v7 }
 0x2be   :  { %v11755_v19 = vpop.eup %8554  ;;  %8574 = vpow2.f32 %v7624_v41  ;;  %v11768_v41 = vadd.f32 %v11687_v28, %v1994_v47  ;;  %v11776_v14 = vadd.f32 %v2013_v58, %v1997_v22  ;;  %v1505_v28 = vrot.slane %v11628_v44, 5 }
 0x2bf   :  { %v11758_v56 = vpop.eup %8556  ;;  %8576 = vpow2.f32 %v7625_v17  ;;  %v11778_v34 = vadd.f32 %v2014_v43, %v1998_v51  ;;  %v1484_v26 = vrot.slane %v11634_v54, 7  ;;  %v1625_v17 = vadd.f32 %v1497_v59, %v14702_v30  ;;  %v14708_v30 = vld [vmem:[#allocation44_spill] sm:$0xff] }
 0x2c0   :  { %v8559_v63 = vpop.eup %8558  ;;  %8578 = vtanh.f32 %v1609_v35  ;;  %v1488_v38 = vrot.slane %v11634_v54, 1  ;;  %v1492_v10 = vrot.slane %v11634_v54, 2  ;;  %v1496_v22 = vrot.slane %v11634_v54, 3 }
 0x2c1   :  { %v8561_v60 = vpop.eup %8560  ;;  %v1695_v8 = vadd.f32 1.0, %v8559_v63  ;;  %8580 = vtanh.f32 %v1613_v3  ;;  %v1509_v3 = vrot.slane %v11628_v44, 6  ;;  %v1500_v51 = vrot.slane %v11634_v54, 4 }
 0x2c2   :  { %v8563_v29 = vpop.eup %8562  ;;  %v1696_v16 = vadd.f32 1.0, %v8561_v60  ;;  %8582 = vtanh.f32 %v1617_v21  ;;  %v14703_v21 = vld [vmem:[#allocation68_spill] sm:$0xff]  ;;  %v1504_v58 = vrot.slane %v11634_v54, 5  ;;  %v1508_v43 = vrot.slane %v11634_v54, 6  ;;  %v14704_v60 = vld [vmem:[#allocation38_spill] sm:$0xff] }
 0x2c3   :  { %v8565_v53 = vpop.eup %8564  ;;  %v1697_v49 = vadd.f32 1.0, %v8563_v29  ;;  %8584 = vrcp.f32 %v1695_v8  ;;  %v1629_v52 = vadd.f32 %v1501_v55, %v14703_v21  ;;  %v1608_v8 = vadd.f32 %v1484_v26, %v14704_v60  ;;  %v14705_v55 = vld [vmem:[#allocation42_spill] sm:$0xff]  ;;  %v14709_v26 = vld [vmem:[#allocation45_spill] sm:$0xff] }
 0x2c4   :  { %v8567_v25 = vpop.eup %8566  ;;  %v1698_v47 = vadd.f32 1.0, %v8565_v53  ;;  %8586 = vrcp.f32 %v1696_v16  ;;  %v1612_v16 = vadd.f32 %v11634_v54, %v14705_v55  ;;  %v14706_v53 = vld [vmem:[#allocation43_spill] sm:$0xff]  ;;  %v1637_v7 = vadd.f32 %v1509_v3, %v11330_v20 }
 0x2c5   :  { %v11783_v42 = vpop.eup %8568  ;;  %v1699_v6 = vadd.f32 1.0, %v8567_v25  ;;  %8588 = vrcp.f32 %v1697_v49  ;;  %v1616_v49 = vadd.f32 %v1488_v38, %v14706_v53  ;;  %v1624_v60 = vadd.f32 %v1496_v22, %v14709_v26  ;;  %v14711_v54 = vld [vmem:[#allocation47_spill] sm:$0xff] }
 0x2c6   :  { %v11787_v35 = vpop.eup %8570  ;;  %8590 = vrcp.f32 %v1698_v47  ;;  %v1632_v55 = vadd.f32 %v1504_v58, %v14711_v54  ;;  %v7634_v38 = vmul.f32 -1.442695, %v1608_v8  ;;  %v1494_v8 = vrot.slane %v11636_v27, 2 }
 0x2c7   :  { %v8573_v36 = vpop.eup %8572  ;;  %8592 = vrcp.f32 %v1699_v6  ;;  %v14707_v6 = vld [vmem:[#allocation70_spill] sm:$0xff]  ;;  %v7638_v58 = vmul.f32 -1.442695, %v1624_v60 }
 0x2c8   :  { %v8575_v59 = vpop.eup %8574  ;;  %v1700_v63 = vadd.f32 1.0, %v8573_v36  ;;  %8594 = vtanh.f32 %v1621_v1  ;;  %v1633_v21 = vadd.f32 %v1505_v28, %v14707_v6  ;;  %v1620_v36 = vadd.f32 %v1492_v10, %v14708_v30  ;;  %v14712_v28 = vld [vmem:[#allocation48_spill] sm:$0xff]  ;;  %v14713_v60 = vld [vmem:[#allocation62_spill] sm:$0xff] }
 0x2c9   :  { %v8577_v44 = vpop.eup %8576  ;;  %v1701_v29 = vadd.f32 1.0, %v8575_v59  ;;  %8596 = vtanh.f32 %v1625_v17  ;;  %v14710_v59 = vld [vmem:[#allocation46_spill] sm:$0xff]  ;;  %v1636_v53 = vadd.f32 %v1508_v43, %v14712_v28  ;;  %v7635_v10 = vmul.f32 -1.442695, %v1612_v16 }
 0x2ca   :  { %v8579_v25 = vpop.eup %8578  ;;  %v1702_v47 = vadd.f32 1.0, %v8577_v44  ;;  %8598 = vrcp.f32 %v1700_v63  ;;  %v1628_v17 = vadd.f32 %v1500_v51, %v14710_v59  ;;  %v1486_v44 = vrot.slane %v11636_v27, 7 }
 0x2cb   :  { %v8581_v1 = vpop.eup %8580  ;;  %8600 = vrcp.f32 %v1701_v29  ;;  %v7636_v30 = vmul.f32 -1.442695, %v1616_v49  ;;  %v7637_v22 = vmul.f32 -1.442695, %v1620_v36  ;;  %v1490_v51 = vrot.slane %v11636_v27, 1 }
 0x2cc   :  { %v8583_v39 = vpop.eup %8582  ;;  %8602 = vrcp.f32 %v1702_v47  ;;  %v1498_v43 = vrot.slane %v11636_v27, 3  ;;  %v7639_v49 = vmul.f32 -1.442695, %v1628_v17  ;;  %v7640_v36 = vmul.f32 -1.442695, %v1632_v55  ;;  %v14715_v17 = vld [vmem:[#allocation67_spill] sm:$0xff] }
 0x2cd   :  { %v8585_v63 = vpop.eup %8584  ;;  %8604 = vtanh.f32 %v1629_v52 }
 0x2ce   :  { %v8587_v29 = vpop.eup %8586  ;;  %8606 = vtanh.f32 %v1633_v21  ;;  %v11808_v3 = vmul.f32 %v8585_v63, %v8579_v25  ;;  %v1610_v21 = vadd.f32 %v1486_v44, %v11254_v50  ;;  %v1614_v25 = vadd.f32 %v11636_v27, %v11264_v37 }
 0x2cf   :  { %v8589_v59 = vpop.eup %8588  ;;  %8608 = vtanh.f32 %v1637_v7  ;;  %v11811_v47 = vmul.f32 %v8587_v29, %v8581_v1  ;;  %v1618_v1 = vadd.f32 %v1490_v51, %v14713_v60 }
 0x2d0   :  { %v8591_v54 = vpop.eup %8590  ;;  %v11814_v52 = vmul.f32 %v8589_v59, %v8583_v39  ;;  %8610 = vpow2.f32 %v7634_v38  ;;  %v7641_v39 = vmul.f32 -1.442695, %v1636_v53  ;;  %v14714_v59 = vld [vmem:[#allocation65_spill] sm:$0xff]  ;;  %v7650_v50 = vmul.f32 -1.442695, %v1610_v21 }
 0x2d1   :  { %v8593_v16 = vpop.eup %8592  ;;  %8612 = vpow2.f32 %v7635_v10  ;;  %v1622_v38 = vadd.f32 %v1494_v8, %v14714_v59  ;;  %v1626_v10 = vadd.f32 %v1498_v43, %v14715_v17  ;;  %v7652_v51 = vmul.f32 -1.442695, %v1618_v1 }
 0x2d2   :  { %v8595_v7 = vpop.eup %8594  ;;  %8614 = vpow2.f32 %v7636_v30  ;;  %v7651_v30 = vmul.f32 -1.442695, %v1614_v25  ;;  %v1510_v1 = vrot.slane %v11636_v27, 6 }
 0x2d3   :  { %v8597_v63 = vpop.eup %8596  ;;  %v11821_v29 = vmul.f32 %v8595_v7, %v8591_v54  ;;  %8616 = vpow2.f32 %v7637_v22  ;;  %v7653_v54 = vmul.f32 -1.442695, %v1622_v38  ;;  %v7654_v8 = vmul.f32 -1.442695, %v1626_v10 }
 0x2d4   :  { %v8599_v28 = vpop.eup %8598  ;;  %v11824_v44 = vmul.f32 %v8597_v63, %v8593_v16  ;;  %8618 = vpow2.f32 %v7638_v58  ;;  %v1502_v58 = vrot.slane %v11636_v27, 4 }
 0x2d5   :  { %v8601_v37 = vpop.eup %8600  ;;  %8620 = vpow2.f32 %v7639_v49  ;;  %v1506_v49 = vrot.slane %v11636_v27, 5 }
 0x2d6   :  { %v8603_v55 = vpop.eup %8602  ;;  %8622 = vpow2.f32 %v7640_v36 }
 0x2d7   :  { %v8605_v60 = vpop.eup %8604  ;;  %8624 = vpow2.f32 %v7641_v39  ;;  %v1634_v10 = vadd.f32 %v1506_v49, %v11321_v11 }
 0x2d8   :  { %v8607_v22 = vpop.eup %8606  ;;  %v11827_v53 = vmul.f32 %v8605_v60, %v8599_v28  ;;  %8626 = vpow2.f32 %v7650_v50 }
 0x2d9   :  { %v8609_v16 = vpop.eup %8608  ;;  %8628 = vpow2.f32 %v7651_v30  ;;  %v11830_v43 = vmul.f32 %v8607_v22, %v8601_v37  ;;  %v1630_v37 = vadd.f32 %v1502_v58, %v11306_v2  ;;  %v7656_v58 = vmul.f32 -1.442695, %v1634_v10 }
 0x2da   :  { %v8611_v21 = vpop.eup %8610  ;;  %8630 = vpow2.f32 %v7652_v51  ;;  %v11833_v25 = vmul.f32 %v8609_v16, %v8603_v55  ;;  %v14716_v51 = vld [vmem:[#allocation39_spill] sm:$0xff] }
 0x2db   :  { %v8613_v7 = vpop.eup %8612  ;;  %v1791_v36 = vadd.f32 1.0, %v8611_v21  ;;  %8632 = vpow2.f32 %v7653_v54  ;;  %v1638_v22 = vadd.f32 %v1510_v1, %v14716_v51  ;;  %v7655_v21 = vmul.f32 -1.442695, %v1630_v37 }
 0x2dc   :  { %v8615_v28 = vpop.eup %8614  ;;  %v1792_v50 = vadd.f32 1.0, %v8613_v7  ;;  %8634 = vpow2.f32 %v7654_v8  ;;  %v1968_v37 = vrot.slane %v11449_v48, 7 }
 0x2dd   :  { %v8617_v60 = vpop.eup %8616  ;;  %v1793_v63 = vadd.f32 1.0, %v8615_v28  ;;  %8636 = vrcp.f32 %v1791_v36 }
 0x2de   :  { %v8619_v39 = vpop.eup %8618  ;;  %v1794_v38 = vadd.f32 1.0, %v8617_v60  ;;  %8638 = vrcp.f32 %v1792_v50  ;;  %v7657_v50 = vmul.f32 -1.442695, %v1638_v22 }
 0x2df   :  { %v8621_v30 = vpop.eup %8620  ;;  %v1795_v55 = vadd.f32 1.0, %v8619_v39  ;;  %8640 = vrcp.f32 %v1793_v63 }
 0x2e0   :  { %v8623_v27 = vpop.eup %8622  ;;  %v1796_v54 = vadd.f32 1.0, %v8621_v30  ;;  %8642 = vrcp.f32 %v1794_v38  ;;  %v1967_v38 = vrot.slane %v11447_v13, 7 }
 0x2e1   :  { %v8625_v16 = vpop.eup %8624  ;;  %v1797_v8 = vadd.f32 1.0, %v8623_v27  ;;  %8644 = vrcp.f32 %v1795_v55 }
 0x2e2   :  { %v8627_v7 = vpop.eup %8626  ;;  %v1798_v36 = vadd.f32 1.0, %v8625_v16  ;;  %8646 = vrcp.f32 %v1796_v54  ;;  %v1969_v54 = vrot.slane %v11454_v31, 7  ;;  %v14719_v31 = vld [vmem:[#allocation41_spill] sm:$0xff] }
 0x2e3   :  { %v8629_v28 = vpop.eup %8628  ;;  %8648 = vrcp.f32 %v1797_v8  ;;  %v1903_v60 = vadd.f32 1.0, %v8627_v7  ;;  %v14717_v7 = vld [vmem:[#allocation40_spill] sm:$0xff] }
 0x2e4   :  { %v8631_v49 = vpop.eup %8630  ;;  %8650 = vrcp.f32 %v1798_v36  ;;  %v1904_v1 = vadd.f32 1.0, %v8629_v28  ;;  %v1902_v36 = vadd.f32 1.0, %v11737_v32  ;;  %v14721_v32 = vld [vmem:[#allocation58_spill] sm:$0xff] }
 0x2e5   :  { %v8633_v63 = vpop.eup %8632  ;;  %8652 = vpow2.f32 %v7655_v21  ;;  %v1905_v30 = vadd.f32 1.0, %v8631_v49  ;;  %v1970_v21 = vrot.slane %v14717_v7, 7 }
 0x2e6   :  { %v8635_v39 = vpop.eup %8634  ;;  %8654 = vpow2.f32 %v7656_v58  ;;  %v1906_v27 = vadd.f32 1.0, %v8633_v63  ;;  %v14718_v58 = vld [vmem:[#allocation33_spill] sm:$0xff]  ;;  %v1972_v63 = vrot.slane %v14719_v31, 7 }
 0x2e7   :  { %v8637_v55 = vpop.eup %8636  ;;  %8656 = vpow2.f32 %v7657_v50  ;;  %v1907_v16 = vadd.f32 1.0, %v8635_v39  ;;  %v1971_v49 = vrot.slane %v14718_v58, 7 }
 0x2e8   :  { %v8639_v10 = vpop.eup %8638  ;;  %v1999_v22 = vmul.f32 %v8637_v55, %v1967_v38  ;;  %8658 = vrcp.f32 %v1903_v60  ;;  %v1973_v55 = vrot.slane %v14721_v32, 7 }
 0x2e9   :  { %v8641_v8 = vpop.eup %8640  ;;  %v2000_v28 = vmul.f32 %v8639_v10, %v1968_v37  ;;  %8660 = vrcp.f32 %v1904_v1 }
 0x2ea   :  { %v8643_v13 = vpop.eup %8642  ;;  %v2001_v51 = vmul.f32 %v8641_v8, %v1969_v54  ;;  %v11846_v48 = vadd.f32 %v11808_v3, %v1999_v22  ;;  %8662 = vrcp.f32 %v1905_v30  ;;  %v14723_v3 = vld [vmem:[#allocation18_spill] sm:$0xff] }
 0x2eb   :  { %v8645_v50 = vpop.eup %8644  ;;  %v2002_v39 = vmul.f32 %v8643_v13, %v1970_v21  ;;  %v11850_v60 = vadd.f32 %v11811_v47, %v2000_v28  ;;  %8664 = vrcp.f32 %v1906_v27  ;;  %v1974_v54 = vrot.slane %v14723_v3, 7 }
 0x2ec   :  { %v8647_v38 = vpop.eup %8646  ;;  %8666 = vrcp.f32 %v1907_v16  ;;  %v2003_v1 = vmul.f32 %v8645_v50, %v1971_v49  ;;  %v11854_v37 = vadd.f32 %v11814_v52, %v2001_v51 }
 0x2ed   :  { %14720 = vst [vmem:[#allocation21_spill] sm:$0xff] %v11850_v60  ;;  %v8649_v10 = vpop.eup %8648  ;;  %8668 = vrcp.f32 %v1902_v36  ;;  %v2004_v30 = vmul.f32 %v8647_v38, %v1972_v63  ;;  %v11858_v22 = vadd.f32 %v11821_v29, %v2002_v39 }
 0x2ee   :  { %14722 = vst [vmem:[#allocation61_spill] sm:$0xff] %v11854_v37  ;;  %v8651_v8 = vpop.eup %8650  ;;  %v2005_v47 = vmul.f32 %v8649_v10, %v1973_v55  ;;  %v11861_v27 = vadd.f32 %v11824_v44, %v2003_v1  ;;  %8670 = vtanh.f32 %v11727_v9 }
 0x2ef   :  { %14724 = vst [vmem:[#allocation63_spill] sm:$0xff] %v11858_v22  ;;  %v8653_v16 = vpop.eup %8652  ;;  %v2006_v7 = vmul.f32 %v8651_v8, %v1974_v54  ;;  %v11865_v52 = vadd.f32 %v11827_v53, %v2004_v30  ;;  %8672 = vtanh.f32 %v11730_v62 }
 0x2f0   :  { %14725 = vst [vmem:[#allocation71_spill] sm:$0xff] %v11861_v27  ;;  %v8655_v51 = vpop.eup %8654  ;;  %v1908_v21 = vadd.f32 1.0, %v8653_v16  ;;  %v11869_v36 = vadd.f32 %v11830_v43, %v2005_v47  ;;  %8674 = vtanh.f32 %v11765_v0 }
 0x2f1   :  { %14726 = vst [vmem:[#allocation73_spill] sm:$0xff] %v11865_v52  ;;  %v8657_v29 = vpop.eup %8656  ;;  %v1909_v28 = vadd.f32 1.0, %v8655_v51  ;;  %v11873_v44 = vadd.f32 %v11833_v25, %v2006_v7  ;;  %8676 = vtanh.f32 %v11768_v41 }
 0x2f2   :  { %14727 = vst [vmem:[#allocation32_spill] sm:$0xff] %v11869_v36  ;;  %v8659_v13 = vpop.eup %8658  ;;  %v1910_v58 = vadd.f32 1.0, %v8657_v29  ;;  %8678 = vrcp.f32 %v1908_v21 }
 0x2f3   :  { %14728 = vst [vmem:[#allocation34_spill] sm:$0xff] %v11873_v44  ;;  %v8661_v53 = vpop.eup %8660  ;;  %8680 = vrcp.f32 %v1909_v28 }
 0x2f4   :  { %v8663_v49 = vpop.eup %8662  ;;  %8682 = vrcp.f32 %v1910_v58 }
 0x2f5   :  { %v11876_v50 = vpop.eup %8664  ;;  %8684 = vtanh.f32 %v11771_v5 }
 0x2f6   :  { %v11879_v43 = vpop.eup %8666  ;;  %8686 = vtanh.f32 %v11774_v46 }
 0x2f7   :  { %v8669_v31 = vpop.eup %8668  ;;  %8688 = vtanh.f32 %v11776_v14 }
 0x2f8   :  { %v8671_v25 = vpop.eup %8670  ;;  %8690 = vtanh.f32 %v11778_v34 }
 0x2f9   :  { %v8673_v63 = vpop.eup %8672  ;;  %8692 = vtanh.f32 %v11846_v48  ;;  %v2055_v39 = vmul.f32 %v8671_v25, %v11740_v33 }
 0x2fa   :  { %v8675_v38 = vpop.eup %8674  ;;  %8694 = vtanh.f32 %v11850_v60  ;;  %v2056_v32 = vmul.f32 %v8673_v63, %v11744_v4 }
 0x2fb   :  { %v8677_v55 = vpop.eup %8676  ;;  %8696 = vtanh.f32 %v11854_v37  ;;  %v2057_v1 = vmul.f32 %v8675_v38, %v11749_v40  ;;  %v2071_v10 = vpack.c.bf16 %v2055_v39, %v2055_v39 }
 0x2fc   :  { %v8679_v3 = vpop.eup %8678  ;;  %8698 = vtanh.f32 %v11858_v22  ;;  %v2058_v54 = vmul.f32 %v8677_v55, %v11755_v19  ;;  %v2072_v30 = vpack.c.bf16 %v2056_v32, %v2056_v32 }
 0x2fd   :  { %v8681_v8 = vpop.eup %8680  ;;  %8700 = vtanh.f32 %v11861_v27  ;;  %v2073_v33 = vpack.c.bf16 %v2057_v1, %v2057_v1  ;;  %v2103_v47 = vunpack.c.l.b16 %v2071_v10 }
 0x2fe   :  { %v8683_v16 = vpop.eup %8682  ;;  %8702 = vtanh.f32 %v11865_v52  ;;  %v2074_v4 = vpack.c.bf16 %v2058_v54, %v2058_v54  ;;  %v2104_v40 = vunpack.c.l.b16 %v2072_v30 }
 0x2ff   :  { %v8685_v7 = vpop.eup %8684  ;;  %8704 = vtanh.f32 %v11869_v36  ;;  %v2105_v51 = vunpack.c.l.b16 %v2073_v33  ;;  %v2119_v21 = vrot.slane %v2103_v47, 1 }
 0x300   :  { %v8687_v29 = vpop.eup %8686  ;;  %8706 = vtanh.f32 %v11873_v44  ;;  %v2059_v19 = vmul.f32 %v8685_v7, %v11758_v56  ;;  %v2106_v28 = vunpack.c.l.b16 %v2074_v4 }
 0x301   :  { %v8689_v58 = vpop.eup %8688  ;;  %v2060_v25 = vmul.f32 %v8687_v29, %v11783_v42  ;;  %v2120_v63 = vsel %vm1325_vm1, %v2104_v40, %v2119_v21  ;;  %v2121_v39 = vrot.slane %v2105_v51, 7 }
 0x302   :  { %v8691_v38 = vpop.eup %8690  ;;  %v2061_v32 = vmul.f32 %v8689_v58, %v11787_v35  ;;  %v2075_v55 = vpack.c.bf16 %v2059_v19, %v2059_v19  ;;  %v2123_v1 = vrot.slane %v2106_v28, 6 }
 0x303   :  { %v8693_v10 = vpop.eup %8692  ;;  %v2062_v54 = vmul.f32 %v8691_v38, %v8669_v31  ;;  %v2076_v30 = vpack.c.bf16 %v2060_v25, %v2060_v25  ;;  %v2122_v33 = vsel %vm1328_vm2, %v2121_v39, %v2120_v63 }
 0x304   :  { %v8695_v47 = vpop.eup %8694  ;;  %v2063_v44 = vmul.f32 %v8693_v10, %v8659_v13  ;;  %v2077_v56 = vpack.c.bf16 %v2061_v32, %v2061_v32  ;;  %v2107_v4 = vunpack.c.l.b16 %v2075_v55  ;;  %v2124_v7 = vsel %vm1331_vm3, %v2123_v1, %v2122_v33 }
 0x305   :  { %v8697_v42 = vpop.eup %8696  ;;  %v2064_v29 = vmul.f32 %v8695_v47, %v8661_v53  ;;  %v2078_v40 = vpack.c.bf16 %v2062_v54, %v2062_v54  ;;  %v2108_v51 = vunpack.c.l.b16 %v2076_v30 }
 0x306   :  { %v8699_v21 = vpop.eup %8698  ;;  %v2065_v36 = vmul.f32 %v8697_v42, %v8663_v49  ;;  %v2079_v35 = vpack.c.bf16 %v2063_v44, %v2063_v44  ;;  %v2109_v19 = vunpack.c.l.b16 %v2077_v56  ;;  %v2125_v28 = vrot.slane %v2107_v4, 5 }
 0x307   :  { %v8701_v58 = vpop.eup %8700  ;;  %v2066_v31 = vmul.f32 %v8699_v21, %v11876_v50  ;;  %v2080_v25 = vpack.c.bf16 %v2064_v29, %v2064_v29  ;;  %v2110_v63 = vunpack.c.l.b16 %v2078_v40  ;;  %v2127_v39 = vrot.slane %v2108_v51, 4 }
 0x308   :  { %v8703_v13 = vpop.eup %8702  ;;  %v2067_v38 = vmul.f32 %v8701_v58, %v11879_v43  ;;  %v2081_v32 = vpack.c.bf16 %v2065_v36, %v2065_v36  ;;  %v2111_v55 = vunpack.c.l.b16 %v2079_v35  ;;  %v2126_v53 = vsel %vm1334_vm4, %v2125_v28, %v2124_v7 }
 0x309   :  { %v8705_v1 = vpop.eup %8704  ;;  %v2068_v10 = vmul.f32 %v8703_v13, %v8679_v3  ;;  %v2082_v54 = vpack.c.bf16 %v2066_v31, %v2066_v31  ;;  %v2112_v49 = vunpack.c.l.b16 %v2080_v25  ;;  %v2128_v44 = vsel %vm1337_vm5, %v2127_v39, %v2126_v53 }
 0x30a   :  { %v8707_v30 = vpop.eup %8706  ;;  %v2069_v33 = vmul.f32 %v8705_v1, %v8681_v8  ;;  %v2083_v47 = vpack.c.bf16 %v2067_v38, %v2067_v38  ;;  %v2113_v50 = vunpack.c.l.b16 %v2081_v32  ;;  %v2129_v56 = vrot.slane %v2109_v19, 3 }
 0x30b   :  { %v2070_v4 = vmul.f32 %v8707_v30, %v8683_v16  ;;  %v2084_v42 = vpack.c.bf16 %v2068_v10, %v2068_v10  ;;  %v2114_v29 = vunpack.c.l.b16 %v2082_v54  ;;  %v2131_v40 = vrot.slane %v2110_v63, 2  ;;  %v10308_v54 = vld [vmem:[%s14351_s4] ss:$16 sps:$4 sm:$0xff]   ;;  %v10311_v30 = vld [vmem:[%s14351_s4 + $0x2c] ss:$16 sps:$4 sm:$0xff]  }
 0x30c   :  { %v2085_v43 = vpack.c.bf16 %v2069_v33, %v2069_v33  ;;  %v2115_v36 = vunpack.c.l.b16 %v2083_v47  ;;  %v2130_v51 = vsel %vm1340_vm6, %v2129_v56, %v2128_v44  ;;  %v2133_v7 = vrot.slane %v2111_v55, 1  ;;  %v10310_v44 = vld [vmem:[%s14351_s4 + $0x24] ss:$16 sps:$4 sm:$0xff]   ;;  %v10312_v47 = vld [vmem:[%s14351_s4 + $0x20] ss:$16 sps:$4 sm:$0xff]  }
 0x30d   :  { %v2086_v21 = vpack.c.bf16 %v2070_v4, %v2070_v4  ;;  %v2116_v3 = vunpack.c.l.b16 %v2084_v42  ;;  %v2132_v35 = vsel %vm1343_vm7, %v2131_v40, %v2130_v51  ;;  %v2135_v28 = vrot.slane %v2113_v50, 7  ;;  %v10313_v50 = vld [vmem:[%s14351_s4 + $0x28] ss:$16 sps:$4 sm:$0xff]   ;;  %v10314_v56 = vld [vmem:[%s14351_s4 + $0x44] ss:$16 sps:$4 sm:$0xff]  }
 0x30e   :  { %v2117_v58 = vunpack.c.l.b16 %v2085_v43  ;;  %v2134_v8 = vsel %vm1325_vm1, %v2112_v49, %v2133_v7  ;;  %v2137_v31 = vrot.slane %v2114_v29, 6  ;;  %v2139_v19 = vrot.slane %v2115_v36, 5  ;;  %v10309_v49 = vld [vmem:[%s14351_s4 + $0x8] ss:$16 sps:$4 sm:$0xff]   ;;  %v10315_v4 = vld [vmem:[%s14351_s4 + $0x4c] ss:$16 sps:$4 sm:$0xff]  }
 0x30f   :  { %v2118_v25 = vunpack.c.l.b16 %v2086_v21  ;;  %v2136_v16 = vsel %vm1328_vm2, %v2135_v28, %v2134_v8  ;;  %v2141_v39 = vrot.slane %v2116_v3, 4  ;;  %v14729_v33 = vmov 0   ;;  %v10316_v42 = vld [vmem:[%s14351_s4 + $0x40] ss:$16 sps:$4 sm:$0xff]   ;;  %v10317_v29 = vld [vmem:[%s14351_s4 + $0x48] ss:$16 sps:$4 sm:$0xff]  }
 0x310   :  { %v2138_v63 = vsel %vm1331_vm3, %v2137_v31, %v2136_v16  ;;  %v2143_v38 = vrot.slane %v2117_v58, 3  ;;  %v10318_v40 = vld [vmem:[%s14351_s4 + $0x64] ss:$16 sps:$4 sm:$0xff]   ;;  %v10319_v43 = vld [vmem:[%s14351_s4 + $0x6c] ss:$16 sps:$4 sm:$0xff]  }
 0x311   :  { %v2140_v13 = vsel %vm1334_vm4, %v2139_v19, %v2138_v63  ;;  %v2145_v55 = vrot.slane %v2118_v25, 2  ;;  %v10320_v36 = vld [vmem:[%s14351_s4 + $0x60] ss:$16 sps:$4 sm:$0xff]   ;;  %v10321_v51 = vld [vmem:[%s14351_s4 + $0x68] ss:$16 sps:$4 sm:$0xff]  }
 0x312   :  { %v2142_v32 = vsel %vm1337_vm5, %v2141_v39, %v2140_v13  ;;  %v10322_v7 = vld [vmem:[%s14351_s4 + $0x84] ss:$16 sps:$4 sm:$0xff]   ;;  %v10323_v21 = vld [vmem:[%s14351_s4 + $0x8c] ss:$16 sps:$4 sm:$0xff]   ;;  %v10324_v3 = vld [vmem:[%s14351_s4 + $0x80] ss:$16 sps:$4 sm:$0xff]  }
 0x313   :  { %v2144_v53 = vsel %vm1340_vm6, %v2143_v38, %v2142_v32  ;;  %v10326_v28 = vld [vmem:[%s14351_s4 + $0xa4] ss:$16 sps:$4 sm:$0xff]   ;;  %v10327_v58 = vld [vmem:[%s14351_s4 + $0xac] ss:$16 sps:$4 sm:$0xff]   ;;  %v10328_v8 = vld [vmem:[%s14351_s4 + $0xa0] ss:$16 sps:$4 sm:$0xff]  }
 0x314   :  { %v2146_v1 = vsel %vm1343_vm7, %v2145_v55, %v2144_v53  ;;  %v10329_v31 = vld [vmem:[%s14351_s4 + $0xa8] ss:$16 sps:$4 sm:$0xff]   ;;  %v10330_v25 = vld [vmem:[%s14351_s4 + $0xc4] ss:$16 sps:$4 sm:$0xff]   ;;  %v10331_v16 = vld [vmem:[%s14351_s4 + $0xcc] ss:$16 sps:$4 sm:$0xff]  }
 0x315   :  { %v2147_v10 = vpack.c.b16 %v2146_v1, %v2132_v35  ;;  %v10325_v35 = vld [vmem:[%s14351_s4 + $0x88] ss:$16 sps:$4 sm:$0xff]   ;;  %v10332_v19 = vld [vmem:[%s14351_s4 + $0xc0] ss:$16 sps:$4 sm:$0xff]   ;;  %v10334_v39 = vld [vmem:[%s14351_s4 + $0xe4] ss:$16 sps:$4 sm:$0xff]  }
 0x316   :  { %v10333_v63 = vld [vmem:[%s14351_s4 + $0xc8] ss:$16 sps:$4 sm:$0xff]   ;;  %v10335_v13 = vld [vmem:[%s14351_s4 + $0xec] ss:$16 sps:$4 sm:$0xff]   ;;  %v10336_v38 = vld [vmem:[%s14351_s4 + $0xe0] ss:$16 sps:$4 sm:$0xff]  }
 0x317   :  { %2182 = vmatmul.mubr.bf16.vlgmr.msra.gmra.mrb[32].mxu0 %v2147_v10  ;;  %2225 = vmatmul.mubr.bf16.vlgmr.msra.gmra.mrb[48].mxu1 %v2147_v10  ;;  %v10337_v32 = vld [vmem:[%s14351_s4 + $0xe8] ss:$16 sps:$4 sm:$0xff]   ;;  %v10338_v55 = vld [vmem:[%s14351_s4 + $0x4] ss:$16 sps:$4 sm:$0xff]   ;;  %v10339_v53 = vld [vmem:[%s14351_s4 + $0xc] ss:$16 sps:$4 sm:$0xff]  }
 0x318   :  { %2938 = vmatpush1.bf16.msra.mxu0 %v10308_v54  ;;  %2981 = vmatpush1.bf16.msra.mxu1 %v10309_v49 }
 0x319   :  { %2939 = vmatprep.subr.bf16.mxu0 %v10310_v44  ;;  %2982 = vmatprep.subr.bf16.mxu1 %v10311_v30 }
 0x31a   :  { %2969 = vmatprep.mubr.bf16.mxu0 %v14729_v33  ;;  %3012 = vmatprep.mubr.bf16.mxu1 %v14729_v33 }
 0x31c   :  { %2940 = vmatpush1.bf16.msra.mxu0 %v10312_v47  ;;  %2983 = vmatpush1.bf16.msra.mxu1 %v10313_v50 }
 0x31d   :  { %2941 = vmatprep.subr.bf16.mxu0 %v10314_v56  ;;  %2984 = vmatprep.subr.bf16.mxu1 %v10315_v4 }
 0x320   :  { %2942 = vmatpush1.bf16.msra.mxu0 %v10316_v42  ;;  %2985 = vmatpush1.bf16.msra.mxu1 %v10317_v29  ;;  %v14730_v29 = vld [vmem:[#allocation13_spill] sm:$0xff] }
 0x321   :  { %2943 = vmatprep.subr.bf16.mxu0 %v10318_v40  ;;  %2986 = vmatprep.subr.bf16.mxu1 %v10319_v43 }
 0x324   :  { %2944 = vmatpush1.bf16.msra.mxu0 %v10320_v36  ;;  %2987 = vmatpush1.bf16.msra.mxu1 %v10321_v51  ;;  %v14731_v51 = vld [vmem:[#allocation10_spill] sm:$0xff] }
 0x325   :  { %2945 = vmatprep.subr.bf16.mxu0 %v10322_v7  ;;  %2988 = vmatprep.subr.bf16.mxu1 %v10323_v21  ;;  %v14732_v21 = vld [vmem:[#allocation12_spill] sm:$0xff] }
 0x328   :  { %2946 = vmatpush1.bf16.msra.mxu0 %v10324_v3  ;;  %2989 = vmatpush1.bf16.msra.mxu1 %v10325_v35  ;;  %v14733_v35 = vld [vmem:[#allocation14_spill] sm:$0xff] }
 0x329   :  { %2947 = vmatprep.subr.bf16.mxu0 %v10326_v28  ;;  %2990 = vmatprep.subr.bf16.mxu1 %v10327_v58  ;;  %v14734_v58 = vld [vmem:[#allocation15_spill] sm:$0xff] }
 0x32c   :  { %2948 = vmatpush1.bf16.msra.mxu0 %v10328_v8  ;;  %2991 = vmatpush1.bf16.msra.mxu1 %v10329_v31 }
 0x32d   :  { %2949 = vmatprep.subr.bf16.mxu0 %v10330_v25  ;;  %2992 = vmatprep.subr.bf16.mxu1 %v10331_v16  ;;  %v14735_v16 = vld [vmem:[#allocation16_spill] sm:$0xff] }
 0x330   :  { %2950 = vmatpush1.bf16.msra.mxu0 %v10332_v19  ;;  %2993 = vmatpush1.bf16.msra.mxu1 %v10333_v63  ;;  %v14736_v63 = vld [vmem:[#allocation17_spill] sm:$0xff] }
 0x331   :  { %2951 = vmatprep.subr.bf16.mxu0 %v10334_v39  ;;  %2994 = vmatprep.subr.bf16.mxu1 %v10335_v13 }
 0x334   :  { %2952 = vmatpush1.bf16.msra.mxu0 %v10336_v38  ;;  %2995 = vmatpush1.bf16.msra.mxu1 %v10337_v32  ;;  %v14737_v38 = vld [vmem:[#allocation19_spill] sm:$0xff] }
 0x335   :  { %3725 = vmatprep.subr.bf16.mxu0 %v10338_v55  ;;  %3768 = vmatprep.subr.bf16.mxu1 %v10339_v53 }
 0x3ea   :  { %v2183_v1 = vpop.f32.mrb[32].mxu0  ;;  %v12013_v10 = vpop.f32.mrb[48].mxu1 }
 0x3eb   :  { %v2243_v54 = vrot.slane %v2183_v1, 6  ;;  %v2247_v49 = vrot.slane %v2183_v1, 7  ;;  %v2251_v44 = vrot.slane %v2183_v1, 1  ;;  %v2255_v30 = vrot.slane %v2183_v1, 2  ;;  %v12015_v47 = vpop.f32.mrb[33].mxu0  ;;  %v12017_v50 = vpop.f32.mrb[49].mxu1 }
 0x3ec   :  { %v2259_v56 = vrot.slane %v2183_v1, 3  ;;  %v2263_v4 = vrot.slane %v2183_v1, 4  ;;  %v2267_v42 = vrot.slane %v2183_v1, 5  ;;  %v2371_v40 = vadd.f32 %v2183_v1, %v14730_v29  ;;  %v12020_v43 = vpop.f32.mrb[34].mxu0  ;;  %v12022_v36 = vpop.f32.mrb[50].mxu1  ;;  %v14748_v29 = vld [vmem:[#allocation8_spill] sm:$0xff] }
 0x3ed   :  { %v2363_v7 = vadd.f32 %v2243_v54, %v14731_v51  ;;  %v2367_v3 = vadd.f32 %v2247_v49, %v14732_v21  ;;  %v2375_v28 = vadd.f32 %v2251_v44, %v14733_v35  ;;  %v2379_v8 = vadd.f32 %v2255_v30, %v14734_v58  ;;  %v12028_v31 = vpop.f32.mrb[35].mxu0  ;;  %v12030_v25 = vpop.f32.mrb[51].mxu1 }
 0x3ee   :  { %v2383_v19 = vadd.f32 %v2259_v56, %v14735_v16  ;;  %v2387_v39 = vadd.f32 %v2263_v4, %v14736_v63  ;;  %v7660_v13 = vmul.f32 -1.442695, %v2371_v40  ;;  %v2391_v32 = vadd.f32 %v2267_v42, %v14737_v38  ;;  %v14738_v40 = vld [vmem:[#allocation49_spill] sm:$0xff]  ;;  %v14745_v38 = vld [vmem:[#allocation11_spill] sm:$0xff] }
 0x3ef   :  { %v7658_v55 = vmul.f32 -1.442695, %v2363_v7  ;;  %v7659_v53 = vmul.f32 -1.442695, %v2367_v3  ;;  %v7661_v1 = vmul.f32 -1.442695, %v2375_v28 }
 0x3f0   :  { %8708 = vpow2.f32 %v7660_v13  ;;  %v7662_v54 = vmul.f32 -1.442695, %v2379_v8  ;;  %v7663_v49 = vmul.f32 -1.442695, %v2383_v19  ;;  %v2245_v44 = vrot.slane %v12013_v10, 6  ;;  %v14739_v3 = vld [vmem:[#allocation51_spill] sm:$0xff] }
 0x3f1   :  { %8710 = vpow2.f32 %v7658_v55  ;;  %v2249_v30 = vrot.slane %v12013_v10, 7  ;;  %v7664_v58 = vmul.f32 -1.442695, %v2387_v39  ;;  %v7665_v56 = vmul.f32 -1.442695, %v2391_v32  ;;  %v14740_v8 = vld [vmem:[#allocation53_spill] sm:$0xff] }
 0x3f2   :  { %8712 = vpow2.f32 %v7659_v53  ;;  %v2253_v4 = vrot.slane %v12013_v10, 1  ;;  %v2257_v42 = vrot.slane %v12013_v10, 2  ;;  %v2365_v7 = vadd.f32 %v2245_v44, %v14738_v40  ;;  %v14741_v13 = vld [vmem:[#allocation55_spill] sm:$0xff]  ;;  %v14742_v39 = vld [vmem:[#allocation57_spill] sm:$0xff] }
 0x3f3   :  { %8714 = vpow2.f32 %v7661_v1  ;;  %v2369_v28 = vadd.f32 %v2249_v30, %v14739_v3  ;;  %v2373_v19 = vadd.f32 %v12013_v10, %v14740_v8  ;;  %v2261_v1 = vrot.slane %v12013_v10, 3  ;;  %v14744_v3 = vld [vmem:[#allocation6_spill] sm:$0xff]  ;;  %v14747_v16 = vld [vmem:[#allocation23_spill] sm:$0xff] }
 0x3f4   :  { %8716 = vpow2.f32 %v7662_v54  ;;  %v2377_v55 = vadd.f32 %v2253_v4, %v14741_v13  ;;  %v2381_v53 = vadd.f32 %v2257_v42, %v14742_v39  ;;  %v2265_v54 = vrot.slane %v12013_v10, 4  ;;  %v14743_v13 = vld [vmem:[#allocation3_spill] sm:$0xff] }
 0x3f5   :  { %8718 = vpow2.f32 %v7663_v49  ;;  %v2269_v42 = vrot.slane %v12013_v10, 5  ;;  %v2260_v10 = vrot.slane %v12015_v47, 3 }
 0x3f6   :  { %8720 = vpow2.f32 %v7664_v58 }
 0x3f7   :  { %8722 = vpow2.f32 %v7665_v56  ;;  %v2244_v56 = vrot.slane %v12015_v47, 6  ;;  %v2393_v21 = vadd.f32 %v2269_v42, %v14748_v29  ;;  %v14753_v29 = vld [vmem:[#allocation28_spill] sm:$0xff] }
 0x3f8   :  { %8724 = vtanh.f32 %v2365_v7  ;;  %v2248_v7 = vrot.slane %v12015_v47, 7 }
 0x3f9   :  { %8726 = vtanh.f32 %v2369_v28  ;;  %v2364_v63 = vadd.f32 %v2244_v56, %v14745_v38  ;;  %v14749_v56 = vld [vmem:[#allocation24_spill] sm:$0xff] }
 0x3fa   :  { %v8709_v32 = vpop.eup %8708  ;;  %8728 = vtanh.f32 %v2373_v19  ;;  %v2385_v19 = vadd.f32 %v2261_v1, %v14743_v13  ;;  %v2264_v1 = vrot.slane %v12015_v47, 4  ;;  %v2268_v13 = vrot.slane %v12015_v47, 5 }
 0x3fb   :  { %v8711_v49 = vpop.eup %8710  ;;  %v2477_v44 = vadd.f32 1.0, %v8709_v32  ;;  %8730 = vtanh.f32 %v2377_v55  ;;  %v2389_v32 = vadd.f32 %v2265_v54, %v14744_v3  ;;  %v14746_v54 = vld [vmem:[#allocation22_spill] sm:$0xff]  ;;  %v7674_v35 = vmul.f32 -1.442695, %v2364_v63 }
 0x3fc   :  { %v8713_v58 = vpop.eup %8712  ;;  %v2475_v30 = vadd.f32 1.0, %v8711_v49  ;;  %8732 = vtanh.f32 %v2381_v53  ;;  %v2252_v53 = vrot.slane %v12015_v47, 1  ;;  %v2256_v49 = vrot.slane %v12015_v47, 2 }
 0x3fd   :  { %v8715_v8 = vpop.eup %8714  ;;  %v2476_v4 = vadd.f32 1.0, %v8713_v58  ;;  %8734 = vrcp.f32 %v2477_v44  ;;  %v2368_v3 = vadd.f32 %v2248_v7, %v14746_v54  ;;  %v2246_v7 = vrot.slane %v12017_v50, 6 }
 0x3fe   :  { %v8717_v28 = vpop.eup %8716  ;;  %v2478_v39 = vadd.f32 1.0, %v8715_v8  ;;  %8736 = vrcp.f32 %v2475_v30  ;;  %v2376_v38 = vadd.f32 %v2252_v53, %v14749_v56  ;;  %v2392_v53 = vadd.f32 %v2268_v13, %v14753_v29  ;;  %v14756_v29 = vld [vmem:[#allocation54_spill] sm:$0xff] }
 0x3ff   :  { %v8719_v55 = vpop.eup %8718  ;;  %v2479_v40 = vadd.f32 1.0, %v8717_v28  ;;  %8738 = vrcp.f32 %v2476_v4  ;;  %v7675_v33 = vmul.f32 -1.442695, %v2368_v3  ;;  %v2258_v3 = vrot.slane %v12017_v50, 2 }
 0x400   :  { %v8721_v58 = vpop.eup %8720  ;;  %v2480_v44 = vadd.f32 1.0, %v8719_v55  ;;  %8740 = vrcp.f32 %v2478_v39  ;;  %v2372_v55 = vadd.f32 %v12015_v47, %v14747_v16  ;;  %v2250_v47 = vrot.slane %v12017_v50, 7 }
 0x401   :  { %v8723_v8 = vpop.eup %8722  ;;  %v2481_v30 = vadd.f32 1.0, %v8721_v58  ;;  %8742 = vrcp.f32 %v2479_v40  ;;  %v14750_v58 = vld [vmem:[#allocation25_spill] sm:$0xff] }
 0x402   :  { %v8725_v28 = vpop.eup %8724  ;;  %v2482_v4 = vadd.f32 1.0, %v8723_v8  ;;  %8744 = vrcp.f32 %v2480_v44  ;;  %v2380_v40 = vadd.f32 %v2256_v49, %v14750_v58  ;;  %v14751_v44 = vld [vmem:[#allocation26_spill] sm:$0xff]  ;;  %v7676_v56 = vmul.f32 -1.442695, %v2372_v55 }
 0x403   :  { %v8727_v39 = vpop.eup %8726  ;;  %8746 = vrcp.f32 %v2481_v30  ;;  %v2384_v54 = vadd.f32 %v2260_v10, %v14751_v44  ;;  %v14752_v30 = vld [vmem:[#allocation27_spill] sm:$0xff]  ;;  %v2254_v58 = vrot.slane %v12017_v50, 1  ;;  %v14754_v10 = vld [vmem:[#allocation50_spill] sm:$0xff] }
 0x404   :  { %v8729_v51 = vpop.eup %8728  ;;  %8748 = vrcp.f32 %v2482_v4  ;;  %v2388_v42 = vadd.f32 %v2264_v1, %v14752_v30  ;;  %v7677_v4 = vmul.f32 -1.442695, %v2376_v38  ;;  %v7678_v63 = vmul.f32 -1.442695, %v2380_v40  ;;  %v14755_v1 = vld [vmem:[#allocation52_spill] sm:$0xff] }
 0x405   :  { %v8731_v8 = vpop.eup %8730  ;;  %8750 = vtanh.f32 %v2385_v19  ;;  %v2366_v44 = vadd.f32 %v2246_v7, %v14754_v10  ;;  %v7679_v13 = vmul.f32 -1.442695, %v2384_v54  ;;  %v2370_v55 = vadd.f32 %v2250_v47, %v14755_v1  ;;  %v14757_v10 = vld [vmem:[#allocation56_spill] sm:$0xff]  ;;  %v14758_v54 = vld [vmem:[#allocation2_spill] sm:$0xff] }
 0x406   :  { %v8733_v16 = vpop.eup %8732  ;;  %8752 = vtanh.f32 %v2389_v32  ;;  %v7680_v40 = vmul.f32 -1.442695, %v2388_v42  ;;  %v7681_v7 = vmul.f32 -1.442695, %v2392_v53  ;;  %v2382_v47 = vadd.f32 %v2258_v3, %v14758_v54 }
 0x407   :  { %v8735_v49 = vpop.eup %8734  ;;  %8754 = vtanh.f32 %v2393_v21  ;;  %v2295_v30 = vrot.slane %v12020_v43, 5 }
 0x408   :  { %v8737_v52 = vpop.eup %8736  ;;  %v12070_v19 = vmul.f32 %v8735_v49, %v8729_v51  ;;  %8756 = vpow2.f32 %v7674_v35  ;;  %v2374_v51 = vadd.f32 %v12017_v50, %v14756_v29 }
 0x409   :  { %v8739_v32 = vpop.eup %8738  ;;  %v12074_v27 = vmul.f32 %v8737_v52, %v8725_v28  ;;  %8758 = vpow2.f32 %v7675_v33  ;;  %v2378_v52 = vadd.f32 %v2254_v58, %v14757_v10 }
 0x40a   :  { %v8741_v21 = vpop.eup %8740  ;;  %v12077_v38 = vmul.f32 %v8739_v32, %v8727_v39  ;;  %8760 = vpow2.f32 %v7676_v56  ;;  %v7690_v39 = vmul.f32 -1.442695, %v2366_v44  ;;  %v7691_v56 = vmul.f32 -1.442695, %v2370_v55 }
 0x40b   :  { %v8743_v35 = vpop.eup %8742  ;;  %v12081_v49 = vmul.f32 %v8741_v21, %v8731_v8  ;;  %8762 = vpow2.f32 %v7677_v4  ;;  %v7692_v8 = vmul.f32 -1.442695, %v2374_v51  ;;  %v7693_v53 = vmul.f32 -1.442695, %v2378_v52 }
 0x40c   :  { %v8745_v28 = vpop.eup %8744  ;;  %v12084_v33 = vmul.f32 %v8743_v35, %v8733_v16  ;;  %8764 = vpow2.f32 %v7678_v63  ;;  %v7694_v16 = vmul.f32 -1.442695, %v2382_v47  ;;  %v2262_v44 = vrot.slane %v12017_v50, 3  ;;  %v14759_v47 = vld [vmem:[#allocation4_spill] sm:$0xff] }
 0x40d   :  { %v12087_v32 = vpop.eup %8746  ;;  %8766 = vpow2.f32 %v7679_v13  ;;  %v2266_v13 = vrot.slane %v12017_v50, 4  ;;  %v2270_v51 = vrot.slane %v12017_v50, 5 }
 0x40e   :  { %v12089_v42 = vpop.eup %8748  ;;  %8768 = vpow2.f32 %v7680_v40 }
 0x40f   :  { %v8751_v21 = vpop.eup %8750  ;;  %8770 = vpow2.f32 %v7681_v7 }
 0x410   :  { %v12091_v4 = vpop.eup %8752  ;;  %v12093_v58 = vmul.f32 %v8751_v21, %v8745_v28  ;;  %8772 = vpow2.f32 %v7690_v39  ;;  %v2386_v39 = vadd.f32 %v2262_v44, %v14759_v47 }
 0x411   :  { %v12095_v63 = vpop.eup %8754  ;;  %8774 = vpow2.f32 %v7691_v56  ;;  %v14760_v56 = vld [vmem:[#allocation7_spill] sm:$0xff] }
 0x412   :  { %v8757_v3 = vpop.eup %8756  ;;  %8776 = vpow2.f32 %v7692_v8  ;;  %v2390_v10 = vadd.f32 %v2266_v13, %v14760_v56  ;;  %v7695_v44 = vmul.f32 -1.442695, %v2386_v39  ;;  %v2279_v39 = vrot.slane %v12020_v43, 1 }
 0x413   :  { %v8759_v55 = vpop.eup %8758  ;;  %v2571_v40 = vadd.f32 1.0, %v8757_v3  ;;  %8778 = vpow2.f32 %v7693_v53  ;;  %v14761_v3 = vld [vmem:[#allocation9_spill] sm:$0xff]  ;;  %v2750_v53 = vrot.slane %v11768_v41, 7  ;;  %v2748_v41 = vrot.slane %v11730_v62, 7 }
 0x414   :  { %v8761_v35 = vpop.eup %8760  ;;  %v2572_v7 = vadd.f32 1.0, %v8759_v55  ;;  %8780 = vpow2.f32 %v7694_v16  ;;  %v2394_v1 = vadd.f32 %v2270_v51, %v14761_v3  ;;  %v2747_v16 = vrot.slane %v11727_v9, 7 }
 0x415   :  { %v8763_v52 = vpop.eup %8762  ;;  %v2573_v28 = vadd.f32 1.0, %v8761_v35  ;;  %8782 = vrcp.f32 %v2571_v40 }
 0x416   :  { %v8765_v21 = vpop.eup %8764  ;;  %v2574_v54 = vadd.f32 1.0, %v8763_v52  ;;  %8784 = vrcp.f32 %v2572_v7  ;;  %v2271_v7 = vrot.slane %v12020_v43, 6 }
 0x417   :  { %v8767_v29 = vpop.eup %8766  ;;  %v2575_v8 = vadd.f32 1.0, %v8765_v21  ;;  %8786 = vrcp.f32 %v2573_v28  ;;  %v7696_v21 = vmul.f32 -1.442695, %v2390_v10  ;;  %v2275_v28 = vrot.slane %v12020_v43, 7 }
 0x418   :  { %v8769_v50 = vpop.eup %8768  ;;  %v2576_v55 = vadd.f32 1.0, %v8767_v29  ;;  %8788 = vrcp.f32 %v2574_v54  ;;  %v2749_v29 = vrot.slane %v11765_v0, 7  ;;  %v7697_v54 = vmul.f32 -1.442695, %v2394_v1  ;;  %v14763_v1 = vld [vmem:[#allocation30_spill] sm:$0xff] }
 0x419   :  { %v8771_v40 = vpop.eup %8770  ;;  %v2577_v35 = vadd.f32 1.0, %v8769_v50  ;;  %8790 = vrcp.f32 %v2575_v8  ;;  %v2283_v8 = vrot.slane %v12020_v43, 2  ;;  %v2287_v10 = vrot.slane %v12020_v43, 3 }
 0x41a   :  { %v8773_v52 = vpop.eup %8772  ;;  %v2578_v13 = vadd.f32 1.0, %v8771_v40  ;;  %8792 = vrcp.f32 %v2576_v55  ;;  %v14762_v40 = vld [vmem:[#allocation29_spill] sm:$0xff]  ;;  %v2291_v0 = vrot.slane %v12020_v43, 4  ;;  %v2399_v47 = vadd.f32 %v2275_v28, %v14763_v1 }
 0x41b   :  { %v8775_v51 = vpop.eup %8774  ;;  %8794 = vrcp.f32 %v2577_v35  ;;  %v2683_v50 = vadd.f32 1.0, %v8773_v52  ;;  %v2395_v56 = vadd.f32 %v2271_v7, %v14762_v40  ;;  %v2407_v7 = vadd.f32 %v2279_v39, %v14697_v24 }
 0x41c   :  { %v8777_v9 = vpop.eup %8776  ;;  %8796 = vrcp.f32 %v2578_v13  ;;  %v2684_v55 = vadd.f32 1.0, %v8775_v51  ;;  %v2411_v40 = vadd.f32 %v2283_v8, %v14698_v12  ;;  %v7667_v60 = vmul.f32 -1.442695, %v2399_v47 }
 0x41d   :  { %v8779_v3 = vpop.eup %8778  ;;  %8798 = vpow2.f32 %v7695_v44  ;;  %v2685_v62 = vadd.f32 1.0, %v8777_v9  ;;  %v2403_v44 = vadd.f32 %v12020_v43, %v14696_v23  ;;  %v7666_v28 = vmul.f32 -1.442695, %v2395_v56 }
 0x41e   :  { %v8781_v35 = vpop.eup %8780  ;;  %8800 = vpow2.f32 %v7696_v21  ;;  %v2686_v52 = vadd.f32 1.0, %v8779_v3  ;;  %v2415_v56 = vadd.f32 %v2287_v10, %v14699_v15  ;;  %v2277_v10 = vrot.slane %v12022_v36, 7 }
 0x41f   :  { %v8783_v13 = vpop.eup %8782  ;;  %8802 = vpow2.f32 %v7697_v54  ;;  %v2687_v37 = vadd.f32 1.0, %v8781_v35 }
 0x420   :  { %v8785_v51 = vpop.eup %8784  ;;  %v2779_v22 = vmul.f32 %v8783_v13, %v2747_v16  ;;  %8804 = vrcp.f32 %v2683_v50  ;;  %v7668_v50 = vmul.f32 -1.442695, %v2403_v44  ;;  %v2753_v44 = vrot.slane %v11776_v14, 7  ;;  %v14764_v14 = vld [vmem:[#allocation60_spill] sm:$0xff] }
 0x421   :  { %v8787_v21 = vpop.eup %8786  ;;  %v2780_v9 = vmul.f32 %v8785_v51, %v2748_v41  ;;  %8806 = vrcp.f32 %v2684_v55  ;;  %v2273_v55 = vrot.slane %v12022_v36, 6  ;;  %v2754_v51 = vrot.slane %v11778_v34, 7 }
 0x422   :  { %v8789_v1 = vpop.eup %8788  ;;  %v2781_v54 = vmul.f32 %v8787_v21, %v2749_v29  ;;  %v12121_v3 = vadd.f32 %v12074_v27, %v2779_v22  ;;  %8808 = vrcp.f32 %v2685_v62  ;;  %v7669_v29 = vmul.f32 -1.442695, %v2407_v7 }
 0x423   :  { %v8791_v43 = vpop.eup %8790  ;;  %v2782_v23 = vmul.f32 %v8789_v1, %v2750_v53  ;;  %v12124_v16 = vadd.f32 %v12077_v38, %v2780_v9  ;;  %8810 = vrcp.f32 %v2686_v52  ;;  %v2419_v22 = vadd.f32 %v2291_v0, %v14700_v61 }
 0x424   :  { %v8793_v39 = vpop.eup %8792  ;;  %v12127_v41 = vadd.f32 %v12070_v19, %v2781_v54  ;;  %8812 = vrcp.f32 %v2687_v37  ;;  %v7670_v27 = vmul.f32 -1.442695, %v2411_v40  ;;  %v2423_v53 = vadd.f32 %v2295_v30, %v14701_v45 }
 0x425   :  { %v8795_v8 = vpop.eup %8794  ;;  %8814 = vpow2.f32 %v7666_v28  ;;  %v7671_v37 = vmul.f32 -1.442695, %v2415_v56  ;;  %v7672_v0 = vmul.f32 -1.442695, %v2419_v22  ;;  %v2751_v30 = vrot.slane %v11771_v5, 7 }
 0x426   :  { %v8797_v47 = vpop.eup %8796  ;;  %8816 = vpow2.f32 %v7667_v60  ;;  %v2752_v60 = vrot.slane %v11774_v46, 7  ;;  %v7673_v13 = vmul.f32 -1.442695, %v2423_v53  ;;  %v2397_v7 = vadd.f32 %v2273_v55, %v11248_v18 }
 0x427   :  { %v8799_v38 = vpop.eup %8798  ;;  %8818 = vpow2.f32 %v7668_v50  ;;  %v2281_v9 = vrot.slane %v12022_v36, 1  ;;  %v2285_v5 = vrot.slane %v12022_v36, 2  ;;  %v2401_v46 = vadd.f32 %v2277_v10, %v11258_v57 }
 0x428   :  { %v8801_v35 = vpop.eup %8800  ;;  %v2688_v19 = vadd.f32 1.0, %v8799_v38  ;;  %8820 = vpow2.f32 %v7669_v29  ;;  %v2289_v54 = vrot.slane %v12022_v36, 3  ;;  %v2405_v34 = vadd.f32 %v12022_v36, %v14764_v14 }
 0x429   :  { %v12134_v62 = vpop.eup %8802  ;;  %v2689_v1 = vadd.f32 1.0, %v8801_v35  ;;  %8822 = vpow2.f32 %v7670_v27  ;;  %v2783_v50 = vmul.f32 %v8791_v43, %v2751_v30  ;;  %v2784_v29 = vmul.f32 %v8793_v39, %v2752_v60  ;;  %v14766_v60 = vld [vmem:[#allocation66_spill] sm:$0xff] }
 0x42a   :  { %v12136_v40 = vpop.eup %8804  ;;  %8824 = vrcp.f32 %v2688_v19  ;;  %v2785_v22 = vmul.f32 %v8795_v8, %v2753_v44  ;;  %v2786_v27 = vmul.f32 %v8797_v47, %v2754_v51  ;;  %v2801_v38 = vmul.f32 %v12091_v4, %v12087_v32 }
 0x42b   :  { %v12140_v52 = vpop.eup %8806  ;;  %8826 = vrcp.f32 %v2689_v1  ;;  %v2802_v55 = vmul.f32 %v12095_v63, %v12089_v42  ;;  %v12162_v35 = vadd.f32 %v12081_v49, %v2782_v23  ;;  %v12165_v43 = vadd.f32 %v12084_v33, %v2783_v50  ;;  %v14765_v33 = vld [vmem:[#allocation64_spill] sm:$0xff] }
 0x42c   :  { %v12145_v21 = vpop.eup %8808  ;;  %8828 = vpow2.f32 %v7671_v37  ;;  %v12168_v39 = vadd.f32 %v12093_v58, %v2784_v29  ;;  %v12170_v10 = vadd.f32 %v2801_v38, %v2785_v22  ;;  %v2293_v23 = vrot.slane %v12022_v36, 4 }
 0x42d   :  { %v12150_v28 = vpop.eup %8810  ;;  %8830 = vpow2.f32 %v7672_v0  ;;  %v12172_v32 = vadd.f32 %v2802_v55, %v2786_v27  ;;  %v2409_v1 = vadd.f32 %v2281_v9, %v14765_v33  ;;  %v2272_v58 = vrot.slane %v12028_v31, 6  ;;  %v14768_v55 = vld [vmem:[#allocation38_spill] sm:$0xff] }
 0x42e   :  { %v12155_v56 = vpop.eup %8812  ;;  %8832 = vpow2.f32 %v7673_v13  ;;  %v2413_v13 = vadd.f32 %v2285_v5, %v14766_v60  ;;  %v2276_v44 = vrot.slane %v12028_v31, 7  ;;  %v2280_v50 = vrot.slane %v12028_v31, 1 }
 0x42f   :  { %v8815_v53 = vpop.eup %8814  ;;  %8834 = vtanh.f32 %v2397_v7  ;;  %v2297_v7 = vrot.slane %v12022_v36, 5  ;;  %v2421_v29 = vadd.f32 %v2293_v23, %v14707_v6  ;;  %v2284_v22 = vrot.slane %v12028_v31, 2  ;;  %v14770_v23 = vld [vmem:[#allocation43_spill] sm:$0xff] }
 0x430   :  { %v8817_v19 = vpop.eup %8816  ;;  %v2483_v37 = vadd.f32 1.0, %v8815_v53  ;;  %8836 = vtanh.f32 %v2401_v46  ;;  %v14767_v46 = vld [vmem:[#allocation68_spill] sm:$0xff]  ;;  %v2288_v27 = vrot.slane %v12028_v31, 3  ;;  %v2292_v38 = vrot.slane %v12028_v31, 4  ;;  %v14773_v6 = vld [vmem:[#allocation47_spill] sm:$0xff] }
 0x431   :  { %v8819_v8 = vpop.eup %8818  ;;  %v2484_v47 = vadd.f32 1.0, %v8817_v19  ;;  %8838 = vtanh.f32 %v2405_v34  ;;  %v2417_v34 = vadd.f32 %v2289_v54, %v14767_v46  ;;  %v2396_v19 = vadd.f32 %v2272_v58, %v14768_v55 }
 0x432   :  { %v8821_v42 = vpop.eup %8820  ;;  %v2485_v4 = vadd.f32 1.0, %v8819_v8  ;;  %8840 = vrcp.f32 %v2483_v37  ;;  %v2296_v54 = vrot.slane %v12028_v31, 5  ;;  %v14769_v8 = vld [vmem:[#allocation42_spill] sm:$0xff]  ;;  %v2412_v58 = vadd.f32 %v2284_v22, %v14709_v26 }
 0x433   :  { %v8823_v49 = vpop.eup %8822  ;;  %v2486_v63 = vadd.f32 1.0, %v8821_v42  ;;  %8842 = vrcp.f32 %v2484_v47  ;;  %v2400_v47 = vadd.f32 %v2276_v44, %v14769_v8  ;;  %v2420_v44 = vadd.f32 %v2292_v38, %v14773_v6 }
 0x434   :  { %v12177_v0 = vpop.eup %8824  ;;  %v2487_v30 = vadd.f32 1.0, %v8823_v49  ;;  %8844 = vrcp.f32 %v2485_v4  ;;  %v2404_v49 = vadd.f32 %v12028_v31, %v14770_v23  ;;  %v7682_v8 = vmul.f32 -1.442695, %v2396_v19  ;;  %v14774_v31 = vld [vmem:[#allocation48_spill] sm:$0xff] }
 0x435   :  { %v12181_v51 = vpop.eup %8826  ;;  %8846 = vrcp.f32 %v2486_v63  ;;  %v14771_v63 = vld [vmem:[#allocation44_spill] sm:$0xff]  ;;  %v2424_v23 = vadd.f32 %v2296_v54, %v14774_v31  ;;  %v7686_v38 = vmul.f32 -1.442695, %v2412_v58  ;;  %v2282_v19 = vrot.slane %v12030_v25, 1 }
 0x436   :  { %v8829_v9 = vpop.eup %8828  ;;  %8848 = vrcp.f32 %v2487_v30  ;;  %v2408_v30 = vadd.f32 %v2280_v50, %v14771_v63  ;;  %v7683_v50 = vmul.f32 -1.442695, %v2400_v47  ;;  %v7684_v22 = vmul.f32 -1.442695, %v2404_v49  ;;  %v14775_v47 = vld [vmem:[#allocation20_spill] sm:$0xff]  ;;  %v14776_v49 = vld [vmem:[#allocation59_spill] sm:$0xff] }
 0x437   :  { %v8831_v5 = vpop.eup %8830  ;;  %v2488_v53 = vadd.f32 1.0, %v8829_v9  ;;  %8850 = vtanh.f32 %v2409_v1  ;;  %v2425_v9 = vadd.f32 %v2297_v7, %v11330_v20  ;;  %v2286_v54 = vrot.slane %v12030_v25, 2 }
 0x438   :  { %v8833_v36 = vpop.eup %8832  ;;  %v2489_v37 = vadd.f32 1.0, %v8831_v5  ;;  %8852 = vtanh.f32 %v2413_v13  ;;  %v14772_v5 = vld [vmem:[#allocation46_spill] sm:$0xff] }
 0x439   :  { %v8835_v42 = vpop.eup %8834  ;;  %v2490_v4 = vadd.f32 1.0, %v8833_v36  ;;  %8854 = vrcp.f32 %v2488_v53  ;;  %v2416_v13 = vadd.f32 %v2288_v27, %v14772_v5  ;;  %v2274_v53 = vrot.slane %v12030_v25, 6 }
 0x43a   :  { %v8837_v1 = vpop.eup %8836  ;;  %8856 = vrcp.f32 %v2489_v37  ;;  %v2278_v37 = vrot.slane %v12030_v25, 7  ;;  %v7685_v27 = vmul.f32 -1.442695, %v2408_v30 }
 0x43b   :  { %v8839_v55 = vpop.eup %8838  ;;  %8858 = vrcp.f32 %v2490_v4  ;;  %v2398_v31 = vadd.f32 %v2274_v53, %v14775_v47 }
 0x43c   :  { %v8841_v36 = vpop.eup %8840  ;;  %8860 = vtanh.f32 %v2417_v34  ;;  %v2402_v30 = vadd.f32 %v2278_v37, %v14776_v49 }
 0x43d   :  { %v8843_v63 = vpop.eup %8842  ;;  %8862 = vtanh.f32 %v2421_v29  ;;  %v12203_v7 = vmul.f32 %v8841_v36, %v8835_v42  ;;  %v7687_v42 = vmul.f32 -1.442695, %v2416_v13  ;;  %v2414_v13 = vadd.f32 %v2286_v54, %v14715_v17 }
 0x43e   :  { %v8845_v5 = vpop.eup %8844  ;;  %8864 = vtanh.f32 %v2425_v9  ;;  %v12205_v4 = vmul.f32 %v8843_v63, %v8837_v1  ;;  %v7688_v63 = vmul.f32 -1.442695, %v2420_v44  ;;  %v14777_v1 = vld [vmem:[#allocation62_spill] sm:$0xff]  ;;  %v7699_v44 = vmul.f32 -1.442695, %v2402_v30 }
 0x43f   :  { %v8847_v6 = vpop.eup %8846  ;;  %v12208_v34 = vmul.f32 %v8845_v5, %v8839_v55  ;;  %8866 = vpow2.f32 %v7682_v8  ;;  %v2406_v9 = vadd.f32 %v12030_v25, %v14777_v1  ;;  %v7689_v55 = vmul.f32 -1.442695, %v2424_v23 }
 0x440   :  { %v8849_v29 = vpop.eup %8848  ;;  %8868 = vpow2.f32 %v7683_v50  ;;  %v2410_v8 = vadd.f32 %v2282_v19, %v14714_v59  ;;  %v7698_v50 = vmul.f32 -1.442695, %v2398_v31  ;;  %v7702_v19 = vmul.f32 -1.442695, %v2414_v13 }
 0x441   :  { %v8851_v36 = vpop.eup %8850  ;;  %8870 = vpow2.f32 %v7684_v22  ;;  %v7700_v1 = vmul.f32 -1.442695, %v2406_v9  ;;  %v2298_v9 = vrot.slane %v12030_v25, 5 }
 0x442   :  { %v8853_v58 = vpop.eup %8852  ;;  %v12215_v26 = vmul.f32 %v8851_v36, %v8847_v6  ;;  %8872 = vpow2.f32 %v7685_v27  ;;  %v7701_v6 = vmul.f32 -1.442695, %v2410_v8 }
 0x443   :  { %v8855_v5 = vpop.eup %8854  ;;  %v12218_v53 = vmul.f32 %v8853_v58, %v8849_v29  ;;  %8874 = vpow2.f32 %v7686_v38  ;;  %v2290_v38 = vrot.slane %v12030_v25, 3 }
 0x444   :  { %v8857_v37 = vpop.eup %8856  ;;  %8876 = vpow2.f32 %v7687_v42  ;;  %v2294_v42 = vrot.slane %v12030_v25, 4 }
 0x445   :  { %v8859_v22 = vpop.eup %8858  ;;  %8878 = vpow2.f32 %v7688_v63 }
 0x446   :  { %v8861_v49 = vpop.eup %8860  ;;  %8880 = vpow2.f32 %v7689_v55 }
 0x447   :  { %v8863_v27 = vpop.eup %8862  ;;  %v12221_v23 = vmul.f32 %v8861_v49, %v8855_v5  ;;  %8882 = vpow2.f32 %v7698_v50  ;;  %v2418_v5 = vadd.f32 %v2290_v38, %v11306_v2 }
 0x448   :  { %v8865_v29 = vpop.eup %8864  ;;  %8884 = vpow2.f32 %v7699_v44  ;;  %v12224_v54 = vmul.f32 %v8863_v27, %v8857_v37 }
 0x449   :  { %v8867_v31 = vpop.eup %8866  ;;  %8886 = vpow2.f32 %v7700_v1  ;;  %v12227_v30 = vmul.f32 %v8865_v29, %v8859_v22  ;;  %v2422_v1 = vadd.f32 %v2294_v42, %v11321_v11  ;;  %v14778_v22 = vld [vmem:[#allocation39_spill] sm:$0xff] }
 0x44a   :  { %v8869_v36 = vpop.eup %8868  ;;  %v2579_v63 = vadd.f32 1.0, %v8867_v31  ;;  %8888 = vpow2.f32 %v7701_v6  ;;  %v2426_v27 = vadd.f32 %v2298_v9, %v14778_v22  ;;  %v7703_v31 = vmul.f32 -1.442695, %v2418_v5  ;;  %v14779_v5 = vld [vmem:[#allocation21_spill] sm:$0xff] }
 0x44b   :  { %v8871_v49 = vpop.eup %8870  ;;  %v2580_v58 = vadd.f32 1.0, %v8869_v36  ;;  %8890 = vpow2.f32 %v7702_v19  ;;  %v7704_v38 = vmul.f32 -1.442695, %v2422_v1 }
 0x44c   :  { %v8873_v55 = vpop.eup %8872  ;;  %v2581_v8 = vadd.f32 1.0, %v8871_v49  ;;  %8892 = vrcp.f32 %v2579_v63 }
 0x44d   :  { %v8875_v13 = vpop.eup %8874  ;;  %v2582_v50 = vadd.f32 1.0, %v8873_v55  ;;  %8894 = vrcp.f32 %v2580_v58  ;;  %v7705_v58 = vmul.f32 -1.442695, %v2426_v27 }
 0x44e   :  { %v8877_v37 = vpop.eup %8876  ;;  %v2583_v44 = vadd.f32 1.0, %v8875_v13  ;;  %8896 = vrcp.f32 %v2581_v8 }
 0x44f   :  { %v8879_v25 = vpop.eup %8878  ;;  %v2584_v6 = vadd.f32 1.0, %v8877_v37  ;;  %8898 = vrcp.f32 %v2582_v50  ;;  %v2755_v50 = vrot.slane %v11846_v48, 7 }
 0x450   :  { %v8881_v29 = vpop.eup %8880  ;;  %v2585_v19 = vadd.f32 1.0, %v8879_v25  ;;  %8900 = vrcp.f32 %v2583_v44  ;;  %v2756_v25 = vrot.slane %v14779_v5, 7  ;;  %v14783_v5 = vld [vmem:[#allocation73_spill] sm:$0xff] }
 0x451   :  { %v8883_v36 = vpop.eup %8882  ;;  %v2586_v63 = vadd.f32 1.0, %v8881_v29  ;;  %8902 = vrcp.f32 %v2584_v6  ;;  %v14780_v29 = vld [vmem:[#allocation61_spill] sm:$0xff] }
 0x452   :  { %v8885_v49 = vpop.eup %8884  ;;  %8904 = vrcp.f32 %v2585_v19  ;;  %v2691_v55 = vadd.f32 1.0, %v8883_v36  ;;  %v2757_v19 = vrot.slane %v14780_v29, 7 }
 0x453   :  { %v8887_v42 = vpop.eup %8886  ;;  %8906 = vrcp.f32 %v2586_v63  ;;  %v2692_v9 = vadd.f32 1.0, %v8885_v49  ;;  %v14781_v63 = vld [vmem:[#allocation63_spill] sm:$0xff]  ;;  %v2690_v49 = vadd.f32 1.0, %v12134_v62  ;;  %v14785_v62 = vld [vmem:[#allocation32_spill] sm:$0xff] }
 0x454   :  { %v8889_v8 = vpop.eup %8888  ;;  %8908 = vpow2.f32 %v7703_v31  ;;  %v2693_v37 = vadd.f32 1.0, %v8887_v42  ;;  %v2758_v31 = vrot.slane %v14781_v63, 7 }
 0x455   :  { %v8891_v13 = vpop.eup %8890  ;;  %8910 = vpow2.f32 %v7704_v38  ;;  %v2694_v6 = vadd.f32 1.0, %v8889_v8  ;;  %v14782_v38 = vld [vmem:[#allocation71_spill] sm:$0xff] }
 0x456   :  { %v8893_v44 = vpop.eup %8892  ;;  %8912 = vpow2.f32 %v7705_v58  ;;  %v2695_v22 = vadd.f32 1.0, %v8891_v13  ;;  %v2759_v42 = vrot.slane %v14782_v38, 7 }
 0x457   :  { %v8895_v1 = vpop.eup %8894  ;;  %v2787_v27 = vmul.f32 %v8893_v44, %v2755_v50  ;;  %8914 = vrcp.f32 %v2691_v55  ;;  %v2760_v50 = vrot.slane %v14783_v5, 7 }
 0x458   :  { %v8897_v36 = vpop.eup %8896  ;;  %v2788_v11 = vmul.f32 %v8895_v1, %v2756_v25  ;;  %8916 = vrcp.f32 %v2692_v9  ;;  %v2761_v25 = vrot.slane %v14785_v62, 7 }
 0x459   :  { %v8899_v48 = vpop.eup %8898  ;;  %v2789_v2 = vmul.f32 %v8897_v36, %v2757_v19  ;;  %v12240_v58 = vadd.f32 %v12203_v7, %v2787_v27  ;;  %8918 = vrcp.f32 %v2693_v37  ;;  %v14787_v7 = vld [vmem:[#allocation34_spill] sm:$0xff] }
 0x45a   :  { %v8901_v8 = vpop.eup %8900  ;;  %v2790_v13 = vmul.f32 %v8899_v48, %v2758_v31  ;;  %v12244_v55 = vadd.f32 %v12205_v4, %v2788_v11  ;;  %8920 = vrcp.f32 %v2694_v6  ;;  %v2762_v19 = vrot.slane %v14787_v7, 7 }
 0x45b   :  { %v8903_v44 = vpop.eup %8902  ;;  %v12248_v9 = vadd.f32 %v12208_v34, %v2789_v2  ;;  %8922 = vrcp.f32 %v2695_v22  ;;  %v2791_v1 = vmul.f32 %v8901_v8, %v2759_v42 }
 0x45c   :  { %14784 = vst [vmem:[#allocation35_spill] sm:$0xff] %v12244_v55  ;;  %v8905_v29 = vpop.eup %8904  ;;  %8924 = vrcp.f32 %v2690_v49  ;;  %v2792_v37 = vmul.f32 %v8903_v44, %v2760_v50  ;;  %v12252_v27 = vadd.f32 %v12215_v26, %v2790_v13 }
 0x45d   :  { %14786 = vst [vmem:[#allocation36_spill] sm:$0xff] %v12248_v9  ;;  %v8907_v36 = vpop.eup %8906  ;;  %v2793_v11 = vmul.f32 %v8905_v29, %v2761_v25  ;;  %v12255_v4 = vadd.f32 %v12218_v53, %v2791_v1  ;;  %8926 = vtanh.f32 %v12121_v3 }
 0x45e   :  { %14788 = vst [vmem:[#allocation37_spill] sm:$0xff] %v12252_v27  ;;  %v8909_v6 = vpop.eup %8908  ;;  %v2794_v2 = vmul.f32 %v8907_v36, %v2762_v19  ;;  %v12259_v34 = vadd.f32 %v12221_v23, %v2792_v37  ;;  %8928 = vtanh.f32 %v12124_v16 }
 0x45f   :  { %14789 = vst [vmem:[#allocation40_spill] sm:$0xff] %v12255_v4  ;;  %v8911_v22 = vpop.eup %8910  ;;  %v2696_v63 = vadd.f32 1.0, %v8909_v6  ;;  %v12263_v31 = vadd.f32 %v12224_v54, %v2793_v11  ;;  %8930 = vtanh.f32 %v12127_v41 }
 0x460   :  { %14790 = vst [vmem:[#allocation33_spill] sm:$0xff] %v12259_v34  ;;  %v8913_v26 = vpop.eup %8912  ;;  %v2697_v49 = vadd.f32 1.0, %v8911_v22  ;;  %v12267_v53 = vadd.f32 %v12227_v30, %v2794_v2  ;;  %8932 = vtanh.f32 %v12162_v35 }
 0x461   :  { %14791 = vst [vmem:[#allocation41_spill] sm:$0xff] %v12263_v31  ;;  %v8915_v48 = vpop.eup %8914  ;;  %v2698_v38 = vadd.f32 1.0, %v8913_v26  ;;  %8934 = vrcp.f32 %v2696_v63 }
 0x462   :  { %14792 = vst [vmem:[#allocation58_spill] sm:$0xff] %v12267_v53  ;;  %v8917_v23 = vpop.eup %8916  ;;  %8936 = vrcp.f32 %v2697_v49 }
 0x463   :  { %v8919_v42 = vpop.eup %8918  ;;  %8938 = vrcp.f32 %v2698_v38 }
 0x464   :  { %v12270_v8 = vpop.eup %8920  ;;  %8940 = vtanh.f32 %v12165_v43 }
 0x465   :  { %v12273_v54 = vpop.eup %8922  ;;  %8942 = vtanh.f32 %v12168_v39 }
 0x466   :  { %v8925_v5 = vpop.eup %8924  ;;  %8944 = vtanh.f32 %v12170_v10 }
 0x467   :  { %v8927_v30 = vpop.eup %8926  ;;  %8946 = vtanh.f32 %v12172_v32 }
 0x468   :  { %v8929_v50 = vpop.eup %8928  ;;  %8948 = vtanh.f32 %v12240_v58  ;;  %v2843_v13 = vmul.f32 %v8927_v30, %v12136_v40 }
 0x469   :  { %v8931_v44 = vpop.eup %8930  ;;  %8950 = vtanh.f32 %v12244_v55  ;;  %v2844_v62 = vmul.f32 %v8929_v50, %v12140_v52 }
 0x46a   :  { %v8933_v25 = vpop.eup %8932  ;;  %8952 = vtanh.f32 %v12248_v9  ;;  %v2845_v1 = vmul.f32 %v8931_v44, %v12145_v21  ;;  %v2859_v29 = vpack.c.bf16 %v2843_v13, %v2843_v13 }
 0x46b   :  { %v8935_v7 = vpop.eup %8934  ;;  %8954 = vtanh.f32 %v12252_v27  ;;  %v2846_v19 = vmul.f32 %v8933_v25, %v12150_v28  ;;  %v2860_v37 = vpack.c.bf16 %v2844_v62, %v2844_v62 }
 0x46c   :  { %v8937_v36 = vpop.eup %8936  ;;  %8956 = vtanh.f32 %v12255_v4  ;;  %v2861_v40 = vpack.c.bf16 %v2845_v1, %v2845_v1  ;;  %v2891_v11 = vunpack.c.l.b16 %v2859_v29 }
 0x46d   :  { %v8939_v6 = vpop.eup %8938  ;;  %8958 = vtanh.f32 %v12259_v34  ;;  %v2862_v52 = vpack.c.bf16 %v2846_v19, %v2846_v19  ;;  %v2892_v2 = vunpack.c.l.b16 %v2860_v37 }
 0x46e   :  { %v8941_v22 = vpop.eup %8940  ;;  %8960 = vtanh.f32 %v12263_v31  ;;  %v2907_v21 = vrot.slane %v2891_v11, 2  ;;  %v2893_v50 = vunpack.c.l.b16 %v2861_v40 }
 0x46f   :  { %v8943_v63 = vpop.eup %8942  ;;  %8962 = vtanh.f32 %v12267_v53  ;;  %v2847_v28 = vmul.f32 %v8941_v22, %v12155_v56  ;;  %v2894_v26 = vunpack.c.l.b16 %v2862_v52  ;;  %v2908_v49 = vrot.slane %v2892_v2, 1 }
 0x470   :  { %v8945_v38 = vpop.eup %8944  ;;  %v2848_v30 = vmul.f32 %v8943_v63, %v12177_v0 }
 0x471   :  { %v8947_v13 = vpop.eup %8946  ;;  %v2849_v44 = vmul.f32 %v8945_v38, %v12181_v51  ;;  %v2863_v62 = vpack.c.bf16 %v2847_v28, %v2847_v28  ;;  %v2909_v25 = vsel %vm1325_vm1, %v2908_v49, %v2907_v21  ;;  %v2911_v1 = vrot.slane %v2894_v26, 7 }
 0x472   :  { %v8949_v29 = vpop.eup %8948  ;;  %v2850_v19 = vmul.f32 %v8947_v13, %v8925_v5  ;;  %v2864_v37 = vpack.c.bf16 %v2848_v30, %v2848_v30  ;;  %v2910_v11 = vsel %vm1328_vm2, %v2893_v50, %v2909_v25 }
 0x473   :  { %v8951_v53 = vpop.eup %8950  ;;  %v2851_v56 = vmul.f32 %v8949_v29, %v8915_v48  ;;  %v2865_v52 = vpack.c.bf16 %v2849_v44, %v2849_v44  ;;  %v2895_v2 = vunpack.c.l.b16 %v2863_v62  ;;  %v2912_v22 = vsel %vm1331_vm3, %v2911_v1, %v2910_v11 }
 0x474   :  { %v8953_v0 = vpop.eup %8952  ;;  %v2852_v40 = vmul.f32 %v8951_v53, %v8917_v23  ;;  %v2866_v63 = vpack.c.bf16 %v2850_v19, %v2850_v19  ;;  %v2896_v31 = vunpack.c.l.b16 %v2864_v37 }
 0x475   :  { %v8955_v51 = vpop.eup %8954  ;;  %v2853_v28 = vmul.f32 %v8953_v0, %v8919_v42  ;;  %v2867_v38 = vpack.c.bf16 %v2851_v56, %v2851_v56  ;;  %v2897_v21 = vunpack.c.l.b16 %v2865_v52  ;;  %v2913_v26 = vrot.slane %v2895_v2, 6 }
 0x476   :  { %v8957_v49 = vpop.eup %8956  ;;  %v2854_v5 = vmul.f32 %v8955_v51, %v12270_v8  ;;  %v2868_v30 = vpack.c.bf16 %v2852_v40, %v2852_v40  ;;  %v2898_v50 = vunpack.c.l.b16 %v2866_v63  ;;  %v2915_v13 = vrot.slane %v2896_v31, 5 }
 0x477   :  { %v8959_v48 = vpop.eup %8958  ;;  %v2855_v44 = vmul.f32 %v8957_v49, %v12273_v54  ;;  %v2899_v62 = vunpack.c.l.b16 %v2867_v38  ;;  %v2914_v25 = vsel %vm1334_vm4, %v2913_v26, %v2912_v22  ;;  %v2869_v11 = vpack.c.bf16 %v2853_v28, %v2853_v28 }
 0x478   :  { %v8961_v53 = vpop.eup %8960  ;;  %v2856_v23 = vmul.f32 %v8959_v48, %v8935_v7  ;;  %v2870_v1 = vpack.c.bf16 %v2854_v5, %v2854_v5  ;;  %v2900_v29 = vunpack.c.l.b16 %v2868_v30  ;;  %v2916_v42 = vsel %vm1337_vm5, %v2915_v13, %v2914_v25 }
 0x479   :  { %v8963_v19 = vpop.eup %8962  ;;  %v2857_v37 = vmul.f32 %v8961_v53, %v8937_v36  ;;  %v2871_v56 = vpack.c.bf16 %v2855_v44, %v2855_v44  ;;  %v2917_v8 = vrot.slane %v2897_v21, 4  ;;  %v2919_v0 = vrot.slane %v2898_v50, 3 }
 0x47a   :  { %v2858_v52 = vmul.f32 %v8963_v19, %v8939_v6  ;;  %v2872_v2 = vpack.c.bf16 %v2856_v23, %v2856_v23  ;;  %v2902_v31 = vunpack.c.l.b16 %v2870_v1  ;;  %v2921_v22 = vrot.slane %v2899_v62, 2  ;;  %v10342_v19 = vld [vmem:[%s14351_s4 + $0x24] ss:$16 sps:$4 sm:$0xff]  }
 0x47b   :  { %v2873_v40 = vpack.c.bf16 %v2857_v37, %v2857_v37  ;;  %v2903_v54 = vunpack.c.l.b16 %v2871_v56  ;;  %v2918_v63 = vsel %vm1340_vm6, %v2917_v8, %v2916_v42  ;;  %v2922_v26 = vrot.slane %v2900_v29, 1  ;;  %v10340_v29 = vld [vmem:[%s14351_s4] ss:$16 sps:$4 sm:$0xff]   ;;  %v10341_v42 = vld [vmem:[%s14351_s4 + $0x8] ss:$16 sps:$4 sm:$0xff]  }
 0x47c   :  { %v2874_v51 = vpack.c.bf16 %v2858_v52, %v2858_v52  ;;  %v2904_v7 = vunpack.c.l.b16 %v2872_v2  ;;  %v2920_v38 = vsel %vm1343_vm7, %v2919_v0, %v2918_v63  ;;  %v2901_v49 = vunpack.c.l.b16 %v2869_v11  ;;  %v10343_v37 = vld [vmem:[%s14351_s4 + $0x2c] ss:$16 sps:$4 sm:$0xff]   ;;  %v10344_v56 = vld [vmem:[%s14351_s4 + $0x20] ss:$16 sps:$4 sm:$0xff]   ;;  %v10345_v8 = vld [vmem:[%s14351_s4 + $0x28] ss:$16 sps:$4 sm:$0xff]  }
 0x47d   :  { %v2905_v5 = vunpack.c.l.b16 %v2873_v40  ;;  %v2923_v28 = vsel %vm1325_vm1, %v2922_v26, %v2921_v22  ;;  %v2925_v21 = vrot.slane %v2902_v31, 7  ;;  %v2927_v30 = vrot.slane %v2903_v54, 6  ;;  %v10346_v52 = vld [vmem:[%s14351_s4 + $0x44] ss:$16 sps:$4 sm:$0xff]   ;;  %v10347_v2 = vld [vmem:[%s14351_s4 + $0x4c] ss:$16 sps:$4 sm:$0xff]  }
 0x47e   :  { %v2906_v36 = vunpack.c.l.b16 %v2874_v51  ;;  %v2924_v6 = vsel %vm1328_vm2, %v2901_v49, %v2923_v28  ;;  %v2929_v13 = vrot.slane %v2904_v7, 5  ;;  %v14793_v11 = vmov 0   ;;  %v10348_v31 = vld [vmem:[%s14351_s4 + $0x40] ss:$16 sps:$4 sm:$0xff]   ;;  %v10349_v0 = vld [vmem:[%s14351_s4 + $0x48] ss:$16 sps:$4 sm:$0xff]  }
 0x47f   :  { %v2926_v50 = vsel %vm1331_vm3, %v2925_v21, %v2924_v6  ;;  %v2931_v44 = vrot.slane %v2905_v5, 4  ;;  %v10350_v40 = vld [vmem:[%s14351_s4 + $0x64] ss:$16 sps:$4 sm:$0xff]   ;;  %v10351_v54 = vld [vmem:[%s14351_s4 + $0x6c] ss:$16 sps:$4 sm:$0xff]  }
 0x480   :  { %v2928_v48 = vsel %vm1334_vm4, %v2927_v30, %v2926_v50  ;;  %v2933_v25 = vrot.slane %v2906_v36, 3  ;;  %v10352_v63 = vld [vmem:[%s14351_s4 + $0x60] ss:$16 sps:$4 sm:$0xff]   ;;  %v10353_v22 = vld [vmem:[%s14351_s4 + $0x68] ss:$16 sps:$4 sm:$0xff]  }
 0x481   :  { %v2930_v62 = vsel %vm1337_vm5, %v2929_v13, %v2928_v48  ;;  %v10354_v51 = vld [vmem:[%s14351_s4 + $0x84] ss:$16 sps:$4 sm:$0xff]   ;;  %v10355_v7 = vld [vmem:[%s14351_s4 + $0x8c] ss:$16 sps:$4 sm:$0xff]   ;;  %v10357_v26 = vld [vmem:[%s14351_s4 + $0x88] ss:$16 sps:$4 sm:$0xff]  }
 0x482   :  { %v2932_v53 = vsel %vm1340_vm6, %v2931_v44, %v2930_v62  ;;  %v10358_v49 = vld [vmem:[%s14351_s4 + $0xa4] ss:$16 sps:$4 sm:$0xff]   ;;  %v10359_v5 = vld [vmem:[%s14351_s4 + $0xac] ss:$16 sps:$4 sm:$0xff]   ;;  %v10360_v36 = vld [vmem:[%s14351_s4 + $0xa0] ss:$16 sps:$4 sm:$0xff]  }
 0x483   :  { %v2934_v23 = vsel %vm1343_vm7, %v2933_v25, %v2932_v53  ;;  %v10361_v28 = vld [vmem:[%s14351_s4 + $0xa8] ss:$16 sps:$4 sm:$0xff]   ;;  %v10362_v21 = vld [vmem:[%s14351_s4 + $0xc4] ss:$16 sps:$4 sm:$0xff]   ;;  %v10363_v6 = vld [vmem:[%s14351_s4 + $0xcc] ss:$16 sps:$4 sm:$0xff]  }
 0x484   :  { %v2935_v1 = vpack.c.b16 %v2934_v23, %v2920_v38  ;;  %v10356_v38 = vld [vmem:[%s14351_s4 + $0x80] ss:$16 sps:$4 sm:$0xff]   ;;  %v10365_v50 = vld [vmem:[%s14351_s4 + $0xc8] ss:$16 sps:$4 sm:$0xff]   ;;  %v10366_v13 = vld [vmem:[%s14351_s4 + $0xe4] ss:$16 sps:$4 sm:$0xff]  }
 0x485   :  { %v10364_v30 = vld [vmem:[%s14351_s4 + $0xc0] ss:$16 sps:$4 sm:$0xff]   ;;  %v10367_v48 = vld [vmem:[%s14351_s4 + $0xec] ss:$16 sps:$4 sm:$0xff]   ;;  %v10369_v62 = vld [vmem:[%s14351_s4 + $0xe8] ss:$16 sps:$4 sm:$0xff]  }
 0x486   :  { %2970 = vmatmul.mubr.bf16.vlgmr.msra.gmra.mrb[36].mxu0 %v2935_v1  ;;  %3013 = vmatmul.mubr.bf16.vlgmr.msra.gmra.mrb[52].mxu1 %v2935_v1  ;;  %v10368_v44 = vld [vmem:[%s14351_s4 + $0xe0] ss:$16 sps:$4 sm:$0xff]   ;;  %v10370_v25 = vld [vmem:[%s14351_s4 + $0x4] ss:$16 sps:$4 sm:$0xff]   ;;  %v10371_v53 = vld [vmem:[%s14351_s4 + $0xc] ss:$16 sps:$4 sm:$0xff]  }
 0x487   :  { %3726 = vmatpush1.bf16.msra.mxu0 %v10340_v29  ;;  %3769 = vmatpush1.bf16.msra.mxu1 %v10341_v42 }
 0x488   :  { %3727 = vmatprep.subr.bf16.mxu0 %v10342_v19  ;;  %3770 = vmatprep.subr.bf16.mxu1 %v10343_v37 }
 0x489   :  { %3757 = vmatprep.mubr.bf16.mxu0 %v14793_v11  ;;  %3800 = vmatprep.mubr.bf16.mxu1 %v14793_v11 }
 0x48b   :  { %3728 = vmatpush1.bf16.msra.mxu0 %v10344_v56  ;;  %3771 = vmatpush1.bf16.msra.mxu1 %v10345_v8 }
 0x48c   :  { %3729 = vmatprep.subr.bf16.mxu0 %v10346_v52  ;;  %3772 = vmatprep.subr.bf16.mxu1 %v10347_v2 }
 0x48f   :  { %3730 = vmatpush1.bf16.msra.mxu0 %v10348_v31  ;;  %3773 = vmatpush1.bf16.msra.mxu1 %v10349_v0  ;;  %v14794_v0 = vld [vmem:[#allocation14_spill] sm:$0xff] }
 0x490   :  { %3731 = vmatprep.subr.bf16.mxu0 %v10350_v40  ;;  %3774 = vmatprep.subr.bf16.mxu1 %v10351_v54 }
 0x493   :  { %3732 = vmatpush1.bf16.msra.mxu0 %v10352_v63  ;;  %3775 = vmatpush1.bf16.msra.mxu1 %v10353_v22  ;;  %v14795_v22 = vld [vmem:[#allocation10_spill] sm:$0xff] }
 0x494   :  { %3733 = vmatprep.subr.bf16.mxu0 %v10354_v51  ;;  %3776 = vmatprep.subr.bf16.mxu1 %v10355_v7  ;;  %v14796_v7 = vld [vmem:[#allocation12_spill] sm:$0xff] }
 0x497   :  { %3734 = vmatpush1.bf16.msra.mxu0 %v10356_v38  ;;  %3777 = vmatpush1.bf16.msra.mxu1 %v10357_v26  ;;  %v14797_v26 = vld [vmem:[#allocation13_spill] sm:$0xff] }
 0x498   :  { %3735 = vmatprep.subr.bf16.mxu0 %v10358_v49  ;;  %3778 = vmatprep.subr.bf16.mxu1 %v10359_v5  ;;  %v14798_v5 = vld [vmem:[#allocation15_spill] sm:$0xff] }
 0x49b   :  { %3736 = vmatpush1.bf16.msra.mxu0 %v10360_v36  ;;  %3779 = vmatpush1.bf16.msra.mxu1 %v10361_v28 }
 0x49c   :  { %3737 = vmatprep.subr.bf16.mxu0 %v10362_v21  ;;  %3780 = vmatprep.subr.bf16.mxu1 %v10363_v6  ;;  %v14799_v6 = vld [vmem:[#allocation16_spill] sm:$0xff] }
 0x49f   :  { %3738 = vmatpush1.bf16.msra.mxu0 %v10364_v30  ;;  %3781 = vmatpush1.bf16.msra.mxu1 %v10365_v50  ;;  %v14800_v50 = vld [vmem:[#allocation17_spill] sm:$0xff] }
 0x4a0   :  { %3739 = vmatprep.subr.bf16.mxu0 %v10366_v13  ;;  %3782 = vmatprep.subr.bf16.mxu1 %v10367_v48 }
 0x4a3   :  { %3740 = vmatpush1.bf16.msra.mxu0 %v10368_v44  ;;  %3783 = vmatpush1.bf16.msra.mxu1 %v10369_v62  ;;  %v14801_v44 = vld [vmem:[#allocation19_spill] sm:$0xff] }
 0x4a4   :  { %4513 = vmatprep.subr.bf16.mxu0 %v10370_v25  ;;  %4556 = vmatprep.subr.bf16.mxu1 %v10371_v53 }
 0x559   :  { %v2971_v23 = vpop.f32.mrb[36].mxu0  ;;  %v12407_v1 = vpop.f32.mrb[52].mxu1 }
 0x55a   :  { %v3031_v29 = vrot.slane %v2971_v23, 5  ;;  %v3035_v42 = vrot.slane %v2971_v23, 6  ;;  %v3039_v19 = vrot.slane %v2971_v23, 7  ;;  %v3043_v37 = vrot.slane %v2971_v23, 1  ;;  %v12409_v56 = vpop.f32.mrb[37].mxu0  ;;  %v12411_v8 = vpop.f32.mrb[53].mxu1 }
 0x55b   :  { %v3047_v52 = vrot.slane %v2971_v23, 2  ;;  %v3051_v2 = vrot.slane %v2971_v23, 3  ;;  %v3055_v31 = vrot.slane %v2971_v23, 4  ;;  %v3163_v40 = vadd.f32 %v2971_v23, %v14794_v0  ;;  %v12414_v54 = vpop.f32.mrb[38].mxu0  ;;  %v12416_v63 = vpop.f32.mrb[54].mxu1 }
 0x55c   :  { %v3151_v51 = vadd.f32 %v3031_v29, %v14795_v22  ;;  %v3155_v38 = vadd.f32 %v3035_v42, %v14796_v7  ;;  %v3159_v49 = vadd.f32 %v3039_v19, %v14797_v26  ;;  %v3167_v36 = vadd.f32 %v3043_v37, %v14798_v5  ;;  %v12422_v28 = vpop.f32.mrb[39].mxu0  ;;  %v12424_v21 = vpop.f32.mrb[55].mxu1 }
 0x55d   :  { %v3171_v30 = vadd.f32 %v3047_v52, %v14799_v6  ;;  %v3175_v13 = vadd.f32 %v3051_v2, %v14800_v50  ;;  %v7709_v48 = vmul.f32 -1.442695, %v3163_v40  ;;  %v3179_v62 = vadd.f32 %v3055_v31, %v14801_v44  ;;  %v14802_v40 = vld [vmem:[#allocation49_spill] sm:$0xff]  ;;  %v14810_v50 = vld [vmem:[#allocation11_spill] sm:$0xff] }
 0x55e   :  { %v7706_v25 = vmul.f32 -1.442695, %v3151_v51  ;;  %v7707_v53 = vmul.f32 -1.442695, %v3155_v38  ;;  %v7708_v23 = vmul.f32 -1.442695, %v3159_v49 }
 0x55f   :  { %8964 = vpow2.f32 %v7709_v48  ;;  %v7710_v29 = vmul.f32 -1.442695, %v3167_v36  ;;  %v7711_v42 = vmul.f32 -1.442695, %v3171_v30  ;;  %v3033_v19 = vrot.slane %v12407_v1, 5  ;;  %v14803_v38 = vld [vmem:[#allocation51_spill] sm:$0xff] }
 0x560   :  { %8966 = vpow2.f32 %v7706_v25  ;;  %v3037_v37 = vrot.slane %v12407_v1, 6  ;;  %v7712_v0 = vmul.f32 -1.442695, %v3175_v13  ;;  %v3041_v52 = vrot.slane %v12407_v1, 7  ;;  %v14804_v36 = vld [vmem:[#allocation53_spill] sm:$0xff]  ;;  %v14805_v48 = vld [vmem:[#allocation55_spill] sm:$0xff] }
 0x561   :  { %8968 = vpow2.f32 %v7707_v53  ;;  %v7713_v2 = vmul.f32 -1.442695, %v3179_v62  ;;  %v3045_v31 = vrot.slane %v12407_v1, 1  ;;  %v3153_v51 = vadd.f32 %v3033_v19, %v14802_v40  ;;  %v14806_v13 = vld [vmem:[#allocation57_spill] sm:$0xff] }
 0x562   :  { %8970 = vpow2.f32 %v7708_v23  ;;  %v3157_v49 = vadd.f32 %v3037_v37, %v14803_v38  ;;  %v3161_v30 = vadd.f32 %v3041_v52, %v14804_v36  ;;  %v3165_v25 = vadd.f32 %v12407_v1, %v14805_v48 }
 0x563   :  { %8972 = vpow2.f32 %v7710_v29  ;;  %v3169_v53 = vadd.f32 %v3045_v31, %v14806_v13  ;;  %v3049_v23 = vrot.slane %v12407_v1, 2  ;;  %v3057_v52 = vrot.slane %v12407_v1, 4 }
 0x564   :  { %8974 = vpow2.f32 %v7711_v42  ;;  %v3053_v42 = vrot.slane %v12407_v1, 3  ;;  %v3040_v36 = vrot.slane %v12409_v56, 7 }
 0x565   :  { %8976 = vpow2.f32 %v7712_v0 }
 0x566   :  { %8978 = vpow2.f32 %v7713_v2  ;;  %v3032_v2 = vrot.slane %v12409_v56, 5 }
 0x567   :  { %8980 = vtanh.f32 %v3153_v51  ;;  %v3036_v51 = vrot.slane %v12409_v56, 6 }
 0x568   :  { %8982 = vtanh.f32 %v3157_v49  ;;  %v3152_v6 = vadd.f32 %v3032_v2, %v14810_v50 }
 0x569   :  { %v8965_v62 = vpop.eup %8964  ;;  %8984 = vtanh.f32 %v3161_v30  ;;  %v14807_v30 = vld [vmem:[#allocation3_spill] sm:$0xff] }
 0x56a   :  { %v8967_v29 = vpop.eup %8966  ;;  %v3266_v19 = vadd.f32 1.0, %v8965_v62  ;;  %8986 = vtanh.f32 %v3165_v25  ;;  %v3173_v62 = vadd.f32 %v3049_v23, %v14807_v30  ;;  %v3048_v23 = vrot.slane %v12409_v56, 2  ;;  %v14811_v30 = vld [vmem:[#allocation22_spill] sm:$0xff] }
 0x56b   :  { %v8969_v0 = vpop.eup %8968  ;;  %v3263_v37 = vadd.f32 1.0, %v8967_v29  ;;  %8988 = vtanh.f32 %v3169_v53  ;;  %v14808_v29 = vld [vmem:[#allocation6_spill] sm:$0xff]  ;;  %v3044_v53 = vrot.slane %v12409_v56, 1  ;;  %v3156_v26 = vadd.f32 %v3036_v51, %v14811_v30 }
 0x56c   :  { %v8971_v48 = vpop.eup %8970  ;;  %v3264_v31 = vadd.f32 1.0, %v8969_v0  ;;  %8990 = vrcp.f32 %v3266_v19  ;;  %v3177_v1 = vadd.f32 %v3053_v42, %v14808_v29  ;;  %v14809_v19 = vld [vmem:[#allocation8_spill] sm:$0xff]  ;;  %v3052_v42 = vrot.slane %v12409_v56, 3  ;;  %v14812_v29 = vld [vmem:[#allocation23_spill] sm:$0xff] }
 0x56d   :  { %v8973_v49 = vpop.eup %8972  ;;  %v3265_v13 = vadd.f32 1.0, %v8971_v48  ;;  %8992 = vrcp.f32 %v3263_v37  ;;  %v3181_v0 = vadd.f32 %v3057_v52, %v14809_v19  ;;  %v3160_v7 = vadd.f32 %v3040_v36, %v14812_v29  ;;  %v14813_v52 = vld [vmem:[#allocation24_spill] sm:$0xff]  ;;  %v14816_v29 = vld [vmem:[#allocation27_spill] sm:$0xff] }
 0x56e   :  { %v8975_v25 = vpop.eup %8974  ;;  %v3267_v38 = vadd.f32 1.0, %v8973_v49  ;;  %8994 = vrcp.f32 %v3264_v31  ;;  %v3164_v2 = vadd.f32 %v12409_v56, %v14813_v52  ;;  %v7722_v50 = vmul.f32 -1.442695, %v3152_v6 }
 0x56f   :  { %v8977_v40 = vpop.eup %8976  ;;  %v3268_v44 = vadd.f32 1.0, %v8975_v25  ;;  %8996 = vrcp.f32 %v3265_v13  ;;  %v3056_v13 = vrot.slane %v12409_v56, 4  ;;  %v3034_v51 = vrot.slane %v12411_v8, 5 }
 0x570   :  { %v8979_v48 = vpop.eup %8978  ;;  %v3269_v37 = vadd.f32 1.0, %v8977_v40  ;;  %8998 = vrcp.f32 %v3267_v38  ;;  %v14814_v40 = vld [vmem:[#allocation25_spill] sm:$0xff]  ;;  %v7723_v22 = vmul.f32 -1.442695, %v3156_v26  ;;  %v3038_v36 = vrot.slane %v12411_v8, 6 }
 0x571   :  { %v8981_v49 = vpop.eup %8980  ;;  %v3270_v31 = vadd.f32 1.0, %v8979_v48  ;;  %9000 = vrcp.f32 %v3268_v44  ;;  %v3168_v38 = vadd.f32 %v3044_v53, %v14814_v40  ;;  %v14815_v44 = vld [vmem:[#allocation26_spill] sm:$0xff]  ;;  %v3176_v5 = vadd.f32 %v3052_v42, %v14816_v29  ;;  %v14819_v42 = vld [vmem:[#allocation52_spill] sm:$0xff] }
 0x572   :  { %v8983_v25 = vpop.eup %8982  ;;  %9002 = vrcp.f32 %v3269_v37  ;;  %v3172_v30 = vadd.f32 %v3048_v23, %v14815_v44  ;;  %v7724_v11 = vmul.f32 -1.442695, %v3160_v7  ;;  %v3042_v56 = vrot.slane %v12411_v8, 7  ;;  %v14818_v23 = vld [vmem:[#allocation50_spill] sm:$0xff] }
 0x573   :  { %v8985_v19 = vpop.eup %8984  ;;  %9004 = vrcp.f32 %v3270_v31  ;;  %v14817_v31 = vld [vmem:[#allocation28_spill] sm:$0xff]  ;;  %v7725_v40 = vmul.f32 -1.442695, %v3164_v2  ;;  %v7726_v52 = vmul.f32 -1.442695, %v3168_v38  ;;  %v3046_v26 = vrot.slane %v12411_v8, 1 }
 0x574   :  { %v8987_v48 = vpop.eup %8986  ;;  %9006 = vtanh.f32 %v3173_v62  ;;  %v3180_v6 = vadd.f32 %v3056_v13, %v14817_v31  ;;  %v3154_v44 = vadd.f32 %v3034_v51, %v14818_v23  ;;  %v7727_v7 = vmul.f32 -1.442695, %v3172_v30  ;;  %v14820_v2 = vld [vmem:[#allocation54_spill] sm:$0xff]  ;;  %v14821_v51 = vld [vmem:[#allocation56_spill] sm:$0xff]  ;;  %v14828_v31 = vld [vmem:[#allocation31_spill] sm:$0xff] }
 0x575   :  { %v8989_v37 = vpop.eup %8988  ;;  %9008 = vtanh.f32 %v3177_v1  ;;  %v3158_v29 = vadd.f32 %v3038_v36, %v14819_v42  ;;  %v7728_v13 = vmul.f32 -1.442695, %v3176_v5  ;;  %v3162_v38 = vadd.f32 %v3042_v56, %v14820_v2  ;;  %v14822_v30 = vld [vmem:[#allocation2_spill] sm:$0xff] }
 0x576   :  { %v8991_v53 = vpop.eup %8990  ;;  %9010 = vtanh.f32 %v3181_v0  ;;  %v3170_v36 = vadd.f32 %v3046_v26, %v14822_v30 }
 0x577   :  { %v8993_v34 = vpop.eup %8992  ;;  %v12464_v62 = vmul.f32 %v8991_v53, %v8987_v48  ;;  %9012 = vpow2.f32 %v7722_v50  ;;  %v7729_v53 = vmul.f32 -1.442695, %v3180_v6 }
 0x578   :  { %v8995_v1 = vpop.eup %8994  ;;  %v12468_v4 = vmul.f32 %v8993_v34, %v8981_v49  ;;  %9014 = vpow2.f32 %v7723_v22  ;;  %v3166_v34 = vadd.f32 %v12411_v8, %v14821_v51 }
 0x579   :  { %v8997_v0 = vpop.eup %8996  ;;  %v12471_v27 = vmul.f32 %v8995_v1, %v8983_v25  ;;  %9016 = vpow2.f32 %v7724_v11  ;;  %v7738_v25 = vmul.f32 -1.442695, %v3154_v44  ;;  %v7739_v11 = vmul.f32 -1.442695, %v3158_v29 }
 0x57a   :  { %v8999_v48 = vpop.eup %8998  ;;  %v12474_v50 = vmul.f32 %v8997_v0, %v8985_v19  ;;  %9018 = vpow2.f32 %v7725_v40  ;;  %v7740_v19 = vmul.f32 -1.442695, %v3162_v38  ;;  %v7741_v56 = vmul.f32 -1.442695, %v3166_v34 }
 0x57b   :  { %v9001_v49 = vpop.eup %9000  ;;  %v12478_v22 = vmul.f32 %v8999_v48, %v8989_v37  ;;  %9020 = vpow2.f32 %v7726_v52  ;;  %v7742_v52 = vmul.f32 -1.442695, %v3170_v36  ;;  %v3050_v44 = vrot.slane %v12411_v8, 2  ;;  %v14823_v36 = vld [vmem:[#allocation4_spill] sm:$0xff] }
 0x57c   :  { %v12481_v1 = vpop.eup %9002  ;;  %9022 = vpow2.f32 %v7727_v7  ;;  %v3054_v29 = vrot.slane %v12411_v8, 3  ;;  %v3058_v38 = vrot.slane %v12411_v8, 4 }
 0x57d   :  { %v12483_v5 = vpop.eup %9004  ;;  %9024 = vpow2.f32 %v7728_v13 }
 0x57e   :  { %v9007_v40 = vpop.eup %9006  ;;  %9026 = vpow2.f32 %v7729_v53 }
 0x57f   :  { %v12485_v6 = vpop.eup %9008  ;;  %v12487_v0 = vmul.f32 %v9007_v40, %v9001_v49  ;;  %9028 = vpow2.f32 %v7738_v25  ;;  %v3174_v25 = vadd.f32 %v3050_v44, %v14823_v36  ;;  %v14827_v36 = vld [vmem:[#allocation30_spill] sm:$0xff] }
 0x580   :  { %v12489_v37 = vpop.eup %9010  ;;  %9030 = vpow2.f32 %v7739_v11  ;;  %v14824_v11 = vld [vmem:[#allocation7_spill] sm:$0xff] }
 0x581   :  { %v9013_v26 = vpop.eup %9012  ;;  %9032 = vpow2.f32 %v7740_v19  ;;  %v3178_v51 = vadd.f32 %v3054_v29, %v14824_v11  ;;  %v7743_v44 = vmul.f32 -1.442695, %v3174_v25 }
 0x582   :  { %v9015_v7 = vpop.eup %9014  ;;  %v3359_v13 = vadd.f32 1.0, %v9013_v26  ;;  %9034 = vpow2.f32 %v7741_v56  ;;  %v14825_v26 = vld [vmem:[#allocation9_spill] sm:$0xff] }
 0x583   :  { %v9017_v48 = vpop.eup %9016  ;;  %v3360_v53 = vadd.f32 1.0, %v9015_v7  ;;  %9036 = vpow2.f32 %v7742_v52  ;;  %v3182_v42 = vadd.f32 %v3058_v38, %v14825_v26  ;;  %v3535_v52 = vrot.slane %v12121_v3, 7 }
 0x584   :  { %v9019_v34 = vpop.eup %9018  ;;  %v3361_v49 = vadd.f32 1.0, %v9017_v48  ;;  %9038 = vrcp.f32 %v3359_v13  ;;  %v3536_v7 = vrot.slane %v12124_v16, 7  ;;  %v3067_v3 = vrot.slane %v12414_v54, 7 }
 0x585   :  { %v9021_v40 = vpop.eup %9020  ;;  %v3362_v30 = vadd.f32 1.0, %v9019_v34  ;;  %9040 = vrcp.f32 %v3360_v53  ;;  %v3059_v53 = vrot.slane %v12414_v54, 5 }
 0x586   :  { %v9023_v2 = vpop.eup %9022  ;;  %v3363_v19 = vadd.f32 1.0, %v9021_v40  ;;  %9042 = vrcp.f32 %v3361_v49  ;;  %v7744_v40 = vmul.f32 -1.442695, %v3178_v51  ;;  %v3063_v49 = vrot.slane %v12414_v54, 6 }
 0x587   :  { %v9025_v8 = vpop.eup %9024  ;;  %v3364_v56 = vadd.f32 1.0, %v9023_v2  ;;  %9044 = vrcp.f32 %v3362_v30  ;;  %v3537_v2 = vrot.slane %v12127_v41, 7  ;;  %v7745_v30 = vmul.f32 -1.442695, %v3182_v42 }
 0x588   :  { %v9027_v13 = vpop.eup %9026  ;;  %v3365_v48 = vadd.f32 1.0, %v9025_v8  ;;  %9046 = vrcp.f32 %v3363_v19  ;;  %v3538_v19 = vrot.slane %v12162_v35, 7  ;;  %v3071_v8 = vrot.slane %v12414_v54, 1 }
 0x589   :  { %v9029_v34 = vpop.eup %9028  ;;  %v3366_v29 = vadd.f32 1.0, %v9027_v13  ;;  %9048 = vrcp.f32 %v3364_v56  ;;  %v3075_v51 = vrot.slane %v12414_v54, 2  ;;  %v14826_v13 = vld [vmem:[#allocation29_spill] sm:$0xff]  ;;  %v3079_v42 = vrot.slane %v12414_v54, 3 }
 0x58a   :  { %v9031_v38 = vpop.eup %9030  ;;  %9050 = vrcp.f32 %v3365_v48  ;;  %v3471_v25 = vadd.f32 1.0, %v9029_v34  ;;  %v3183_v11 = vadd.f32 %v3059_v53, %v14826_v13  ;;  %v3187_v23 = vadd.f32 %v3063_v49, %v14827_v36 }
 0x58b   :  { %v9033_v16 = vpop.eup %9032  ;;  %9052 = vrcp.f32 %v3366_v29  ;;  %v3472_v56 = vadd.f32 1.0, %v9031_v38  ;;  %v3083_v34 = vrot.slane %v12414_v54, 4  ;;  %v3191_v9 = vadd.f32 %v3067_v3, %v14828_v31 }
 0x58c   :  { %v9035_v26 = vpop.eup %9034  ;;  %9054 = vpow2.f32 %v7743_v44  ;;  %v3473_v41 = vadd.f32 1.0, %v9033_v16  ;;  %v3195_v53 = vadd.f32 %v12414_v54, %v14697_v24  ;;  %v3199_v13 = vadd.f32 %v3071_v8, %v14698_v12 }
 0x58d   :  { %v9037_v48 = vpop.eup %9036  ;;  %9056 = vpow2.f32 %v7744_v40  ;;  %v3474_v35 = vadd.f32 1.0, %v9035_v26  ;;  %v7714_v49 = vmul.f32 -1.442695, %v3183_v11  ;;  %v7715_v3 = vmul.f32 -1.442695, %v3187_v23 }
 0x58e   :  { %v9039_v29 = vpop.eup %9038  ;;  %9058 = vpow2.f32 %v7745_v30  ;;  %v3475_v55 = vadd.f32 1.0, %v9037_v48  ;;  %v7716_v54 = vmul.f32 -1.442695, %v3191_v9  ;;  %v7717_v8 = vmul.f32 -1.442695, %v3195_v53 }
 0x58f   :  { %v9041_v44 = vpop.eup %9040  ;;  %v3567_v38 = vmul.f32 %v9039_v29, %v3535_v52  ;;  %9060 = vrcp.f32 %v3471_v25  ;;  %v3211_v23 = vadd.f32 %v3083_v34, %v14701_v45  ;;  %v3539_v34 = vrot.slane %v12165_v43, 7 }
 0x590   :  { %v9043_v40 = vpop.eup %9042  ;;  %v3568_v16 = vmul.f32 %v9041_v44, %v3536_v7  ;;  %9062 = vrcp.f32 %v3472_v56  ;;  %v3203_v7 = vadd.f32 %v3075_v51, %v14699_v15  ;;  %v3065_v51 = vrot.slane %v12416_v63, 6 }
 0x591   :  { %v9045_v36 = vpop.eup %9044  ;;  %v3569_v30 = vmul.f32 %v9043_v40, %v3537_v2  ;;  %v12515_v26 = vadd.f32 %v12468_v4, %v3567_v38  ;;  %9064 = vrcp.f32 %v3473_v41  ;;  %v3207_v2 = vadd.f32 %v3079_v42, %v14700_v61 }
 0x592   :  { %v9047_v31 = vpop.eup %9046  ;;  %v3570_v52 = vmul.f32 %v9045_v36, %v3538_v19  ;;  %v12518_v25 = vadd.f32 %v12471_v27, %v3568_v16  ;;  %9066 = vrcp.f32 %v3474_v35  ;;  %v7718_v4 = vmul.f32 -1.442695, %v3199_v13 }
 0x593   :  { %v9049_v48 = vpop.eup %9048  ;;  %9068 = vrcp.f32 %v3475_v55  ;;  %v3061_v27 = vrot.slane %v12416_v63, 5  ;;  %v7719_v55 = vmul.f32 -1.442695, %v3203_v7  ;;  %v7720_v42 = vmul.f32 -1.442695, %v3207_v2 }
 0x594   :  { %v9051_v11 = vpop.eup %9050  ;;  %9070 = vpow2.f32 %v7714_v49  ;;  %v3069_v13 = vrot.slane %v12416_v63, 7  ;;  %v3540_v44 = vrot.slane %v12168_v39, 7  ;;  %v7721_v38 = vmul.f32 -1.442695, %v3211_v23 }
 0x595   :  { %v9053_v56 = vpop.eup %9052  ;;  %9072 = vpow2.f32 %v7715_v3  ;;  %v3541_v40 = vrot.slane %v12170_v10, 7  ;;  %v3542_v16 = vrot.slane %v12172_v32, 7  ;;  %v3185_v49 = vadd.f32 %v3061_v27, %v11248_v18 }
 0x596   :  { %v9055_v36 = vpop.eup %9054  ;;  %9074 = vpow2.f32 %v7716_v54  ;;  %v3073_v54 = vrot.slane %v12416_v63, 1  ;;  %v3077_v43 = vrot.slane %v12416_v63, 2  ;;  %v3189_v39 = vadd.f32 %v3065_v51, %v11258_v57 }
 0x597   :  { %v9057_v19 = vpop.eup %9056  ;;  %v3476_v9 = vadd.f32 1.0, %v9055_v36  ;;  %9076 = vpow2.f32 %v7717_v8  ;;  %v3193_v8 = vadd.f32 %v3069_v13, %v14764_v14  ;;  %v3571_v10 = vmul.f32 %v9047_v31, %v3539_v34 }
 0x598   :  { %v12525_v41 = vpop.eup %9058  ;;  %v3477_v29 = vadd.f32 1.0, %v9057_v19  ;;  %9078 = vpow2.f32 %v7718_v4  ;;  %v3572_v2 = vmul.f32 %v9049_v48, %v3540_v44  ;;  %v3573_v4 = vmul.f32 %v9051_v11, %v3541_v40 }
 0x599   :  { %v12528_v35 = vpop.eup %9060  ;;  %9080 = vrcp.f32 %v3476_v9  ;;  %v3574_v23 = vmul.f32 %v9053_v56, %v3542_v16  ;;  %v3589_v36 = vmul.f32 %v12485_v6, %v12481_v1  ;;  %v3590_v19 = vmul.f32 %v12489_v37, %v12483_v5 }
 0x59a   :  { %v12532_v53 = vpop.eup %9062  ;;  %9082 = vrcp.f32 %v3477_v29  ;;  %v12552_v9 = vadd.f32 %v12474_v50, %v3569_v30  ;;  %v12558_v11 = vadd.f32 %v12478_v22, %v3571_v10  ;;  %v12561_v56 = vadd.f32 %v12487_v0, %v3572_v2 }
 0x59b   :  { %v12537_v3 = vpop.eup %9064  ;;  %9084 = vpow2.f32 %v7719_v55  ;;  %v12555_v55 = vadd.f32 %v12464_v62, %v3570_v52  ;;  %v12563_v51 = vadd.f32 %v3589_v36, %v3573_v4  ;;  %v12565_v5 = vadd.f32 %v3590_v19, %v3574_v23  ;;  %v14830_v36 = vld [vmem:[#allocation38_spill] sm:$0xff] }
 0x59c   :  { %v12542_v7 = vpop.eup %9066  ;;  %9086 = vpow2.f32 %v7720_v42  ;;  %v3081_v62 = vrot.slane %v12416_v63, 3  ;;  %v3197_v22 = vadd.f32 %v12416_v63, %v14765_v33  ;;  %v3060_v0 = vrot.slane %v12422_v28, 5 }
 0x59d   :  { %v12545_v32 = vpop.eup %9068  ;;  %9088 = vpow2.f32 %v7721_v38  ;;  %v3201_v13 = vadd.f32 %v3073_v54, %v14766_v60  ;;  %v3064_v34 = vrot.slane %v12422_v28, 6  ;;  %v3085_v38 = vrot.slane %v12416_v63, 4 }
 0x59e   :  { %v9071_v27 = vpop.eup %9070  ;;  %9090 = vtanh.f32 %v3185_v49  ;;  %v3205_v40 = vadd.f32 %v3077_v43, %v14767_v46  ;;  %v3068_v16 = vrot.slane %v12422_v28, 7  ;;  %v3072_v10 = vrot.slane %v12422_v28, 1 }
 0x59f   :  { %v9073_v31 = vpop.eup %9072  ;;  %v3271_v48 = vadd.f32 1.0, %v9071_v27  ;;  %9092 = vtanh.f32 %v3189_v39  ;;  %v14829_v39 = vld [vmem:[#allocation70_spill] sm:$0xff]  ;;  %v3076_v2 = vrot.slane %v12422_v28, 2  ;;  %v3080_v23 = vrot.slane %v12422_v28, 3 }
 0x5a0   :  { %v9075_v1 = vpop.eup %9074  ;;  %v3272_v6 = vadd.f32 1.0, %v9073_v31  ;;  %9094 = vtanh.f32 %v3193_v8  ;;  %v3209_v8 = vadd.f32 %v3081_v62, %v14829_v39  ;;  %v3184_v27 = vadd.f32 %v3060_v0, %v14830_v36  ;;  %v14831_v31 = vld [vmem:[#allocation42_spill] sm:$0xff]  ;;  %v14834_v0 = vld [vmem:[#allocation45_spill] sm:$0xff]  ;;  %v14836_v36 = vld [vmem:[#allocation47_spill] sm:$0xff] }
 0x5a1   :  { %v9077_v50 = vpop.eup %9076  ;;  %v3273_v37 = vadd.f32 1.0, %v9075_v1  ;;  %9096 = vrcp.f32 %v3271_v48  ;;  %v3084_v43 = vrot.slane %v12422_v28, 4  ;;  %v3188_v48 = vadd.f32 %v3064_v34, %v14831_v31 }
 0x5a2   :  { %v9079_v30 = vpop.eup %9078  ;;  %v3274_v52 = vadd.f32 1.0, %v9077_v50  ;;  %9098 = vrcp.f32 %v3272_v6  ;;  %v3213_v50 = vadd.f32 %v3085_v38, %v11330_v20  ;;  %v3208_v34 = vadd.f32 %v3080_v23, %v14836_v36  ;;  %v14837_v38 = vld [vmem:[#allocation48_spill] sm:$0xff] }
 0x5a3   :  { %v12571_v29 = vpop.eup %9080  ;;  %v3275_v42 = vadd.f32 1.0, %v9079_v30  ;;  %9100 = vrcp.f32 %v3273_v37  ;;  %v14832_v37 = vld [vmem:[#allocation43_spill] sm:$0xff]  ;;  %v7730_v31 = vmul.f32 -1.442695, %v3184_v27 }
 0x5a4   :  { %v12575_v44 = vpop.eup %9082  ;;  %9102 = vrcp.f32 %v3274_v52  ;;  %v3192_v62 = vadd.f32 %v3068_v16, %v14832_v37  ;;  %v14833_v52 = vld [vmem:[#allocation44_spill] sm:$0xff]  ;;  %v3212_v16 = vadd.f32 %v3084_v43, %v14837_v38  ;;  %v7731_v37 = vmul.f32 -1.442695, %v3188_v48 }
 0x5a5   :  { %v9085_v49 = vpop.eup %9084  ;;  %9104 = vrcp.f32 %v3275_v42  ;;  %v3200_v42 = vadd.f32 %v3072_v10, %v14834_v0  ;;  %v3074_v43 = vrot.slane %v12424_v21, 1 }
 0x5a6   :  { %v9087_v54 = vpop.eup %9086  ;;  %v3276_v4 = vadd.f32 1.0, %v9085_v49  ;;  %9106 = vtanh.f32 %v3197_v22  ;;  %v3196_v22 = vadd.f32 %v12422_v28, %v14833_v52  ;;  %v14835_v49 = vld [vmem:[#allocation46_spill] sm:$0xff]  ;;  %v7732_v10 = vmul.f32 -1.442695, %v3192_v62  ;;  %v14838_v62 = vld [vmem:[#allocation59_spill] sm:$0xff] }
 0x5a7   :  { %v9089_v63 = vpop.eup %9088  ;;  %v3277_v19 = vadd.f32 1.0, %v9087_v54  ;;  %9108 = vtanh.f32 %v3201_v13  ;;  %v3204_v13 = vadd.f32 %v3076_v2, %v14835_v49  ;;  %v3070_v2 = vrot.slane %v12424_v21, 7 }
 0x5a8   :  { %v9091_v1 = vpop.eup %9090  ;;  %v3278_v6 = vadd.f32 1.0, %v9089_v63  ;;  %9110 = vrcp.f32 %v3276_v4  ;;  %v3062_v4 = vrot.slane %v12424_v21, 5  ;;  %v7733_v27 = vmul.f32 -1.442695, %v3196_v22 }
 0x5a9   :  { %v9093_v30 = vpop.eup %9092  ;;  %9112 = vrcp.f32 %v3277_v19  ;;  %v3066_v19 = vrot.slane %v12424_v21, 6  ;;  %v7734_v36 = vmul.f32 -1.442695, %v3200_v42 }
 0x5aa   :  { %v9095_v54 = vpop.eup %9094  ;;  %9114 = vrcp.f32 %v3278_v6  ;;  %v3186_v48 = vadd.f32 %v3062_v4, %v14775_v47 }
 0x5ab   :  { %v9097_v63 = vpop.eup %9096  ;;  %9116 = vtanh.f32 %v3205_v40 }
 0x5ac   :  { %v9099_v20 = vpop.eup %9098  ;;  %9118 = vtanh.f32 %v3209_v8  ;;  %v12597_v28 = vmul.f32 %v9097_v63, %v9091_v1  ;;  %v7735_v1 = vmul.f32 -1.442695, %v3204_v13  ;;  %v3190_v63 = vadd.f32 %v3066_v19, %v14838_v62 }
 0x5ad   :  { %v9101_v6 = vpop.eup %9100  ;;  %9120 = vtanh.f32 %v3213_v50  ;;  %v12600_v23 = vmul.f32 %v9099_v20, %v9093_v30  ;;  %v7736_v50 = vmul.f32 -1.442695, %v3208_v34  ;;  %v14839_v20 = vld [vmem:[#allocation62_spill] sm:$0xff]  ;;  %v7746_v13 = vmul.f32 -1.442695, %v3186_v48 }
 0x5ae   :  { %v9103_v49 = vpop.eup %9102  ;;  %v12602_v40 = vmul.f32 %v9101_v6, %v9095_v54  ;;  %9122 = vpow2.f32 %v7730_v31  ;;  %v3194_v30 = vadd.f32 %v3070_v2, %v14839_v20  ;;  %v7737_v54 = vmul.f32 -1.442695, %v3212_v16 }
 0x5af   :  { %v9105_v8 = vpop.eup %9104  ;;  %9124 = vpow2.f32 %v7731_v37  ;;  %v3198_v31 = vadd.f32 %v12424_v21, %v14714_v59  ;;  %v3202_v37 = vadd.f32 %v3074_v43, %v14715_v17  ;;  %v7747_v34 = vmul.f32 -1.442695, %v3190_v63 }
 0x5b0   :  { %v9107_v38 = vpop.eup %9106  ;;  %9126 = vpow2.f32 %v7732_v10  ;;  %v7748_v2 = vmul.f32 -1.442695, %v3194_v30 }
 0x5b1   :  { %v9109_v22 = vpop.eup %9108  ;;  %v12608_v42 = vmul.f32 %v9107_v38, %v9103_v49  ;;  %9128 = vpow2.f32 %v7733_v27  ;;  %v7749_v38 = vmul.f32 -1.442695, %v3198_v31  ;;  %v7750_v59 = vmul.f32 -1.442695, %v3202_v37 }
 0x5b2   :  { %v9111_v6 = vpop.eup %9110  ;;  %v12612_v4 = vmul.f32 %v9109_v22, %v9105_v8  ;;  %9130 = vpow2.f32 %v7734_v36  ;;  %v3078_v36 = vrot.slane %v12424_v21, 2  ;;  %v3086_v22 = vrot.slane %v12424_v21, 4 }
 0x5b3   :  { %v9113_v19 = vpop.eup %9112  ;;  %9132 = vpow2.f32 %v7735_v1  ;;  %v3082_v1 = vrot.slane %v12424_v21, 3 }
 0x5b4   :  { %v9115_v10 = vpop.eup %9114  ;;  %9134 = vpow2.f32 %v7736_v50 }
 0x5b5   :  { %v9117_v49 = vpop.eup %9116  ;;  %9136 = vpow2.f32 %v7737_v54 }
 0x5b6   :  { %v9119_v16 = vpop.eup %9118  ;;  %v12615_v27 = vmul.f32 %v9117_v49, %v9111_v6  ;;  %9138 = vpow2.f32 %v7746_v13  ;;  %v14840_v13 = vld [vmem:[#allocation69_spill] sm:$0xff] }
 0x5b7   :  { %v9121_v8 = vpop.eup %9120  ;;  %9140 = vpow2.f32 %v7747_v34  ;;  %v12618_v43 = vmul.f32 %v9119_v16, %v9113_v19  ;;  %v3206_v19 = vadd.f32 %v3078_v36, %v14840_v13  ;;  %v14841_v16 = vld [vmem:[#allocation72_spill] sm:$0xff] }
 0x5b8   :  { %v9123_v48 = vpop.eup %9122  ;;  %9142 = vpow2.f32 %v7748_v2  ;;  %v12621_v63 = vmul.f32 %v9121_v8, %v9115_v10  ;;  %v3210_v2 = vadd.f32 %v3082_v1, %v14841_v16 }
 0x5b9   :  { %v9125_v50 = vpop.eup %9124  ;;  %v3367_v30 = vadd.f32 1.0, %v9123_v48  ;;  %9144 = vpow2.f32 %v7749_v38  ;;  %v14842_v48 = vld [vmem:[#allocation39_spill] sm:$0xff] }
 0x5ba   :  { %v9127_v54 = vpop.eup %9126  ;;  %v3368_v31 = vadd.f32 1.0, %v9125_v50  ;;  %9146 = vpow2.f32 %v7750_v59  ;;  %v3214_v17 = vadd.f32 %v3086_v22, %v14842_v48  ;;  %v7752_v36 = vmul.f32 -1.442695, %v3210_v2 }
 0x5bb   :  { %v9129_v6 = vpop.eup %9128  ;;  %v3369_v37 = vadd.f32 1.0, %v9127_v54  ;;  %9148 = vrcp.f32 %v3367_v30  ;;  %v7751_v54 = vmul.f32 -1.442695, %v3206_v19  ;;  %v14843_v19 = vld [vmem:[#allocation35_spill] sm:$0xff] }
 0x5bc   :  { %v9131_v34 = vpop.eup %9130  ;;  %v3370_v49 = vadd.f32 1.0, %v9129_v6  ;;  %9150 = vrcp.f32 %v3368_v31  ;;  %v7753_v31 = vmul.f32 -1.442695, %v3214_v17 }
 0x5bd   :  { %v9133_v10 = vpop.eup %9132  ;;  %v3371_v8 = vadd.f32 1.0, %v9131_v34  ;;  %9152 = vrcp.f32 %v3369_v37 }
 0x5be   :  { %v9135_v21 = vpop.eup %9134  ;;  %v3372_v38 = vadd.f32 1.0, %v9133_v10  ;;  %9154 = vrcp.f32 %v3370_v49  ;;  %v3543_v49 = vrot.slane %v12240_v58, 7 }
 0x5bf   :  { %v9137_v50 = vpop.eup %9136  ;;  %v3373_v59 = vadd.f32 1.0, %v9135_v21  ;;  %9156 = vrcp.f32 %v3371_v8  ;;  %v3544_v21 = vrot.slane %v14843_v19, 7  ;;  %v14847_v19 = vld [vmem:[#allocation33_spill] sm:$0xff] }
 0x5c0   :  { %v9139_v30 = vpop.eup %9138  ;;  %v3374_v20 = vadd.f32 1.0, %v9137_v50  ;;  %9158 = vrcp.f32 %v3372_v38  ;;  %v14844_v50 = vld [vmem:[#allocation36_spill] sm:$0xff] }
 0x5c1   :  { %v9141_v6 = vpop.eup %9140  ;;  %9160 = vrcp.f32 %v3373_v59  ;;  %v3479_v34 = vadd.f32 1.0, %v9139_v30  ;;  %v3545_v59 = vrot.slane %v14844_v50, 7  ;;  %v14845_v30 = vld [vmem:[#allocation37_spill] sm:$0xff] }
 0x5c2   :  { %v9143_v1 = vpop.eup %9142  ;;  %9162 = vrcp.f32 %v3374_v20  ;;  %v3480_v22 = vadd.f32 1.0, %v9141_v6  ;;  %v3546_v6 = vrot.slane %v14845_v30, 7 }
 0x5c3   :  { %v9145_v37 = vpop.eup %9144  ;;  %9164 = vpow2.f32 %v7751_v54  ;;  %v3481_v10 = vadd.f32 1.0, %v9143_v1  ;;  %v3478_v54 = vadd.f32 1.0, %v12525_v41 }
 0x5c4   :  { %v9147_v48 = vpop.eup %9146  ;;  %9166 = vpow2.f32 %v7752_v36  ;;  %v3482_v38 = vadd.f32 1.0, %v9145_v37  ;;  %v14846_v36 = vld [vmem:[#allocation40_spill] sm:$0xff] }
 0x5c5   :  { %v9149_v8 = vpop.eup %9148  ;;  %9168 = vpow2.f32 %v7753_v31  ;;  %v3483_v16 = vadd.f32 1.0, %v9147_v48  ;;  %v3547_v1 = vrot.slane %v14846_v36, 7 }
 0x5c6   :  { %v9151_v2 = vpop.eup %9150  ;;  %v3575_v17 = vmul.f32 %v9149_v8, %v3543_v49  ;;  %9170 = vrcp.f32 %v3479_v34  ;;  %v3548_v49 = vrot.slane %v14847_v19, 7  ;;  %v14849_v8 = vld [vmem:[#allocation41_spill] sm:$0xff] }
 0x5c7   :  { %v9153_v20 = vpop.eup %9152  ;;  %v3576_v13 = vmul.f32 %v9151_v2, %v3544_v21  ;;  %9172 = vrcp.f32 %v3480_v22  ;;  %v3549_v21 = vrot.slane %v14849_v8, 7 }
 0x5c8   :  { %v9155_v58 = vpop.eup %9154  ;;  %v3577_v62 = vmul.f32 %v9153_v20, %v3545_v59  ;;  %v12634_v31 = vadd.f32 %v12597_v28, %v3575_v17  ;;  %9174 = vrcp.f32 %v3481_v10  ;;  %v14851_v28 = vld [vmem:[#allocation58_spill] sm:$0xff] }
 0x5c9   :  { %v9157_v37 = vpop.eup %9156  ;;  %v3578_v48 = vmul.f32 %v9155_v58, %v3546_v6  ;;  %v12638_v34 = vadd.f32 %v12600_v23, %v3576_v13  ;;  %9176 = vrcp.f32 %v3482_v38  ;;  %v3550_v59 = vrot.slane %v14851_v28, 7 }
 0x5ca   :  { %v9159_v41 = vpop.eup %9158  ;;  %9178 = vrcp.f32 %v3483_v16  ;;  %v3579_v22 = vmul.f32 %v9157_v37, %v3547_v1  ;;  %v12642_v2 = vadd.f32 %v12602_v40, %v3577_v62 }
 0x5cb   :  { %14848 = vst [vmem:[#allocation18_spill] sm:$0xff] %v12638_v34  ;;  %v9161_v50 = vpop.eup %9160  ;;  %9180 = vrcp.f32 %v3478_v54  ;;  %v3580_v10 = vmul.f32 %v9159_v41, %v3548_v49  ;;  %v12646_v17 = vadd.f32 %v12608_v42, %v3578_v48 }
 0x5cc   :  { %14850 = vst [vmem:[#allocation60_spill] sm:$0xff] %v12642_v2  ;;  %v9163_v20 = vpop.eup %9162  ;;  %v3581_v23 = vmul.f32 %v9161_v50, %v3549_v21  ;;  %v12649_v13 = vadd.f32 %v12612_v4, %v3579_v22  ;;  %9182 = vtanh.f32 %v12515_v26 }
 0x5cd   :  { %14852 = vst [vmem:[#allocation64_spill] sm:$0xff] %v12646_v17  ;;  %v9165_v16 = vpop.eup %9164  ;;  %v3582_v38 = vmul.f32 %v9163_v20, %v3550_v59  ;;  %v12653_v40 = vadd.f32 %v12615_v27, %v3580_v10  ;;  %9184 = vtanh.f32 %v12518_v25 }
 0x5ce   :  { %14853 = vst [vmem:[#allocation66_spill] sm:$0xff] %v12649_v13  ;;  %v9167_v62 = vpop.eup %9166  ;;  %v3484_v54 = vadd.f32 1.0, %v9165_v16  ;;  %v12657_v30 = vadd.f32 %v12618_v43, %v3581_v23  ;;  %9186 = vtanh.f32 %v12552_v9 }
 0x5cf   :  { %14854 = vst [vmem:[#allocation68_spill] sm:$0xff] %v12653_v40  ;;  %v9169_v42 = vpop.eup %9168  ;;  %v3485_v6 = vadd.f32 1.0, %v9167_v62  ;;  %v12661_v4 = vadd.f32 %v12621_v63, %v3582_v38  ;;  %9188 = vtanh.f32 %v12555_v55 }
 0x5d0   :  { %14855 = vst [vmem:[#allocation20_spill] sm:$0xff] %v12657_v30  ;;  %v9171_v58 = vpop.eup %9170  ;;  %v3486_v36 = vadd.f32 1.0, %v9169_v42  ;;  %9190 = vrcp.f32 %v3484_v54 }
 0x5d1   :  { %14856 = vst [vmem:[#allocation21_spill] sm:$0xff] %v12661_v4  ;;  %v9173_v27 = vpop.eup %9172  ;;  %9192 = vrcp.f32 %v3485_v6 }
 0x5d2   :  { %v9175_v1 = vpop.eup %9174  ;;  %9194 = vrcp.f32 %v3486_v36 }
 0x5d3   :  { %v12664_v37 = vpop.eup %9176  ;;  %9196 = vtanh.f32 %v12558_v11 }
 0x5d4   :  { %v12667_v43 = vpop.eup %9178  ;;  %9198 = vtanh.f32 %v12561_v56 }
 0x5d5   :  { %v9181_v19 = vpop.eup %9180  ;;  %9200 = vtanh.f32 %v12563_v51 }
 0x5d6   :  { %v9183_v63 = vpop.eup %9182  ;;  %9202 = vtanh.f32 %v12565_v5 }
 0x5d7   :  { %v9185_v49 = vpop.eup %9184  ;;  %9204 = vtanh.f32 %v12634_v31  ;;  %v3631_v48 = vmul.f32 %v9183_v63, %v12528_v35 }
 0x5d8   :  { %v9187_v41 = vpop.eup %9186  ;;  %9206 = vtanh.f32 %v12638_v34  ;;  %v3632_v8 = vmul.f32 %v9185_v49, %v12532_v53 }
 0x5d9   :  { %v9189_v21 = vpop.eup %9188  ;;  %9208 = vtanh.f32 %v12642_v2  ;;  %v3633_v22 = vmul.f32 %v9187_v41, %v12537_v3  ;;  %v3647_v50 = vpack.c.bf16 %v3631_v48, %v3631_v48 }
 0x5da   :  { %v9191_v28 = vpop.eup %9190  ;;  %9210 = vtanh.f32 %v12646_v17  ;;  %v3634_v59 = vmul.f32 %v9189_v21, %v12542_v7  ;;  %v3648_v10 = vpack.c.bf16 %v3632_v8, %v3632_v8 }
 0x5db   :  { %v9193_v20 = vpop.eup %9192  ;;  %9212 = vtanh.f32 %v12649_v13  ;;  %v3649_v35 = vpack.c.bf16 %v3633_v22, %v3633_v22  ;;  %v3679_v23 = vunpack.c.l.b16 %v3647_v50 }
 0x5dc   :  { %v9195_v16 = vpop.eup %9194  ;;  %9214 = vtanh.f32 %v12653_v40  ;;  %v3650_v53 = vpack.c.bf16 %v3634_v59, %v3634_v59  ;;  %v3680_v38 = vunpack.c.l.b16 %v3648_v10 }
 0x5dd   :  { %v9197_v62 = vpop.eup %9196  ;;  %9216 = vtanh.f32 %v12657_v30  ;;  %v3681_v3 = vunpack.c.l.b16 %v3649_v35  ;;  %v3695_v54 = vrot.slane %v3679_v23, 3 }
 0x5de   :  { %v9199_v42 = vpop.eup %9198  ;;  %9218 = vtanh.f32 %v12661_v4  ;;  %v3635_v7 = vmul.f32 %v9197_v62, %v12545_v32  ;;  %v3696_v6 = vrot.slane %v3680_v38, 2  ;;  %v3682_v21 = vunpack.c.l.b16 %v3650_v53 }
 0x5df   :  { %v9201_v36 = vpop.eup %9200  ;;  %v3636_v63 = vmul.f32 %v9199_v42, %v12571_v29  ;;  %v3698_v49 = vrot.slane %v3681_v3, 1 }
 0x5e0   :  { %v9203_v48 = vpop.eup %9202  ;;  %v3637_v41 = vmul.f32 %v9201_v36, %v12575_v44  ;;  %v3651_v8 = vpack.c.bf16 %v3635_v7, %v3635_v7  ;;  %v3697_v22 = vsel %vm1325_vm1, %v3696_v6, %v3695_v54 }
 0x5e1   :  { %v9205_v50 = vpop.eup %9204  ;;  %v3638_v59 = vmul.f32 %v9203_v48, %v9181_v19  ;;  %v3652_v10 = vpack.c.bf16 %v3636_v63, %v3636_v63  ;;  %v3699_v35 = vsel %vm1328_vm2, %v3698_v49, %v3697_v22 }
 0x5e2   :  { %v9207_v23 = vpop.eup %9206  ;;  %v3639_v4 = vmul.f32 %v9205_v50, %v9171_v58  ;;  %v3653_v32 = vpack.c.bf16 %v3637_v41, %v3637_v41  ;;  %v3683_v38 = vunpack.c.l.b16 %v3651_v8  ;;  %v3700_v62 = vsel %vm1331_vm3, %v3682_v21, %v3699_v35 }
 0x5e3   :  { %v9209_v29 = vpop.eup %9208  ;;  %v3640_v3 = vmul.f32 %v9207_v23, %v9173_v27  ;;  %v3654_v42 = vpack.c.bf16 %v3638_v59, %v3638_v59  ;;  %v3684_v30 = vunpack.c.l.b16 %v3652_v10 }
 0x5e4   :  { %v9211_v44 = vpop.eup %9210  ;;  %v3641_v7 = vmul.f32 %v9209_v29, %v9175_v1  ;;  %v3655_v53 = vpack.c.bf16 %v3639_v4, %v3639_v4  ;;  %v3685_v36 = vunpack.c.l.b16 %v3653_v32  ;;  %v3701_v54 = vrot.slane %v3683_v38, 7 }
 0x5e5   :  { %v9213_v6 = vpop.eup %9212  ;;  %v3642_v19 = vmul.f32 %v9211_v44, %v12664_v37  ;;  %v3656_v63 = vpack.c.bf16 %v3640_v3, %v3640_v3  ;;  %v3686_v49 = vunpack.c.l.b16 %v3654_v42  ;;  %v3703_v48 = vrot.slane %v3684_v30, 6 }
 0x5e6   :  { %v9215_v58 = vpop.eup %9214  ;;  %v3643_v41 = vmul.f32 %v9213_v6, %v12667_v43  ;;  %v3657_v8 = vpack.c.bf16 %v3641_v7, %v3641_v7  ;;  %v3687_v21 = vunpack.c.l.b16 %v3655_v53  ;;  %v3702_v27 = vsel %vm1334_vm4, %v3701_v54, %v3700_v62 }
 0x5e7   :  { %v9217_v22 = vpop.eup %9216  ;;  %v3644_v50 = vmul.f32 %v9215_v58, %v9191_v28  ;;  %v3688_v59 = vunpack.c.l.b16 %v3656_v63  ;;  %v3704_v4 = vsel %vm1337_vm5, %v3703_v48, %v3702_v27  ;;  %v3705_v37 = vrot.slane %v3685_v36, 5 }
 0x5e8   :  { %v9219_v1 = vpop.eup %9218  ;;  %v3645_v10 = vmul.f32 %v9217_v22, %v9193_v20  ;;  %v3659_v35 = vpack.c.bf16 %v3643_v41, %v3643_v41  ;;  %v3689_v23 = vunpack.c.l.b16 %v3657_v8  ;;  %v3658_v38 = vpack.c.bf16 %v3642_v19, %v3642_v19 }
 0x5e9   :  { %v3646_v32 = vmul.f32 %v9219_v1, %v9195_v16  ;;  %v3660_v30 = vpack.c.bf16 %v3644_v50, %v3644_v50  ;;  %v3707_v29 = vrot.slane %v3686_v49, 4  ;;  %v3706_v42 = vsel %vm1340_vm6, %v3705_v37, %v3704_v4  ;;  %v10373_v4 = vld [vmem:[%s14351_s4 + $0x8] ss:$16 sps:$4 sm:$0xff]   ;;  %v10374_v1 = vld [vmem:[%s14351_s4 + $0x24] ss:$16 sps:$4 sm:$0xff]  }
 0x5ea   :  { %v3661_v3 = vpack.c.bf16 %v3645_v10, %v3645_v10  ;;  %v3691_v43 = vunpack.c.l.b16 %v3659_v35  ;;  %v3709_v44 = vrot.slane %v3687_v21, 3  ;;  %v3710_v53 = vrot.slane %v3688_v59, 2  ;;  %v10372_v59 = vld [vmem:[%s14351_s4] ss:$16 sps:$4 sm:$0xff]   ;;  %v10375_v10 = vld [vmem:[%s14351_s4 + $0x2c] ss:$16 sps:$4 sm:$0xff]  }
 0x5eb   :  { %v3662_v62 = vpack.c.bf16 %v3646_v32, %v3646_v32  ;;  %v3692_v7 = vunpack.c.l.b16 %v3660_v30  ;;  %v3708_v28 = vsel %vm1343_vm7, %v3707_v29, %v3706_v42  ;;  %v3712_v6 = vrot.slane %v3689_v23, 1  ;;  %v10376_v23 = vld [vmem:[%s14351_s4 + $0x20] ss:$16 sps:$4 sm:$0xff]   ;;  %v10377_v37 = vld [vmem:[%s14351_s4 + $0x28] ss:$16 sps:$4 sm:$0xff]  }
 0x5ec   :  { %v3693_v54 = vunpack.c.l.b16 %v3661_v3  ;;  %v3690_v20 = vunpack.c.l.b16 %v3658_v38  ;;  %v3711_v36 = vsel %vm1325_vm1, %v3710_v53, %v3709_v44  ;;  %v3715_v19 = vrot.slane %v3691_v43, 7  ;;  %v10378_v32 = vld [vmem:[%s14351_s4 + $0x44] ss:$16 sps:$4 sm:$0xff]   ;;  %v10379_v38 = vld [vmem:[%s14351_s4 + $0x4c] ss:$16 sps:$4 sm:$0xff]  }
 0x5ed   :  { %v3694_v63 = vunpack.c.l.b16 %v3662_v62  ;;  %v3713_v16 = vsel %vm1328_vm2, %v3712_v6, %v3711_v36  ;;  %v3717_v48 = vrot.slane %v3692_v7, 6  ;;  %v14857_v35 = vmov 0   ;;  %v10380_v30 = vld [vmem:[%s14351_s4 + $0x40] ss:$16 sps:$4 sm:$0xff]   ;;  %v10381_v29 = vld [vmem:[%s14351_s4 + $0x48] ss:$16 sps:$4 sm:$0xff]  }
 0x5ee   :  { %v3714_v49 = vsel %vm1331_vm3, %v3690_v20, %v3713_v16  ;;  %v3719_v41 = vrot.slane %v3693_v54, 5  ;;  %v10382_v3 = vld [vmem:[%s14351_s4 + $0x64] ss:$16 sps:$4 sm:$0xff]   ;;  %v10383_v43 = vld [vmem:[%s14351_s4 + $0x6c] ss:$16 sps:$4 sm:$0xff]  }
 0x5ef   :  { %v3716_v58 = vsel %vm1334_vm4, %v3715_v19, %v3714_v49  ;;  %v3721_v21 = vrot.slane %v3694_v63, 4  ;;  %v10384_v42 = vld [vmem:[%s14351_s4 + $0x60] ss:$16 sps:$4 sm:$0xff]   ;;  %v10385_v44 = vld [vmem:[%s14351_s4 + $0x68] ss:$16 sps:$4 sm:$0xff]  }
 0x5f0   :  { %v3718_v8 = vsel %vm1337_vm5, %v3717_v48, %v3716_v58  ;;  %v10386_v62 = vld [vmem:[%s14351_s4 + $0x84] ss:$16 sps:$4 sm:$0xff]   ;;  %v10387_v7 = vld [vmem:[%s14351_s4 + $0x8c] ss:$16 sps:$4 sm:$0xff]   ;;  %v10389_v53 = vld [vmem:[%s14351_s4 + $0x88] ss:$16 sps:$4 sm:$0xff]  }
 0x5f1   :  { %v3720_v27 = vsel %vm1340_vm6, %v3719_v41, %v3718_v8  ;;  %v10390_v54 = vld [vmem:[%s14351_s4 + $0xa4] ss:$16 sps:$4 sm:$0xff]   ;;  %v10391_v6 = vld [vmem:[%s14351_s4 + $0xac] ss:$16 sps:$4 sm:$0xff]   ;;  %v10392_v20 = vld [vmem:[%s14351_s4 + $0xa0] ss:$16 sps:$4 sm:$0xff]  }
 0x5f2   :  { %v3722_v22 = vsel %vm1343_vm7, %v3721_v21, %v3720_v27  ;;  %v10393_v63 = vld [vmem:[%s14351_s4 + $0xa8] ss:$16 sps:$4 sm:$0xff]   ;;  %v10394_v36 = vld [vmem:[%s14351_s4 + $0xc4] ss:$16 sps:$4 sm:$0xff]   ;;  %v10395_v16 = vld [vmem:[%s14351_s4 + $0xcc] ss:$16 sps:$4 sm:$0xff]  }
 0x5f3   :  { %v3723_v50 = vpack.c.b16 %v3722_v22, %v3708_v28  ;;  %v10388_v28 = vld [vmem:[%s14351_s4 + $0x80] ss:$16 sps:$4 sm:$0xff]   ;;  %v10397_v49 = vld [vmem:[%s14351_s4 + $0xc8] ss:$16 sps:$4 sm:$0xff]   ;;  %v10398_v48 = vld [vmem:[%s14351_s4 + $0xe4] ss:$16 sps:$4 sm:$0xff]  }
 0x5f4   :  { %v10396_v19 = vld [vmem:[%s14351_s4 + $0xc0] ss:$16 sps:$4 sm:$0xff]   ;;  %v10399_v58 = vld [vmem:[%s14351_s4 + $0xec] ss:$16 sps:$4 sm:$0xff]   ;;  %v10401_v8 = vld [vmem:[%s14351_s4 + $0xe8] ss:$16 sps:$4 sm:$0xff]  }
 0x5f5   :  { %3758 = vmatmul.mubr.bf16.vlgmr.msra.gmra.mrb[40].mxu0 %v3723_v50  ;;  %3801 = vmatmul.mubr.bf16.vlgmr.msra.gmra.mrb[56].mxu1 %v3723_v50  ;;  %v10400_v41 = vld [vmem:[%s14351_s4 + $0xe0] ss:$16 sps:$4 sm:$0xff]   ;;  %v10402_v21 = vld [vmem:[%s14351_s4 + $0x4] ss:$16 sps:$4 sm:$0xff]   ;;  %v10403_v27 = vld [vmem:[%s14351_s4 + $0xc] ss:$16 sps:$4 sm:$0xff]  }
 0x5f6   :  { %4514 = vmatpush1.bf16.msra.mxu0 %v10372_v59  ;;  %4557 = vmatpush1.bf16.msra.mxu1 %v10373_v4 }
 0x5f7   :  { %4515 = vmatprep.subr.bf16.mxu0 %v10374_v1  ;;  %4558 = vmatprep.subr.bf16.mxu1 %v10375_v10 }
 0x5f8   :  { %4545 = vmatprep.mubr.bf16.mxu0 %v14857_v35  ;;  %4588 = vmatprep.mubr.bf16.mxu1 %v14857_v35 }
 0x5fa   :  { %4516 = vmatpush1.bf16.msra.mxu0 %v10376_v23  ;;  %4559 = vmatpush1.bf16.msra.mxu1 %v10377_v37 }
 0x5fb   :  { %4517 = vmatprep.subr.bf16.mxu0 %v10378_v32  ;;  %4560 = vmatprep.subr.bf16.mxu1 %v10379_v38 }
 0x5fe   :  { %4518 = vmatpush1.bf16.msra.mxu0 %v10380_v30  ;;  %4561 = vmatpush1.bf16.msra.mxu1 %v10381_v29  ;;  %v14858_v29 = vld [vmem:[#allocation15_spill] sm:$0xff] }
 0x5ff   :  { %4519 = vmatprep.subr.bf16.mxu0 %v10382_v3  ;;  %4562 = vmatprep.subr.bf16.mxu1 %v10383_v43 }
 0x602   :  { %4520 = vmatpush1.bf16.msra.mxu0 %v10384_v42  ;;  %4563 = vmatpush1.bf16.msra.mxu1 %v10385_v44  ;;  %v14859_v44 = vld [vmem:[#allocation10_spill] sm:$0xff] }
 0x603   :  { %4521 = vmatprep.subr.bf16.mxu0 %v10386_v62  ;;  %4564 = vmatprep.subr.bf16.mxu1 %v10387_v7  ;;  %v14860_v7 = vld [vmem:[#allocation12_spill] sm:$0xff] }
 0x606   :  { %4522 = vmatpush1.bf16.msra.mxu0 %v10388_v28  ;;  %4565 = vmatpush1.bf16.msra.mxu1 %v10389_v53  ;;  %v14861_v53 = vld [vmem:[#allocation13_spill] sm:$0xff] }
 0x607   :  { %4523 = vmatprep.subr.bf16.mxu0 %v10390_v54  ;;  %4566 = vmatprep.subr.bf16.mxu1 %v10391_v6  ;;  %v14862_v6 = vld [vmem:[#allocation14_spill] sm:$0xff] }
 0x60a   :  { %4524 = vmatpush1.bf16.msra.mxu0 %v10392_v20  ;;  %4567 = vmatpush1.bf16.msra.mxu1 %v10393_v63 }
 0x60b   :  { %4525 = vmatprep.subr.bf16.mxu0 %v10394_v36  ;;  %4568 = vmatprep.subr.bf16.mxu1 %v10395_v16  ;;  %v14863_v16 = vld [vmem:[#allocation16_spill] sm:$0xff] }
 0x60e   :  { %4526 = vmatpush1.bf16.msra.mxu0 %v10396_v19  ;;  %4569 = vmatpush1.bf16.msra.mxu1 %v10397_v49  ;;  %v14864_v49 = vld [vmem:[#allocation17_spill] sm:$0xff] }
 0x60f   :  { %4527 = vmatprep.subr.bf16.mxu0 %v10398_v48  ;;  %4570 = vmatprep.subr.bf16.mxu1 %v10399_v58 }
 0x612   :  { %4528 = vmatpush1.bf16.msra.mxu0 %v10400_v41  ;;  %4571 = vmatpush1.bf16.msra.mxu1 %v10401_v8  ;;  %v14865_v41 = vld [vmem:[#allocation19_spill] sm:$0xff] }
 0x613   :  { %5301 = vmatprep.subr.bf16.mxu0 %v10402_v21  ;;  %5344 = vmatprep.subr.bf16.mxu1 %v10403_v27 }
 0x6c8   :  { %v3759_v22 = vpop.f32.mrb[40].mxu0  ;;  %v12801_v50 = vpop.f32.mrb[56].mxu1 }
 0x6c9   :  { %v3819_v59 = vrot.slane %v3759_v22, 4  ;;  %v3823_v4 = vrot.slane %v3759_v22, 5  ;;  %v3827_v1 = vrot.slane %v3759_v22, 6  ;;  %v3831_v10 = vrot.slane %v3759_v22, 7  ;;  %v12803_v23 = vpop.f32.mrb[41].mxu0  ;;  %v12805_v37 = vpop.f32.mrb[57].mxu1 }
 0x6ca   :  { %v3835_v32 = vrot.slane %v3759_v22, 1  ;;  %v3839_v38 = vrot.slane %v3759_v22, 2  ;;  %v3843_v30 = vrot.slane %v3759_v22, 3  ;;  %v3955_v3 = vadd.f32 %v3759_v22, %v14858_v29  ;;  %v12808_v43 = vpop.f32.mrb[42].mxu0  ;;  %v12810_v42 = vpop.f32.mrb[58].mxu1 }
 0x6cb   :  { %v3939_v62 = vadd.f32 %v3819_v59, %v14859_v44  ;;  %v3943_v28 = vadd.f32 %v3823_v4, %v14860_v7  ;;  %v3947_v54 = vadd.f32 %v3827_v1, %v14861_v53  ;;  %v3951_v20 = vadd.f32 %v3831_v10, %v14862_v6  ;;  %v12816_v63 = vpop.f32.mrb[43].mxu0  ;;  %v12818_v36 = vpop.f32.mrb[59].mxu1  ;;  %v14874_v6 = vld [vmem:[#allocation22_spill] sm:$0xff] }
 0x6cc   :  { %v3959_v19 = vadd.f32 %v3835_v32, %v14863_v16  ;;  %v3963_v48 = vadd.f32 %v3839_v38, %v14864_v49  ;;  %v7758_v58 = vmul.f32 -1.442695, %v3955_v3  ;;  %v3967_v8 = vadd.f32 %v3843_v30, %v14865_v41  ;;  %v14866_v30 = vld [vmem:[#allocation49_spill] sm:$0xff]  ;;  %v14873_v41 = vld [vmem:[#allocation11_spill] sm:$0xff]  ;;  %v14879_v44 = vld [vmem:[#allocation26_spill] sm:$0xff] }
 0x6cd   :  { %v7754_v21 = vmul.f32 -1.442695, %v3939_v62  ;;  %v7755_v27 = vmul.f32 -1.442695, %v3943_v28  ;;  %v7756_v22 = vmul.f32 -1.442695, %v3947_v54 }
 0x6ce   :  { %v7757_v59 = vmul.f32 -1.442695, %v3951_v20  ;;  %9220 = vpow2.f32 %v7758_v58  ;;  %v7759_v4 = vmul.f32 -1.442695, %v3959_v19  ;;  %v3821_v1 = vrot.slane %v12801_v50, 4  ;;  %v14867_v28 = vld [vmem:[#allocation51_spill] sm:$0xff] }
 0x6cf   :  { %9222 = vpow2.f32 %v7754_v21  ;;  %v3825_v10 = vrot.slane %v12801_v50, 5  ;;  %v7760_v29 = vmul.f32 -1.442695, %v3963_v48  ;;  %v3829_v32 = vrot.slane %v12801_v50, 6  ;;  %v14868_v20 = vld [vmem:[#allocation53_spill] sm:$0xff]  ;;  %v14869_v58 = vld [vmem:[#allocation55_spill] sm:$0xff] }
 0x6d0   :  { %9224 = vpow2.f32 %v7755_v27  ;;  %v7761_v38 = vmul.f32 -1.442695, %v3967_v8  ;;  %v3833_v3 = vrot.slane %v12801_v50, 7  ;;  %v3941_v62 = vadd.f32 %v3821_v1, %v14866_v30  ;;  %v14870_v27 = vld [vmem:[#allocation57_spill] sm:$0xff] }
 0x6d1   :  { %9226 = vpow2.f32 %v7756_v22  ;;  %v3945_v54 = vadd.f32 %v3825_v10, %v14867_v28  ;;  %v3949_v19 = vadd.f32 %v3829_v32, %v14868_v20  ;;  %v3957_v48 = vadd.f32 %v12801_v50, %v14870_v27 }
 0x6d2   :  { %9228 = vpow2.f32 %v7757_v59  ;;  %v3953_v21 = vadd.f32 %v3833_v3, %v14869_v58  ;;  %v3837_v1 = vrot.slane %v12801_v50, 1  ;;  %v3820_v32 = vrot.slane %v12803_v23, 4 }
 0x6d3   :  { %9230 = vpow2.f32 %v7759_v4  ;;  %v3834_v35 = vrot.slane %v12805_v37, 7 }
 0x6d4   :  { %9232 = vpow2.f32 %v7760_v29  ;;  %v3841_v29 = vrot.slane %v12801_v50, 2  ;;  %v3940_v49 = vadd.f32 %v3820_v32, %v14873_v41  ;;  %v3844_v32 = vrot.slane %v12803_v23, 3  ;;  %v14878_v41 = vld [vmem:[#allocation25_spill] sm:$0xff] }
 0x6d5   :  { %9234 = vpow2.f32 %v7761_v38 }
 0x6d6   :  { %9236 = vtanh.f32 %v3941_v62  ;;  %v3824_v62 = vrot.slane %v12803_v23, 5 }
 0x6d7   :  { %9238 = vtanh.f32 %v3945_v54 }
 0x6d8   :  { %v9221_v8 = vpop.eup %9220  ;;  %9240 = vtanh.f32 %v3949_v19  ;;  %v3845_v19 = vrot.slane %v12801_v50, 3  ;;  %v3836_v50 = vrot.slane %v12803_v23, 1  ;;  %v3944_v53 = vadd.f32 %v3824_v62, %v14874_v6 }
 0x6d9   :  { %v9223_v22 = vpop.eup %9222  ;;  %v4055_v59 = vadd.f32 1.0, %v9221_v8  ;;  %9242 = vtanh.f32 %v3953_v21  ;;  %v3828_v8 = vrot.slane %v12803_v23, 6  ;;  %v3956_v62 = vadd.f32 %v12803_v23, %v14878_v41 }
 0x6da   :  { %v9225_v4 = vpop.eup %9224  ;;  %v4051_v10 = vadd.f32 1.0, %v9223_v22  ;;  %9244 = vtanh.f32 %v3957_v48  ;;  %v14871_v22 = vld [vmem:[#allocation3_spill] sm:$0xff]  ;;  %v3832_v48 = vrot.slane %v12803_v23, 7  ;;  %v7770_v6 = vmul.f32 -1.442695, %v3940_v49 }
 0x6db   :  { %v9227_v38 = vpop.eup %9226  ;;  %v4052_v3 = vadd.f32 1.0, %v9225_v4  ;;  %9246 = vrcp.f32 %v4055_v59  ;;  %v3961_v20 = vadd.f32 %v3837_v1, %v14871_v22  ;;  %v14872_v59 = vld [vmem:[#allocation6_spill] sm:$0xff]  ;;  %v3840_v1 = vrot.slane %v12803_v23, 2  ;;  %v14875_v22 = vld [vmem:[#allocation23_spill] sm:$0xff]  ;;  %v14881_v23 = vld [vmem:[#allocation28_spill] sm:$0xff] }
 0x6dc   :  { %v9229_v54 = vpop.eup %9228  ;;  %v4053_v27 = vadd.f32 1.0, %v9227_v38  ;;  %9248 = vrcp.f32 %v4051_v10  ;;  %v3965_v4 = vadd.f32 %v3841_v29, %v14872_v59  ;;  %v3948_v7 = vadd.f32 %v3828_v8, %v14875_v22  ;;  %v14877_v59 = vld [vmem:[#allocation24_spill] sm:$0xff] }
 0x6dd   :  { %v9231_v21 = vpop.eup %9230  ;;  %v4054_v58 = vadd.f32 1.0, %v9229_v54  ;;  %9250 = vrcp.f32 %v4052_v3  ;;  %v3960_v8 = vadd.f32 %v3836_v50, %v14879_v44  ;;  %v7771_v22 = vmul.f32 -1.442695, %v3944_v53  ;;  %v14882_v50 = vld [vmem:[#allocation50_spill] sm:$0xff] }
 0x6de   :  { %v9233_v28 = vpop.eup %9232  ;;  %v4056_v30 = vadd.f32 1.0, %v9231_v21  ;;  %9252 = vrcp.f32 %v4053_v27  ;;  %v14876_v27 = vld [vmem:[#allocation8_spill] sm:$0xff]  ;;  %v3968_v49 = vadd.f32 %v3844_v32, %v14881_v23  ;;  %v7774_v53 = vmul.f32 -1.442695, %v3956_v62 }
 0x6df   :  { %v9235_v38 = vpop.eup %9234  ;;  %v4057_v10 = vadd.f32 1.0, %v9233_v28  ;;  %9254 = vrcp.f32 %v4054_v58  ;;  %v3969_v29 = vadd.f32 %v3845_v19, %v14876_v27  ;;  %v3952_v28 = vadd.f32 %v3832_v48, %v14877_v59  ;;  %v14880_v27 = vld [vmem:[#allocation27_spill] sm:$0xff]  ;;  %v14885_v62 = vld [vmem:[#allocation56_spill] sm:$0xff] }
 0x6e0   :  { %v9237_v54 = vpop.eup %9236  ;;  %v4058_v3 = vadd.f32 1.0, %v9235_v38  ;;  %9256 = vrcp.f32 %v4056_v30  ;;  %v3822_v30 = vrot.slane %v12805_v37, 4  ;;  %v3964_v16 = vadd.f32 %v3840_v1, %v14880_v27  ;;  %v14883_v1 = vld [vmem:[#allocation52_spill] sm:$0xff] }
 0x6e1   :  { %v9239_v21 = vpop.eup %9238  ;;  %9258 = vrcp.f32 %v4057_v10  ;;  %v3826_v10 = vrot.slane %v12805_v37, 5  ;;  %v7772_v48 = vmul.f32 -1.442695, %v3948_v7  ;;  %v7773_v41 = vmul.f32 -1.442695, %v3952_v28  ;;  %v14884_v28 = vld [vmem:[#allocation54_spill] sm:$0xff] }
 0x6e2   :  { %v9241_v58 = vpop.eup %9240  ;;  %9260 = vrcp.f32 %v4058_v3  ;;  %v3830_v3 = vrot.slane %v12805_v37, 6  ;;  %v3942_v44 = vadd.f32 %v3822_v30, %v14882_v50  ;;  %v7775_v7 = vmul.f32 -1.442695, %v3960_v8  ;;  %v14892_v50 = vld [vmem:[#allocation31_spill] sm:$0xff] }
 0x6e3   :  { %v9243_v38 = vpop.eup %9242  ;;  %9262 = vtanh.f32 %v3961_v20  ;;  %v3946_v27 = vadd.f32 %v3826_v10, %v14883_v1  ;;  %v7776_v32 = vmul.f32 -1.442695, %v3964_v16  ;;  %v3954_v30 = vadd.f32 %v3834_v35, %v14885_v62 }
 0x6e4   :  { %v9245_v19 = vpop.eup %9244  ;;  %9264 = vtanh.f32 %v3965_v4  ;;  %v3950_v23 = vadd.f32 %v3830_v3, %v14884_v28 }
 0x6e5   :  { %v9247_v59 = vpop.eup %9246  ;;  %9266 = vtanh.f32 %v3969_v29  ;;  %v7787_v16 = vmul.f32 -1.442695, %v3946_v27  ;;  %v7789_v3 = vmul.f32 -1.442695, %v3954_v30  ;;  %v3842_v27 = vrot.slane %v12805_v37, 2 }
 0x6e6   :  { %v9249_v20 = vpop.eup %9248  ;;  %v12859_v40 = vmul.f32 %v9247_v59, %v9245_v19  ;;  %9268 = vpow2.f32 %v7770_v6  ;;  %v7777_v6 = vmul.f32 -1.442695, %v3968_v49 }
 0x6e7   :  { %v9251_v4 = vpop.eup %9250  ;;  %v12862_v13 = vmul.f32 %v9249_v20, %v9237_v54  ;;  %9270 = vpow2.f32 %v7771_v22  ;;  %v14886_v22 = vld [vmem:[#allocation2_spill] sm:$0xff] }
 0x6e8   :  { %v9253_v29 = vpop.eup %9252  ;;  %v12865_v17 = vmul.f32 %v9251_v4, %v9239_v21  ;;  %9272 = vpow2.f32 %v7772_v48  ;;  %v3958_v8 = vadd.f32 %v12805_v37, %v14886_v22  ;;  %v7786_v21 = vmul.f32 -1.442695, %v3942_v44 }
 0x6e9   :  { %v9255_v59 = vpop.eup %9254  ;;  %v12868_v19 = vmul.f32 %v9253_v29, %v9241_v58  ;;  %9274 = vpow2.f32 %v7773_v41  ;;  %v7788_v58 = vmul.f32 -1.442695, %v3950_v23  ;;  %v3838_v44 = vrot.slane %v12805_v37, 1 }
 0x6ea   :  { %v9257_v54 = vpop.eup %9256  ;;  %v12871_v20 = vmul.f32 %v9255_v59, %v9243_v38  ;;  %9276 = vpow2.f32 %v7774_v53  ;;  %v7790_v49 = vmul.f32 -1.442695, %v3958_v8  ;;  %v3846_v29 = vrot.slane %v12805_v37, 3  ;;  %v14889_v37 = vld [vmem:[#allocation9_spill] sm:$0xff] }
 0x6eb   :  { %v12875_v10 = vpop.eup %9258  ;;  %9278 = vpow2.f32 %v7775_v7 }
 0x6ec   :  { %v12877_v48 = vpop.eup %9260  ;;  %9280 = vpow2.f32 %v7776_v32 }
 0x6ed   :  { %v9263_v41 = vpop.eup %9262  ;;  %9282 = vpow2.f32 %v7777_v6 }
 0x6ee   :  { %v12879_v35 = vpop.eup %9264  ;;  %v12881_v38 = vmul.f32 %v9263_v41, %v9257_v54  ;;  %9284 = vpow2.f32 %v7786_v21  ;;  %v14887_v54 = vld [vmem:[#allocation4_spill] sm:$0xff] }
 0x6ef   :  { %v12883_v53 = vpop.eup %9266  ;;  %9286 = vpow2.f32 %v7787_v16  ;;  %v3962_v8 = vadd.f32 %v3838_v44, %v14887_v54  ;;  %v14888_v16 = vld [vmem:[#allocation7_spill] sm:$0xff]  ;;  %v14891_v54 = vld [vmem:[#allocation30_spill] sm:$0xff] }
 0x6f0   :  { %v9269_v4 = vpop.eup %9268  ;;  %9288 = vpow2.f32 %v7788_v58  ;;  %v3966_v22 = vadd.f32 %v3842_v27, %v14888_v16  ;;  %v4326_v58 = vrot.slane %v12555_v55, 7  ;;  %v3847_v27 = vrot.slane %v12808_v43, 4 }
 0x6f1   :  { %v9271_v7 = vpop.eup %9270  ;;  %v4147_v23 = vadd.f32 1.0, %v9269_v4  ;;  %9290 = vpow2.f32 %v7789_v3  ;;  %v3970_v3 = vadd.f32 %v3846_v29, %v14889_v37 }
 0x6f2   :  { %v9273_v32 = vpop.eup %9272  ;;  %v4148_v59 = vadd.f32 1.0, %v9271_v7  ;;  %9292 = vpow2.f32 %v7790_v49  ;;  %v4327_v49 = vrot.slane %v12558_v11, 7  ;;  %v7792_v55 = vmul.f32 -1.442695, %v3966_v22 }
 0x6f3   :  { %v9275_v6 = vpop.eup %9274  ;;  %v4149_v30 = vadd.f32 1.0, %v9273_v32  ;;  %9294 = vrcp.f32 %v4147_v23  ;;  %v4323_v23 = vrot.slane %v12515_v26, 7  ;;  %v4324_v11 = vrot.slane %v12518_v25, 7 }
 0x6f4   :  { %v9277_v21 = vpop.eup %9276  ;;  %v4150_v41 = vadd.f32 1.0, %v9275_v6  ;;  %9296 = vrcp.f32 %v4148_v59  ;;  %v7791_v59 = vmul.f32 -1.442695, %v3962_v8  ;;  %v3863_v22 = vrot.slane %v12808_v43, 1 }
 0x6f5   :  { %v9279_v62 = vpop.eup %9278  ;;  %v4151_v4 = vadd.f32 1.0, %v9277_v21  ;;  %9298 = vrcp.f32 %v4149_v30  ;;  %v3851_v30 = vrot.slane %v12808_v43, 5  ;;  %v3855_v21 = vrot.slane %v12808_v43, 6 }
 0x6f6   :  { %v9281_v28 = vpop.eup %9280  ;;  %v4152_v7 = vadd.f32 1.0, %v9279_v62  ;;  %9300 = vrcp.f32 %v4150_v41  ;;  %v7793_v62 = vmul.f32 -1.442695, %v3970_v3  ;;  %v3859_v41 = vrot.slane %v12808_v43, 7 }
 0x6f7   :  { %v9283_v44 = vpop.eup %9282  ;;  %v4153_v32 = vadd.f32 1.0, %v9281_v28  ;;  %9302 = vrcp.f32 %v4151_v4  ;;  %v4325_v28 = vrot.slane %v12552_v9, 7  ;;  %v3867_v3 = vrot.slane %v12808_v43, 2 }
 0x6f8   :  { %v9285_v6 = vpop.eup %9284  ;;  %v4154_v16 = vadd.f32 1.0, %v9283_v44  ;;  %9304 = vrcp.f32 %v4152_v7  ;;  %v14890_v44 = vld [vmem:[#allocation29_spill] sm:$0xff]  ;;  %v3975_v1 = vadd.f32 %v3851_v30, %v14891_v54  ;;  %v3979_v2 = vadd.f32 %v3855_v21, %v14892_v50 }
 0x6f9   :  { %v9287_v29 = vpop.eup %9286  ;;  %9306 = vrcp.f32 %v4153_v32  ;;  %v4259_v8 = vadd.f32 1.0, %v9285_v6  ;;  %v3971_v37 = vadd.f32 %v3847_v27, %v14890_v44  ;;  %v3871_v6 = vrot.slane %v12808_v43, 3 }
 0x6fa   :  { %v9289_v26 = vpop.eup %9288  ;;  %9308 = vrcp.f32 %v4154_v16  ;;  %v4260_v7 = vadd.f32 1.0, %v9287_v29  ;;  %v3983_v27 = vadd.f32 %v3859_v41, %v14697_v24  ;;  %v7763_v21 = vmul.f32 -1.442695, %v3975_v1 }
 0x6fb   :  { %v9291_v4 = vpop.eup %9290  ;;  %9310 = vpow2.f32 %v7791_v59  ;;  %v4261_v25 = vadd.f32 1.0, %v9289_v26  ;;  %v3987_v26 = vadd.f32 %v12808_v43, %v14698_v12  ;;  %v7762_v30 = vmul.f32 -1.442695, %v3971_v37 }
 0x6fc   :  { %v9293_v32 = vpop.eup %9292  ;;  %9312 = vpow2.f32 %v7792_v55  ;;  %v4262_v9 = vadd.f32 1.0, %v9291_v4  ;;  %v7764_v41 = vmul.f32 -1.442695, %v3979_v2  ;;  %v3991_v43 = vadd.f32 %v3863_v22, %v14699_v15 }
 0x6fd   :  { %v9295_v16 = vpop.eup %9294  ;;  %9314 = vpow2.f32 %v7793_v62  ;;  %v4263_v34 = vadd.f32 1.0, %v9293_v32  ;;  %v7765_v37 = vmul.f32 -1.442695, %v3983_v27  ;;  %v3999_v1 = vadd.f32 %v3871_v6, %v14701_v45 }
 0x6fe   :  { %v9297_v59 = vpop.eup %9296  ;;  %v4355_v29 = vmul.f32 %v9295_v16, %v4323_v23  ;;  %9316 = vrcp.f32 %v4259_v8 }
 0x6ff   :  { %v9299_v44 = vpop.eup %9298  ;;  %v4356_v55 = vmul.f32 %v9297_v59, %v4324_v11  ;;  %9318 = vrcp.f32 %v4260_v7  ;;  %v4328_v59 = vrot.slane %v12561_v56, 7 }
 0x700   :  { %v9301_v54 = vpop.eup %9300  ;;  %v4357_v62 = vmul.f32 %v9299_v44, %v4325_v28  ;;  %v12910_v4 = vadd.f32 %v12862_v13, %v4355_v29  ;;  %9320 = vrcp.f32 %v4261_v25  ;;  %v3995_v28 = vadd.f32 %v3867_v3, %v14700_v61 }
 0x701   :  { %v9303_v50 = vpop.eup %9302  ;;  %v4358_v23 = vmul.f32 %v9301_v54, %v4326_v58  ;;  %v12913_v8 = vadd.f32 %v12865_v17, %v4356_v55  ;;  %9322 = vrcp.f32 %v4262_v9  ;;  %v7766_v13 = vmul.f32 -1.442695, %v3987_v26 }
 0x702   :  { %v9305_v11 = vpop.eup %9304  ;;  %v4359_v7 = vmul.f32 %v9303_v50, %v4327_v49  ;;  %9324 = vrcp.f32 %v4263_v34  ;;  %v3849_v17 = vrot.slane %v12810_v42, 4  ;;  %v7767_v34 = vmul.f32 -1.442695, %v3991_v43 }
 0x703   :  { %v9307_v32 = vpop.eup %9306  ;;  %9326 = vpow2.f32 %v7762_v30  ;;  %v3853_v50 = vrot.slane %v12810_v42, 5  ;;  %v7768_v25 = vmul.f32 -1.442695, %v3995_v28  ;;  %v3857_v3 = vrot.slane %v12810_v42, 6 }
 0x704   :  { %v9309_v44 = vpop.eup %9308  ;;  %9328 = vpow2.f32 %v7763_v21  ;;  %v7769_v9 = vmul.f32 -1.442695, %v3999_v1  ;;  %v4329_v29 = vrot.slane %v12563_v51, 7  ;;  %v3973_v27 = vadd.f32 %v3849_v17, %v11248_v18 }
 0x705   :  { %v9311_v54 = vpop.eup %9310  ;;  %9330 = vpow2.f32 %v7764_v41  ;;  %v4330_v26 = vrot.slane %v12565_v5, 7  ;;  %v3861_v30 = vrot.slane %v12810_v42, 7  ;;  %v3977_v21 = vadd.f32 %v3853_v50, %v11258_v57 }
 0x706   :  { %v9313_v2 = vpop.eup %9312  ;;  %v4264_v58 = vadd.f32 1.0, %v9311_v54  ;;  %9332 = vpow2.f32 %v7765_v37  ;;  %v3865_v43 = vrot.slane %v12810_v42, 1  ;;  %v3981_v56 = vadd.f32 %v3857_v3, %v14764_v14 }
 0x707   :  { %v12920_v49 = vpop.eup %9314  ;;  %v4265_v22 = vadd.f32 1.0, %v9313_v2  ;;  %9334 = vpow2.f32 %v7766_v13  ;;  %v4360_v51 = vmul.f32 %v9305_v11, %v4328_v59  ;;  %v4361_v28 = vmul.f32 %v9307_v32, %v4329_v29 }
 0x708   :  { %v12923_v16 = vpop.eup %9316  ;;  %9336 = vrcp.f32 %v4264_v58  ;;  %v4362_v13 = vmul.f32 %v9309_v44, %v4330_v26  ;;  %v4377_v5 = vmul.f32 %v12879_v35, %v12875_v10  ;;  %v4378_v54 = vmul.f32 %v12883_v53, %v12877_v48 }
 0x709   :  { %v12925_v6 = vpop.eup %9318  ;;  %9338 = vrcp.f32 %v4265_v22  ;;  %v12946_v17 = vadd.f32 %v12868_v19, %v4357_v62  ;;  %v12949_v2 = vadd.f32 %v12871_v20, %v4358_v23  ;;  %v12952_v32 = vadd.f32 %v12859_v40, %v4359_v7 }
 0x70a   :  { %v12930_v55 = vpop.eup %9320  ;;  %9340 = vpow2.f32 %v7767_v34  ;;  %v12955_v44 = vadd.f32 %v12881_v38, %v4360_v51  ;;  %v12957_v34 = vadd.f32 %v4377_v5, %v4361_v28  ;;  %v12959_v48 = vadd.f32 %v4378_v54, %v4362_v13  ;;  %v14893_v13 = vld [vmem:[#allocation38_spill] sm:$0xff] }
 0x70b   :  { %v12935_v41 = vpop.eup %9322  ;;  %9342 = vpow2.f32 %v7768_v25  ;;  %v3869_v20 = vrot.slane %v12810_v42, 2  ;;  %v3985_v40 = vadd.f32 %v3861_v30, %v14765_v33  ;;  %v3848_v38 = vrot.slane %v12816_v63, 4  ;;  %v14894_v54 = vld [vmem:[#allocation42_spill] sm:$0xff] }
 0x70c   :  { %v12939_v37 = vpop.eup %9324  ;;  %9344 = vpow2.f32 %v7769_v9  ;;  %v3989_v22 = vadd.f32 %v12810_v42, %v14766_v60  ;;  %v3852_v25 = vrot.slane %v12816_v63, 5  ;;  %v3873_v9 = vrot.slane %v12810_v42, 3 }
 0x70d   :  { %v9327_v1 = vpop.eup %9326  ;;  %9346 = vtanh.f32 %v3973_v27  ;;  %v3993_v59 = vadd.f32 %v3865_v43, %v14767_v46  ;;  %v3856_v29 = vrot.slane %v12816_v63, 6  ;;  %v3997_v26 = vadd.f32 %v3869_v20, %v14829_v39 }
 0x70e   :  { %v9329_v11 = vpop.eup %9328  ;;  %v4059_v58 = vadd.f32 1.0, %v9327_v1  ;;  %9348 = vtanh.f32 %v3977_v21  ;;  %v3860_v30 = vrot.slane %v12816_v63, 7  ;;  %v3864_v21 = vrot.slane %v12816_v63, 1 }
 0x70f   :  { %v9331_v10 = vpop.eup %9330  ;;  %v4060_v35 = vadd.f32 1.0, %v9329_v11  ;;  %9350 = vtanh.f32 %v3981_v56  ;;  %v3868_v28 = vrot.slane %v12816_v63, 2  ;;  %v3972_v5 = vadd.f32 %v3848_v38, %v14893_v13  ;;  %v14897_v38 = vld [vmem:[#allocation46_spill] sm:$0xff] }
 0x710   :  { %v9333_v19 = vpop.eup %9332  ;;  %v4061_v53 = vadd.f32 1.0, %v9331_v10  ;;  %9352 = vrcp.f32 %v4059_v58  ;;  %v3872_v43 = vrot.slane %v12816_v63, 3  ;;  %v3976_v11 = vadd.f32 %v3852_v25, %v14894_v54 }
 0x711   :  { %v9335_v62 = vpop.eup %9334  ;;  %v4062_v23 = vadd.f32 1.0, %v9333_v19  ;;  %9354 = vrcp.f32 %v4060_v35  ;;  %v14895_v35 = vld [vmem:[#allocation74_spill] sm:$0xff] }
 0x712   :  { %v12964_v7 = vpop.eup %9336  ;;  %v4063_v50 = vadd.f32 1.0, %v9335_v62  ;;  %9356 = vrcp.f32 %v4061_v53  ;;  %v4001_v19 = vadd.f32 %v3873_v9, %v14895_v35  ;;  %v14896_v53 = vld [vmem:[#allocation43_spill] sm:$0xff]  ;;  %v14899_v9 = vld [vmem:[#allocation48_spill] sm:$0xff]  ;;  %v7779_v35 = vmul.f32 -1.442695, %v3976_v11 }
 0x713   :  { %v12969_v3 = vpop.eup %9338  ;;  %9358 = vrcp.f32 %v4062_v23  ;;  %v3980_v20 = vadd.f32 %v3856_v29, %v14896_v53  ;;  %v3984_v23 = vadd.f32 %v3860_v30, %v14833_v52  ;;  %v4000_v29 = vadd.f32 %v3872_v43, %v14899_v9 }
 0x714   :  { %v9341_v27 = vpop.eup %9340  ;;  %9360 = vrcp.f32 %v4063_v50  ;;  %v3992_v50 = vadd.f32 %v3864_v21, %v14897_v38  ;;  %v3858_v21 = vrot.slane %v12818_v36, 6 }
 0x715   :  { %v9343_v56 = vpop.eup %9342  ;;  %v4064_v51 = vadd.f32 1.0, %v9341_v27  ;;  %9362 = vtanh.f32 %v3985_v40  ;;  %v3988_v40 = vadd.f32 %v12816_v63, %v14834_v0  ;;  %v14898_v27 = vld [vmem:[#allocation47_spill] sm:$0xff]  ;;  %v7780_v63 = vmul.f32 -1.442695, %v3980_v20 }
 0x716   :  { %v9345_v42 = vpop.eup %9344  ;;  %v4065_v1 = vadd.f32 1.0, %v9343_v56  ;;  %9364 = vtanh.f32 %v3989_v22  ;;  %v3996_v25 = vadd.f32 %v3868_v28, %v14898_v27  ;;  %v7778_v56 = vmul.f32 -1.442695, %v3972_v5  ;;  %v14900_v20 = vld [vmem:[#allocation59_spill] sm:$0xff] }
 0x717   :  { %v9347_v58 = vpop.eup %9346  ;;  %v4066_v10 = vadd.f32 1.0, %v9345_v42  ;;  %9366 = vrcp.f32 %v4064_v51  ;;  %v3850_v51 = vrot.slane %v12818_v36, 4  ;;  %v7781_v5 = vmul.f32 -1.442695, %v3984_v23 }
 0x718   :  { %v9349_v62 = vpop.eup %9348  ;;  %9368 = vrcp.f32 %v4065_v1  ;;  %v3854_v1 = vrot.slane %v12818_v36, 5  ;;  %v3862_v27 = vrot.slane %v12818_v36, 7  ;;  %v7782_v43 = vmul.f32 -1.442695, %v3988_v40 }
 0x719   :  { %v9351_v22 = vpop.eup %9350  ;;  %9370 = vrcp.f32 %v4066_v10  ;;  %v3974_v11 = vadd.f32 %v3850_v51, %v14775_v47 }
 0x71a   :  { %v9353_v42 = vpop.eup %9352  ;;  %9372 = vtanh.f32 %v3993_v59 }
 0x71b   :  { %v9355_v30 = vpop.eup %9354  ;;  %9374 = vtanh.f32 %v3997_v26  ;;  %v12991_v52 = vmul.f32 %v9353_v42, %v9347_v58  ;;  %v7783_v58 = vmul.f32 -1.442695, %v3992_v50  ;;  %v3978_v42 = vadd.f32 %v3854_v1, %v14900_v20 }
 0x71c   :  { %v9357_v10 = vpop.eup %9356  ;;  %9376 = vtanh.f32 %v4001_v19  ;;  %v12994_v28 = vmul.f32 %v9355_v30, %v9349_v62  ;;  %v7784_v19 = vmul.f32 -1.442695, %v3996_v25  ;;  %v14901_v62 = vld [vmem:[#allocation62_spill] sm:$0xff]  ;;  %v7794_v51 = vmul.f32 -1.442695, %v3974_v11 }
 0x71d   :  { %v9359_v59 = vpop.eup %9358  ;;  %v12997_v38 = vmul.f32 %v9357_v10, %v9351_v22  ;;  %9378 = vpow2.f32 %v7778_v56  ;;  %v3982_v30 = vadd.f32 %v3858_v21, %v14901_v62  ;;  %v7785_v22 = vmul.f32 -1.442695, %v4000_v29  ;;  %v14902_v10 = vld [vmem:[#allocation65_spill] sm:$0xff] }
 0x71e   :  { %v9361_v26 = vpop.eup %9360  ;;  %9380 = vpow2.f32 %v7779_v35  ;;  %v3986_v56 = vadd.f32 %v3862_v27, %v14902_v10  ;;  %v14903_v35 = vld [vmem:[#allocation67_spill] sm:$0xff]  ;;  %v7795_v25 = vmul.f32 -1.442695, %v3978_v42 }
 0x71f   :  { %v9363_v9 = vpop.eup %9362  ;;  %9382 = vpow2.f32 %v7780_v63  ;;  %v3990_v50 = vadd.f32 %v12818_v36, %v14903_v35  ;;  %v7796_v21 = vmul.f32 -1.442695, %v3982_v30  ;;  %v14905_v35 = vld [vmem:[#allocation72_spill] sm:$0xff] }
 0x720   :  { %v9365_v23 = vpop.eup %9364  ;;  %v13002_v0 = vmul.f32 %v9363_v9, %v9359_v59  ;;  %9384 = vpow2.f32 %v7781_v5  ;;  %v7797_v5 = vmul.f32 -1.442695, %v3986_v56 }
 0x721   :  { %v9367_v40 = vpop.eup %9366  ;;  %v13005_v53 = vmul.f32 %v9365_v23, %v9361_v26  ;;  %9386 = vpow2.f32 %v7782_v43  ;;  %v7798_v27 = vmul.f32 -1.442695, %v3990_v50  ;;  %v3866_v43 = vrot.slane %v12818_v36, 1 }
 0x722   :  { %v9369_v1 = vpop.eup %9368  ;;  %9388 = vpow2.f32 %v7783_v58  ;;  %v3870_v58 = vrot.slane %v12818_v36, 2 }
 0x723   :  { %v9371_v63 = vpop.eup %9370  ;;  %9390 = vpow2.f32 %v7784_v19 }
 0x724   :  { %v9373_v9 = vpop.eup %9372  ;;  %9392 = vpow2.f32 %v7785_v22  ;;  %v3874_v22 = vrot.slane %v12818_v36, 3 }
 0x725   :  { %v9375_v29 = vpop.eup %9374  ;;  %v13009_v59 = vmul.f32 %v9373_v9, %v9367_v40  ;;  %9394 = vpow2.f32 %v7794_v51 }
 0x726   :  { %v9377_v26 = vpop.eup %9376  ;;  %9396 = vpow2.f32 %v7795_v25  ;;  %v13012_v23 = vmul.f32 %v9375_v29, %v9369_v1  ;;  %v14904_v25 = vld [vmem:[#allocation69_spill] sm:$0xff] }
 0x727   :  { %v9379_v11 = vpop.eup %9378  ;;  %9398 = vpow2.f32 %v7796_v21  ;;  %v13015_v42 = vmul.f32 %v9377_v26, %v9371_v63  ;;  %v3994_v1 = vadd.f32 %v3866_v43, %v14904_v25  ;;  %v3998_v21 = vadd.f32 %v3870_v58, %v14905_v35 }
 0x728   :  { %v9381_v19 = vpop.eup %9380  ;;  %v4155_v30 = vadd.f32 1.0, %v9379_v11  ;;  %9400 = vpow2.f32 %v7797_v5  ;;  %v14906_v11 = vld [vmem:[#allocation39_spill] sm:$0xff] }
 0x729   :  { %v9383_v56 = vpop.eup %9382  ;;  %v4156_v40 = vadd.f32 1.0, %v9381_v19  ;;  %9402 = vpow2.f32 %v7798_v27  ;;  %v4002_v10 = vadd.f32 %v3874_v22, %v14906_v11  ;;  %v7800_v43 = vmul.f32 -1.442695, %v3998_v21 }
 0x72a   :  { %v9385_v50 = vpop.eup %9384  ;;  %v4157_v51 = vadd.f32 1.0, %v9383_v56  ;;  %9404 = vrcp.f32 %v4155_v30  ;;  %v7799_v56 = vmul.f32 -1.442695, %v3994_v1  ;;  %v14907_v1 = vld [vmem:[#allocation18_spill] sm:$0xff] }
 0x72b   :  { %v9387_v9 = vpop.eup %9386  ;;  %v4158_v29 = vadd.f32 1.0, %v9385_v50  ;;  %9406 = vrcp.f32 %v4156_v40  ;;  %v7801_v40 = vmul.f32 -1.442695, %v4002_v10 }
 0x72c   :  { %v9389_v63 = vpop.eup %9388  ;;  %v4159_v26 = vadd.f32 1.0, %v9387_v9  ;;  %9408 = vrcp.f32 %v4157_v51 }
 0x72d   :  { %v9391_v36 = vpop.eup %9390  ;;  %v4160_v5 = vadd.f32 1.0, %v9389_v63  ;;  %9410 = vrcp.f32 %v4158_v29  ;;  %v4331_v29 = vrot.slane %v12634_v31, 7 }
 0x72e   :  { %v9393_v19 = vpop.eup %9392  ;;  %v4161_v27 = vadd.f32 1.0, %v9391_v36  ;;  %9412 = vrcp.f32 %v4159_v26  ;;  %v4332_v36 = vrot.slane %v14907_v1, 7  ;;  %v14912_v1 = vld [vmem:[#allocation68_spill] sm:$0xff] }
 0x72f   :  { %v9395_v30 = vpop.eup %9394  ;;  %v4162_v62 = vadd.f32 1.0, %v9393_v19  ;;  %9414 = vrcp.f32 %v4160_v5  ;;  %v14908_v19 = vld [vmem:[#allocation60_spill] sm:$0xff] }
 0x730   :  { %v9397_v50 = vpop.eup %9396  ;;  %9416 = vrcp.f32 %v4161_v27  ;;  %v4267_v9 = vadd.f32 1.0, %v9395_v30  ;;  %v4333_v27 = vrot.slane %v14908_v19, 7  ;;  %v14909_v30 = vld [vmem:[#allocation64_spill] sm:$0xff] }
 0x731   :  { %v9399_v58 = vpop.eup %9398  ;;  %9418 = vrcp.f32 %v4162_v62  ;;  %v4268_v22 = vadd.f32 1.0, %v9397_v50  ;;  %v4266_v50 = vadd.f32 1.0, %v12920_v49  ;;  %v14914_v49 = vld [vmem:[#allocation20_spill] sm:$0xff] }
 0x732   :  { %v9401_v51 = vpop.eup %9400  ;;  %9420 = vpow2.f32 %v7799_v56  ;;  %v4269_v63 = vadd.f32 1.0, %v9399_v58  ;;  %v4334_v56 = vrot.slane %v14909_v30, 7 }
 0x733   :  { %v9403_v11 = vpop.eup %9402  ;;  %9422 = vpow2.f32 %v7800_v43  ;;  %v4270_v5 = vadd.f32 1.0, %v9401_v51  ;;  %v14910_v43 = vld [vmem:[#allocation66_spill] sm:$0xff] }
 0x734   :  { %v9405_v26 = vpop.eup %9404  ;;  %9424 = vpow2.f32 %v7801_v40  ;;  %v4271_v35 = vadd.f32 1.0, %v9403_v11  ;;  %v4335_v58 = vrot.slane %v14910_v43, 7 }
 0x735   :  { %v9407_v21 = vpop.eup %9406  ;;  %v4363_v10 = vmul.f32 %v9405_v26, %v4331_v29  ;;  %9426 = vrcp.f32 %v4267_v9  ;;  %v4336_v29 = vrot.slane %v14912_v1, 7 }
 0x736   :  { %v9409_v62 = vpop.eup %9408  ;;  %v4364_v25 = vmul.f32 %v9407_v21, %v4332_v36  ;;  %9428 = vrcp.f32 %v4268_v22  ;;  %v4337_v36 = vrot.slane %v14914_v49, 7 }
 0x737   :  { %v9411_v31 = vpop.eup %9410  ;;  %v4365_v20 = vmul.f32 %v9409_v62, %v4333_v27  ;;  %v13028_v40 = vadd.f32 %v12991_v52, %v4363_v10  ;;  %9430 = vrcp.f32 %v4269_v63  ;;  %v14916_v52 = vld [vmem:[#allocation21_spill] sm:$0xff] }
 0x738   :  { %v9413_v51 = vpop.eup %9412  ;;  %v4366_v11 = vmul.f32 %v9411_v31, %v4334_v56  ;;  %v13032_v9 = vadd.f32 %v12994_v28, %v4364_v25  ;;  %9432 = vrcp.f32 %v4270_v5  ;;  %v4338_v27 = vrot.slane %v14916_v52, 7 }
 0x739   :  { %14911 = vst [vmem:[#allocation61_spill] sm:$0xff] %v13028_v40  ;;  %v9415_v26 = vpop.eup %9414  ;;  %v4367_v22 = vmul.f32 %v9413_v51, %v4335_v58  ;;  %9434 = vrcp.f32 %v4271_v35  ;;  %v13036_v21 = vadd.f32 %v12997_v38, %v4365_v20 }
 0x73a   :  { %14913 = vst [vmem:[#allocation63_spill] sm:$0xff] %v13032_v9  ;;  %v9417_v19 = vpop.eup %9416  ;;  %9436 = vrcp.f32 %v4266_v50  ;;  %v4368_v63 = vmul.f32 %v9415_v26, %v4336_v29  ;;  %v13040_v10 = vadd.f32 %v13002_v0, %v4366_v11 }
 0x73b   :  { %14915 = vst [vmem:[#allocation71_spill] sm:$0xff] %v13036_v21  ;;  %v9419_v62 = vpop.eup %9418  ;;  %v4369_v28 = vmul.f32 %v9417_v19, %v4337_v36  ;;  %v13043_v25 = vadd.f32 %v13005_v53, %v4367_v22  ;;  %9438 = vtanh.f32 %v12910_v4 }
 0x73c   :  { %14917 = vst [vmem:[#allocation73_spill] sm:$0xff] %v13040_v10  ;;  %v9421_v5 = vpop.eup %9420  ;;  %v4370_v35 = vmul.f32 %v9419_v62, %v4338_v27  ;;  %v13047_v38 = vadd.f32 %v13009_v59, %v4368_v63  ;;  %9440 = vtanh.f32 %v12913_v8 }
 0x73d   :  { %14918 = vst [vmem:[#allocation32_spill] sm:$0xff] %v13043_v25  ;;  %v9423_v20 = vpop.eup %9422  ;;  %v4272_v30 = vadd.f32 1.0, %v9421_v5  ;;  %v13051_v56 = vadd.f32 %v13012_v23, %v4369_v28  ;;  %9442 = vtanh.f32 %v12946_v17 }
 0x73e   :  { %14919 = vst [vmem:[#allocation34_spill] sm:$0xff] %v13047_v38  ;;  %v9425_v0 = vpop.eup %9424  ;;  %v4273_v50 = vadd.f32 1.0, %v9423_v20  ;;  %v13055_v53 = vadd.f32 %v13015_v42, %v4370_v35  ;;  %9444 = vtanh.f32 %v12949_v2 }
 0x73f   :  { %14920 = vst [vmem:[#allocation70_spill] sm:$0xff] %v13051_v56  ;;  %v9427_v31 = vpop.eup %9426  ;;  %v4274_v43 = vadd.f32 1.0, %v9425_v0  ;;  %9446 = vrcp.f32 %v4272_v30 }
 0x740   :  { %14921 = vst [vmem:[#allocation35_spill] sm:$0xff] %v13055_v53  ;;  %v9429_v59 = vpop.eup %9428  ;;  %9448 = vrcp.f32 %v4273_v50 }
 0x741   :  { %v13058_v58 = vpop.eup %9430  ;;  %9450 = vrcp.f32 %v4274_v43 }
 0x742   :  { %v13060_v51 = vpop.eup %9432  ;;  %9452 = vtanh.f32 %v12952_v32 }
 0x743   :  { %v13063_v23 = vpop.eup %9434  ;;  %9454 = vtanh.f32 %v12955_v44 }
 0x744   :  { %v9437_v42 = vpop.eup %9436  ;;  %9456 = vtanh.f32 %v12957_v34 }
 0x745   :  { %v9439_v1 = vpop.eup %9438  ;;  %9458 = vtanh.f32 %v12959_v48 }
 0x746   :  { %v9441_v29 = vpop.eup %9440  ;;  %9460 = vtanh.f32 %v13028_v40  ;;  %v4419_v11 = vmul.f32 %v9439_v1, %v12923_v16 }
 0x747   :  { %v9443_v26 = vpop.eup %9442  ;;  %9462 = vtanh.f32 %v13032_v9  ;;  %v4420_v49 = vmul.f32 %v9441_v29, %v12925_v6 }
 0x748   :  { %v9445_v36 = vpop.eup %9444  ;;  %9464 = vtanh.f32 %v13036_v21  ;;  %v4421_v22 = vmul.f32 %v9443_v26, %v12930_v55  ;;  %v4435_v19 = vpack.c.bf16 %v4419_v11, %v4419_v11 }
 0x749   :  { %v9447_v52 = vpop.eup %9446  ;;  %9466 = vtanh.f32 %v13040_v10  ;;  %v4422_v27 = vmul.f32 %v9445_v36, %v12935_v41  ;;  %v4436_v63 = vpack.c.bf16 %v4420_v49, %v4420_v49 }
 0x74a   :  { %v9449_v62 = vpop.eup %9448  ;;  %9468 = vtanh.f32 %v13043_v25  ;;  %v4437_v16 = vpack.c.bf16 %v4421_v22, %v4421_v22  ;;  %v4467_v28 = vunpack.c.l.b16 %v4435_v19 }
 0x74b   :  { %v9451_v5 = vpop.eup %9450  ;;  %9470 = vtanh.f32 %v13047_v38  ;;  %v4438_v6 = vpack.c.bf16 %v4422_v27, %v4422_v27  ;;  %v4468_v35 = vunpack.c.l.b16 %v4436_v63 }
 0x74c   :  { %v9453_v20 = vpop.eup %9452  ;;  %9472 = vtanh.f32 %v13051_v56  ;;  %v4469_v55 = vunpack.c.l.b16 %v4437_v16  ;;  %v4483_v30 = vrot.slane %v4467_v28, 4 }
 0x74d   :  { %v9455_v0 = vpop.eup %9454  ;;  %9474 = vtanh.f32 %v13055_v53  ;;  %v4423_v41 = vmul.f32 %v9453_v20, %v12939_v37  ;;  %v4470_v50 = vunpack.c.l.b16 %v4438_v6  ;;  %v4484_v43 = vrot.slane %v4468_v35, 3 }
 0x74e   :  { %v9457_v1 = vpop.eup %9456  ;;  %v4424_v29 = vmul.f32 %v9455_v0, %v12964_v7  ;;  %v4486_v11 = vrot.slane %v4469_v55, 2 }
 0x74f   :  { %v9459_v26 = vpop.eup %9458  ;;  %v4425_v49 = vmul.f32 %v9457_v1, %v12969_v3  ;;  %v4439_v36 = vpack.c.bf16 %v4423_v41, %v4423_v41  ;;  %v4485_v22 = vsel %vm1325_vm1, %v4484_v43, %v4483_v30  ;;  %v4488_v19 = vrot.slane %v4470_v50, 1 }
 0x750   :  { %v9461_v27 = vpop.eup %9460  ;;  %v4426_v63 = vmul.f32 %v9459_v26, %v9437_v42  ;;  %v4440_v16 = vpack.c.bf16 %v4424_v29, %v4424_v29  ;;  %v4487_v28 = vsel %vm1328_vm2, %v4486_v11, %v4485_v22 }
 0x751   :  { %v9463_v53 = vpop.eup %9462  ;;  %v4427_v37 = vmul.f32 %v9461_v27, %v9427_v31  ;;  %v4441_v6 = vpack.c.bf16 %v4425_v49, %v4425_v49  ;;  %v4471_v35 = vunpack.c.l.b16 %v4439_v36  ;;  %v4489_v20 = vsel %vm1331_vm3, %v4488_v19, %v4487_v28 }
 0x752   :  { %v9465_v7 = vpop.eup %9464  ;;  %v4428_v55 = vmul.f32 %v9463_v53, %v9429_v59  ;;  %v4442_v0 = vpack.c.bf16 %v4426_v63, %v4426_v63  ;;  %v4472_v56 = vunpack.c.l.b16 %v4440_v16 }
 0x753   :  { %v9467_v3 = vpop.eup %9466  ;;  %v4429_v41 = vmul.f32 %v9465_v7, %v13058_v58  ;;  %v4443_v30 = vpack.c.bf16 %v4427_v37, %v4427_v37  ;;  %v4473_v50 = vunpack.c.l.b16 %v4441_v6  ;;  %v4490_v42 = vsel %vm1334_vm4, %v4471_v35, %v4489_v20 }
 0x754   :  { %v9469_v43 = vpop.eup %9468  ;;  %v4430_v1 = vmul.f32 %v9467_v3, %v13060_v51  ;;  %v4444_v29 = vpack.c.bf16 %v4428_v55, %v4428_v55  ;;  %v4474_v31 = vunpack.c.l.b16 %v4442_v0  ;;  %v4491_v11 = vrot.slane %v4472_v56, 7 }
 0x755   :  { %v9471_v26 = vpop.eup %9470  ;;  %v4431_v49 = vmul.f32 %v9469_v43, %v13063_v23  ;;  %v4445_v36 = vpack.c.bf16 %v4429_v41, %v4429_v41  ;;  %v4475_v53 = vunpack.c.l.b16 %v4443_v30  ;;  %v4493_v59 = vrot.slane %v4473_v50, 6 }
 0x756   :  { %v9473_v22 = vpop.eup %9472  ;;  %v4432_v19 = vmul.f32 %v9471_v26, %v9447_v52  ;;  %v4446_v27 = vpack.c.bf16 %v4430_v1, %v4430_v1  ;;  %v4476_v58 = vunpack.c.l.b16 %v4444_v29  ;;  %v4492_v63 = vsel %vm1337_vm5, %v4491_v11, %v4490_v42 }
 0x757   :  { %v9475_v16 = vpop.eup %9474  ;;  %v4433_v28 = vmul.f32 %v9473_v22, %v9449_v62  ;;  %v4447_v37 = vpack.c.bf16 %v4431_v49, %v4431_v49  ;;  %v4477_v6 = vunpack.c.l.b16 %v4445_v36  ;;  %v4494_v51 = vsel %vm1340_vm6, %v4493_v59, %v4492_v63  ;;  %v10407_v63 = vld [vmem:[%s14351_s4 + $0x2c] ss:$16 sps:$4 sm:$0xff]  }
 0x758   :  { %v4434_v35 = vmul.f32 %v9475_v16, %v9451_v5  ;;  %v4448_v56 = vpack.c.bf16 %v4432_v19, %v4432_v19  ;;  %v4478_v20 = vunpack.c.l.b16 %v4446_v27  ;;  %v4495_v7 = vrot.slane %v4474_v31, 5  ;;  %v10404_v19 = vld [vmem:[%s14351_s4] ss:$16 sps:$4 sm:$0xff]   ;;  %v10405_v27 = vld [vmem:[%s14351_s4 + $0x8] ss:$16 sps:$4 sm:$0xff]  }
 0x759   :  { %v4449_v23 = vpack.c.bf16 %v4433_v28, %v4433_v28  ;;  %v4497_v55 = vrot.slane %v4475_v53, 4  ;;  %v4498_v0 = vrot.slane %v4476_v58, 3  ;;  %v4500_v30 = vrot.slane %v4477_v6, 2  ;;  %v10406_v58 = vld [vmem:[%s14351_s4 + $0x24] ss:$16 sps:$4 sm:$0xff]  }
 0x75a   :  { %v4450_v3 = vpack.c.bf16 %v4434_v35, %v4434_v35  ;;  %v4480_v41 = vunpack.c.l.b16 %v4448_v56  ;;  %v4496_v52 = vsel %vm1343_vm7, %v4495_v7, %v4494_v51  ;;  %v4502_v62 = vrot.slane %v4478_v20, 1  ;;  %v10408_v28 = vld [vmem:[%s14351_s4 + $0x20] ss:$16 sps:$4 sm:$0xff]   ;;  %v10410_v6 = vld [vmem:[%s14351_s4 + $0x44] ss:$16 sps:$4 sm:$0xff]  }
 0x75b   :  { %v4481_v50 = vunpack.c.l.b16 %v4449_v23  ;;  %v4499_v42 = vsel %vm1325_vm1, %v4498_v0, %v4497_v55  ;;  %v4479_v43 = vunpack.c.l.b16 %v4447_v37  ;;  %v14922_v16 = vmov 0   ;;  %v10409_v37 = vld [vmem:[%s14351_s4 + $0x28] ss:$16 sps:$4 sm:$0xff]   ;;  %v10411_v51 = vld [vmem:[%s14351_s4 + $0x4c] ss:$16 sps:$4 sm:$0xff]  }
 0x75c   :  { %v4482_v1 = vunpack.c.l.b16 %v4450_v3  ;;  %v4501_v29 = vsel %vm1328_vm2, %v4500_v30, %v4499_v42  ;;  %v4505_v11 = vrot.slane %v4480_v41, 7  ;;  %v10412_v35 = vld [vmem:[%s14351_s4 + $0x40] ss:$16 sps:$4 sm:$0xff]   ;;  %v10413_v56 = vld [vmem:[%s14351_s4 + $0x48] ss:$16 sps:$4 sm:$0xff]  }
 0x75d   :  { %v4503_v5 = vsel %vm1331_vm3, %v4502_v62, %v4501_v29  ;;  %v4507_v26 = vrot.slane %v4481_v50, 6  ;;  %v10414_v20 = vld [vmem:[%s14351_s4 + $0x64] ss:$16 sps:$4 sm:$0xff]   ;;  %v10415_v7 = vld [vmem:[%s14351_s4 + $0x6c] ss:$16 sps:$4 sm:$0xff]  }
 0x75e   :  { %v4504_v31 = vsel %vm1334_vm4, %v4479_v43, %v4503_v5  ;;  %v4509_v36 = vrot.slane %v4482_v1, 5  ;;  %v10416_v23 = vld [vmem:[%s14351_s4 + $0x60] ss:$16 sps:$4 sm:$0xff]   ;;  %v10417_v55 = vld [vmem:[%s14351_s4 + $0x68] ss:$16 sps:$4 sm:$0xff]  }
 0x75f   :  { %v4506_v49 = vsel %vm1337_vm5, %v4505_v11, %v4504_v31  ;;  %v10418_v0 = vld [vmem:[%s14351_s4 + $0x84] ss:$16 sps:$4 sm:$0xff]   ;;  %v10419_v3 = vld [vmem:[%s14351_s4 + $0x8c] ss:$16 sps:$4 sm:$0xff]   ;;  %v10420_v41 = vld [vmem:[%s14351_s4 + $0x80] ss:$16 sps:$4 sm:$0xff]  }
 0x760   :  { %v4508_v53 = vsel %vm1340_vm6, %v4507_v26, %v4506_v49  ;;  %v10422_v30 = vld [vmem:[%s14351_s4 + $0xa4] ss:$16 sps:$4 sm:$0xff]   ;;  %v10423_v50 = vld [vmem:[%s14351_s4 + $0xac] ss:$16 sps:$4 sm:$0xff]   ;;  %v10424_v42 = vld [vmem:[%s14351_s4 + $0xa0] ss:$16 sps:$4 sm:$0xff]  }
 0x761   :  { %v4510_v59 = vsel %vm1343_vm7, %v4509_v36, %v4508_v53  ;;  %v10425_v62 = vld [vmem:[%s14351_s4 + $0xa8] ss:$16 sps:$4 sm:$0xff]   ;;  %v10426_v43 = vld [vmem:[%s14351_s4 + $0xc4] ss:$16 sps:$4 sm:$0xff]   ;;  %v10427_v1 = vld [vmem:[%s14351_s4 + $0xcc] ss:$16 sps:$4 sm:$0xff]  }
 0x762   :  { %v4511_v22 = vpack.c.b16 %v4510_v59, %v4496_v52  ;;  %v10421_v52 = vld [vmem:[%s14351_s4 + $0x88] ss:$16 sps:$4 sm:$0xff]   ;;  %v10428_v29 = vld [vmem:[%s14351_s4 + $0xc0] ss:$16 sps:$4 sm:$0xff]   ;;  %v10430_v11 = vld [vmem:[%s14351_s4 + $0xe4] ss:$16 sps:$4 sm:$0xff]  }
 0x763   :  { %v10429_v5 = vld [vmem:[%s14351_s4 + $0xc8] ss:$16 sps:$4 sm:$0xff]   ;;  %v10431_v31 = vld [vmem:[%s14351_s4 + $0xec] ss:$16 sps:$4 sm:$0xff]   ;;  %v10432_v26 = vld [vmem:[%s14351_s4 + $0xe0] ss:$16 sps:$4 sm:$0xff]  }
 0x764   :  { %4546 = vmatmul.mubr.bf16.vlgmr.msra.gmra.mrb[44].mxu0 %v4511_v22  ;;  %4589 = vmatmul.mubr.bf16.vlgmr.msra.gmra.mrb[60].mxu1 %v4511_v22  ;;  %v10433_v49 = vld [vmem:[%s14351_s4 + $0xe8] ss:$16 sps:$4 sm:$0xff]   ;;  %v10434_v36 = vld [vmem:[%s14351_s4 + $0x4] ss:$16 sps:$4 sm:$0xff]   ;;  %v10435_v53 = vld [vmem:[%s14351_s4 + $0xc] ss:$16 sps:$4 sm:$0xff]  }
 0x765   :  { %5302 = vmatpush1.bf16.msra.mxu0 %v10404_v19  ;;  %5345 = vmatpush1.bf16.msra.mxu1 %v10405_v27 }
 0x766   :  { %5303 = vmatprep.subr.bf16.mxu0 %v10406_v58  ;;  %5346 = vmatprep.subr.bf16.mxu1 %v10407_v63 }
 0x767   :  { %5333 = vmatprep.mubr.bf16.mxu0 %v14922_v16  ;;  %5376 = vmatprep.mubr.bf16.mxu1 %v14922_v16 }
 0x769   :  { %5304 = vmatpush1.bf16.msra.mxu0 %v10408_v28  ;;  %5347 = vmatpush1.bf16.msra.mxu1 %v10409_v37 }
 0x76a   :  { %5305 = vmatprep.subr.bf16.mxu0 %v10410_v6  ;;  %5348 = vmatprep.subr.bf16.mxu1 %v10411_v51 }
 0x76d   :  { %5306 = vmatpush1.bf16.msra.mxu0 %v10412_v35  ;;  %5349 = vmatpush1.bf16.msra.mxu1 %v10413_v56  ;;  %v14923_v56 = vld [vmem:[#allocation16_spill] sm:$0xff] }
 0x76e   :  { %5307 = vmatprep.subr.bf16.mxu0 %v10414_v20  ;;  %5350 = vmatprep.subr.bf16.mxu1 %v10415_v7 }
 0x771   :  { %5308 = vmatpush1.bf16.msra.mxu0 %v10416_v23  ;;  %5351 = vmatpush1.bf16.msra.mxu1 %v10417_v55  ;;  %v14924_v55 = vld [vmem:[#allocation10_spill] sm:$0xff] }
 0x772   :  { %5309 = vmatprep.subr.bf16.mxu0 %v10418_v0  ;;  %5352 = vmatprep.subr.bf16.mxu1 %v10419_v3  ;;  %v14925_v3 = vld [vmem:[#allocation12_spill] sm:$0xff] }
 0x775   :  { %5310 = vmatpush1.bf16.msra.mxu0 %v10420_v41  ;;  %5353 = vmatpush1.bf16.msra.mxu1 %v10421_v52  ;;  %v14926_v52 = vld [vmem:[#allocation13_spill] sm:$0xff] }
 0x776   :  { %5311 = vmatprep.subr.bf16.mxu0 %v10422_v30  ;;  %5354 = vmatprep.subr.bf16.mxu1 %v10423_v50  ;;  %v14927_v50 = vld [vmem:[#allocation14_spill] sm:$0xff] }
 0x779   :  { %5312 = vmatpush1.bf16.msra.mxu0 %v10424_v42  ;;  %5355 = vmatpush1.bf16.msra.mxu1 %v10425_v62 }
 0x77a   :  { %5313 = vmatprep.subr.bf16.mxu0 %v10426_v43  ;;  %5356 = vmatprep.subr.bf16.mxu1 %v10427_v1  ;;  %v14928_v1 = vld [vmem:[#allocation15_spill] sm:$0xff] }
 0x77d   :  { %5314 = vmatpush1.bf16.msra.mxu0 %v10428_v29  ;;  %5357 = vmatpush1.bf16.msra.mxu1 %v10429_v5  ;;  %v14929_v5 = vld [vmem:[#allocation17_spill] sm:$0xff] }
 0x77e   :  { %5315 = vmatprep.subr.bf16.mxu0 %v10430_v11  ;;  %5358 = vmatprep.subr.bf16.mxu1 %v10431_v31 }
 0x781   :  { %5316 = vmatpush1.bf16.msra.mxu0 %v10432_v26  ;;  %5359 = vmatpush1.bf16.msra.mxu1 %v10433_v49  ;;  %v14930_v26 = vld [vmem:[#allocation19_spill] sm:$0xff] }
 0x782   :  { %6089 = vmatprep.subr.bf16.mxu0 %v10434_v36  ;;  %6132 = vmatprep.subr.bf16.mxu1 %v10435_v53 }
 0x837   :  { %v4547_v59 = vpop.f32.mrb[44].mxu0  ;;  %v13198_v22 = vpop.f32.mrb[60].mxu1 }
 0x838   :  { %v4607_v19 = vrot.slane %v4547_v59, 3  ;;  %v4611_v27 = vrot.slane %v4547_v59, 4  ;;  %v4615_v58 = vrot.slane %v4547_v59, 5  ;;  %v4619_v63 = vrot.slane %v4547_v59, 6  ;;  %v13200_v28 = vpop.f32.mrb[45].mxu0  ;;  %v13202_v37 = vpop.f32.mrb[61].mxu1 }
 0x839   :  { %v4623_v6 = vrot.slane %v4547_v59, 7  ;;  %v4627_v51 = vrot.slane %v4547_v59, 1  ;;  %v4631_v35 = vrot.slane %v4547_v59, 2  ;;  %v4747_v20 = vadd.f32 %v4547_v59, %v14923_v56  ;;  %v13205_v7 = vpop.f32.mrb[46].mxu0  ;;  %v13207_v23 = vpop.f32.mrb[62].mxu1 }
 0x83a   :  { %v4727_v0 = vadd.f32 %v4607_v19, %v14924_v55  ;;  %v4731_v41 = vadd.f32 %v4611_v27, %v14925_v3  ;;  %v4735_v30 = vadd.f32 %v4615_v58, %v14926_v52  ;;  %v4739_v42 = vadd.f32 %v4619_v63, %v14927_v50  ;;  %v13213_v62 = vpop.f32.mrb[47].mxu0  ;;  %v13215_v43 = vpop.f32.mrb[63].mxu1  ;;  %v14940_v52 = vld [vmem:[#allocation23_spill] sm:$0xff] }
 0x83b   :  { %v4743_v29 = vadd.f32 %v4623_v6, %v14928_v1  ;;  %v4751_v11 = vadd.f32 %v4627_v51, %v14929_v5  ;;  %v7807_v31 = vmul.f32 -1.442695, %v4747_v20  ;;  %v4755_v49 = vadd.f32 %v4631_v35, %v14930_v26 }
 0x83c   :  { %v7802_v36 = vmul.f32 -1.442695, %v4727_v0  ;;  %v7803_v53 = vmul.f32 -1.442695, %v4731_v41  ;;  %v7804_v59 = vmul.f32 -1.442695, %v4735_v30 }
 0x83d   :  { %v7805_v19 = vmul.f32 -1.442695, %v4739_v42  ;;  %9476 = vpow2.f32 %v7807_v31  ;;  %v7806_v27 = vmul.f32 -1.442695, %v4743_v29  ;;  %v4609_v58 = vrot.slane %v13198_v22, 3  ;;  %v14931_v0 = vld [vmem:[#allocation49_spill] sm:$0xff] }
 0x83e   :  { %9478 = vpow2.f32 %v7802_v36  ;;  %v4613_v63 = vrot.slane %v13198_v22, 4  ;;  %v7808_v56 = vmul.f32 -1.442695, %v4751_v11  ;;  %v4617_v6 = vrot.slane %v13198_v22, 5  ;;  %v14932_v30 = vld [vmem:[#allocation51_spill] sm:$0xff]  ;;  %v14933_v29 = vld [vmem:[#allocation53_spill] sm:$0xff] }
 0x83f   :  { %9480 = vpow2.f32 %v7803_v53  ;;  %v7809_v51 = vmul.f32 -1.442695, %v4755_v49  ;;  %v4621_v20 = vrot.slane %v13198_v22, 6  ;;  %v4625_v35 = vrot.slane %v13198_v22, 7  ;;  %v14934_v36 = vld [vmem:[#allocation55_spill] sm:$0xff]  ;;  %v14935_v53 = vld [vmem:[#allocation57_spill] sm:$0xff] }
 0x840   :  { %9482 = vpow2.f32 %v7804_v59  ;;  %v4729_v41 = vadd.f32 %v4609_v58, %v14931_v0  ;;  %v4733_v42 = vadd.f32 %v4613_v63, %v14932_v30  ;;  %v4737_v31 = vadd.f32 %v4617_v6, %v14933_v29  ;;  %v14939_v0 = vld [vmem:[#allocation22_spill] sm:$0xff] }
 0x841   :  { %9484 = vpow2.f32 %v7805_v19  ;;  %v4741_v11 = vadd.f32 %v4621_v20, %v14934_v36  ;;  %v4745_v26 = vadd.f32 %v4625_v35, %v14935_v53  ;;  %v4629_v6 = vrot.slane %v13198_v22, 1  ;;  %v14937_v36 = vld [vmem:[#allocation11_spill] sm:$0xff] }
 0x842   :  { %9486 = vpow2.f32 %v7806_v27  ;;  %v4608_v27 = vrot.slane %v13200_v28, 3  ;;  %v4624_v53 = vrot.slane %v13200_v28, 7 }
 0x843   :  { %9488 = vpow2.f32 %v7808_v56 }
 0x844   :  { %9490 = vpow2.f32 %v7809_v51  ;;  %v4612_v51 = vrot.slane %v13200_v28, 4 }
 0x845   :  { %9492 = vtanh.f32 %v4729_v41  ;;  %v14936_v41 = vld [vmem:[#allocation3_spill] sm:$0xff] }
 0x846   :  { %9494 = vtanh.f32 %v4733_v42  ;;  %v4749_v42 = vadd.f32 %v13198_v22, %v14936_v41  ;;  %v14938_v41 = vld [vmem:[#allocation6_spill] sm:$0xff]  ;;  %v4732_v50 = vadd.f32 %v4612_v51, %v14939_v0 }
 0x847   :  { %v9477_v49 = vpop.eup %9476  ;;  %9496 = vtanh.f32 %v4737_v31  ;;  %v4616_v31 = vrot.slane %v13200_v28, 5  ;;  %v4753_v30 = vadd.f32 %v4629_v6, %v14938_v41  ;;  %v14943_v6 = vld [vmem:[#allocation25_spill] sm:$0xff]  ;;  %v14944_v0 = vld [vmem:[#allocation26_spill] sm:$0xff] }
 0x848   :  { %v9479_v59 = vpop.eup %9478  ;;  %v4844_v19 = vadd.f32 1.0, %v9477_v49  ;;  %9498 = vtanh.f32 %v4741_v11  ;;  %v4744_v41 = vadd.f32 %v4624_v53, %v14943_v6  ;;  %v14946_v53 = vld [vmem:[#allocation28_spill] sm:$0xff] }
 0x849   :  { %v9481_v1 = vpop.eup %9480  ;;  %v4839_v58 = vadd.f32 1.0, %v9479_v59  ;;  %9500 = vtanh.f32 %v4745_v26  ;;  %v4633_v26 = vrot.slane %v13198_v22, 2  ;;  %v4628_v22 = vrot.slane %v13200_v28, 1 }
 0x84a   :  { %v9483_v56 = vpop.eup %9482  ;;  %v4840_v63 = vadd.f32 1.0, %v9481_v1  ;;  %9502 = vrcp.f32 %v4844_v19  ;;  %v4620_v1 = vrot.slane %v13200_v28, 6  ;;  %v4736_v3 = vadd.f32 %v4616_v31, %v14940_v52 }
 0x84b   :  { %v9485_v20 = vpop.eup %9484  ;;  %v4841_v35 = vadd.f32 1.0, %v9483_v56  ;;  %9504 = vrcp.f32 %v4839_v58  ;;  %v4728_v56 = vadd.f32 %v4608_v27, %v14937_v36  ;;  %v4632_v27 = vrot.slane %v13200_v28, 2  ;;  %v14942_v36 = vld [vmem:[#allocation24_spill] sm:$0xff] }
 0x84c   :  { %v9487_v11 = vpop.eup %9486  ;;  %v4842_v49 = vadd.f32 1.0, %v9485_v20  ;;  %9506 = vrcp.f32 %v4840_v63  ;;  %v4748_v31 = vadd.f32 %v13200_v28, %v14944_v0  ;;  %v7819_v52 = vmul.f32 -1.442695, %v4732_v50  ;;  %v14947_v0 = vld [vmem:[#allocation50_spill] sm:$0xff] }
 0x84d   :  { %v9489_v59 = vpop.eup %9488  ;;  %v4843_v19 = vadd.f32 1.0, %v9487_v11  ;;  %9508 = vrcp.f32 %v4841_v35  ;;  %v14941_v35 = vld [vmem:[#allocation8_spill] sm:$0xff]  ;;  %v7818_v51 = vmul.f32 -1.442695, %v4728_v56  ;;  %v4756_v56 = vadd.f32 %v4632_v27, %v14946_v53 }
 0x84e   :  { %v9491_v58 = vpop.eup %9490  ;;  %v4845_v29 = vadd.f32 1.0, %v9489_v59  ;;  %9510 = vrcp.f32 %v4842_v49  ;;  %v4757_v55 = vadd.f32 %v4633_v26, %v14941_v35  ;;  %v4740_v59 = vadd.f32 %v4620_v1, %v14942_v36  ;;  %v14945_v35 = vld [vmem:[#allocation27_spill] sm:$0xff] }
 0x84f   :  { %v9493_v20 = vpop.eup %9492  ;;  %v4846_v63 = vadd.f32 1.0, %v9491_v58  ;;  %9512 = vrcp.f32 %v4843_v19  ;;  %v4610_v58 = vrot.slane %v13202_v37, 3  ;;  %v4752_v5 = vadd.f32 %v4628_v22, %v14945_v35  ;;  %v14948_v22 = vld [vmem:[#allocation52_spill] sm:$0xff] }
 0x850   :  { %v9495_v11 = vpop.eup %9494  ;;  %9514 = vrcp.f32 %v4845_v29  ;;  %v4614_v29 = vrot.slane %v13202_v37, 4  ;;  %v7820_v1 = vmul.f32 -1.442695, %v4736_v3  ;;  %v7821_v6 = vmul.f32 -1.442695, %v4740_v59  ;;  %v14949_v59 = vld [vmem:[#allocation54_spill] sm:$0xff] }
 0x851   :  { %v9497_v49 = vpop.eup %9496  ;;  %9516 = vrcp.f32 %v4846_v63  ;;  %v4618_v63 = vrot.slane %v13202_v37, 5  ;;  %v7822_v28 = vmul.f32 -1.442695, %v4744_v41  ;;  %v4626_v50 = vrot.slane %v13202_v37, 7 }
 0x852   :  { %v9499_v19 = vpop.eup %9498  ;;  %9518 = vtanh.f32 %v4749_v42  ;;  %v4622_v42 = vrot.slane %v13202_v37, 6  ;;  %v4730_v38 = vadd.f32 %v4610_v58, %v14947_v0  ;;  %v7823_v3 = vmul.f32 -1.442695, %v4748_v31  ;;  %v14950_v58 = vld [vmem:[#allocation56_spill] sm:$0xff] }
 0x853   :  { %v9501_v26 = vpop.eup %9500  ;;  %9520 = vtanh.f32 %v4753_v30  ;;  %v4734_v35 = vadd.f32 %v4614_v29, %v14948_v22  ;;  %v7824_v27 = vmul.f32 -1.442695, %v4752_v5  ;;  %v4738_v53 = vadd.f32 %v4618_v63, %v14949_v59  ;;  %v14957_v59 = vld [vmem:[#allocation31_spill] sm:$0xff] }
 0x854   :  { %v9503_v36 = vpop.eup %9502  ;;  %9522 = vtanh.f32 %v4757_v55  ;;  %v7825_v21 = vmul.f32 -1.442695, %v4756_v56  ;;  %v4742_v0 = vadd.f32 %v4622_v42, %v14950_v58  ;;  %v7834_v29 = vmul.f32 -1.442695, %v4730_v38 }
 0x855   :  { %v9505_v16 = vpop.eup %9504  ;;  %9524 = vpow2.f32 %v7818_v51  ;;  %v7835_v5 = vmul.f32 -1.442695, %v4734_v35 }
 0x856   :  { %v9507_v30 = vpop.eup %9506  ;;  %v13258_v25 = vmul.f32 %v9505_v16, %v9493_v20  ;;  %9526 = vpow2.f32 %v7819_v52  ;;  %v14951_v52 = vld [vmem:[#allocation2_spill] sm:$0xff]  ;;  %v7837_v56 = vmul.f32 -1.442695, %v4742_v0 }
 0x857   :  { %v9509_v55 = vpop.eup %9508  ;;  %v13261_v10 = vmul.f32 %v9507_v30, %v9495_v11  ;;  %9528 = vpow2.f32 %v7820_v1  ;;  %v4746_v31 = vadd.f32 %v4626_v50, %v14951_v52  ;;  %v4630_v50 = vrot.slane %v13202_v37, 1 }
 0x858   :  { %v9511_v51 = vpop.eup %9510  ;;  %v13264_v41 = vmul.f32 %v9509_v55, %v9497_v49  ;;  %9530 = vpow2.f32 %v7821_v6  ;;  %v7836_v49 = vmul.f32 -1.442695, %v4738_v53  ;;  %v4634_v53 = vrot.slane %v13202_v37, 2  ;;  %v14952_v55 = vld [vmem:[#allocation4_spill] sm:$0xff] }
 0x859   :  { %v9513_v16 = vpop.eup %9512  ;;  %v13267_v20 = vmul.f32 %v9511_v51, %v9499_v19  ;;  %9532 = vpow2.f32 %v7822_v28  ;;  %v7838_v28 = vmul.f32 -1.442695, %v4746_v31  ;;  %v14953_v31 = vld [vmem:[#allocation7_spill] sm:$0xff] }
 0x85a   :  { %v13270_v11 = vpop.eup %9514  ;;  %v13272_v1 = vmul.f32 %v9513_v16, %v9501_v26  ;;  %9534 = vpow2.f32 %v7823_v3 }
 0x85b   :  { %v13274_v63 = vpop.eup %9516  ;;  %9536 = vpow2.f32 %v7824_v27  ;;  %v4750_v27 = vadd.f32 %v13202_v37, %v14952_v55  ;;  %v14956_v55 = vld [vmem:[#allocation30_spill] sm:$0xff] }
 0x85c   :  { %v9519_v6 = vpop.eup %9518  ;;  %9538 = vpow2.f32 %v7825_v21 }
 0x85d   :  { %v13276_v42 = vpop.eup %9520  ;;  %v13278_v19 = vmul.f32 %v9519_v6, %v9503_v36  ;;  %9540 = vpow2.f32 %v7834_v29  ;;  %v4754_v29 = vadd.f32 %v4630_v50, %v14953_v31  ;;  %v14954_v6 = vld [vmem:[#allocation9_spill] sm:$0xff]  ;;  %v7839_v37 = vmul.f32 -1.442695, %v4750_v27 }
 0x85e   :  { %v13280_v38 = vpop.eup %9522  ;;  %9542 = vpow2.f32 %v7835_v5 }
 0x85f   :  { %v9525_v26 = vpop.eup %9524  ;;  %9544 = vpow2.f32 %v7836_v49 }
 0x860   :  { %v9527_v35 = vpop.eup %9526  ;;  %v4935_v30 = vadd.f32 1.0, %v9525_v26  ;;  %9546 = vpow2.f32 %v7837_v56  ;;  %v4758_v26 = vadd.f32 %v4634_v53, %v14954_v6 }
 0x861   :  { %v9529_v21 = vpop.eup %9528  ;;  %v4936_v0 = vadd.f32 1.0, %v9527_v35  ;;  %9548 = vpow2.f32 %v7838_v28  ;;  %v5114_v35 = vrot.slane %v12949_v2, 7  ;;  %v5112_v2 = vrot.slane %v12913_v8, 7 }
 0x862   :  { %v9531_v3 = vpop.eup %9530  ;;  %v4937_v36 = vadd.f32 1.0, %v9529_v21  ;;  %9550 = vrcp.f32 %v4935_v30  ;;  %v5111_v30 = vrot.slane %v12910_v4, 7 }
 0x863   :  { %v9533_v51 = vpop.eup %9532  ;;  %v4938_v16 = vadd.f32 1.0, %v9531_v3  ;;  %9552 = vrcp.f32 %v4936_v0  ;;  %v4635_v0 = vrot.slane %v13205_v7, 3 }
 0x864   :  { %v9535_v5 = vpop.eup %9534  ;;  %v4939_v49 = vadd.f32 1.0, %v9533_v51  ;;  %9554 = vrcp.f32 %v4937_v36  ;;  %v7840_v51 = vmul.f32 -1.442695, %v4754_v29  ;;  %v4639_v36 = vrot.slane %v13205_v7, 4 }
 0x865   :  { %v9537_v56 = vpop.eup %9536  ;;  %v4940_v28 = vadd.f32 1.0, %v9535_v5  ;;  %9556 = vrcp.f32 %v4938_v16  ;;  %v7841_v5 = vmul.f32 -1.442695, %v4758_v26  ;;  %v4643_v16 = vrot.slane %v13205_v7, 5 }
 0x866   :  { %v9539_v21 = vpop.eup %9538  ;;  %v4941_v52 = vadd.f32 1.0, %v9537_v56  ;;  %9558 = vrcp.f32 %v4939_v49  ;;  %v5113_v49 = vrot.slane %v12946_v17, 7  ;;  %v4647_v56 = vrot.slane %v13205_v7, 6 }
 0x867   :  { %v9541_v3 = vpop.eup %9540  ;;  %v4942_v50 = vadd.f32 1.0, %v9539_v21  ;;  %9560 = vrcp.f32 %v4940_v28  ;;  %v4651_v29 = vrot.slane %v13205_v7, 7  ;;  %v14955_v21 = vld [vmem:[#allocation29_spill] sm:$0xff]  ;;  %v4655_v26 = vrot.slane %v13205_v7, 1 }
 0x868   :  { %v9543_v53 = vpop.eup %9542  ;;  %9562 = vrcp.f32 %v4941_v52  ;;  %v5047_v27 = vadd.f32 1.0, %v9541_v3  ;;  %v4759_v31 = vadd.f32 %v4635_v0, %v14955_v21  ;;  %v4763_v58 = vadd.f32 %v4639_v36, %v14956_v55 }
 0x869   :  { %v9545_v4 = vpop.eup %9544  ;;  %9564 = vrcp.f32 %v4942_v50  ;;  %v5048_v28 = vadd.f32 1.0, %v9543_v53  ;;  %v4659_v3 = vrot.slane %v13205_v7, 2  ;;  %v4767_v22 = vadd.f32 %v4643_v16, %v14957_v59 }
 0x86a   :  { %v9547_v6 = vpop.eup %9546  ;;  %9566 = vpow2.f32 %v7839_v37  ;;  %v5049_v8 = vadd.f32 1.0, %v9545_v4  ;;  %v4771_v0 = vadd.f32 %v4647_v56, %v14697_v24  ;;  %v4775_v4 = vadd.f32 %v4651_v29, %v14698_v12 }
 0x86b   :  { %v9549_v52 = vpop.eup %9548  ;;  %9568 = vpow2.f32 %v7840_v51  ;;  %v5050_v17 = vadd.f32 1.0, %v9547_v6  ;;  %v7810_v40 = vmul.f32 -1.442695, %v4759_v31 }
 0x86c   :  { %v9551_v50 = vpop.eup %9550  ;;  %9570 = vpow2.f32 %v7841_v5  ;;  %v5051_v9 = vadd.f32 1.0, %v9549_v52  ;;  %v7811_v5 = vmul.f32 -1.442695, %v4763_v58  ;;  %v7813_v31 = vmul.f32 -1.442695, %v4771_v0 }
 0x86d   :  { %v9553_v37 = vpop.eup %9552  ;;  %v5143_v53 = vmul.f32 %v9551_v50, %v5111_v30  ;;  %9572 = vrcp.f32 %v5047_v27  ;;  %v7812_v27 = vmul.f32 -1.442695, %v4767_v22  ;;  %v4787_v58 = vadd.f32 %v4659_v3, %v14701_v45 }
 0x86e   :  { %v9555_v21 = vpop.eup %9554  ;;  %v5144_v51 = vmul.f32 %v9553_v37, %v5112_v2  ;;  %9574 = vrcp.f32 %v5048_v28  ;;  %v4779_v2 = vadd.f32 %v13205_v7, %v14699_v15  ;;  %v4641_v7 = vrot.slane %v13207_v23, 4 }
 0x86f   :  { %v9557_v36 = vpop.eup %9556  ;;  %v5145_v55 = vmul.f32 %v9555_v21, %v5113_v49  ;;  %v13305_v6 = vadd.f32 %v13258_v25, %v5143_v53  ;;  %9576 = vrcp.f32 %v5049_v8  ;;  %v4783_v49 = vadd.f32 %v4655_v26, %v14700_v61 }
 0x870   :  { %v9559_v16 = vpop.eup %9558  ;;  %v5146_v59 = vmul.f32 %v9557_v36, %v5114_v35  ;;  %v13308_v30 = vadd.f32 %v13261_v10, %v5144_v51  ;;  %9578 = vrcp.f32 %v5050_v17  ;;  %v7814_v25 = vmul.f32 -1.442695, %v4775_v4 }
 0x871   :  { %v9561_v56 = vpop.eup %9560  ;;  %9580 = vrcp.f32 %v5051_v9  ;;  %v4637_v10 = vrot.slane %v13207_v23, 3  ;;  %v7815_v9 = vmul.f32 -1.442695, %v4779_v2  ;;  %v4645_v26 = vrot.slane %v13207_v23, 5 }
 0x872   :  { %v9563_v28 = vpop.eup %9562  ;;  %9582 = vpow2.f32 %v7810_v40  ;;  %v7816_v40 = vmul.f32 -1.442695, %v4783_v49  ;;  %v5115_v17 = vrot.slane %v12952_v32, 7  ;;  %v5116_v3 = vrot.slane %v12955_v44, 7 }
 0x873   :  { %v9565_v29 = vpop.eup %9564  ;;  %9584 = vpow2.f32 %v7811_v5  ;;  %v7817_v37 = vmul.f32 -1.442695, %v4787_v58  ;;  %v5117_v0 = vrot.slane %v12957_v34, 7  ;;  %v5118_v51 = vrot.slane %v12959_v48, 7 }
 0x874   :  { %v9567_v35 = vpop.eup %9566  ;;  %9586 = vpow2.f32 %v7812_v27  ;;  %v4761_v4 = vadd.f32 %v4637_v10, %v11248_v18  ;;  %v4649_v5 = vrot.slane %v13207_v23, 6  ;;  %v4653_v32 = vrot.slane %v13207_v23, 7 }
 0x875   :  { %v9569_v22 = vpop.eup %9568  ;;  %v5052_v21 = vadd.f32 1.0, %v9567_v35  ;;  %9588 = vpow2.f32 %v7813_v31  ;;  %v4765_v44 = vadd.f32 %v4641_v7, %v11258_v57  ;;  %v4769_v2 = vadd.f32 %v4645_v26, %v14764_v14 }
 0x876   :  { %v13316_v52 = vpop.eup %9570  ;;  %v5053_v8 = vadd.f32 1.0, %v9569_v22  ;;  %9590 = vpow2.f32 %v7814_v25  ;;  %v5147_v34 = vmul.f32 %v9559_v16, %v5115_v17  ;;  %v5148_v31 = vmul.f32 %v9561_v56, %v5116_v3 }
 0x877   :  { %v13319_v50 = vpop.eup %9572  ;;  %9592 = vrcp.f32 %v5052_v21  ;;  %v5149_v49 = vmul.f32 %v9563_v28, %v5117_v0  ;;  %v5150_v25 = vmul.f32 %v9565_v29, %v5118_v51  ;;  %v5165_v58 = vmul.f32 %v13276_v42, %v13270_v11 }
 0x878   :  { %v13323_v53 = vpop.eup %9574  ;;  %9594 = vrcp.f32 %v5053_v8  ;;  %v5166_v10 = vmul.f32 %v13280_v38, %v13274_v63  ;;  %v13343_v22 = vadd.f32 %v13264_v41, %v5145_v55  ;;  %v13346_v21 = vadd.f32 %v13267_v20, %v5146_v59 }
 0x879   :  { %v13328_v36 = vpop.eup %9576  ;;  %9596 = vpow2.f32 %v7815_v9  ;;  %v13349_v28 = vadd.f32 %v13272_v1, %v5147_v34  ;;  %v13352_v29 = vadd.f32 %v13278_v19, %v5148_v31  ;;  %v13354_v9 = vadd.f32 %v5165_v58, %v5149_v49 }
 0x87a   :  { %v13333_v27 = vpop.eup %9578  ;;  %9598 = vpow2.f32 %v7816_v40  ;;  %v13356_v63 = vadd.f32 %v5166_v10, %v5150_v25  ;;  %v4657_v59 = vrot.slane %v13207_v23, 1  ;;  %v4773_v20 = vadd.f32 %v4649_v5, %v14765_v33 }
 0x87b   :  { %v13336_v48 = vpop.eup %9580  ;;  %9600 = vpow2.f32 %v7817_v37  ;;  %v4777_v19 = vadd.f32 %v4653_v32, %v14766_v60  ;;  %v4636_v7 = vrot.slane %v13213_v62, 3  ;;  %v4640_v26 = vrot.slane %v13213_v62, 4 }
 0x87c   :  { %v9583_v35 = vpop.eup %9582  ;;  %9602 = vtanh.f32 %v4761_v4  ;;  %v4644_v17 = vrot.slane %v13213_v62, 5  ;;  %v4661_v37 = vrot.slane %v13207_v23, 2  ;;  %v4781_v0 = vadd.f32 %v13207_v23, %v14767_v46 }
 0x87d   :  { %v9585_v16 = vpop.eup %9584  ;;  %v4847_v56 = vadd.f32 1.0, %v9583_v35  ;;  %9604 = vtanh.f32 %v4765_v44  ;;  %v4648_v51 = vrot.slane %v13213_v62, 6  ;;  %v4785_v5 = vadd.f32 %v4657_v59, %v14829_v39  ;;  %v14958_v35 = vld [vmem:[#allocation43_spill] sm:$0xff] }
 0x87e   :  { %v9587_v11 = vpop.eup %9586  ;;  %v4848_v42 = vadd.f32 1.0, %v9585_v16  ;;  %9606 = vtanh.f32 %v4769_v2  ;;  %v4652_v32 = vrot.slane %v13213_v62, 7  ;;  %v4656_v44 = vrot.slane %v13213_v62, 1 }
 0x87f   :  { %v9589_v41 = vpop.eup %9588  ;;  %v4849_v38 = vadd.f32 1.0, %v9587_v11  ;;  %9608 = vrcp.f32 %v4847_v56  ;;  %v4660_v31 = vrot.slane %v13213_v62, 2  ;;  %v4760_v49 = vadd.f32 %v4636_v7, %v14893_v13  ;;  %v14959_v11 = vld [vmem:[#allocation74_spill] sm:$0xff] }
 0x880   :  { %v9591_v55 = vpop.eup %9590  ;;  %v4850_v1 = vadd.f32 1.0, %v9589_v41  ;;  %9610 = vrcp.f32 %v4848_v42  ;;  %v4764_v23 = vadd.f32 %v4640_v26, %v14894_v54  ;;  %v4768_v10 = vadd.f32 %v4644_v17, %v14958_v35  ;;  %v14960_v41 = vld [vmem:[#allocation44_spill] sm:$0xff] }
 0x881   :  { %v13362_v8 = vpop.eup %9592  ;;  %v4851_v40 = vadd.f32 1.0, %v9591_v55  ;;  %9612 = vrcp.f32 %v4849_v38  ;;  %v4789_v42 = vadd.f32 %v4661_v37, %v14959_v11  ;;  %v4772_v38 = vadd.f32 %v4648_v51, %v14960_v41  ;;  %v14964_v26 = vld [vmem:[#allocation48_spill] sm:$0xff] }
 0x882   :  { %v13366_v3 = vpop.eup %9594  ;;  %9614 = vrcp.f32 %v4850_v1  ;;  %v14962_v1 = vld [vmem:[#allocation46_spill] sm:$0xff]  ;;  %v4788_v17 = vadd.f32 %v4660_v31, %v14964_v26  ;;  %v7827_v37 = vmul.f32 -1.442695, %v4764_v23  ;;  %v7828_v51 = vmul.f32 -1.442695, %v4768_v10 }
 0x883   :  { %v9597_v4 = vpop.eup %9596  ;;  %9616 = vrcp.f32 %v4851_v40  ;;  %v4780_v7 = vadd.f32 %v13213_v62, %v14962_v1  ;;  %v14963_v40 = vld [vmem:[#allocation47_spill] sm:$0xff]  ;;  %v7829_v62 = vmul.f32 -1.442695, %v4772_v38  ;;  %v4654_v23 = vrot.slane %v13215_v43, 7 }
 0x884   :  { %v9599_v2 = vpop.eup %9598  ;;  %v4852_v34 = vadd.f32 1.0, %v9597_v4  ;;  %9618 = vtanh.f32 %v4773_v20  ;;  %v14961_v20 = vld [vmem:[#allocation45_spill] sm:$0xff]  ;;  %v14965_v38 = vld [vmem:[#allocation59_spill] sm:$0xff] }
 0x885   :  { %v9601_v25 = vpop.eup %9600  ;;  %v4853_v58 = vadd.f32 1.0, %v9599_v2  ;;  %9620 = vtanh.f32 %v4777_v19  ;;  %v4776_v55 = vadd.f32 %v4652_v32, %v14961_v20  ;;  %v4784_v19 = vadd.f32 %v4656_v44, %v14963_v40 }
 0x886   :  { %v9603_v16 = vpop.eup %9602  ;;  %v4854_v56 = vadd.f32 1.0, %v9601_v25  ;;  %9622 = vrcp.f32 %v4852_v34  ;;  %v7826_v2 = vmul.f32 -1.442695, %v4760_v49  ;;  %v4638_v34 = vrot.slane %v13215_v43, 3 }
 0x887   :  { %v9605_v59 = vpop.eup %9604  ;;  %9624 = vrcp.f32 %v4853_v58  ;;  %v4642_v58 = vrot.slane %v13215_v43, 4  ;;  %v4646_v44 = vrot.slane %v13215_v43, 5  ;;  %v7830_v31 = vmul.f32 -1.442695, %v4776_v55 }
 0x888   :  { %v9607_v4 = vpop.eup %9606  ;;  %9626 = vrcp.f32 %v4854_v56  ;;  %v4650_v49 = vrot.slane %v13215_v43, 6 }
 0x889   :  { %v9609_v25 = vpop.eup %9608  ;;  %9628 = vtanh.f32 %v4781_v0 }
 0x88a   :  { %v9611_v41 = vpop.eup %9610  ;;  %9630 = vtanh.f32 %v4785_v5  ;;  %v13388_v32 = vmul.f32 %v9609_v25, %v9603_v16  ;;  %v4762_v5 = vadd.f32 %v4638_v34, %v14775_v47  ;;  %v7831_v16 = vmul.f32 -1.442695, %v4780_v7  ;;  %v14968_v34 = vld [vmem:[#allocation67_spill] sm:$0xff] }
 0x88b   :  { %v9613_v40 = vpop.eup %9612  ;;  %9632 = vtanh.f32 %v4789_v42  ;;  %v13391_v56 = vmul.f32 %v9611_v41, %v9605_v59  ;;  %v4766_v25 = vadd.f32 %v4642_v58, %v14965_v38  ;;  %v7832_v42 = vmul.f32 -1.442695, %v4784_v19  ;;  %v14966_v41 = vld [vmem:[#allocation62_spill] sm:$0xff] }
 0x88c   :  { %v9615_v26 = vpop.eup %9614  ;;  %v13394_v0 = vmul.f32 %v9613_v40, %v9607_v4  ;;  %9634 = vpow2.f32 %v7826_v2  ;;  %v4770_v59 = vadd.f32 %v4646_v44, %v14966_v41  ;;  %v7833_v40 = vmul.f32 -1.442695, %v4788_v17  ;;  %v14967_v4 = vld [vmem:[#allocation65_spill] sm:$0xff] }
 0x88d   :  { %v9617_v10 = vpop.eup %9616  ;;  %9636 = vpow2.f32 %v7827_v37  ;;  %v4774_v2 = vadd.f32 %v4650_v49, %v14967_v4  ;;  %v4778_v7 = vadd.f32 %v4654_v23, %v14968_v34  ;;  %v7842_v37 = vmul.f32 -1.442695, %v4762_v5 }
 0x88e   :  { %v9619_v1 = vpop.eup %9618  ;;  %9638 = vpow2.f32 %v7828_v51  ;;  %v7843_v51 = vmul.f32 -1.442695, %v4766_v25  ;;  %v7844_v44 = vmul.f32 -1.442695, %v4770_v59  ;;  %v4658_v5 = vrot.slane %v13215_v43, 1 }
 0x88f   :  { %v9621_v55 = vpop.eup %9620  ;;  %v13400_v20 = vmul.f32 %v9619_v1, %v9615_v26  ;;  %9640 = vpow2.f32 %v7829_v62  ;;  %v7845_v1 = vmul.f32 -1.442695, %v4774_v2  ;;  %v7846_v62 = vmul.f32 -1.442695, %v4778_v7 }
 0x890   :  { %v9623_v11 = vpop.eup %9622  ;;  %v13403_v35 = vmul.f32 %v9621_v55, %v9617_v10  ;;  %9642 = vpow2.f32 %v7830_v31 }
 0x891   :  { %v9625_v58 = vpop.eup %9624  ;;  %9644 = vpow2.f32 %v7831_v16 }
 0x892   :  { %v9627_v19 = vpop.eup %9626  ;;  %9646 = vpow2.f32 %v7832_v42  ;;  %v4662_v42 = vrot.slane %v13215_v43, 2 }
 0x893   :  { %v9629_v41 = vpop.eup %9628  ;;  %9648 = vpow2.f32 %v7833_v40  ;;  %v14969_v40 = vld [vmem:[#allocation69_spill] sm:$0xff] }
 0x894   :  { %v9631_v26 = vpop.eup %9630  ;;  %v13406_v17 = vmul.f32 %v9629_v41, %v9623_v11  ;;  %9650 = vpow2.f32 %v7842_v37  ;;  %v4782_v2 = vadd.f32 %v13215_v43, %v14969_v40 }
 0x895   :  { %v9633_v49 = vpop.eup %9632  ;;  %9652 = vpow2.f32 %v7843_v51  ;;  %v13408_v31 = vmul.f32 %v9631_v26, %v9625_v58  ;;  %v14970_v58 = vld [vmem:[#allocation72_spill] sm:$0xff]  ;;  %v14971_v26 = vld [vmem:[#allocation39_spill] sm:$0xff] }
 0x896   :  { %v9635_v23 = vpop.eup %9634  ;;  %9654 = vpow2.f32 %v7844_v44  ;;  %v13411_v10 = vmul.f32 %v9633_v49, %v9627_v19  ;;  %v4786_v51 = vadd.f32 %v4658_v5, %v14970_v58  ;;  %v4790_v49 = vadd.f32 %v4662_v42, %v14971_v26 }
 0x897   :  { %v9637_v16 = vpop.eup %9636  ;;  %v4943_v25 = vadd.f32 1.0, %v9635_v23  ;;  %9656 = vpow2.f32 %v7845_v1 }
 0x898   :  { %v9639_v59 = vpop.eup %9638  ;;  %v4944_v11 = vadd.f32 1.0, %v9637_v16  ;;  %9658 = vpow2.f32 %v7846_v62  ;;  %v7848_v43 = vmul.f32 -1.442695, %v4786_v51 }
 0x899   :  { %v9641_v41 = vpop.eup %9640  ;;  %v4945_v55 = vadd.f32 1.0, %v9639_v59  ;;  %9660 = vrcp.f32 %v4943_v25  ;;  %v7847_v25 = vmul.f32 -1.442695, %v4782_v2  ;;  %v14973_v2 = vld [vmem:[#allocation63_spill] sm:$0xff] }
 0x89a   :  { %v9643_v7 = vpop.eup %9642  ;;  %v4946_v37 = vadd.f32 1.0, %v9641_v41  ;;  %9662 = vrcp.f32 %v4944_v11  ;;  %v7849_v11 = vmul.f32 -1.442695, %v4790_v49  ;;  %v5120_v58 = vrot.slane %v14973_v2, 7  ;;  %v14978_v2 = vld [vmem:[#allocation34_spill] sm:$0xff] }
 0x89b   :  { %v9645_v19 = vpop.eup %9644  ;;  %v4947_v44 = vadd.f32 1.0, %v9643_v7  ;;  %9664 = vrcp.f32 %v4945_v55 }
 0x89c   :  { %v9647_v1 = vpop.eup %9646  ;;  %v4948_v23 = vadd.f32 1.0, %v9645_v19  ;;  %9666 = vrcp.f32 %v4946_v37  ;;  %v14972_v19 = vld [vmem:[#allocation61_spill] sm:$0xff] }
 0x89d   :  { %v9649_v62 = vpop.eup %9648  ;;  %v4949_v16 = vadd.f32 1.0, %v9647_v1  ;;  %9668 = vrcp.f32 %v4947_v44  ;;  %v5119_v37 = vrot.slane %v14972_v19, 7 }
 0x89e   :  { %v9651_v59 = vpop.eup %9650  ;;  %v4950_v34 = vadd.f32 1.0, %v9649_v62  ;;  %9670 = vrcp.f32 %v4948_v23  ;;  %v14974_v62 = vld [vmem:[#allocation71_spill] sm:$0xff] }
 0x89f   :  { %v9653_v41 = vpop.eup %9652  ;;  %9672 = vrcp.f32 %v4949_v16  ;;  %v5055_v7 = vadd.f32 1.0, %v9651_v59  ;;  %v5121_v16 = vrot.slane %v14974_v62, 7  ;;  %v14975_v59 = vld [vmem:[#allocation73_spill] sm:$0xff] }
 0x8a0   :  { %v9655_v5 = vpop.eup %9654  ;;  %9674 = vrcp.f32 %v4950_v34  ;;  %v5056_v42 = vadd.f32 1.0, %v9653_v41  ;;  %v5054_v41 = vadd.f32 1.0, %v13316_v52  ;;  %v14980_v52 = vld [vmem:[#allocation70_spill] sm:$0xff] }
 0x8a1   :  { %v9657_v55 = vpop.eup %9656  ;;  %9676 = vpow2.f32 %v7847_v25  ;;  %v5057_v1 = vadd.f32 1.0, %v9655_v5  ;;  %v5122_v25 = vrot.slane %v14975_v59, 7  ;;  %v14976_v5 = vld [vmem:[#allocation32_spill] sm:$0xff] }
 0x8a2   :  { %v9659_v26 = vpop.eup %9658  ;;  %9678 = vpow2.f32 %v7848_v43  ;;  %v5058_v23 = vadd.f32 1.0, %v9657_v55  ;;  %v5123_v19 = vrot.slane %v14976_v5, 7 }
 0x8a3   :  { %v9661_v44 = vpop.eup %9660  ;;  %9680 = vpow2.f32 %v7849_v11  ;;  %v5059_v40 = vadd.f32 1.0, %v9659_v26 }
 0x8a4   :  { %v9663_v51 = vpop.eup %9662  ;;  %v5151_v49 = vmul.f32 %v9661_v44, %v5119_v37  ;;  %9682 = vrcp.f32 %v5055_v7  ;;  %v5124_v37 = vrot.slane %v14978_v2, 7 }
 0x8a5   :  { %v9665_v34 = vpop.eup %9664  ;;  %v5152_v4 = vmul.f32 %v9663_v51, %v5120_v58  ;;  %9684 = vrcp.f32 %v5056_v42  ;;  %v5125_v58 = vrot.slane %v14980_v52, 7 }
 0x8a6   :  { %v9667_v43 = vpop.eup %9666  ;;  %v5153_v38 = vmul.f32 %v9665_v34, %v5121_v16  ;;  %v13425_v11 = vadd.f32 %v13388_v32, %v5151_v49  ;;  %9686 = vrcp.f32 %v5057_v1  ;;  %v14982_v32 = vld [vmem:[#allocation35_spill] sm:$0xff] }
 0x8a7   :  { %v9669_v55 = vpop.eup %9668  ;;  %v5154_v26 = vmul.f32 %v9667_v43, %v5122_v25  ;;  %v13429_v7 = vadd.f32 %v13391_v56, %v5152_v4  ;;  %9688 = vrcp.f32 %v5058_v23  ;;  %v5126_v16 = vrot.slane %v14982_v32, 7 }
 0x8a8   :  { %14977 = vst [vmem:[#allocation36_spill] sm:$0xff] %v13425_v11  ;;  %v9671_v44 = vpop.eup %9670  ;;  %9690 = vrcp.f32 %v5059_v40  ;;  %v5155_v42 = vmul.f32 %v9669_v55, %v5123_v19  ;;  %v13433_v51 = vadd.f32 %v13394_v0, %v5153_v38 }
 0x8a9   :  { %14979 = vst [vmem:[#allocation37_spill] sm:$0xff] %v13429_v7  ;;  %v9673_v62 = vpop.eup %9672  ;;  %9692 = vrcp.f32 %v5054_v41  ;;  %v5156_v1 = vmul.f32 %v9671_v44, %v5124_v37  ;;  %v13437_v49 = vadd.f32 %v13400_v20, %v5154_v26 }
 0x8aa   :  { %14981 = vst [vmem:[#allocation40_spill] sm:$0xff] %v13433_v51  ;;  %v9675_v34 = vpop.eup %9674  ;;  %v5157_v56 = vmul.f32 %v9673_v62, %v5125_v58  ;;  %v13440_v4 = vadd.f32 %v13403_v35, %v5155_v42  ;;  %9694 = vtanh.f32 %v13305_v6 }
 0x8ab   :  { %14983 = vst [vmem:[#allocation33_spill] sm:$0xff] %v13437_v49  ;;  %v9677_v40 = vpop.eup %9676  ;;  %v5158_v23 = vmul.f32 %v9675_v34, %v5126_v16  ;;  %v13444_v0 = vadd.f32 %v13406_v17, %v5156_v1  ;;  %9696 = vtanh.f32 %v13308_v30 }
 0x8ac   :  { %14984 = vst [vmem:[#allocation41_spill] sm:$0xff] %v13440_v4  ;;  %v9679_v38 = vpop.eup %9678  ;;  %v5060_v59 = vadd.f32 1.0, %v9677_v40  ;;  %v13448_v25 = vadd.f32 %v13408_v31, %v5157_v56  ;;  %9698 = vtanh.f32 %v13343_v22 }
 0x8ad   :  { %14985 = vst [vmem:[#allocation58_spill] sm:$0xff] %v13444_v0  ;;  %v9681_v20 = vpop.eup %9680  ;;  %v5061_v41 = vadd.f32 1.0, %v9679_v38  ;;  %v13452_v35 = vadd.f32 %v13411_v10, %v5158_v23  ;;  %9700 = vtanh.f32 %v13346_v21 }
 0x8ae   :  { %14986 = vst [vmem:[#allocation38_spill] sm:$0xff] %v13448_v25  ;;  %v9683_v43 = vpop.eup %9682  ;;  %v5062_v5 = vadd.f32 1.0, %v9681_v20  ;;  %9702 = vrcp.f32 %v5060_v59 }
 0x8af   :  { %14987 = vst [vmem:[#allocation18_spill] sm:$0xff] %v13452_v35  ;;  %v9685_v17 = vpop.eup %9684  ;;  %9704 = vrcp.f32 %v5061_v41 }
 0x8b0   :  { %v9687_v19 = vpop.eup %9686  ;;  %9706 = vrcp.f32 %v5062_v5 }
 0x8b1   :  { %v13455_v55 = vpop.eup %9688  ;;  %9708 = vtanh.f32 %v13349_v28 }
 0x8b2   :  { %v13458_v31 = vpop.eup %9690  ;;  %9710 = vtanh.f32 %v13352_v29 }
 0x8b3   :  { %v9693_v2 = vpop.eup %9692  ;;  %9712 = vtanh.f32 %v13354_v9 }
 0x8b4   :  { %v9695_v10 = vpop.eup %9694  ;;  %9714 = vtanh.f32 %v13356_v63 }
 0x8b5   :  { %v9697_v37 = vpop.eup %9696  ;;  %9716 = vtanh.f32 %v13425_v11  ;;  %v5207_v26 = vmul.f32 %v9695_v10, %v13319_v50 }
 0x8b6   :  { %v9699_v44 = vpop.eup %9698  ;;  %9718 = vtanh.f32 %v13429_v7  ;;  %v5208_v52 = vmul.f32 %v9697_v37, %v13323_v53 }
 0x8b7   :  { %v9701_v58 = vpop.eup %9700  ;;  %9720 = vtanh.f32 %v13433_v51  ;;  %v5209_v42 = vmul.f32 %v9699_v44, %v13328_v36  ;;  %v5223_v62 = vpack.c.bf16 %v5207_v26, %v5207_v26 }
 0x8b8   :  { %v9703_v32 = vpop.eup %9702  ;;  %9722 = vtanh.f32 %v13437_v49  ;;  %v5210_v16 = vmul.f32 %v9701_v58, %v13333_v27  ;;  %v5224_v1 = vpack.c.bf16 %v5208_v52, %v5208_v52 }
 0x8b9   :  { %v9705_v34 = vpop.eup %9704  ;;  %9724 = vtanh.f32 %v13440_v4  ;;  %v5225_v50 = vpack.c.bf16 %v5209_v42, %v5209_v42  ;;  %v5255_v56 = vunpack.c.l.b16 %v5223_v62 }
 0x8ba   :  { %v9707_v40 = vpop.eup %9706  ;;  %9726 = vtanh.f32 %v13444_v0  ;;  %v5226_v53 = vpack.c.bf16 %v5210_v16, %v5210_v16  ;;  %v5256_v23 = vunpack.c.l.b16 %v5224_v1 }
 0x8bb   :  { %v9709_v38 = vpop.eup %9708  ;;  %9728 = vtanh.f32 %v13448_v25  ;;  %v5257_v36 = vunpack.c.l.b16 %v5225_v50  ;;  %v5271_v59 = vrot.slane %v5255_v56, 5 }
 0x8bc   :  { %v9711_v20 = vpop.eup %9710  ;;  %9730 = vtanh.f32 %v13452_v35  ;;  %v5211_v27 = vmul.f32 %v9709_v38, %v13336_v48  ;;  %v5258_v41 = vunpack.c.l.b16 %v5226_v53  ;;  %v5272_v5 = vrot.slane %v5256_v23, 4 }
 0x8bd   :  { %v9713_v10 = vpop.eup %9712  ;;  %v5212_v37 = vmul.f32 %v9711_v20, %v13362_v8  ;;  %v5274_v26 = vrot.slane %v5257_v36, 3 }
 0x8be   :  { %v9715_v44 = vpop.eup %9714  ;;  %v5213_v52 = vmul.f32 %v9713_v10, %v13366_v3  ;;  %v5227_v58 = vpack.c.bf16 %v5211_v27, %v5211_v27  ;;  %v5273_v42 = vsel %vm1325_vm1, %v5272_v5, %v5271_v59  ;;  %v5276_v62 = vrot.slane %v5258_v41, 2 }
 0x8bf   :  { %v9717_v16 = vpop.eup %9716  ;;  %v5214_v1 = vmul.f32 %v9715_v44, %v9693_v2  ;;  %v5228_v50 = vpack.c.bf16 %v5212_v37, %v5212_v37  ;;  %v5275_v56 = vsel %vm1328_vm2, %v5274_v26, %v5273_v42 }
 0x8c0   :  { %v9719_v35 = vpop.eup %9718  ;;  %v5215_v48 = vmul.f32 %v9717_v16, %v9683_v43  ;;  %v5229_v53 = vpack.c.bf16 %v5213_v52, %v5213_v52  ;;  %v5259_v23 = vunpack.c.l.b16 %v5227_v58  ;;  %v5277_v38 = vsel %vm1331_vm3, %v5276_v62, %v5275_v56 }
 0x8c1   :  { %v9721_v8 = vpop.eup %9720  ;;  %v5216_v36 = vmul.f32 %v9719_v35, %v9685_v17  ;;  %v5230_v20 = vpack.c.bf16 %v5214_v1, %v5214_v1  ;;  %v5260_v37 = vunpack.c.l.b16 %v5228_v50 }
 0x8c2   :  { %v9723_v25 = vpop.eup %9722  ;;  %v5217_v3 = vmul.f32 %v9721_v8, %v9687_v19  ;;  %v5231_v27 = vpack.c.bf16 %v5215_v48, %v5215_v48  ;;  %v5261_v10 = vunpack.c.l.b16 %v5229_v53  ;;  %v5278_v59 = vrot.slane %v5259_v23, 1 }
 0x8c3   :  { %v9725_v41 = vpop.eup %9724  ;;  %v5218_v2 = vmul.f32 %v9723_v25, %v13455_v55  ;;  %v5232_v5 = vpack.c.bf16 %v5216_v36, %v5216_v36  ;;  %v5262_v26 = vunpack.c.l.b16 %v5230_v20 }
 0x8c4   :  { %v9727_v44 = vpop.eup %9726  ;;  %v5219_v43 = vmul.f32 %v9725_v41, %v13458_v31  ;;  %v5233_v52 = vpack.c.bf16 %v5217_v3, %v5217_v3  ;;  %v5263_v58 = vunpack.c.l.b16 %v5231_v27  ;;  %v5279_v42 = vsel %vm1334_vm4, %v5278_v59, %v5277_v38 }
 0x8c5   :  { %v9729_v35 = vpop.eup %9728  ;;  %v5220_v17 = vmul.f32 %v9727_v44, %v9703_v32  ;;  %v5234_v62 = vpack.c.bf16 %v5218_v2, %v5218_v2  ;;  %v5264_v19 = vunpack.c.l.b16 %v5232_v5  ;;  %v5280_v16 = vsel %vm1337_vm5, %v5260_v37, %v5279_v42 }
 0x8c6   :  { %v9731_v1 = vpop.eup %9730  ;;  %v5221_v56 = vmul.f32 %v9729_v35, %v9705_v34  ;;  %v5235_v48 = vpack.c.bf16 %v5219_v43, %v5219_v43  ;;  %v5265_v25 = vunpack.c.l.b16 %v5233_v52  ;;  %v5281_v55 = vrot.slane %v5261_v10, 7 }
 0x8c7   :  { %v5222_v50 = vmul.f32 %v9731_v1, %v9707_v40  ;;  %v5266_v53 = vunpack.c.l.b16 %v5234_v62  ;;  %v5283_v23 = vrot.slane %v5262_v26, 6  ;;  %v5285_v20 = vrot.slane %v5263_v58, 5  ;;  %v10436_v62 = vld [vmem:[%s14351_s4] ss:$16 sps:$4 sm:$0xff]   ;;  %v10439_v1 = vld [vmem:[%s14351_s4 + $0x2c] ss:$16 sps:$4 sm:$0xff]  }
 0x8c8   :  { %v5237_v8 = vpack.c.bf16 %v5221_v56, %v5221_v56  ;;  %v5267_v31 = vunpack.c.l.b16 %v5235_v48  ;;  %v5282_v36 = vsel %vm1340_vm6, %v5281_v55, %v5280_v16  ;;  %v5236_v38 = vpack.c.bf16 %v5220_v17, %v5220_v17  ;;  %v10438_v16 = vld [vmem:[%s14351_s4 + $0x24] ss:$16 sps:$4 sm:$0xff]   ;;  %v10440_v48 = vld [vmem:[%s14351_s4 + $0x20] ss:$16 sps:$4 sm:$0xff]  }
 0x8c9   :  { %v5238_v3 = vpack.c.bf16 %v5222_v50, %v5222_v50  ;;  %v5284_v32 = vsel %vm1343_vm7, %v5283_v23, %v5282_v36  ;;  %v5286_v27 = vrot.slane %v5264_v19, 4  ;;  %v5288_v41 = vrot.slane %v5265_v25, 3  ;;  %v10437_v19 = vld [vmem:[%s14351_s4 + $0x8] ss:$16 sps:$4 sm:$0xff]   ;;  %v10442_v55 = vld [vmem:[%s14351_s4 + $0x44] ss:$16 sps:$4 sm:$0xff]  }
 0x8ca   :  { %v5269_v59 = vunpack.c.l.b16 %v5237_v8  ;;  %v5290_v5 = vrot.slane %v5266_v53, 2  ;;  %v5292_v10 = vrot.slane %v5267_v31, 1  ;;  %v5268_v37 = vunpack.c.l.b16 %v5236_v38  ;;  %v10441_v25 = vld [vmem:[%s14351_s4 + $0x28] ss:$16 sps:$4 sm:$0xff]   ;;  %v10443_v50 = vld [vmem:[%s14351_s4 + $0x4c] ss:$16 sps:$4 sm:$0xff]  }
 0x8cb   :  { %v5270_v2 = vunpack.c.l.b16 %v5238_v3  ;;  %v5287_v34 = vsel %vm1325_vm1, %v5286_v27, %v5285_v20  ;;  %v14988_v56 = vmov 0   ;;  %v10444_v53 = vld [vmem:[%s14351_s4 + $0x40] ss:$16 sps:$4 sm:$0xff]   ;;  %v10445_v23 = vld [vmem:[%s14351_s4 + $0x48] ss:$16 sps:$4 sm:$0xff]  }
 0x8cc   :  { %v5289_v40 = vsel %vm1328_vm2, %v5288_v41, %v5287_v34  ;;  %v5295_v43 = vrot.slane %v5269_v59, 7  ;;  %v10446_v8 = vld [vmem:[%s14351_s4 + $0x64] ss:$16 sps:$4 sm:$0xff]   ;;  %v10447_v31 = vld [vmem:[%s14351_s4 + $0x6c] ss:$16 sps:$4 sm:$0xff]  }
 0x8cd   :  { %v5291_v26 = vsel %vm1331_vm3, %v5290_v5, %v5289_v40  ;;  %v5297_v58 = vrot.slane %v5270_v2, 6  ;;  %v10448_v36 = vld [vmem:[%s14351_s4 + $0x60] ss:$16 sps:$4 sm:$0xff]   ;;  %v10449_v20 = vld [vmem:[%s14351_s4 + $0x68] ss:$16 sps:$4 sm:$0xff]  }
 0x8ce   :  { %v5293_v44 = vsel %vm1334_vm4, %v5292_v10, %v5291_v26  ;;  %v10450_v38 = vld [vmem:[%s14351_s4 + $0x84] ss:$16 sps:$4 sm:$0xff]   ;;  %v10451_v3 = vld [vmem:[%s14351_s4 + $0x8c] ss:$16 sps:$4 sm:$0xff]   ;;  %v10453_v27 = vld [vmem:[%s14351_s4 + $0x88] ss:$16 sps:$4 sm:$0xff]  }
 0x8cf   :  { %v5294_v52 = vsel %vm1337_vm5, %v5268_v37, %v5293_v44  ;;  %v10454_v59 = vld [vmem:[%s14351_s4 + $0xa4] ss:$16 sps:$4 sm:$0xff]   ;;  %v10455_v41 = vld [vmem:[%s14351_s4 + $0xac] ss:$16 sps:$4 sm:$0xff]   ;;  %v10456_v2 = vld [vmem:[%s14351_s4 + $0xa0] ss:$16 sps:$4 sm:$0xff]  }
 0x8d0   :  { %v5296_v42 = vsel %vm1340_vm6, %v5295_v43, %v5294_v52  ;;  %v10457_v34 = vld [vmem:[%s14351_s4 + $0xa8] ss:$16 sps:$4 sm:$0xff]   ;;  %v10458_v5 = vld [vmem:[%s14351_s4 + $0xc4] ss:$16 sps:$4 sm:$0xff]   ;;  %v10459_v40 = vld [vmem:[%s14351_s4 + $0xcc] ss:$16 sps:$4 sm:$0xff]  }
 0x8d1   :  { %v5298_v35 = vsel %vm1343_vm7, %v5297_v58, %v5296_v42  ;;  %v10460_v10 = vld [vmem:[%s14351_s4 + $0xc0] ss:$16 sps:$4 sm:$0xff]   ;;  %v10461_v37 = vld [vmem:[%s14351_s4 + $0xc8] ss:$16 sps:$4 sm:$0xff]   ;;  %v10462_v26 = vld [vmem:[%s14351_s4 + $0xe4] ss:$16 sps:$4 sm:$0xff]  }
 0x8d2   :  { %v5299_v17 = vpack.c.b16 %v5298_v35, %v5284_v32  ;;  %v10452_v32 = vld [vmem:[%s14351_s4 + $0x80] ss:$16 sps:$4 sm:$0xff]   ;;  %v10463_v44 = vld [vmem:[%s14351_s4 + $0xec] ss:$16 sps:$4 sm:$0xff]   ;;  %v10465_v52 = vld [vmem:[%s14351_s4 + $0xe8] ss:$16 sps:$4 sm:$0xff]  }
 0x8d3   :  { %v10464_v43 = vld [vmem:[%s14351_s4 + $0xe0] ss:$16 sps:$4 sm:$0xff]  }
 0x8d4   :  { %5334 = vmatmul.mubr.bf16.vlgmr.msra.gmra.mrb[48].mxu0 %v5299_v17  ;;  %5377 = vmatmul.mubr.bf16.vlgmr.msra.gmra.mrb[64].mxu1 %v5299_v17 }
 0x8d5   :  { %6090 = vmatpush1.bf16.msra.mxu0 %v10436_v62  ;;  %6133 = vmatpush1.bf16.msra.mxu1 %v10437_v19 }
 0x8d6   :  { %6091 = vmatprep.subr.bf16.mxu0 %v10438_v16  ;;  %6134 = vmatprep.subr.bf16.mxu1 %v10439_v1 }
 0x8d7   :  { %6121 = vmatprep.mubr.bf16.mxu0 %v14988_v56  ;;  %6164 = vmatprep.mubr.bf16.mxu1 %v14988_v56 }
 0x8d9   :  { %6092 = vmatpush1.bf16.msra.mxu0 %v10440_v48  ;;  %6135 = vmatpush1.bf16.msra.mxu1 %v10441_v25 }
 0x8da   :  { %6093 = vmatprep.subr.bf16.mxu0 %v10442_v55  ;;  %6136 = vmatprep.subr.bf16.mxu1 %v10443_v50  ;;  %v14989_v50 = vld [vmem:[#allocation17_spill] sm:$0xff] }
 0x8dd   :  { %6094 = vmatpush1.bf16.msra.mxu0 %v10444_v53  ;;  %6137 = vmatpush1.bf16.msra.mxu1 %v10445_v23 }
 0x8de   :  { %6095 = vmatprep.subr.bf16.mxu0 %v10446_v8  ;;  %6138 = vmatprep.subr.bf16.mxu1 %v10447_v31  ;;  %v14990_v31 = vld [vmem:[#allocation10_spill] sm:$0xff] }
 0x8e1   :  { %6096 = vmatpush1.bf16.msra.mxu0 %v10448_v36  ;;  %6139 = vmatpush1.bf16.msra.mxu1 %v10449_v20  ;;  %v14991_v20 = vld [vmem:[#allocation12_spill] sm:$0xff] }
 0x8e2   :  { %6097 = vmatprep.subr.bf16.mxu0 %v10450_v38  ;;  %6140 = vmatprep.subr.bf16.mxu1 %v10451_v3  ;;  %v14992_v3 = vld [vmem:[#allocation13_spill] sm:$0xff] }
 0x8e5   :  { %6098 = vmatpush1.bf16.msra.mxu0 %v10452_v32  ;;  %6141 = vmatpush1.bf16.msra.mxu1 %v10453_v27  ;;  %v14993_v27 = vld [vmem:[#allocation14_spill] sm:$0xff] }
 0x8e6   :  { %6099 = vmatprep.subr.bf16.mxu0 %v10454_v59  ;;  %6142 = vmatprep.subr.bf16.mxu1 %v10455_v41 }
 0x8e9   :  { %6100 = vmatpush1.bf16.msra.mxu0 %v10456_v2  ;;  %6143 = vmatpush1.bf16.msra.mxu1 %v10457_v34  ;;  %v14994_v34 = vld [vmem:[#allocation15_spill] sm:$0xff] }
 0x8ea   :  { %6101 = vmatprep.subr.bf16.mxu0 %v10458_v5  ;;  %6144 = vmatprep.subr.bf16.mxu1 %v10459_v40  ;;  %v14995_v40 = vld [vmem:[#allocation16_spill] sm:$0xff] }
 0x8ed   :  { %6102 = vmatpush1.bf16.msra.mxu0 %v10460_v10  ;;  %6145 = vmatpush1.bf16.msra.mxu1 %v10461_v37 }
 0x8ee   :  { %6103 = vmatprep.subr.bf16.mxu0 %v10462_v26  ;;  %6146 = vmatprep.subr.bf16.mxu1 %v10463_v44  ;;  %v14996_v26 = vld [vmem:[#allocation19_spill] sm:$0xff] }
 0x8f1   :  { %6104 = vmatpush1.bf16.msra.mxu0 %v10464_v43  ;;  %6147 = vmatpush1.bf16.msra.mxu1 %v10465_v52 }
 0x9a7   :  { %v5335_v58 = vpop.f32.mrb[48].mxu0  ;;  %v13586_v42 = vpop.f32.mrb[64].mxu1 }
 0x9a8   :  { %v5395_v35 = vrot.slane %v5335_v58, 2  ;;  %v5399_v17 = vrot.slane %v5335_v58, 3  ;;  %v5403_v62 = vrot.slane %v5335_v58, 4  ;;  %v5407_v19 = vrot.slane %v5335_v58, 5  ;;  %v13588_v16 = vpop.f32.mrb[49].mxu0  ;;  %v13590_v1 = vpop.f32.mrb[65].mxu1 }
 0x9a9   :  { %v5411_v48 = vrot.slane %v5335_v58, 6  ;;  %v5415_v25 = vrot.slane %v5335_v58, 7  ;;  %v5419_v55 = vrot.slane %v5335_v58, 1  ;;  %v5539_v53 = vadd.f32 %v5335_v58, %v14989_v50  ;;  %v13593_v23 = vpop.f32.mrb[50].mxu0  ;;  %v13595_v8 = vpop.f32.mrb[66].mxu1 }
 0x9aa   :  { %v5515_v36 = vadd.f32 %v5395_v35, %v14990_v31  ;;  %v5519_v38 = vadd.f32 %v5399_v17, %v14991_v20  ;;  %v5523_v32 = vadd.f32 %v5403_v62, %v14992_v3  ;;  %v5527_v59 = vadd.f32 %v5407_v19, %v14993_v27  ;;  %v13601_v41 = vpop.f32.mrb[51].mxu0  ;;  %v13603_v2 = vpop.f32.mrb[67].mxu1  ;;  %v15006_v27 = vld [vmem:[#allocation23_spill] sm:$0xff]  ;;  %v15007_v3 = vld [vmem:[#allocation8_spill] sm:$0xff] }
 0x9ab   :  { %v5531_v5 = vadd.f32 %v5411_v48, %v14994_v34  ;;  %v5535_v10 = vadd.f32 %v5415_v25, %v14995_v40  ;;  %v7856_v37 = vmul.f32 -1.442695, %v5539_v53  ;;  %v5543_v44 = vadd.f32 %v5419_v55, %v14996_v26  ;;  %v15009_v26 = vld [vmem:[#allocation25_spill] sm:$0xff] }
 0x9ac   :  { %v7850_v43 = vmul.f32 -1.442695, %v5515_v36  ;;  %v7851_v52 = vmul.f32 -1.442695, %v5519_v38  ;;  %v7852_v58 = vmul.f32 -1.442695, %v5523_v32 }
 0x9ad   :  { %v7853_v35 = vmul.f32 -1.442695, %v5527_v59  ;;  %9732 = vpow2.f32 %v7856_v37  ;;  %v7854_v17 = vmul.f32 -1.442695, %v5531_v5  ;;  %v5397_v62 = vrot.slane %v13586_v42, 2  ;;  %v14997_v36 = vld [vmem:[#allocation49_spill] sm:$0xff] }
 0x9ae   :  { %9734 = vpow2.f32 %v7850_v43  ;;  %v5401_v19 = vrot.slane %v13586_v42, 3  ;;  %v7855_v31 = vmul.f32 -1.442695, %v5535_v10  ;;  %v5405_v48 = vrot.slane %v13586_v42, 4  ;;  %v14998_v32 = vld [vmem:[#allocation51_spill] sm:$0xff]  ;;  %v14999_v5 = vld [vmem:[#allocation53_spill] sm:$0xff] }
 0x9af   :  { %9736 = vpow2.f32 %v7851_v52  ;;  %v7857_v25 = vmul.f32 -1.442695, %v5543_v44  ;;  %v5409_v53 = vrot.slane %v13586_v42, 5  ;;  %v5413_v55 = vrot.slane %v13586_v42, 6  ;;  %v15000_v43 = vld [vmem:[#allocation55_spill] sm:$0xff]  ;;  %v15001_v52 = vld [vmem:[#allocation57_spill] sm:$0xff] }
 0x9b0   :  { %9738 = vpow2.f32 %v7852_v58  ;;  %v5517_v38 = vadd.f32 %v5397_v62, %v14997_v36  ;;  %v5521_v59 = vadd.f32 %v5401_v19, %v14998_v32  ;;  %v5525_v37 = vadd.f32 %v5405_v48, %v14999_v5  ;;  %v15004_v36 = vld [vmem:[#allocation22_spill] sm:$0xff] }
 0x9b1   :  { %9740 = vpow2.f32 %v7853_v35  ;;  %v5529_v10 = vadd.f32 %v5409_v53, %v15000_v43  ;;  %v5533_v50 = vadd.f32 %v5413_v55, %v15001_v52  ;;  %v5417_v40 = vrot.slane %v13586_v42, 7 }
 0x9b2   :  { %9742 = vpow2.f32 %v7854_v17  ;;  %v5416_v32 = vrot.slane %v13588_v16, 7 }
 0x9b3   :  { %9744 = vpow2.f32 %v7855_v31  ;;  %v5396_v31 = vrot.slane %v13588_v16, 2 }
 0x9b4   :  { %9746 = vpow2.f32 %v7857_v25  ;;  %v5400_v25 = vrot.slane %v13588_v16, 3 }
 0x9b5   :  { %9748 = vtanh.f32 %v5517_v38  ;;  %v5421_v38 = vrot.slane %v13586_v42, 1 }
 0x9b6   :  { %9750 = vtanh.f32 %v5521_v59  ;;  %v5404_v59 = vrot.slane %v13588_v16, 4  ;;  %v5520_v34 = vadd.f32 %v5400_v25, %v15004_v36 }
 0x9b7   :  { %v9733_v44 = vpop.eup %9732  ;;  %9752 = vtanh.f32 %v5525_v37  ;;  %v5545_v20 = vadd.f32 %v5421_v38, %v15007_v3  ;;  %v15011_v38 = vld [vmem:[#allocation27_spill] sm:$0xff] }
 0x9b8   :  { %v9735_v58 = vpop.eup %9734  ;;  %v5633_v35 = vadd.f32 1.0, %v9733_v44  ;;  %9754 = vtanh.f32 %v5529_v10  ;;  %v15002_v10 = vld [vmem:[#allocation3_spill] sm:$0xff]  ;;  %v5540_v3 = vadd.f32 %v13588_v16, %v15011_v38  ;;  %v15014_v38 = vld [vmem:[#allocation52_spill] sm:$0xff] }
 0x9b9   :  { %v9737_v17 = vpop.eup %9736  ;;  %v5627_v62 = vadd.f32 1.0, %v9735_v58  ;;  %9756 = vtanh.f32 %v5533_v50  ;;  %v5537_v58 = vadd.f32 %v5417_v40, %v15002_v10  ;;  %v5408_v50 = vrot.slane %v13588_v16, 5  ;;  %v15005_v40 = vld [vmem:[#allocation6_spill] sm:$0xff] }
 0x9ba   :  { %v9739_v19 = vpop.eup %9738  ;;  %v5628_v48 = vadd.f32 1.0, %v9737_v17  ;;  %9758 = vrcp.f32 %v5633_v35  ;;  %v5412_v35 = vrot.slane %v13588_v16, 6  ;;  %v15003_v17 = vld [vmem:[#allocation11_spill] sm:$0xff]  ;;  %v5541_v10 = vadd.f32 %v13586_v42, %v15005_v40  ;;  %v15010_v42 = vld [vmem:[#allocation26_spill] sm:$0xff] }
 0x9bb   :  { %v9741_v53 = vpop.eup %9740  ;;  %v5629_v55 = vadd.f32 1.0, %v9739_v19  ;;  %9760 = vrcp.f32 %v5627_v62  ;;  %v5516_v5 = vadd.f32 %v5396_v31, %v15003_v17  ;;  %v5420_v31 = vrot.slane %v13588_v16, 1 }
 0x9bc   :  { %v9743_v37 = vpop.eup %9742  ;;  %v5630_v44 = vadd.f32 1.0, %v9741_v53  ;;  %9762 = vrcp.f32 %v5628_v48  ;;  %v5532_v25 = vadd.f32 %v5412_v35, %v15009_v26  ;;  %v5536_v40 = vadd.f32 %v5416_v32, %v15010_v42 }
 0x9bd   :  { %v9745_v52 = vpop.eup %9744  ;;  %v5631_v43 = vadd.f32 1.0, %v9743_v37  ;;  %9764 = vrcp.f32 %v5629_v55  ;;  %v5524_v37 = vadd.f32 %v5404_v59, %v15006_v27  ;;  %v7866_v36 = vmul.f32 -1.442695, %v5516_v5  ;;  %v15012_v5 = vld [vmem:[#allocation28_spill] sm:$0xff] }
 0x9be   :  { %v9747_v19 = vpop.eup %9746  ;;  %v5632_v62 = vadd.f32 1.0, %v9745_v52  ;;  %9766 = vrcp.f32 %v5630_v44  ;;  %v15008_v52 = vld [vmem:[#allocation24_spill] sm:$0xff]  ;;  %v7867_v59 = vmul.f32 -1.442695, %v5520_v34  ;;  %v5544_v35 = vadd.f32 %v5420_v31, %v15012_v5 }
 0x9bf   :  { %v9749_v53 = vpop.eup %9748  ;;  %v5634_v48 = vadd.f32 1.0, %v9747_v19  ;;  %9768 = vrcp.f32 %v5631_v43  ;;  %v5528_v44 = vadd.f32 %v5408_v50, %v15008_v52  ;;  %v5398_v43 = vrot.slane %v13590_v1, 2 }
 0x9c0   :  { %v9751_v55 = vpop.eup %9750  ;;  %9770 = vrcp.f32 %v5632_v62  ;;  %v5402_v62 = vrot.slane %v13590_v1, 3  ;;  %v7868_v50 = vmul.f32 -1.442695, %v5524_v37  ;;  %v7870_v34 = vmul.f32 -1.442695, %v5532_v25  ;;  %v15015_v25 = vld [vmem:[#allocation54_spill] sm:$0xff] }
 0x9c1   :  { %v9753_v17 = vpop.eup %9752  ;;  %9772 = vrcp.f32 %v5634_v48  ;;  %v5406_v48 = vrot.slane %v13590_v1, 4  ;;  %v7869_v26 = vmul.f32 -1.442695, %v5528_v44  ;;  %v5414_v42 = vrot.slane %v13590_v1, 6 }
 0x9c2   :  { %v9755_v19 = vpop.eup %9754  ;;  %9774 = vtanh.f32 %v5537_v58  ;;  %v5410_v58 = vrot.slane %v13590_v1, 5  ;;  %v7871_v37 = vmul.f32 -1.442695, %v5536_v40  ;;  %v5522_v4 = vadd.f32 %v5402_v62, %v15014_v38 }
 0x9c3   :  { %v9757_v27 = vpop.eup %9756  ;;  %9776 = vtanh.f32 %v5541_v10  ;;  %v15013_v10 = vld [vmem:[#allocation50_spill] sm:$0xff]  ;;  %v5526_v5 = vadd.f32 %v5406_v48, %v15015_v25  ;;  %v15023_v25 = vld [vmem:[#allocation31_spill] sm:$0xff] }
 0x9c4   :  { %v13642_v52 = vpop.eup %9758  ;;  %9778 = vtanh.f32 %v5545_v20  ;;  %v5518_v56 = vadd.f32 %v5398_v43, %v15013_v10  ;;  %v8153_v20 = vld [vmem:[%s14353_s5 + $0x4] ss:$16 sps:$4 sm:$0xff]  }
 0x9c5   :  { %v9761_v32 = vpop.eup %9760  ;;  %9780 = vpow2.f32 %v7866_v36  ;;  %v7872_v36 = vmul.f32 -1.442695, %v5540_v3  ;;  %6874 = vmatprep.subr.bf16.mxu0 %v8153_v20  ;;  %v15017_v10 = vld [vmem:[#allocation2_spill] sm:$0xff]  ;;  %v7883_v3 = vmul.f32 -1.442695, %v5522_v4  ;;  %v5418_v4 = vrot.slane %v13590_v1, 7 }
 0x9c6   :  { %v9763_v0 = vpop.eup %9762  ;;  %v13648_v16 = vmul.f32 %v9761_v32, %v9749_v53  ;;  %9782 = vpow2.f32 %v7867_v59  ;;  %v7873_v53 = vmul.f32 -1.442695, %v5544_v35  ;;  %v15016_v59 = vld [vmem:[#allocation56_spill] sm:$0xff]  ;;  %v5534_v38 = vadd.f32 %v5414_v42, %v15017_v10  ;;  %v15022_v10 = vld [vmem:[#allocation30_spill] sm:$0xff] }
 0x9c7   :  { %v9765_v31 = vpop.eup %9764  ;;  %v13654_v44 = vmul.f32 %v9763_v0, %v9751_v55  ;;  %9784 = vpow2.f32 %v7868_v50  ;;  %v5530_v40 = vadd.f32 %v5410_v58, %v15016_v59  ;;  %v7882_v0 = vmul.f32 -1.442695, %v5518_v56 }
 0x9c8   :  { %v9767_v49 = vpop.eup %9766  ;;  %v13657_v43 = vmul.f32 %v9765_v31, %v9753_v17  ;;  %9786 = vpow2.f32 %v7869_v26  ;;  %v7884_v26 = vmul.f32 -1.442695, %v5526_v5  ;;  %v8160_v17 = vld [vmem:[%s14353_s5 + $0xc] ss:$16 sps:$4 sm:$0xff]   ;;  %v7886_v56 = vmul.f32 -1.442695, %v5534_v38 }
 0x9c9   :  { %v9769_v62 = vpop.eup %9768  ;;  %v13660_v32 = vmul.f32 %v9767_v49, %v9755_v19  ;;  %9788 = vpow2.f32 %v7870_v34  ;;  %v7885_v49 = vmul.f32 -1.442695, %v5530_v40  ;;  %6915 = vmatprep.subr.bf16.mxu1 %v8160_v17  ;;  %v15018_v38 = vld [vmem:[#allocation4_spill] sm:$0xff] }
 0x9ca   :  { %v9771_v55 = vpop.eup %9770  ;;  %v13663_v50 = vmul.f32 %v9769_v62, %v9757_v27  ;;  %9790 = vpow2.f32 %v7871_v37  ;;  %v5422_v37 = vrot.slane %v13590_v1, 1  ;;  %v5538_v40 = vadd.f32 %v5418_v4, %v15018_v38 }
 0x9cb   :  { %v13665_v48 = vpop.eup %9772  ;;  %9792 = vpow2.f32 %v7872_v36 }
 0x9cc   :  { %v9775_v35 = vpop.eup %9774  ;;  %9794 = vpow2.f32 %v7873_v53 }
 0x9cd   :  { %v13670_v19 = vpop.eup %9776  ;;  %v13672_v42 = vmul.f32 %v9775_v35, %v9771_v55  ;;  %9796 = vpow2.f32 %v7882_v0  ;;  %v15019_v55 = vld [vmem:[#allocation7_spill] sm:$0xff]  ;;  %v15020_v35 = vld [vmem:[#allocation9_spill] sm:$0xff] }
 0x9ce   :  { %v13674_v27 = vpop.eup %9778  ;;  %9798 = vpow2.f32 %v7883_v3  ;;  %v5542_v3 = vadd.f32 %v13590_v1, %v15019_v55 }
 0x9cf   :  { %v9781_v5 = vpop.eup %9780  ;;  %9800 = vpow2.f32 %v7884_v26 }
 0x9d0   :  { %v9783_v58 = vpop.eup %9782  ;;  %v5723_v34 = vadd.f32 1.0, %v9781_v5  ;;  %9802 = vpow2.f32 %v7885_v49  ;;  %v5546_v5 = vadd.f32 %v5422_v37, %v15020_v35 }
 0x9d1   :  { %v9785_v20 = vpop.eup %9784  ;;  %v5724_v31 = vadd.f32 1.0, %v9783_v58  ;;  %9804 = vpow2.f32 %v7886_v56  ;;  %v5902_v58 = vrot.slane %v13346_v21, 7  ;;  %v5900_v21 = vrot.slane %v13308_v30, 7 }
 0x9d2   :  { %v9787_v36 = vpop.eup %9786  ;;  %v5725_v53 = vadd.f32 1.0, %v9785_v20  ;;  %9806 = vrcp.f32 %v5723_v34  ;;  %v5899_v34 = vrot.slane %v13305_v6, 7 }
 0x9d3   :  { %v9789_v62 = vpop.eup %9788  ;;  %v5726_v0 = vadd.f32 1.0, %v9787_v36  ;;  %9808 = vrcp.f32 %v5724_v31  ;;  %v7887_v36 = vmul.f32 -1.442695, %v5538_v40  ;;  %v5423_v31 = vrot.slane %v13593_v23, 2 }
 0x9d4   :  { %v9791_v26 = vpop.eup %9790  ;;  %v5727_v17 = vadd.f32 1.0, %v9789_v62  ;;  %9810 = vrcp.f32 %v5725_v53  ;;  %v7888_v62 = vmul.f32 -1.442695, %v5542_v3  ;;  %v5427_v53 = vrot.slane %v13593_v23, 3 }
 0x9d5   :  { %v9793_v49 = vpop.eup %9792  ;;  %v5728_v56 = vadd.f32 1.0, %v9791_v26  ;;  %9812 = vrcp.f32 %v5726_v0  ;;  %v7889_v26 = vmul.f32 -1.442695, %v5546_v5  ;;  %v5431_v0 = vrot.slane %v13593_v23, 4 }
 0x9d6   :  { %v9795_v20 = vpop.eup %9794  ;;  %v5729_v4 = vadd.f32 1.0, %v9793_v49  ;;  %9814 = vrcp.f32 %v5727_v17  ;;  %v5901_v17 = vrot.slane %v13343_v22, 7  ;;  %v5435_v49 = vrot.slane %v13593_v23, 5 }
 0x9d7   :  { %v9797_v38 = vpop.eup %9796  ;;  %v5730_v1 = vadd.f32 1.0, %v9795_v20  ;;  %9816 = vrcp.f32 %v5728_v56  ;;  %v5439_v3 = vrot.slane %v13593_v23, 6  ;;  %v15021_v20 = vld [vmem:[#allocation29_spill] sm:$0xff]  ;;  %v5443_v5 = vrot.slane %v13593_v23, 7 }
 0x9d8   :  { %v9799_v37 = vpop.eup %9798  ;;  %9818 = vrcp.f32 %v5729_v4  ;;  %v5835_v40 = vadd.f32 1.0, %v9797_v38  ;;  %v5547_v55 = vadd.f32 %v5423_v31, %v15021_v20  ;;  %v5551_v59 = vadd.f32 %v5427_v53, %v15022_v10 }
 0x9d9   :  { %v9801_v6 = vpop.eup %9800  ;;  %9820 = vrcp.f32 %v5730_v1  ;;  %v5836_v56 = vadd.f32 1.0, %v9799_v37  ;;  %v5447_v38 = vrot.slane %v13593_v23, 1  ;;  %v5555_v51 = vadd.f32 %v5431_v0, %v15023_v25 }
 0x9da   :  { %v9803_v35 = vpop.eup %9802  ;;  %9822 = vpow2.f32 %v7887_v36  ;;  %v5837_v30 = vadd.f32 1.0, %v9801_v6  ;;  %v5559_v31 = vadd.f32 %v5435_v49, %v14697_v24  ;;  %v5563_v6 = vadd.f32 %v5439_v3, %v14698_v12 }
 0x9db   :  { %v9805_v4 = vpop.eup %9804  ;;  %9824 = vpow2.f32 %v7888_v62  ;;  %v5838_v22 = vadd.f32 1.0, %v9803_v35  ;;  %v7858_v11 = vmul.f32 -1.442695, %v5547_v55 }
 0x9dc   :  { %v9807_v1 = vpop.eup %9806  ;;  %9826 = vpow2.f32 %v7889_v26  ;;  %v5839_v7 = vadd.f32 1.0, %v9805_v4  ;;  %v7859_v26 = vmul.f32 -1.442695, %v5551_v59  ;;  %v5575_v59 = vadd.f32 %v5447_v38, %v14701_v45 }
 0x9dd   :  { %v9809_v36 = vpop.eup %9808  ;;  %v5931_v37 = vmul.f32 %v9807_v1, %v5899_v34  ;;  %9828 = vrcp.f32 %v5835_v40  ;;  %v7860_v40 = vmul.f32 -1.442695, %v5555_v51  ;;  %v5425_v51 = vrot.slane %v13595_v8, 2 }
 0x9de   :  { %v9811_v20 = vpop.eup %9810  ;;  %v5932_v62 = vmul.f32 %v9809_v36, %v5900_v21  ;;  %9830 = vrcp.f32 %v5836_v56  ;;  %v5567_v21 = vadd.f32 %v5443_v5, %v14699_v15  ;;  %v7861_v56 = vmul.f32 -1.442695, %v5559_v31 }
 0x9df   :  { %v9813_v53 = vpop.eup %9812  ;;  %v5933_v10 = vmul.f32 %v9811_v20, %v5901_v17  ;;  %v13699_v35 = vadd.f32 %v13648_v16, %v5931_v37  ;;  %9832 = vrcp.f32 %v5837_v30  ;;  %v5571_v17 = vadd.f32 %v13593_v23, %v14700_v61 }
 0x9e0   :  { %v9815_v0 = vpop.eup %9814  ;;  %v5934_v25 = vmul.f32 %v9813_v53, %v5902_v58  ;;  %v13702_v34 = vadd.f32 %v13654_v44, %v5932_v62  ;;  %9834 = vrcp.f32 %v5838_v22  ;;  %v7862_v16 = vmul.f32 -1.442695, %v5563_v6 }
 0x9e1   :  { %v9817_v49 = vpop.eup %9816  ;;  %9836 = vrcp.f32 %v5839_v7  ;;  %v5903_v44 = vrot.slane %v13349_v28, 7  ;;  %v7863_v4 = vmul.f32 -1.442695, %v5567_v21  ;;  %v5429_v30 = vrot.slane %v13595_v8, 3 }
 0x9e2   :  { %v9819_v55 = vpop.eup %9818  ;;  %9838 = vpow2.f32 %v7858_v11  ;;  %v7864_v23 = vmul.f32 -1.442695, %v5571_v17  ;;  %v5433_v1 = vrot.slane %v13595_v8, 4  ;;  %v5904_v28 = vrot.slane %v13352_v29, 7 }
 0x9e3   :  { %v9821_v3 = vpop.eup %9820  ;;  %9840 = vpow2.f32 %v7859_v26  ;;  %v5905_v38 = vrot.slane %v13354_v9, 7  ;;  %v7865_v36 = vmul.f32 -1.442695, %v5575_v59  ;;  %v5906_v31 = vrot.slane %v13356_v63, 7 }
 0x9e4   :  { %v9823_v58 = vpop.eup %9822  ;;  %9842 = vpow2.f32 %v7860_v40  ;;  %v5437_v62 = vrot.slane %v13595_v8, 5  ;;  %v5549_v6 = vadd.f32 %v5425_v51, %v11248_v18  ;;  %v5441_v26 = vrot.slane %v13595_v8, 6 }
 0x9e5   :  { %v9825_v7 = vpop.eup %9824  ;;  %v5840_v20 = vadd.f32 1.0, %v9823_v58  ;;  %9844 = vpow2.f32 %v7861_v56  ;;  %v5445_v29 = vrot.slane %v13595_v8, 7  ;;  %v5553_v9 = vadd.f32 %v5429_v30, %v11258_v57 }
 0x9e6   :  { %v13711_v5 = vpop.eup %9826  ;;  %v5841_v11 = vadd.f32 1.0, %v9825_v7  ;;  %9846 = vpow2.f32 %v7862_v16  ;;  %v5557_v21 = vadd.f32 %v5433_v1, %v14764_v14  ;;  %v5935_v63 = vmul.f32 %v9815_v0, %v5903_v44 }
 0x9e7   :  { %v13714_v22 = vpop.eup %9828  ;;  %9848 = vrcp.f32 %v5840_v20  ;;  %v5936_v56 = vmul.f32 %v9817_v49, %v5904_v28  ;;  %v5937_v16 = vmul.f32 %v9819_v55, %v5905_v38  ;;  %v5938_v59 = vmul.f32 %v9821_v3, %v5906_v31 }
 0x9e8   :  { %v13718_v37 = vpop.eup %9830  ;;  %9850 = vrcp.f32 %v5841_v11  ;;  %v5953_v58 = vmul.f32 %v13670_v19, %v13642_v52  ;;  %v5954_v7 = vmul.f32 %v13674_v27, %v13665_v48  ;;  %v13738_v20 = vadd.f32 %v13657_v43, %v5933_v10 }
 0x9e9   :  { %v13723_v53 = vpop.eup %9832  ;;  %9852 = vpow2.f32 %v7863_v4  ;;  %v13741_v4 = vadd.f32 %v13660_v32, %v5934_v25  ;;  %v13744_v55 = vadd.f32 %v13663_v50, %v5935_v63  ;;  %v13747_v3 = vadd.f32 %v13672_v42, %v5936_v56 }
 0x9ea   :  { %v13728_v40 = vpop.eup %9834  ;;  %9854 = vpow2.f32 %v7864_v23  ;;  %v13749_v44 = vadd.f32 %v5953_v58, %v5937_v16  ;;  %v13751_v48 = vadd.f32 %v5954_v7, %v5938_v59  ;;  %v5561_v25 = vadd.f32 %v5437_v62, %v14765_v33 }
 0x9eb   :  { %v13731_v17 = vpop.eup %9836  ;;  %9856 = vpow2.f32 %v7865_v36  ;;  %v5565_v50 = vadd.f32 %v5441_v26, %v14766_v60  ;;  %v5424_v42 = vrot.slane %v13601_v41, 2  ;;  %v5428_v23 = vrot.slane %v13601_v41, 3 }
 0x9ec   :  { %v9839_v51 = vpop.eup %9838  ;;  %9858 = vtanh.f32 %v5549_v6  ;;  %v5432_v1 = vrot.slane %v13601_v41, 4  ;;  %v5449_v38 = vrot.slane %v13595_v8, 1  ;;  %v5569_v36 = vadd.f32 %v5445_v29, %v14767_v46 }
 0x9ed   :  { %v9841_v0 = vpop.eup %9840  ;;  %v5635_v49 = vadd.f32 1.0, %v9839_v51  ;;  %9860 = vtanh.f32 %v5553_v9  ;;  %v5436_v31 = vrot.slane %v13601_v41, 5  ;;  %v5573_v6 = vadd.f32 %v13595_v8, %v14829_v39  ;;  %v15024_v51 = vld [vmem:[#allocation43_spill] sm:$0xff] }
 0x9ee   :  { %v9843_v52 = vpop.eup %9842  ;;  %v5636_v19 = vadd.f32 1.0, %v9841_v0  ;;  %9862 = vtanh.f32 %v5557_v21  ;;  %v5440_v26 = vrot.slane %v13601_v41, 6  ;;  %v5444_v9 = vrot.slane %v13601_v41, 7 }
 0x9ef   :  { %v9845_v10 = vpop.eup %9844  ;;  %v5637_v43 = vadd.f32 1.0, %v9843_v52  ;;  %9864 = vrcp.f32 %v5635_v49  ;;  %v5448_v56 = vrot.slane %v13601_v41, 1  ;;  %v5548_v16 = vadd.f32 %v5424_v42, %v14893_v13  ;;  %v15025_v49 = vld [vmem:[#allocation74_spill] sm:$0xff] }
 0x9f0   :  { %v9847_v32 = vpop.eup %9846  ;;  %v5638_v27 = vadd.f32 1.0, %v9845_v10  ;;  %9866 = vrcp.f32 %v5636_v19  ;;  %v5552_v58 = vadd.f32 %v5428_v23, %v14894_v54  ;;  %v5556_v7 = vadd.f32 %v5432_v1, %v15024_v51  ;;  %v15026_v19 = vld [vmem:[#allocation44_spill] sm:$0xff] }
 0x9f1   :  { %v13756_v30 = vpop.eup %9848  ;;  %v5639_v11 = vadd.f32 1.0, %v9847_v32  ;;  %9868 = vrcp.f32 %v5637_v43  ;;  %v5577_v52 = vadd.f32 %v5449_v38, %v15025_v49  ;;  %v5560_v10 = vadd.f32 %v5436_v31, %v15026_v19  ;;  %v15030_v23 = vld [vmem:[#allocation48_spill] sm:$0xff] }
 0x9f2   :  { %v13760_v28 = vpop.eup %9850  ;;  %9870 = vrcp.f32 %v5638_v27  ;;  %v15028_v27 = vld [vmem:[#allocation46_spill] sm:$0xff]  ;;  %v5576_v1 = vadd.f32 %v5448_v56, %v15030_v23  ;;  %v7875_v38 = vmul.f32 -1.442695, %v5552_v58  ;;  %v7876_v31 = vmul.f32 -1.442695, %v5556_v7 }
 0x9f3   :  { %v9853_v62 = vpop.eup %9852  ;;  %9872 = vrcp.f32 %v5639_v11  ;;  %v5568_v42 = vadd.f32 %v5444_v9, %v15028_v27  ;;  %v15029_v11 = vld [vmem:[#allocation47_spill] sm:$0xff]  ;;  %v7877_v9 = vmul.f32 -1.442695, %v5560_v10  ;;  %v5442_v58 = vrot.slane %v13603_v2, 6 }
 0x9f4   :  { %v9855_v21 = vpop.eup %9854  ;;  %v5640_v63 = vadd.f32 1.0, %v9853_v62  ;;  %9874 = vtanh.f32 %v5561_v25  ;;  %v15027_v25 = vld [vmem:[#allocation45_spill] sm:$0xff]  ;;  %v15031_v10 = vld [vmem:[#allocation59_spill] sm:$0xff] }
 0x9f5   :  { %v9857_v59 = vpop.eup %9856  ;;  %v5641_v29 = vadd.f32 1.0, %v9855_v21  ;;  %9876 = vtanh.f32 %v5565_v50  ;;  %v5564_v32 = vadd.f32 %v5440_v26, %v15027_v25  ;;  %v5572_v50 = vadd.f32 %v13601_v41, %v15029_v11 }
 0x9f6   :  { %v9859_v0 = vpop.eup %9858  ;;  %v5642_v8 = vadd.f32 1.0, %v9857_v59  ;;  %9878 = vrcp.f32 %v5640_v63  ;;  %v7874_v21 = vmul.f32 -1.442695, %v5548_v16  ;;  %v5426_v63 = vrot.slane %v13603_v2, 2 }
 0x9f7   :  { %v9861_v43 = vpop.eup %9860  ;;  %9880 = vrcp.f32 %v5641_v29  ;;  %v5430_v29 = vrot.slane %v13603_v2, 3  ;;  %v5434_v41 = vrot.slane %v13603_v2, 4  ;;  %v7878_v56 = vmul.f32 -1.442695, %v5564_v32 }
 0x9f8   :  { %v9863_v62 = vpop.eup %9862  ;;  %9882 = vrcp.f32 %v5642_v8  ;;  %v5438_v16 = vrot.slane %v13603_v2, 5 }
 0x9f9   :  { %v9865_v59 = vpop.eup %9864  ;;  %9884 = vtanh.f32 %v5569_v36 }
 0x9fa   :  { %v9867_v19 = vpop.eup %9866  ;;  %9886 = vtanh.f32 %v5573_v6  ;;  %v13782_v26 = vmul.f32 %v9865_v59, %v9859_v0  ;;  %v5550_v6 = vadd.f32 %v5426_v63, %v14775_v47  ;;  %v7879_v0 = vmul.f32 -1.442695, %v5568_v42  ;;  %v15034_v63 = vld [vmem:[#allocation67_spill] sm:$0xff] }
 0x9fb   :  { %v9869_v11 = vpop.eup %9868  ;;  %9888 = vtanh.f32 %v5577_v52  ;;  %v13785_v8 = vmul.f32 %v9867_v19, %v9861_v43  ;;  %v5554_v59 = vadd.f32 %v5430_v29, %v15031_v10  ;;  %v7880_v52 = vmul.f32 -1.442695, %v5572_v50  ;;  %v15032_v19 = vld [vmem:[#allocation62_spill] sm:$0xff] }
 0x9fc   :  { %v9871_v23 = vpop.eup %9870  ;;  %v13788_v36 = vmul.f32 %v9869_v11, %v9863_v62  ;;  %9890 = vpow2.f32 %v7874_v21  ;;  %v5558_v43 = vadd.f32 %v5434_v41, %v15032_v19  ;;  %v7881_v11 = vmul.f32 -1.442695, %v5576_v1  ;;  %v15033_v62 = vld [vmem:[#allocation65_spill] sm:$0xff] }
 0x9fd   :  { %v9873_v7 = vpop.eup %9872  ;;  %9892 = vpow2.f32 %v7875_v38  ;;  %v5562_v21 = vadd.f32 %v5438_v16, %v15033_v62  ;;  %v5566_v42 = vadd.f32 %v5442_v58, %v15034_v63  ;;  %v7890_v38 = vmul.f32 -1.442695, %v5550_v6 }
 0x9fe   :  { %v9875_v27 = vpop.eup %9874  ;;  %9894 = vpow2.f32 %v7876_v31  ;;  %v7891_v31 = vmul.f32 -1.442695, %v5554_v59  ;;  %v7892_v41 = vmul.f32 -1.442695, %v5558_v43 }
 0x9ff   :  { %v9877_v32 = vpop.eup %9876  ;;  %v13794_v25 = vmul.f32 %v9875_v27, %v9871_v23  ;;  %9896 = vpow2.f32 %v7877_v9  ;;  %v7893_v27 = vmul.f32 -1.442695, %v5562_v21  ;;  %v7894_v9 = vmul.f32 -1.442695, %v5566_v42 }
 0xa00   :  { %v9879_v51 = vpop.eup %9878  ;;  %v13797_v54 = vmul.f32 %v9877_v32, %v9873_v7  ;;  %9898 = vpow2.f32 %v7878_v56  ;;  %v5446_v56 = vrot.slane %v13603_v2, 7 }
 0xa01   :  { %v9881_v29 = vpop.eup %9880  ;;  %9900 = vpow2.f32 %v7879_v0 }
 0xa02   :  { %v9883_v50 = vpop.eup %9882  ;;  %9902 = vpow2.f32 %v7880_v52  ;;  %v5450_v52 = vrot.slane %v13603_v2, 1 }
 0xa03   :  { %v9885_v19 = vpop.eup %9884  ;;  %9904 = vpow2.f32 %v7881_v11  ;;  %v15035_v11 = vld [vmem:[#allocation69_spill] sm:$0xff] }
 0xa04   :  { %v9887_v23 = vpop.eup %9886  ;;  %v13800_v1 = vmul.f32 %v9885_v19, %v9879_v51  ;;  %9906 = vpow2.f32 %v7890_v38  ;;  %v5570_v21 = vadd.f32 %v5446_v56, %v15035_v11 }
 0xa05   :  { %v9889_v16 = vpop.eup %9888  ;;  %9908 = vpow2.f32 %v7891_v31  ;;  %v13803_v58 = vmul.f32 %v9887_v23, %v9881_v29  ;;  %v15036_v29 = vld [vmem:[#allocation72_spill] sm:$0xff]  ;;  %v15037_v23 = vld [vmem:[#allocation39_spill] sm:$0xff] }
 0xa06   :  { %v9891_v6 = vpop.eup %9890  ;;  %9910 = vpow2.f32 %v7892_v41  ;;  %v13805_v7 = vmul.f32 %v9889_v16, %v9883_v50  ;;  %v5574_v31 = vadd.f32 %v13603_v2, %v15036_v29  ;;  %v5578_v16 = vadd.f32 %v5450_v52, %v15037_v23 }
 0xa07   :  { %v9893_v0 = vpop.eup %9892  ;;  %v5731_v59 = vadd.f32 1.0, %v9891_v6  ;;  %9912 = vpow2.f32 %v7893_v27 }
 0xa08   :  { %v9895_v43 = vpop.eup %9894  ;;  %v5732_v51 = vadd.f32 1.0, %v9893_v0  ;;  %9914 = vpow2.f32 %v7894_v9  ;;  %v7897_v11 = vmul.f32 -1.442695, %v5578_v16 }
 0xa09   :  { %v9897_v19 = vpop.eup %9896  ;;  %v5733_v32 = vadd.f32 1.0, %v9895_v43  ;;  %9916 = vrcp.f32 %v5731_v59  ;;  %v7895_v59 = vmul.f32 -1.442695, %v5570_v21  ;;  %v15039_v21 = vld [vmem:[#allocation37_spill] sm:$0xff] }
 0xa0a   :  { %v9899_v42 = vpop.eup %9898  ;;  %v5734_v38 = vadd.f32 1.0, %v9897_v19  ;;  %9918 = vrcp.f32 %v5732_v51  ;;  %v7896_v19 = vmul.f32 -1.442695, %v5574_v31  ;;  %v5908_v29 = vrot.slane %v15039_v21, 7  ;;  %v15043_v21 = vld [vmem:[#allocation58_spill] sm:$0xff] }
 0xa0b   :  { %v9901_v50 = vpop.eup %9900  ;;  %v5735_v41 = vadd.f32 1.0, %v9899_v42  ;;  %9920 = vrcp.f32 %v5733_v32 }
 0xa0c   :  { %v9903_v27 = vpop.eup %9902  ;;  %v5736_v6 = vadd.f32 1.0, %v9901_v50  ;;  %9922 = vrcp.f32 %v5734_v38  ;;  %v15038_v50 = vld [vmem:[#allocation36_spill] sm:$0xff] }
 0xa0d   :  { %v9905_v9 = vpop.eup %9904  ;;  %v5737_v0 = vadd.f32 1.0, %v9903_v27  ;;  %9924 = vrcp.f32 %v5735_v41  ;;  %v5907_v38 = vrot.slane %v15038_v50, 7 }
 0xa0e   :  { %v9907_v43 = vpop.eup %9906  ;;  %v5738_v56 = vadd.f32 1.0, %v9905_v9  ;;  %9926 = vrcp.f32 %v5736_v6  ;;  %v15040_v9 = vld [vmem:[#allocation40_spill] sm:$0xff] }
 0xa0f   :  { %v9909_v51 = vpop.eup %9908  ;;  %9928 = vrcp.f32 %v5737_v0  ;;  %v5843_v42 = vadd.f32 1.0, %v9907_v43  ;;  %v5909_v0 = vrot.slane %v15040_v9, 7 }
 0xa10   :  { %v9911_v2 = vpop.eup %9910  ;;  %9930 = vrcp.f32 %v5738_v56  ;;  %v5844_v52 = vadd.f32 1.0, %v9909_v51  ;;  %v15041_v56 = vld [vmem:[#allocation33_spill] sm:$0xff]  ;;  %v5842_v51 = vadd.f32 1.0, %v13711_v5  ;;  %v15045_v5 = vld [vmem:[#allocation38_spill] sm:$0xff] }
 0xa11   :  { %v9913_v32 = vpop.eup %9912  ;;  %9932 = vpow2.f32 %v7895_v59  ;;  %v5845_v27 = vadd.f32 1.0, %v9911_v2  ;;  %v5910_v59 = vrot.slane %v15041_v56, 7  ;;  %v15042_v2 = vld [vmem:[#allocation41_spill] sm:$0xff] }
 0xa12   :  { %v9915_v23 = vpop.eup %9914  ;;  %9934 = vpow2.f32 %v7896_v19  ;;  %v5846_v6 = vadd.f32 1.0, %v9913_v32  ;;  %v5911_v50 = vrot.slane %v15042_v2, 7 }
 0xa13   :  { %v9917_v41 = vpop.eup %9916  ;;  %9936 = vpow2.f32 %v7897_v11  ;;  %v5847_v63 = vadd.f32 1.0, %v9915_v23 }
 0xa14   :  { %v9919_v31 = vpop.eup %9918  ;;  %v5939_v16 = vmul.f32 %v9917_v41, %v5907_v38  ;;  %9938 = vrcp.f32 %v5843_v42  ;;  %v5912_v38 = vrot.slane %v15043_v21, 7 }
 0xa15   :  { %v9921_v43 = vpop.eup %9920  ;;  %v5940_v62 = vmul.f32 %v9919_v31, %v5908_v29  ;;  %9940 = vrcp.f32 %v5844_v52  ;;  %v5913_v29 = vrot.slane %v15045_v5, 7 }
 0xa16   :  { %v9923_v19 = vpop.eup %9922  ;;  %v5941_v10 = vmul.f32 %v9921_v43, %v5909_v0  ;;  %v13819_v11 = vadd.f32 %v13782_v26, %v5939_v16  ;;  %9942 = vrcp.f32 %v5845_v27  ;;  %v15047_v26 = vld [vmem:[#allocation18_spill] sm:$0xff] }
 0xa17   :  { %v9925_v32 = vpop.eup %9924  ;;  %v5942_v23 = vmul.f32 %v9923_v19, %v5910_v59  ;;  %v13823_v42 = vadd.f32 %v13785_v8, %v5940_v62  ;;  %9944 = vrcp.f32 %v5846_v6  ;;  %v5914_v0 = vrot.slane %v15047_v26, 7 }
 0xa18   :  { %v9927_v41 = vpop.eup %9926  ;;  %9946 = vrcp.f32 %v5847_v63  ;;  %v5943_v52 = vmul.f32 %v9925_v32, %v5911_v50  ;;  %v13827_v31 = vadd.f32 %v13788_v36, %v5941_v10 }
 0xa19   :  { %15044 = vst [vmem:[#allocation60_spill] sm:$0xff] %v13823_v42  ;;  %v9929_v9 = vpop.eup %9928  ;;  %9948 = vrcp.f32 %v5842_v51  ;;  %v5944_v27 = vmul.f32 %v9927_v41, %v5912_v38  ;;  %v13831_v16 = vadd.f32 %v13794_v25, %v5942_v23 }
 0xa1a   :  { %15046 = vst [vmem:[#allocation64_spill] sm:$0xff] %v13827_v31  ;;  %v9931_v43 = vpop.eup %9930  ;;  %v5945_v8 = vmul.f32 %v9929_v9, %v5913_v29  ;;  %v13834_v62 = vadd.f32 %v13797_v54, %v5943_v52  ;;  %9950 = vtanh.f32 %v13699_v35 }
 0xa1b   :  { %15048 = vst [vmem:[#allocation66_spill] sm:$0xff] %v13831_v16  ;;  %v9933_v63 = vpop.eup %9932  ;;  %v5946_v6 = vmul.f32 %v9931_v43, %v5914_v0  ;;  %v13838_v36 = vadd.f32 %v13800_v1, %v5944_v27  ;;  %9952 = vtanh.f32 %v13702_v34 }
 0xa1c   :  { %15049 = vst [vmem:[#allocation68_spill] sm:$0xff] %v13834_v62  ;;  %v9935_v10 = vpop.eup %9934  ;;  %v5848_v56 = vadd.f32 1.0, %v9933_v63  ;;  %v13842_v59 = vadd.f32 %v13803_v58, %v5945_v8  ;;  %9954 = vtanh.f32 %v13738_v20 }
 0xa1d   :  { %15050 = vst [vmem:[#allocation20_spill] sm:$0xff] %v13838_v36  ;;  %v9937_v25 = vpop.eup %9936  ;;  %v5849_v51 = vadd.f32 1.0, %v9935_v10  ;;  %v13846_v54 = vadd.f32 %v13805_v7, %v5946_v6  ;;  %9956 = vtanh.f32 %v13741_v4 }
 0xa1e   :  { %15051 = vst [vmem:[#allocation21_spill] sm:$0xff] %v13842_v59  ;;  %v9939_v19 = vpop.eup %9938  ;;  %v5850_v2 = vadd.f32 1.0, %v9937_v25  ;;  %9958 = vrcp.f32 %v5848_v56 }
 0xa1f   :  { %15052 = vst [vmem:[#allocation61_spill] sm:$0xff] %v13846_v54  ;;  %v9941_v1 = vpop.eup %9940  ;;  %9960 = vrcp.f32 %v5849_v51 }
 0xa20   :  { %v13849_v50 = vpop.eup %9942  ;;  %9962 = vrcp.f32 %v5850_v2 }
 0xa21   :  { %v13851_v32 = vpop.eup %9944  ;;  %9964 = vtanh.f32 %v13744_v55 }
 0xa22   :  { %v13854_v58 = vpop.eup %9946  ;;  %9966 = vtanh.f32 %v13747_v3 }
 0xa23   :  { %v9949_v7 = vpop.eup %9948  ;;  %9968 = vtanh.f32 %v13749_v44 }
 0xa24   :  { %v9951_v21 = vpop.eup %9950  ;;  %9970 = vtanh.f32 %v13751_v48 }
 0xa25   :  { %v9953_v38 = vpop.eup %9952  ;;  %9972 = vtanh.f32 %v13819_v11  ;;  %v5995_v23 = vmul.f32 %v9951_v21, %v13714_v22 }
 0xa26   :  { %v9955_v41 = vpop.eup %9954  ;;  %9974 = vtanh.f32 %v13823_v42  ;;  %v5996_v5 = vmul.f32 %v9953_v38, %v13718_v37 }
 0xa27   :  { %v9957_v29 = vpop.eup %9956  ;;  %9976 = vtanh.f32 %v13827_v31  ;;  %v5997_v52 = vmul.f32 %v9955_v41, %v13723_v53  ;;  %v6011_v9 = vpack.c.bf16 %v5995_v23, %v5995_v23 }
 0xa28   :  { %v9959_v26 = vpop.eup %9958  ;;  %9978 = vtanh.f32 %v13831_v16  ;;  %v5998_v0 = vmul.f32 %v9957_v29, %v13728_v40  ;;  %v6012_v27 = vpack.c.bf16 %v5996_v5, %v5996_v5 }
 0xa29   :  { %v9961_v43 = vpop.eup %9960  ;;  %9980 = vtanh.f32 %v13834_v62  ;;  %v6013_v22 = vpack.c.bf16 %v5997_v52, %v5997_v52  ;;  %v6043_v8 = vunpack.c.l.b16 %v6011_v9 }
 0xa2a   :  { %v9963_v63 = vpop.eup %9962  ;;  %9982 = vtanh.f32 %v13838_v36  ;;  %v6014_v37 = vpack.c.bf16 %v5998_v0, %v5998_v0  ;;  %v6044_v6 = vunpack.c.l.b16 %v6012_v27 }
 0xa2b   :  { %v9965_v10 = vpop.eup %9964  ;;  %9984 = vtanh.f32 %v13842_v59  ;;  %v6045_v53 = vunpack.c.l.b16 %v6013_v22  ;;  %v6059_v56 = vrot.slane %v6043_v8, 6 }
 0xa2c   :  { %v9967_v25 = vpop.eup %9966  ;;  %9986 = vtanh.f32 %v13846_v54  ;;  %v5999_v40 = vmul.f32 %v9965_v10, %v13731_v17  ;;  %v6046_v51 = vunpack.c.l.b16 %v6014_v37  ;;  %v6060_v2 = vrot.slane %v6044_v6, 5 }
 0xa2d   :  { %v9969_v21 = vpop.eup %9968  ;;  %v6000_v38 = vmul.f32 %v9967_v25, %v13756_v30  ;;  %v6062_v23 = vrot.slane %v6045_v53, 4 }
 0xa2e   :  { %v9971_v41 = vpop.eup %9970  ;;  %v6001_v5 = vmul.f32 %v9969_v21, %v13760_v28  ;;  %v6015_v29 = vpack.c.bf16 %v5999_v40, %v5999_v40  ;;  %v6061_v52 = vsel %vm1325_vm1, %v6060_v2, %v6059_v56  ;;  %v6064_v9 = vrot.slane %v6046_v51, 3 }
 0xa2f   :  { %v9973_v0 = vpop.eup %9972  ;;  %v6002_v27 = vmul.f32 %v9971_v41, %v9949_v7  ;;  %v6016_v22 = vpack.c.bf16 %v6000_v38, %v6000_v38  ;;  %v6063_v8 = vsel %vm1328_vm2, %v6062_v23, %v6061_v52 }
 0xa30   :  { %v9975_v54 = vpop.eup %9974  ;;  %v6003_v17 = vmul.f32 %v9973_v0, %v9939_v19  ;;  %v6017_v37 = vpack.c.bf16 %v6001_v5, %v6001_v5  ;;  %v6047_v6 = vunpack.c.l.b16 %v6015_v29  ;;  %v6065_v10 = vsel %vm1331_vm3, %v6064_v9, %v6063_v8 }
 0xa31   :  { %v9977_v30 = vpop.eup %9976  ;;  %v6004_v53 = vmul.f32 %v9975_v54, %v9941_v1  ;;  %v6018_v25 = vpack.c.bf16 %v6002_v27, %v6002_v27  ;;  %v6048_v59 = vunpack.c.l.b16 %v6016_v22 }
 0xa32   :  { %v9979_v28 = vpop.eup %9978  ;;  %v6005_v40 = vmul.f32 %v9977_v30, %v13849_v50  ;;  %v6019_v56 = vpack.c.bf16 %v6003_v17, %v6003_v17  ;;  %v6049_v51 = vunpack.c.l.b16 %v6017_v37  ;;  %v6066_v2 = vrot.slane %v6047_v6, 2 }
 0xa33   :  { %v9981_v7 = vpop.eup %9980  ;;  %v6006_v21 = vmul.f32 %v9979_v28, %v13851_v32  ;;  %v6020_v38 = vpack.c.bf16 %v6004_v53, %v6004_v53  ;;  %v6050_v23 = vunpack.c.l.b16 %v6018_v25  ;;  %v6068_v19 = vrot.slane %v6048_v59, 1 }
 0xa34   :  { %v9983_v41 = vpop.eup %9982  ;;  %v6007_v5 = vmul.f32 %v9981_v7, %v13854_v58  ;;  %v6021_v29 = vpack.c.bf16 %v6005_v40, %v6005_v40  ;;  %v6051_v52 = vunpack.c.l.b16 %v6019_v56  ;;  %v6067_v54 = vsel %vm1334_vm4, %v6066_v2, %v6065_v10 }
 0xa35   :  { %v9985_v1 = vpop.eup %9984  ;;  %v6008_v9 = vmul.f32 %v9983_v41, %v9959_v26  ;;  %v6022_v0 = vpack.c.bf16 %v6006_v21, %v6006_v21  ;;  %v6052_v50 = vunpack.c.l.b16 %v6020_v38  ;;  %v6069_v27 = vsel %vm1337_vm5, %v6068_v19, %v6067_v54 }
 0xa36   :  { %v9987_v22 = vpop.eup %9986  ;;  %v6009_v8 = vmul.f32 %v9985_v1, %v9961_v43  ;;  %v6023_v17 = vpack.c.bf16 %v6007_v5, %v6007_v5  ;;  %v6053_v32 = vunpack.c.l.b16 %v6021_v29  ;;  %v6070_v37 = vsel %vm1340_vm6, %v6049_v51, %v6069_v27  ;;  %v8151_v1 = vld [vmem:[%s14353_s5] ss:$16 sps:$4 sm:$0xff]   ;;  %v8163_v27 = vld [vmem:[%s14353_s5 + $0x2c] ss:$16 sps:$4 sm:$0xff]  }
 0xa37   :  { %v6010_v59 = vmul.f32 %v9987_v22, %v9963_v63  ;;  %v6024_v6 = vpack.c.bf16 %v6008_v9, %v6008_v9  ;;  %v6054_v30 = vunpack.c.l.b16 %v6022_v0  ;;  %v6071_v58 = vrot.slane %v6050_v23, 7  ;;  %v8156_v0 = vld [vmem:[%s14353_s5 + $0x24] ss:$16 sps:$4 sm:$0xff]   ;;  %v8154_v22 = vld [vmem:[%s14353_s5 + $0x20] ss:$16 sps:$4 sm:$0xff]  }
 0xa38   :  { %v6025_v53 = vpack.c.bf16 %v6009_v8, %v6009_v8  ;;  %v6055_v25 = vunpack.c.l.b16 %v6023_v17  ;;  %v6073_v28 = vrot.slane %v6051_v52, 6  ;;  %v6074_v10 = vrot.slane %v6052_v50, 5  ;;  %v8158_v50 = vld [vmem:[%s14353_s5 + $0x8] ss:$16 sps:$4 sm:$0xff]  }
 0xa39   :  { %v6026_v40 = vpack.c.bf16 %v6010_v59, %v6010_v59  ;;  %v6056_v26 = vunpack.c.l.b16 %v6024_v6  ;;  %v6072_v56 = vsel %vm1343_vm7, %v6071_v58, %v6070_v37  ;;  %v6076_v2 = vrot.slane %v6053_v32, 4  ;;  %v8161_v17 = vld [vmem:[%s14353_s5 + $0x28] ss:$16 sps:$4 sm:$0xff]   ;;  %v8157_v32 = vld [vmem:[%s14354_s1] sm:$0xff]  }
 0xa3a   :  { %v6075_v7 = vsel %vm1325_vm1, %v6074_v10, %v6073_v28  ;;  %v6078_v43 = vrot.slane %v6054_v30, 3  ;;  %v6080_v51 = vrot.slane %v6055_v25, 2  ;;  %v6057_v23 = vunpack.c.l.b16 %v6025_v53 }
 0xa3b   :  { %v6058_v21 = vunpack.c.l.b16 %v6026_v40  ;;  %v6077_v38 = vsel %vm1328_vm2, %v6076_v2, %v6075_v7  ;;  %v6082_v19 = vrot.slane %v6056_v26, 1  ;;  %v15053_v8 = vmov 0  }
 0xa3c   :  { %v6079_v63 = vsel %vm1331_vm3, %v6078_v43, %v6077_v38 }
 0xa3d   :  { %v6081_v41 = vsel %vm1334_vm4, %v6080_v51, %v6079_v63  ;;  %v6085_v29 = vrot.slane %v6058_v21, 7  ;;  %v15055_v21 = vld [vmem:[#allocation12_spill] sm:$0xff]  ;;  %v15056_v51 = vld [vmem:[#allocation13_spill] sm:$0xff] }
 0xa3e   :  { %v6083_v5 = vsel %vm1337_vm5, %v6082_v19, %v6081_v41  ;;  %v15057_v19 = vld [vmem:[#allocation14_spill] sm:$0xff] }
 0xa3f   :  { %v6084_v52 = vsel %vm1340_vm6, %v6057_v23, %v6083_v5 }
 0xa40   :  { %v6086_v54 = vsel %vm1343_vm7, %v6085_v29, %v6084_v52  ;;  %v15058_v29 = vld [vmem:[#allocation15_spill] sm:$0xff] }
 0xa41   :  { %v6087_v9 = vpack.c.b16 %v6086_v54, %v6072_v56  ;;  %v15054_v56 = vld [vmem:[#allocation19_spill] sm:$0xff]  ;;  %v15059_v54 = vld [vmem:[#allocation16_spill] sm:$0xff] }
 0xa43   :  { %6122 = vmatmul.mubr.bf16.vlgmr.msra.gmra.mrb[52].mxu0 %v6087_v9  ;;  %6165 = vmatmul.mubr.bf16.vlgmr.msra.gmra.mrb[68].mxu1 %v6087_v9 }
 0xa44   :  { %6875 = vmatpush1.bf16.msra.mxu0 %v8151_v1  ;;  %6906 = vmatprep.mubr.bf16.mxu0 %v15053_v8 }
 0xa45   :  { %6876 = vmatprep.subr.bf16.mxu0 %v8156_v0  ;;  %6916 = vmatpush1.bf16.msra.mxu1 %v8158_v50  ;;  %v15060_v0 = vld [vmem:[#allocation17_spill] sm:$0xff] }
 0xa46   :  { %6917 = vmatprep.subr.bf16.mxu1 %v8163_v27  ;;  %6947 = vmatprep.mubr.bf16.mxu1 %v15053_v8  ;;  %v15061_v8 = vld [vmem:[#allocation10_spill] sm:$0xff] }
 0xa48   :  { %6877 = vmatpush1.bf16.msra.mxu0 %v8154_v22 }
 0xa49   :  { %6918 = vmatpush1.bf16.msra.mxu1 %v8161_v17 }
 0xa4b   :  { %7955 = vmatmul.mubr.msk.bf16.vlgmr.msra.gmra.mrb[56].mxu0 %vm171_vm0, %v8157_v32 }
 0xa4c   :  { %7956 = vmatmul.mubr.msk.bf16.vlgmr.msra.gmra.mrb[72].mxu1 %vm171_vm0, %v8157_v32 }
 0xb16   :  { %v6123_v37 = vpop.f32.mrb[52].mxu0  ;;  %v13916_v59 = vpop.f32.mrb[68].mxu1 }
 0xb17   :  { %v6183_v6 = vrot.slane %v6123_v37, 1  ;;  %v6187_v30 = vrot.slane %v6123_v37, 2  ;;  %v6191_v58 = vrot.slane %v6123_v37, 3  ;;  %v6195_v53 = vrot.slane %v6123_v37, 4  ;;  %v13918_v25 = vpop.f32.mrb[53].mxu0  ;;  %v13920_v28 = vpop.f32.mrb[69].mxu1 }
 0xb18   :  { %v6199_v10 = vrot.slane %v6123_v37, 5  ;;  %v6203_v40 = vrot.slane %v6123_v37, 6  ;;  %v6207_v26 = vrot.slane %v6123_v37, 7  ;;  %v6331_v2 = vadd.f32 %v6123_v37, %v15054_v56  ;;  %v13923_v7 = vpop.f32.mrb[54].mxu0  ;;  %v13925_v43 = vpop.f32.mrb[70].mxu1 }
 0xb19   :  { %v6307_v38 = vadd.f32 %v6187_v30, %v15055_v21  ;;  %v6311_v63 = vadd.f32 %v6191_v58, %v15056_v51  ;;  %v6315_v23 = vadd.f32 %v6195_v53, %v15057_v19  ;;  %v13930_v41 = vpop.f32.mrb[55].mxu0  ;;  %v13932_v5 = vpop.f32.mrb[71].mxu1  ;;  %v6303_v17 = vadd.f32 %v6183_v6, %v15061_v8  ;;  %v15066_v19 = vld [vmem:[#allocation49_spill] sm:$0xff]  ;;  %v15071_v8 = vld [vmem:[#allocation55_spill] sm:$0xff] }
 0xb1a   :  { %v6319_v52 = vadd.f32 %v6199_v10, %v15058_v29  ;;  %v6323_v1 = vadd.f32 %v6203_v40, %v15059_v54  ;;  %v7905_v9 = vmul.f32 -1.442695, %v6331_v2  ;;  %v6327_v50 = vadd.f32 %v6207_v26, %v15060_v0  ;;  %v15068_v54 = vld [vmem:[#allocation51_spill] sm:$0xff] }
 0xb1b   :  { %v7899_v27 = vmul.f32 -1.442695, %v6307_v38  ;;  %v7900_v22 = vmul.f32 -1.442695, %v6311_v63  ;;  %v7901_v32 = vmul.f32 -1.442695, %v6315_v23 }
 0xb1c   :  { %9988 = vpow2.f32 %v7905_v9  ;;  %v7902_v37 = vmul.f32 -1.442695, %v6319_v52  ;;  %v6185_v30 = vrot.slane %v13916_v59, 1  ;;  %v7903_v58 = vmul.f32 -1.442695, %v6323_v1 }
 0xb1d   :  { %9990 = vpow2.f32 %v7899_v27  ;;  %v6189_v53 = vrot.slane %v13916_v59, 2  ;;  %v7904_v10 = vmul.f32 -1.442695, %v6327_v50  ;;  %v6193_v40 = vrot.slane %v13916_v59, 3  ;;  %v15070_v50 = vld [vmem:[#allocation53_spill] sm:$0xff] }
 0xb1e   :  { %v13940_v56 = vpop.f32.mrb[56].mxu0  ;;  %9992 = vpow2.f32 %v7900_v22  ;;  %v7898_v21 = vmul.f32 -1.442695, %v6303_v17  ;;  %v6197_v6 = vrot.slane %v13916_v59, 4  ;;  %v6201_v63 = vrot.slane %v13916_v59, 5  ;;  %v8164_v22 = vld [vmem:[%s14355_s7 + $0x40] sm:$0xff]  }
 0xb1f   :  { %15062 = vst [vmem:[#allocation63_spill] sm:$0xff] %v13940_v56  ;;  %v6910_v26 = vpop.f32.mrb[57].mxu0  ;;  %v13943_v2 = vpop.f32.mrb[72].mxu1  ;;  %9994 = vpow2.f32 %v7901_v32  ;;  %v6305_v23 = vadd.f32 %v6185_v30, %v15066_v19  ;;  %v6309_v1 = vadd.f32 %v6189_v53, %v15068_v54  ;;  %v6205_v0 = vrot.slane %v13916_v59, 6  ;;  %v15072_v30 = vld [vmem:[#allocation57_spill] sm:$0xff]  ;;  %7996 = vmatprep.subr.bf16.mxu0 %v8164_v22  ;;  %v15073_v19 = vld [vmem:[#allocation3_spill] sm:$0xff] }
 0xb20   :  { %15063 = vst [vmem:[#allocation71_spill] sm:$0xff] %v13943_v2  ;;  %v13946_v38 = vpop.f32.mrb[58].mxu0  ;;  %v13948_v51 = vpop.f32.mrb[73].mxu1  ;;  %9996 = vpow2.f32 %v7902_v37  ;;  %v6313_v27 = vadd.f32 %v6193_v40, %v15070_v50  ;;  %v6317_v17 = vadd.f32 %v6197_v6, %v15071_v8  ;;  %v6184_v32 = vrot.slane %v13918_v25, 1  ;;  %v8165_v37 = vld [vmem:[%s14355_s7] sm:$0xff]   ;;  %v8167_v26 = vld [vmem:[%s14355_s7 + $0x8] sm:$0xff]  }
 0xb21   :  { %15064 = vst [vmem:[#allocation73_spill] sm:$0xff] %v13946_v38  ;;  %15065 = vst [vmem:[#allocation32_spill] sm:$0xff] %v13948_v51  ;;  %v6913_v29 = vpop.f32.mrb[59].mxu0  ;;  %v13952_v52 = vpop.f32.mrb[74].mxu1  ;;  %9998 = vpow2.f32 %v7903_v58  ;;  %v6321_v58 = vadd.f32 %v6201_v63, %v15072_v30  ;;  %7997 = vmatpush3.bf16.msra.mxu0 %v8165_v37  ;;  %v6209_v6 = vrot.slane %v13916_v59, 7  ;;  %v6325_v63 = vadd.f32 %v6205_v0, %v15073_v19  ;;  %v15074_v50 = vld [vmem:[#allocation11_spill] sm:$0xff] }
 0xb22   :  { %15067 = vst [vmem:[#allocation34_spill] sm:$0xff] %v13952_v52  ;;  %v13955_v9 = vpop.f32.mrb[75].mxu1  ;;  %10000 = vpow2.f32 %v7904_v10  ;;  %v8166_v10 = vld [vmem:[%s14355_s7 + $0x48] sm:$0xff]   ;;  %v6192_v37 = vrot.slane %v13918_v25, 3  ;;  %v6196_v0 = vrot.slane %v13918_v25, 4 }
 0xb23   :  { %15069 = vst [vmem:[#allocation70_spill] sm:$0xff] %v13955_v9  ;;  %10002 = vpow2.f32 %v7898_v21  ;;  %7998 = vmatprep.subr.bf16.mxu0 %v8166_v10  ;;  %v6204_v10 = vrot.slane %v13918_v25, 6  ;;  %v15077_v38 = vld [vmem:[#allocation23_spill] sm:$0xff] }
 0xb24   :  { %10004 = vtanh.f32 %v6305_v23  ;;  %v8168_v23 = vld [vmem:[%s14355_s7 + $0x50] sm:$0xff]  }
 0xb25   :  { %10006 = vtanh.f32 %v6309_v1  ;;  %v6188_v1 = vrot.slane %v13918_v25, 2  ;;  %7999 = vmatpush3.bf16.msra.mxu0 %v8167_v26  ;;  %v15075_v26 = vld [vmem:[#allocation6_spill] sm:$0xff] }
 0xb26   :  { %v9989_v53 = vpop.eup %9988  ;;  %10008 = vtanh.f32 %v6313_v27  ;;  %v6304_v27 = vadd.f32 %v6184_v32, %v15074_v50  ;;  %8000 = vmatprep.subr.bf16.mxu0 %v8168_v23  ;;  %v8170_v32 = vld [vmem:[%s14355_s7 + $0x58] sm:$0xff]   ;;  %v6329_v19 = vadd.f32 %v6209_v6, %v15075_v26  ;;  %v8172_v6 = vld [vmem:[%s14355_s7 + $0x60] sm:$0xff]  }
 0xb27   :  { %v6422_v40 = vadd.f32 1.0, %v9989_v53  ;;  %v9991_v21 = vpop.eup %9990  ;;  %10010 = vtanh.f32 %v6317_v17  ;;  %v8169_v17 = vld [vmem:[%s14355_s7 + $0x10] sm:$0xff]   ;;  %v8171_v23 = vld [vmem:[%s14355_s7 + $0x18] sm:$0xff]  }
 0xb28   :  { %v9993_v29 = vpop.eup %9992  ;;  %v6416_v54 = vadd.f32 1.0, %v9991_v21  ;;  %10012 = vtanh.f32 %v6321_v58  ;;  %v6200_v58 = vrot.slane %v13918_v25, 5  ;;  %v7914_v9 = vmul.f32 -1.442695, %v6304_v27 }
 0xb29   :  { %v9995_v22 = vpop.eup %9994  ;;  %v6417_v8 = vadd.f32 1.0, %v9993_v29  ;;  %10014 = vrcp.f32 %v6422_v40  ;;  %v6208_v29 = vrot.slane %v13918_v25, 7  ;;  %8001 = vmatpush3.bf16.msra.mxu0 %v8169_v17  ;;  %v15083_v17 = vld [vmem:[#allocation28_spill] sm:$0xff] }
 0xb2a   :  { %v9997_v30 = vpop.eup %9996  ;;  %v6418_v53 = vadd.f32 1.0, %v9995_v22  ;;  %10016 = vrcp.f32 %v6416_v54  ;;  %v15076_v54 = vld [vmem:[#allocation22_spill] sm:$0xff]  ;;  %8002 = vmatprep.subr.bf16.mxu0 %v8170_v32 }
 0xb2b   :  { %v9999_v40 = vpop.eup %9998  ;;  %v6419_v21 = vadd.f32 1.0, %v9997_v30  ;;  %10018 = vrcp.f32 %v6417_v8  ;;  %v6308_v22 = vadd.f32 %v6188_v1, %v15076_v54  ;;  %v6312_v30 = vadd.f32 %v6192_v37, %v15077_v38  ;;  %v15078_v8 = vld [vmem:[#allocation24_spill] sm:$0xff]  ;;  %v15081_v54 = vld [vmem:[#allocation26_spill] sm:$0xff]  ;;  %v15082_v38 = vld [vmem:[#allocation27_spill] sm:$0xff] }
 0xb2c   :  { %v10001_v50 = vpop.eup %10000  ;;  %v6420_v52 = vadd.f32 1.0, %v9999_v40  ;;  %10020 = vrcp.f32 %v6418_v53  ;;  %v6316_v56 = vadd.f32 %v6196_v0, %v15078_v8  ;;  %v15079_v1 = vld [vmem:[#allocation8_spill] sm:$0xff]  ;;  %v15080_v40 = vld [vmem:[#allocation25_spill] sm:$0xff]  ;;  %v6328_v37 = vadd.f32 %v6208_v29, %v15082_v38 }
 0xb2d   :  { %v10003_v2 = vpop.eup %10002  ;;  %v6421_v51 = vadd.f32 1.0, %v10001_v50  ;;  %10022 = vrcp.f32 %v6419_v21  ;;  %v6333_v27 = vadd.f32 %v13916_v59, %v15079_v1  ;;  %v6320_v26 = vadd.f32 %v6200_v58, %v15080_v40  ;;  %8003 = vmatpush3.bf16.msra.mxu0 %v8171_v23 }
 0xb2e   :  { %v14002_v53 = vpop.eup %10004  ;;  %10024 = vrcp.f32 %v6420_v52  ;;  %v6324_v50 = vadd.f32 %v6204_v10, %v15081_v54  ;;  %v6332_v8 = vadd.f32 %v13918_v25, %v15083_v17  ;;  %v7915_v36 = vmul.f32 -1.442695, %v6308_v22  ;;  %8004 = vmatprep.subr.bf16.mxu0 %v8172_v6  ;;  %v8175_v6 = vld [vmem:[%s14355_s7 + $0x28] sm:$0xff]  }
 0xb2f   :  { %v10007_v21 = vpop.eup %10006  ;;  %10026 = vrcp.f32 %v6421_v51  ;;  %v6190_v52 = vrot.slane %v13920_v28, 2  ;;  %v7916_v59 = vmul.f32 -1.442695, %v6312_v30  ;;  %v7917_v1 = vmul.f32 -1.442695, %v6316_v56  ;;  %v8173_v51 = vld [vmem:[%s14355_s7 + $0x20] sm:$0xff]  }
 0xb30   :  { %v10009_v0 = vpop.eup %10008  ;;  %10028 = vtanh.f32 %v6325_v63  ;;  %v6194_v58 = vrot.slane %v13920_v28, 3  ;;  %v7918_v63 = vmul.f32 -1.442695, %v6320_v26  ;;  %v7919_v32 = vmul.f32 -1.442695, %v6324_v50  ;;  %v8174_v56 = vld [vmem:[%s14355_s7 + $0x68] sm:$0xff]  }
 0xb31   :  { %v10011_v62 = vpop.eup %10010  ;;  %10030 = vtanh.f32 %v6329_v19  ;;  %v6198_v25 = vrot.slane %v13920_v28, 4  ;;  %v7920_v22 = vmul.f32 -1.442695, %v6328_v37  ;;  %v6202_v19 = vrot.slane %v13920_v28, 5  ;;  %v15085_v50 = vld [vmem:[#allocation54_spill] sm:$0xff]  ;;  %8005 = vmatpush3.bf16.msra.mxu0 %v8173_v51 }
 0xb32   :  { %v10013_v10 = vpop.eup %10012  ;;  %10032 = vtanh.f32 %v6333_v27  ;;  %v7921_v30 = vmul.f32 -1.442695, %v6332_v8  ;;  %v6186_v40 = vrot.slane %v13920_v28, 1  ;;  %v15084_v27 = vld [vmem:[#allocation52_spill] sm:$0xff]  ;;  %v6314_v38 = vadd.f32 %v6194_v58, %v15085_v50  ;;  %8006 = vmatprep.subr.bf16.mxu0 %v8174_v56 }
 0xb33   :  { %v10015_v29 = vpop.eup %10014  ;;  %10034 = vpow2.f32 %v7914_v9  ;;  %v6310_v26 = vadd.f32 %v6190_v52, %v15084_v27  ;;  %v15086_v8 = vld [vmem:[#allocation56_spill] sm:$0xff]  ;;  %v6415_v16 = vadd.f32 1.0, %v10003_v2 }
 0xb34   :  { %v10017_v23 = vpop.eup %10016  ;;  %10036 = vpow2.f32 %v7915_v36  ;;  %v8176_v36 = vld [vmem:[%s14355_s7 + $0x70] sm:$0xff]   ;;  %v6318_v52 = vadd.f32 %v6198_v25, %v15086_v8 }
 0xb35   :  { %v10019_v54 = vpop.eup %10018  ;;  %v14026_v9 = vmul.f32 %v10017_v23, %v10007_v21  ;;  %10038 = vpow2.f32 %v7916_v59  ;;  %v15087_v21 = vld [vmem:[#allocation2_spill] sm:$0xff]  ;;  %v7931_v42 = vmul.f32 -1.442695, %v6310_v26  ;;  %8007 = vmatpush3.bf16.msra.mxu0 %v8175_v6  ;;  %v8177_v2 = vld [vmem:[%s14355_s7 + $0x30] sm:$0xff]  }
 0xb36   :  { %v10021_v37 = vpop.eup %10020  ;;  %v14032_v17 = vmul.f32 %v10019_v54, %v10009_v0  ;;  %10040 = vpow2.f32 %v7917_v1  ;;  %v6322_v59 = vadd.f32 %v6202_v19, %v15087_v21  ;;  %v15088_v23 = vld [vmem:[#allocation50_spill] sm:$0xff]  ;;  %v7932_v1 = vmul.f32 -1.442695, %v6314_v38  ;;  %8008 = vmatprep.subr.bf16.mxu0 %v8176_v36 }
 0xb37   :  { %v10023_v27 = vpop.eup %10022  ;;  %v14035_v31 = vmul.f32 %v10021_v37, %v10011_v62  ;;  %10042 = vpow2.f32 %v7918_v63  ;;  %v6306_v50 = vadd.f32 %v6186_v40, %v15088_v23  ;;  %v7933_v63 = vmul.f32 -1.442695, %v6318_v52 }
 0xb38   :  { %v10025_v58 = vpop.eup %10024  ;;  %v14038_v51 = vmul.f32 %v10023_v27, %v10013_v10  ;;  %10044 = vpow2.f32 %v7919_v32  ;;  %v8178_v10 = vld [vmem:[%s14355_s7 + $0x78] sm:$0xff]   ;;  %v7934_v19 = vmul.f32 -1.442695, %v6322_v59  ;;  %v6206_v40 = vrot.slane %v13920_v28, 6  ;;  %v15090_v59 = vld [vmem:[#allocation7_spill] sm:$0xff] }
 0xb39   :  { %v10027_v0 = vpop.eup %10026  ;;  %10046 = vpow2.f32 %v7920_v22  ;;  %v7930_v26 = vmul.f32 -1.442695, %v6306_v50  ;;  %v6210_v54 = vrot.slane %v13920_v28, 7  ;;  %8009 = vmatpush3.bf16.msra.mxu0 %v8177_v2 }
 0xb3a   :  { %v10029_v62 = vpop.eup %10028  ;;  %10048 = vpow2.f32 %v7921_v30  ;;  %8010 = vmatprep.subr.bf16.mxu0 %v8178_v10  ;;  %v6211_v10 = vrot.slane %v13923_v7, 1 }
 0xb3b   :  { %v10031_v32 = vpop.eup %10030  ;;  %10050 = vrcp.f32 %v6415_v16  ;;  %v14047_v25 = vmul.f32 %v10029_v62, %v10025_v58  ;;  %v8179_v16 = vld [vmem:[%s14355_s7 + $0x38] sm:$0xff]   ;;  %v6330_v58 = vadd.f32 %v6210_v54, %v15090_v59  ;;  %v6692_v54 = vrot.slane %v13747_v3, 7 }
 0xb3c   :  { %v10033_v22 = vpop.eup %10032  ;;  %v14049_v56 = vmul.f32 %v10031_v32, %v10027_v0  ;;  %10052 = vpow2.f32 %v7931_v42  ;;  %v15089_v42 = vld [vmem:[#allocation4_spill] sm:$0xff]  ;;  %v6219_v3 = vrot.slane %v13923_v7, 3 }
 0xb3d   :  { %v10035_v6 = vpop.eup %10034  ;;  %v14052_v30 = vmul.f32 %v10033_v22, %v10015_v29  ;;  %10054 = vpow2.f32 %v7932_v1  ;;  %v6326_v27 = vadd.f32 %v6206_v40, %v15089_v42  ;;  %8011 = vmatpush3.bf16.msra.mxu0 %v8179_v16  ;;  %v15091_v1 = vld [vmem:[#allocation9_spill] sm:$0xff]  ;;  %v7936_v16 = vmul.f32 -1.442695, %v6330_v58 }
 0xb3e   :  { %v10037_v38 = vpop.eup %10036  ;;  %10056 = vpow2.f32 %v7933_v63  ;;  %v6511_v50 = vadd.f32 1.0, %v10035_v6  ;;  %v6334_v2 = vadd.f32 %v13920_v28, %v15091_v1  ;;  %v6691_v6 = vrot.slane %v13744_v55, 7  ;;  %v15092_v42 = vld [vmem:[#allocation29_spill] sm:$0xff]  ;;  %v15093_v1 = vld [vmem:[#allocation30_spill] sm:$0xff] }
 0xb3f   :  { %v10039_v36 = vpop.eup %10038  ;;  %v6512_v37 = vadd.f32 1.0, %v10037_v38  ;;  %10058 = vpow2.f32 %v7934_v19  ;;  %v6690_v19 = vrot.slane %v13741_v4, 7  ;;  %v7935_v40 = vmul.f32 -1.442695, %v6326_v27 }
 0xb40   :  { %v10041_v8 = vpop.eup %10040  ;;  %v6513_v52 = vadd.f32 1.0, %v10039_v36  ;;  %10060 = vpow2.f32 %v7930_v26  ;;  %v6688_v36 = vrot.slane %v13702_v34, 7  ;;  %v6689_v4 = vrot.slane %v13738_v20, 7 }
 0xb41   :  { %v10043_v29 = vpop.eup %10042  ;;  %v6514_v21 = vadd.f32 1.0, %v10041_v8  ;;  %10062 = vrcp.f32 %v6512_v37  ;;  %v7937_v37 = vmul.f32 -1.442695, %v6334_v2  ;;  %v6335_v27 = vadd.f32 %v6211_v10, %v15092_v42 }
 0xb42   :  { %v10045_v23 = vpop.eup %10044  ;;  %v6515_v0 = vadd.f32 1.0, %v10043_v29  ;;  %10064 = vrcp.f32 %v6513_v52  ;;  %v6215_v52 = vrot.slane %v13923_v7, 2  ;;  %v6223_v58 = vrot.slane %v13923_v7, 4 }
 0xb43   :  { %v10047_v62 = vpop.eup %10046  ;;  %v6516_v63 = vadd.f32 1.0, %v10045_v23  ;;  %10066 = vrcp.f32 %v6514_v21  ;;  %v6227_v20 = vrot.slane %v13923_v7, 5 }
 0xb44   :  { %v10049_v32 = vpop.eup %10048  ;;  %v6517_v22 = vadd.f32 1.0, %v10047_v62  ;;  %10068 = vrcp.f32 %v6515_v0  ;;  %v6231_v0 = vrot.slane %v13923_v7, 6  ;;  %v6339_v2 = vadd.f32 %v6215_v52, %v15093_v1 }
 0xb45   :  { %v14064_v26 = vpop.eup %10050  ;;  %10070 = vrcp.f32 %v6516_v63  ;;  %v6518_v38 = vadd.f32 1.0, %v10049_v32  ;;  %v7906_v62 = vmul.f32 -1.442695, %v6335_v27  ;;  %v6351_v52 = vadd.f32 %v6227_v20, %v14698_v12 }
 0xb46   :  { %v10053_v28 = vpop.eup %10052  ;;  %10072 = vrcp.f32 %v6511_v50  ;;  %v6693_v12 = vrot.slane %v13749_v44, 7  ;;  %v6213_v44 = vrot.slane %v13925_v43, 1 }
 0xb47   :  { %v10055_v8 = vpop.eup %10054  ;;  %10074 = vrcp.f32 %v6517_v22  ;;  %v6624_v55 = vadd.f32 1.0, %v10053_v28  ;;  %v15094_v22 = vld [vmem:[#allocation31_spill] sm:$0xff]  ;;  %v7910_v1 = vmul.f32 -1.442695, %v6351_v52 }
 0xb48   :  { %v10057_v29 = vpop.eup %10056  ;;  %10076 = vpow2.f32 %v7935_v40  ;;  %v6625_v59 = vadd.f32 1.0, %v10055_v8  ;;  %v6343_v40 = vadd.f32 %v6219_v3, %v15094_v22  ;;  %v6347_v8 = vadd.f32 %v6223_v58, %v14697_v24 }
 0xb49   :  { %v10059_v21 = vpop.eup %10058  ;;  %10078 = vpow2.f32 %v7936_v16  ;;  %v6626_v23 = vadd.f32 1.0, %v10057_v29  ;;  %v7907_v3 = vmul.f32 -1.442695, %v6339_v2  ;;  %v6237_v22 = vrot.slane %v13925_v43, 7 }
 0xb4a   :  { %v14074_v34 = vpop.eup %10060  ;;  %10080 = vrcp.f32 %v6518_v38  ;;  %v6627_v32 = vadd.f32 1.0, %v10059_v21  ;;  %v6235_v38 = vrot.slane %v13923_v7, 7 }
 0xb4b   :  { %v10063_v50 = vpop.eup %10062  ;;  %10082 = vpow2.f32 %v7937_v37 }
 0xb4c   :  { %v10065_v63 = vpop.eup %10064  ;;  %v6720_v10 = vmul.f32 %v10063_v50, %v6688_v36  ;;  %10084 = vrcp.f32 %v6624_v55  ;;  %v7909_v50 = vmul.f32 -1.442695, %v6347_v8 }
 0xb4d   :  { %v10067_v16 = vpop.eup %10066  ;;  %v6721_v28 = vmul.f32 %v10065_v63, %v6689_v4  ;;  %10086 = vrcp.f32 %v6625_v59 }
 0xb4e   :  { %v10069_v42 = vpop.eup %10068  ;;  %v6722_v37 = vmul.f32 %v10067_v16, %v6690_v19  ;;  %v6752_v29 = vadd.f32 %v14026_v9, %v6720_v10  ;;  %10088 = vrcp.f32 %v6626_v23  ;;  %v7908_v19 = vmul.f32 -1.442695, %v6343_v40 }
 0xb4f   :  { %v10071_v27 = vpop.eup %10070  ;;  %v14084_v36 = vmul.f32 %v10069_v42, %v6691_v6  ;;  %v6753_v55 = vadd.f32 %v14032_v17, %v6721_v28  ;;  %10090 = vpow2.f32 %v7906_v62  ;;  %v6355_v6 = vadd.f32 %v6231_v0, %v14699_v15 }
 0xb50   :  { %v14087_v4 = vpop.eup %10072  ;;  %v14089_v21 = vmul.f32 %v10071_v27, %v6692_v54  ;;  %v6754_v24 = vadd.f32 %v14035_v31, %v6722_v37  ;;  %10092 = vrcp.f32 %v6627_v32  ;;  %v6359_v23 = vadd.f32 %v6235_v38, %v14700_v61 }
 0xb51   :  { %v10075_v59 = vpop.eup %10074  ;;  %10094 = vtanh.f32 %v6752_v29  ;;  %v6363_v54 = vadd.f32 %v13923_v7, %v14701_v45  ;;  %v6217_v15 = vrot.slane %v13925_v43, 2  ;;  %v6221_v0 = vrot.slane %v13925_v43, 3 }
 0xb52   :  { %v10077_v9 = vpop.eup %10076  ;;  %10096 = vtanh.f32 %v6753_v55  ;;  %v7911_v61 = vmul.f32 -1.442695, %v6355_v6  ;;  %v6225_v45 = vrot.slane %v13925_v43, 4  ;;  %v6229_v7 = vrot.slane %v13925_v43, 5 }
 0xb53   :  { %v10079_v58 = vpop.eup %10078  ;;  %v6628_v17 = vadd.f32 1.0, %v10077_v9  ;;  %10098 = vpow2.f32 %v7907_v3  ;;  %v7912_v10 = vmul.f32 -1.442695, %v6359_v23  ;;  %v6233_v32 = vrot.slane %v13925_v43, 6 }
 0xb54   :  { %v10081_v20 = vpop.eup %10080  ;;  %v6629_v31 = vadd.f32 1.0, %v10079_v58  ;;  %10100 = vpow2.f32 %v7908_v19  ;;  %v6694_v16 = vrot.slane %v13751_v48, 7  ;;  %v7913_v28 = vmul.f32 -1.442695, %v6363_v54 }
 0xb55   :  { %v14097_v2 = vpop.eup %10082  ;;  %10102 = vtanh.f32 %v6754_v24  ;;  %v6687_v38 = vrot.slane %v13699_v35, 7  ;;  %v6337_v42 = vadd.f32 %v6213_v44, %v11248_v18  ;;  %v6341_v37 = vadd.f32 %v6217_v15, %v11258_v57 }
 0xb56   :  { %v10085_v62 = vpop.eup %10084  ;;  %10104 = vrcp.f32 %v6628_v17  ;;  %v6345_v29 = vadd.f32 %v6221_v0, %v14764_v14  ;;  %v6349_v55 = vadd.f32 %v6225_v45, %v14765_v33  ;;  %v6353_v48 = vadd.f32 %v6229_v7, %v14766_v60 }
 0xb57   :  { %v10087_v63 = vpop.eup %10086  ;;  %10106 = vrcp.f32 %v6629_v31  ;;  %v14116_v35 = vadd.f32 %v6233_v32, %v14767_v46  ;;  %v14119_v24 = vadd.f32 %v6237_v22, %v14829_v39  ;;  %v14123_v57 = vadd.f32 %v13925_v43, %v15025_v49 }
 0xb58   :  { %v10089_v40 = vpop.eup %10088  ;;  %10108 = vpow2.f32 %v7909_v50  ;;  %v6212_v14 = vrot.slane %v13930_v41, 1  ;;  %v6216_v33 = vrot.slane %v13930_v41, 2  ;;  %v6220_v60 = vrot.slane %v13930_v41, 3 }
 0xb59   :  { %v10091_v8 = vpop.eup %10090  ;;  %10110 = vpow2.f32 %v7910_v1  ;;  %v6224_v46 = vrot.slane %v13930_v41, 4  ;;  %v6719_v9 = vmul.f32 %v14087_v4, %v6687_v38  ;;  %v6725_v39 = vmul.f32 %v10075_v59, %v6693_v12  ;;  %v15095_v38 = vld [vmem:[#allocation42_spill] sm:$0xff] }
 0xb5a   :  { %v14111_v52 = vpop.eup %10092  ;;  %10112 = vpow2.f32 %v7911_v61  ;;  %v6423_v27 = vadd.f32 1.0, %v10091_v8  ;;  %v6228_v49 = vrot.slane %v13930_v41, 5  ;;  %v6726_v43 = vmul.f32 %v10081_v20, %v6694_v16 }
 0xb5b   :  { %v10095_v3 = vpop.eup %10094  ;;  %10114 = vpow2.f32 %v7912_v10  ;;  %v6735_v54 = vmul.f32 %v14064_v26, %v14002_v53  ;;  %v14135_v31 = vadd.f32 %v14038_v51, %v14084_v36  ;;  %v14141_v4 = vadd.f32 %v14047_v25, %v14089_v21  ;;  %v8180_v53 = vld [vmem:[%s14356_s9] sm:$0xff]  }
 0xb5c   :  { %v10097_v18 = vpop.eup %10096  ;;  %10116 = vpow2.f32 %v7913_v28  ;;  %v14144_v59 = vadd.f32 %v14049_v56, %v6725_v39  ;;  %v14147_v12 = vadd.f32 %v14052_v30, %v6726_v43  ;;  %v6784_v36 = vmul.f32 %v10095_v3, %v10085_v62  ;;  %v15100_v39 = vld [vmem:[#allocation47_spill] sm:$0xff] }
 0xb5d   :  { %v10099_v19 = vpop.eup %10098  ;;  %10118 = vrcp.f32 %v6423_v27  ;;  %v14154_v51 = vadd.f32 %v6735_v54, %v6719_v9  ;;  %v6785_v20 = vmul.f32 %v10097_v18, %v10087_v63  ;;  %v6232_v25 = vrot.slane %v13930_v41, 6  ;;  %v8181_v63 = vld [vmem:[%s14356_s9 + $0x8] sm:$0xff]   ;;  %v15098_v18 = vld [vmem:[#allocation45_spill] sm:$0xff] }
 0xb5e   :  { %v10101_v6 = vpop.eup %10100  ;;  %v6424_v58 = vadd.f32 1.0, %v10099_v19  ;;  %10120 = vtanh.f32 %v6337_v42  ;;  %v7006_v30 = vrot.slane %v6784_v36, 7  ;;  %v10467_v0 = vmov 0.0   ;;  %v15096_v27 = vld [vmem:[#allocation43_spill] sm:$0xff]  ;;  %v15099_v19 = vld [vmem:[#allocation46_spill] sm:$0xff] }
 0xb5f   :  { %v10103_v17 = vpop.eup %10102  ;;  %v6425_v23 = vadd.f32 1.0, %v10101_v6  ;;  %10122 = vtanh.f32 %v6341_v37  ;;  %v7007_v15 = vrot.slane %v6785_v20, 6  ;;  %8036 = vmatprep.subr.bf16.mxu1 %v10467_v0  ;;  %8056 = vmatprep.subr.bf16.mxu0 %v10467_v0  ;;  %v6236_v62 = vrot.slane %v13930_v41, 7 }
 0xb60   :  { %v14137_v50 = vpop.eup %10104  ;;  %10124 = vrcp.f32 %v6424_v58  ;;  %v6786_v56 = vmul.f32 %v10103_v17, %v10089_v40  ;;  %8037 = vmatpush3.bf16.msra.mxu1 %v8180_v53  ;;  %v6336_v22 = vadd.f32 %v6212_v14, %v14893_v13  ;;  %v6340_v8 = vadd.f32 %v6216_v33, %v15095_v38  ;;  %v8182_v33 = vld [vmem:[%s14356_s9 + $0x10] sm:$0xff]   ;;  %8052 = vmatprep.mubr.msk.bf16.mxu1 %vm10468_vm10, %v10467_v0 }
 0xb61   :  { %v14152_v26 = vpop.eup %10106  ;;  %10126 = vrcp.f32 %v6425_v23  ;;  %v7008_v40 = vsel %vm1325_vm1, %v7007_v15, %v7006_v30  ;;  %8038 = vmatprep.subr.bf16.mxu1 %v10467_v0  ;;  %v6352_v14 = vadd.f32 %v6228_v49, %v15098_v18  ;;  %v6356_v9 = vadd.f32 %v6232_v25, %v15099_v19  ;;  %v15101_v49 = vld [vmem:[#allocation48_spill] sm:$0xff] }
 0xb62   :  { %v10109_v1 = vpop.eup %10108  ;;  %10128 = vtanh.f32 %v6345_v29  ;;  %v7009_v7 = vrot.slane %v6786_v56, 5  ;;  %v6360_v6 = vadd.f32 %v6236_v62, %v15100_v39  ;;  %v7922_v43 = vmul.f32 -1.442695, %v6336_v22  ;;  %v15102_v62 = vld [vmem:[#allocation59_spill] sm:$0xff] }
 0xb63   :  { %v10111_v21 = vpop.eup %10110  ;;  %v6426_v44 = vadd.f32 1.0, %v10109_v1  ;;  %10130 = vtanh.f32 %v6349_v55  ;;  %v6344_v55 = vadd.f32 %v6220_v60, %v15096_v27  ;;  %v6214_v60 = vrot.slane %v13932_v5, 1 }
 0xb64   :  { %v10113_v61 = vpop.eup %10112  ;;  %v6427_v45 = vadd.f32 1.0, %v10111_v21  ;;  %10132 = vtanh.f32 %v6353_v48  ;;  %v14168_v42 = vsel %vm1328_vm2, %v7009_v7, %v7008_v40  ;;  %v15097_v48 = vld [vmem:[#allocation44_spill] sm:$0xff]  ;;  %8039 = vmatpush3.bf16.msra.mxu1 %v8181_v63  ;;  %v6364_v23 = vadd.f32 %v13930_v41, %v15101_v49 }
 0xb65   :  { %v10115_v10 = vpop.eup %10114  ;;  %v6428_v32 = vadd.f32 1.0, %v10113_v61  ;;  %10134 = vrcp.f32 %v6426_v44  ;;  %v6348_v3 = vadd.f32 %v6224_v46, %v15097_v48  ;;  %8040 = vmatprep.subr.bf16.mxu1 %v10467_v0  ;;  %v7923_v54 = vmul.f32 -1.442695, %v6340_v8 }
 0xb66   :  { %v10117_v16 = vpop.eup %10116  ;;  %v6429_v28 = vadd.f32 1.0, %v10115_v10  ;;  %10136 = vrcp.f32 %v6427_v45  ;;  %v6218_v53 = vrot.slane %v13932_v5, 2  ;;  %v7924_v1 = vmul.f32 -1.442695, %v6344_v55  ;;  %v15103_v10 = vld [vmem:[#allocation62_spill] sm:$0xff] }
 0xb67   :  { %v10119_v37 = vpop.eup %10118  ;;  %v6430_v29 = vadd.f32 1.0, %v10117_v16  ;;  %10138 = vrcp.f32 %v6428_v32  ;;  %v6222_v25 = vrot.slane %v13932_v5, 3  ;;  %v7925_v21 = vmul.f32 -1.442695, %v6348_v3 }
 0xb68   :  { %v10121_v13 = vpop.eup %10120  ;;  %10140 = vrcp.f32 %v6429_v28  ;;  %v7926_v44 = vmul.f32 -1.442695, %v6352_v14  ;;  %8041 = vmatpush3.bf16.msra.mxu1 %v8182_v33  ;;  %v6230_v15 = vrot.slane %v13932_v5, 5  ;;  %v7927_v45 = vmul.f32 -1.442695, %v6356_v9  ;;  %v15104_v28 = vld [vmem:[#allocation65_spill] sm:$0xff] }
 0xb69   :  { %v10123_v58 = vpop.eup %10122  ;;  %10142 = vrcp.f32 %v6430_v29  ;;  %v14179_v17 = vmul.f32 %v10121_v13, %v10119_v37  ;;  %8042 = vmatprep.subr.bf16.mxu1 %v10467_v0  ;;  %v7928_v63 = vmul.f32 -1.442695, %v6360_v6  ;;  %v6346_v32 = vadd.f32 %v6222_v25, %v15103_v10  ;;  %v15105_v37 = vld [vmem:[#allocation67_spill] sm:$0xff]  ;;  %v15106_v25 = vld [vmem:[#allocation69_spill] sm:$0xff] }
 0xb6a   :  { %v10125_v46 = vpop.eup %10124  ;;  %10144 = vtanh.f32 %v14116_v35  ;;  %v6226_v35 = vrot.slane %v13932_v5, 4  ;;  %v7929_v16 = vmul.f32 -1.442695, %v6364_v23  ;;  %v6354_v29 = vadd.f32 %v6230_v15, %v15105_v37  ;;  %v15109_v37 = vld [vmem:[#allocation5_spill] sm:$0xff] }
 0xb6b   :  { %v10127_v36 = vpop.eup %10126  ;;  %10146 = vtanh.f32 %v14119_v24  ;;  %v14187_v20 = vmul.f32 %v10125_v46, %v10123_v58  ;;  %v6338_v24 = vadd.f32 %v6214_v60, %v14775_v47  ;;  %v7940_v13 = vmul.f32 -1.442695, %v6346_v32 }
 0xb6c   :  { %v10129_v56 = vpop.eup %10128  ;;  %10148 = vtanh.f32 %v14123_v57  ;;  %v6342_v57 = vadd.f32 %v6218_v53, %v15102_v62  ;;  %v6350_v38 = vadd.f32 %v6226_v35, %v15104_v28  ;;  %v7942_v39 = vmul.f32 -1.442695, %v6354_v29  ;;  %v15107_v35 = vld [vmem:[#allocation72_spill] sm:$0xff]  ;;  %v15108_v62 = vld [vmem:[#allocation39_spill] sm:$0xff] }
 0xb6d   :  { %v10131_v41 = vpop.eup %10130  ;;  %v14192_v30 = vmul.f32 %v10129_v56, %v10127_v36  ;;  %10150 = vpow2.f32 %v7922_v43  ;;  %v7938_v27 = vmul.f32 -1.442695, %v6338_v24  ;;  %v6234_v58 = vrot.slane %v13932_v5, 6 }
 0xb6e   :  { %v10133_v61 = vpop.eup %10132  ;;  %10152 = vpow2.f32 %v7923_v54  ;;  %v7939_v48 = vmul.f32 -1.442695, %v6342_v57  ;;  %v7941_v14 = vmul.f32 -1.442695, %v6350_v38  ;;  %v6238_v60 = vrot.slane %v13932_v5, 7 }
 0xb6f   :  { %v10135_v7 = vpop.eup %10134  ;;  %10154 = vpow2.f32 %v7924_v1  ;;  %v6358_v56 = vadd.f32 %v6234_v58, %v15106_v25  ;;  %v6366_v57 = vadd.f32 %v13932_v5, %v15108_v62  ;;  %v15110_v29 = vsub.s32 0, %v15109_v37  ;;  %v15114_v58 = vld [vmem:[#allocation68_spill] sm:$0xff]  ;;  %v15120_v62 = vld [vmem:[#allocation61_spill] sm:$0xff] }
 0xb70   :  { %v10137_v22 = vpop.eup %10136  ;;  %v14199_v40 = vmul.f32 %v10135_v7, %v10131_v41  ;;  %10156 = vpow2.f32 %v7925_v21  ;;  %v6362_v41 = vadd.f32 %v6238_v60, %v15107_v35  ;;  %v6809_v7 = vld [vmem:[%s14357_s6] sm:$0xf]  ;;  %v6695_v5 = vrot.slane %v13819_v11, 7 }
 0xb71   :  { %v10139_v47 = vpop.eup %10138  ;;  %v14202_v8 = vmul.f32 %v10137_v22, %v10133_v61  ;;  %10158 = vpow2.f32 %v7926_v44  ;;  %v7943_v32 = vmul.f32 -1.442695, %v6358_v56  ;;  %v15116_v11 = vsub.s32 3, %v15109_v37 }
 0xb72   :  { %v10141_v55 = vpop.eup %10140  ;;  %10160 = vpow2.f32 %v7927_v45  ;;  %v7944_v28 = vmul.f32 -1.442695, %v6362_v41 }
 0xb73   :  { %v10143_v3 = vpop.eup %10142  ;;  %10162 = vpow2.f32 %v7928_v63 }
 0xb74   :  { %v10145_v18 = vpop.eup %10144  ;;  %10164 = vpow2.f32 %v7929_v16 }
 0xb75   :  { %v10147_v19 = vpop.eup %10146  ;;  %v14205_v9 = vmul.f32 %v10145_v18, %v10139_v47  ;;  %10166 = vpow2.f32 %v7938_v27  ;;  %v6630_v47 = vadd.f32 1.0, %v14097_v2  ;;  %v6814_v27 = vrot.slane %v6809_v7, %v15110_v29 }
 0xb76   :  { %v10149_v6 = vpop.eup %10148  ;;  %v14207_v33 = vmul.f32 %v10147_v19, %v10141_v55  ;;  %10168 = vpow2.f32 %v7939_v48  ;;  %v15111_v48 = vld [vmem:[#allocation60_spill] sm:$0xff] }
 0xb77   :  { %v10151_v43 = vpop.eup %10150  ;;  %10170 = vpow2.f32 %v7940_v13  ;;  %v14211_v46 = vmul.f32 %v10149_v6, %v10143_v3  ;;  %v6696_v3 = vrot.slane %v15111_v48, 7  ;;  %v15112_v13 = vld [vmem:[#allocation64_spill] sm:$0xff] }
 0xb78   :  { %v10153_v49 = vpop.eup %10152  ;;  %v6519_v23 = vadd.f32 1.0, %v10151_v43  ;;  %10172 = vpow2.f32 %v7941_v14  ;;  %v6697_v18 = vrot.slane %v15112_v13, 7  ;;  %v7945_v14 = vmul.f32 -1.442695, %v6366_v57 }
 0xb79   :  { %v10155_v54 = vpop.eup %10154  ;;  %v6520_v53 = vadd.f32 1.0, %v10153_v49  ;;  %10174 = vpow2.f32 %v7942_v39  ;;  %v15113_v39 = vld [vmem:[#allocation66_spill] sm:$0xff]  ;;  %v6699_v43 = vrot.slane %v15114_v58, 7  ;;  %v15115_v49 = vld [vmem:[#allocation20_spill] sm:$0xff]  ;;  %v6702_v57 = vrot.slane %v15120_v62, 7 }
 0xb7a   :  { %v10157_v36 = vpop.eup %10156  ;;  %v6521_v1 = vadd.f32 1.0, %v10155_v54  ;;  %10176 = vrcp.f32 %v6519_v23  ;;  %v6698_v6 = vrot.slane %v15113_v39, 7  ;;  %v6700_v23 = vrot.slane %v15115_v49, 7  ;;  %v15123_v39 = vld [vmem:[#allocation71_spill] sm:$0xff] }
 0xb7b   :  { %v10159_v21 = vpop.eup %10158  ;;  %v6522_v44 = vadd.f32 1.0, %v10157_v36  ;;  %10178 = vrcp.f32 %v6520_v53  ;;  %v6822_v53 = vrot.slane %v6809_v7, %v15116_v11 }
 0xb7c   :  { %v10161_v15 = vpop.eup %10160  ;;  %v6523_v24 = vadd.f32 1.0, %v10159_v21  ;;  %10180 = vrcp.f32 %v6521_v1  ;;  %v15117_v1 = vld [vmem:[#allocation21_spill] sm:$0xff]  ;;  %v15118_v21 = vld [vmem:[#allocation63_spill] sm:$0xff] }
 0xb7d   :  { %v10163_v61 = vpop.eup %10162  ;;  %v6524_v45 = vadd.f32 1.0, %v10161_v15  ;;  %10182 = vrcp.f32 %v6522_v44  ;;  %v6701_v25 = vrot.slane %v15117_v1, 7  ;;  %v6909_v44 = vadd.f32 %v15118_v21, %v6814_v27  ;;  %v15119_v15 = vld [vmem:[#allocation73_spill] sm:$0xff] }
 0xb7e   :  { %v10165_v63 = vpop.eup %10164  ;;  %v6525_v10 = vadd.f32 1.0, %v10163_v61  ;;  %10184 = vrcp.f32 %v6523_v24  ;;  %v6912_v24 = vadd.f32 %v15119_v15, %v6814_v27 }
 0xb7f   :  { %v10167_v22 = vpop.eup %10166  ;;  %v6526_v16 = vadd.f32 1.0, %v10165_v63  ;;  %10186 = vrcp.f32 %v6524_v45 }
 0xb80   :  { %v10169_v38 = vpop.eup %10168  ;;  %10188 = vrcp.f32 %v6525_v10  ;;  %v6631_v2 = vadd.f32 1.0, %v10167_v22  ;;  %v15121_v10 = vsub.s32 2, %v15109_v37 }
 0xb81   :  { %v10171_v55 = vpop.eup %10170  ;;  %10190 = vrcp.f32 %v6526_v16  ;;  %v6632_v54 = vadd.f32 1.0, %v10169_v38 }
 0xb82   :  { %v10173_v19 = vpop.eup %10172  ;;  %10192 = vpow2.f32 %v7943_v32  ;;  %v6633_v56 = vadd.f32 1.0, %v10171_v55  ;;  %v6818_v32 = vrot.slane %v6809_v7, %v15121_v10  ;;  %v7958_v7 = vmul.f32 -1.442695, %v6912_v24 }
 0xb83   :  { %v10175_v60 = vpop.eup %10174  ;;  %10194 = vpow2.f32 %v7944_v28  ;;  %v6634_v41 = vadd.f32 1.0, %v10173_v19  ;;  %v15122_v28 = vld [vmem:[#allocation32_spill] sm:$0xff] }
 0xb84   :  { %v10177_v36 = vpop.eup %10176  ;;  %10196 = vrcp.f32 %v6630_v47  ;;  %v6952_v38 = vadd.f32 %v15122_v28, %v6822_v53 }
 0xb85   :  { %v10179_v35 = vpop.eup %10178  ;;  %10198 = vpow2.f32 %v7945_v14  ;;  %v6727_v61 = vmul.f32 %v10177_v36, %v6695_v5  ;;  %v7957_v5 = vmul.f32 -1.442695, %v6909_v44 }
 0xb86   :  { %v10181_v45 = vpop.eup %10180  ;;  %v6728_v63 = vmul.f32 %v10179_v35, %v6696_v3  ;;  %10200 = vrcp.f32 %v6631_v2  ;;  %v7959_v1 = vmul.f32 -1.442695, %v6952_v38  ;;  %v6623_v35 = vadd.f32 1.0, %v14074_v34 }
 0xb87   :  { %v10183_v22 = vpop.eup %10182  ;;  %v6729_v16 = vmul.f32 %v10181_v45, %v6697_v18  ;;  %10202 = vrcp.f32 %v6632_v54  ;;  %v14239_v47 = vadd.f32 %v14179_v17, %v6727_v61  ;;  %v6635_v18 = vadd.f32 1.0, %v10175_v60 }
 0xb88   :  { %v10185_v29 = vpop.eup %10184  ;;  %v6730_v55 = vmul.f32 %v10183_v22, %v6698_v6  ;;  %v6760_v27 = vadd.f32 %v14187_v20, %v6728_v63  ;;  %10204 = vrcp.f32 %v6633_v56  ;;  %v6950_v6 = vadd.f32 %v15123_v39, %v6818_v32  ;;  %v15125_v56 = vld [vmem:[#allocation34_spill] sm:$0xff] }
 0xb89   :  { %v10187_v48 = vpop.eup %10186  ;;  %v6731_v3 = vmul.f32 %v10185_v29, %v6699_v43  ;;  %v6761_v13 = vadd.f32 %v14192_v30, %v6729_v16  ;;  %10206 = vrcp.f32 %v6634_v41  ;;  %v15124_v43 = vld [vmem:[#allocation70_spill] sm:$0xff]  ;;  %v6954_v21 = vadd.f32 %v15125_v56, %v6818_v32 }
 0xb8a   :  { %v10189_v37 = vpop.eup %10188  ;;  %10208 = vtanh.f32 %v6760_v27  ;;  %v6732_v14 = vmul.f32 %v10187_v48, %v6700_v23  ;;  %v6762_v19 = vadd.f32 %v14199_v40, %v6730_v55  ;;  %v6956_v49 = vadd.f32 %v15124_v43, %v6822_v53 }
 0xb8b   :  { %v10191_v17 = vpop.eup %10190  ;;  %10210 = vtanh.f32 %v6761_v13  ;;  %v6733_v58 = vmul.f32 %v10189_v37, %v6701_v25  ;;  %v6763_v20 = vadd.f32 %v14202_v8, %v6731_v3 }
 0xb8c   :  { %v10193_v2 = vpop.eup %10192  ;;  %10212 = vpow2.f32 %v7957_v5  ;;  %v6734_v30 = vmul.f32 %v10191_v17, %v6702_v57  ;;  %v6764_v54 = vadd.f32 %v14205_v9, %v6732_v14  ;;  %v7960_v9 = vmul.f32 -1.442695, %v6956_v49 }
 0xb8d   :  { %v10195_v11 = vpop.eup %10194  ;;  %v6636_v36 = vadd.f32 1.0, %v10193_v2  ;;  %10214 = vpow2.f32 %v7958_v7  ;;  %v6765_v60 = vadd.f32 %v14207_v33, %v6733_v58 }
 0xb8e   :  { %v14249_v40 = vpop.eup %10196  ;;  %v6637_v23 = vadd.f32 1.0, %v10195_v11  ;;  %10216 = vrcp.f32 %v6635_v18  ;;  %v6766_v25 = vadd.f32 %v14211_v46, %v6734_v30 }
 0xb8f   :  { %v10199_v8 = vpop.eup %10198  ;;  %10218 = vtanh.f32 %v6950_v6 }
 0xb90   :  { %v14253_v53 = vpop.eup %10200  ;;  %10220 = vrcp.f32 %v6636_v36  ;;  %v6638_v29 = vadd.f32 1.0, %v10199_v8 }
 0xb91   :  { %v10203_v44 = vpop.eup %10202  ;;  %10222 = vrcp.f32 %v6637_v23 }
 0xb92   :  { %v10205_v33 = vpop.eup %10204  ;;  %10224 = vpow2.f32 %v7959_v1 }
 0xb93   :  { %v14256_v41 = vpop.eup %10206  ;;  %10226 = vtanh.f32 %v6954_v21 }
 0xb94   :  { %v10209_v15 = vpop.eup %10208  ;;  %10228 = vpow2.f32 %v7960_v9 }
 0xb95   :  { %v10211_v46 = vpop.eup %10210  ;;  %10230 = vrcp.f32 %v6623_v35  ;;  %v6792_v24 = vmul.f32 %v10209_v15, %v10203_v44 }
 0xb96   :  { %v10213_v61 = vpop.eup %10212  ;;  %10232 = vtanh.f32 %v14154_v51  ;;  %v6793_v45 = vmul.f32 %v10211_v46, %v10205_v33 }
 0xb97   :  { %v10215_v62 = vpop.eup %10214  ;;  %v6964_v57 = vadd.f32 1.0, %v10213_v61  ;;  %10234 = vtanh.f32 %v14135_v31  ;;  %v7020_v34 = vrot.slane %v6792_v24, 7 }
 0xb98   :  { %v10217_v63 = vpop.eup %10216  ;;  %v6965_v10 = vadd.f32 1.0, %v10215_v62  ;;  %10236 = vtanh.f32 %v14141_v4  ;;  %v7021_v32 = vrot.slane %v6793_v45, 6 }
 0xb99   :  { %v10219_v22 = vpop.eup %10218  ;;  %10238 = vrcp.f32 %v6964_v57 }
 0xb9a   :  { %v10221_v16 = vpop.eup %10220  ;;  %10240 = vrcp.f32 %v6965_v10  ;;  %v7022_v28 = vsel %vm1325_vm1, %v7021_v32, %v7020_v34 }
 0xb9b   :  { %v10223_v38 = vpop.eup %10222  ;;  %10242 = vtanh.f32 %v14144_v59 }
 0xb9c   :  { %v10225_v51 = vpop.eup %10224  ;;  %10244 = vtanh.f32 %v14147_v12 }
 0xb9d   :  { %v10227_v31 = vpop.eup %10226  ;;  %v6978_v55 = vadd.f32 1.0, %v10225_v51  ;;  %10246 = vtanh.f32 %v14239_v47 }
 0xb9e   :  { %v10229_v27 = vpop.eup %10228  ;;  %10248 = vtanh.f32 %v6762_v19 }
 0xb9f   :  { %v10231_v4 = vpop.eup %10230  ;;  %10250 = vrcp.f32 %v6638_v29  ;;  %v6979_v3 = vadd.f32 1.0, %v10229_v27 }
 0xba0   :  { %v10233_v5 = vpop.eup %10232  ;;  %10252 = vtanh.f32 %v6763_v20 }
 0xba1   :  { %v10235_v48 = vpop.eup %10234  ;;  %10254 = vrcp.f32 %v6978_v55  ;;  %v6783_v13 = vmul.f32 %v10233_v5, %v10231_v4 }
 0xba2   :  { %v10237_v7 = vpop.eup %10236  ;;  %10256 = vtanh.f32 %v6764_v54  ;;  %v6787_v59 = vmul.f32 %v10235_v48, %v14111_v52 }
 0xba3   :  { %v10239_v37 = vpop.eup %10238  ;;  %10258 = vtanh.f32 %v6765_v60  ;;  %v6788_v12 = vmul.f32 %v10237_v7, %v14137_v50 }
 0xba4   :  { %v10241_v18 = vpop.eup %10240  ;;  %v6984_v47 = vmul.f32 %v10239_v37, %v10219_v22  ;;  %10260 = vtanh.f32 %v6766_v25  ;;  %v7011_v14 = vrot.slane %v6787_v59, 4 }
 0xba5   :  { %v10243_v19 = vpop.eup %10242  ;;  %v6985_v17 = vmul.f32 %v10241_v18, %v10227_v31  ;;  %10262 = vrcp.f32 %v6979_v3  ;;  %v7013_v39 = vrot.slane %v6788_v12, 3 }
 0xba6   :  { %v10245_v6 = vpop.eup %10244  ;;  %10264 = vtanh.f32 %v6984_v47  ;;  %v6789_v58 = vmul.f32 %v10243_v19, %v14152_v26  ;;  %v7012_v20 = vsel %vm1331_vm3, %v7011_v14, %v14168_v42 }
 0xba7   :  { %v10247_v52 = vpop.eup %10246  ;;  %10266 = vtanh.f32 %v6985_v17  ;;  %v6790_v2 = vmul.f32 %v10245_v6, %v14249_v40  ;;  %v7014_v50 = vsel %vm1334_vm4, %v7013_v39, %v7012_v20 }
 0xba8   :  { %v10249_v43 = vpop.eup %10248  ;;  %v6791_v49 = vmul.f32 %v10247_v52, %v14253_v53  ;;  %v7015_v30 = vrot.slane %v6789_v58, 2 }
 0xba9   :  { %v10251_v54 = vpop.eup %10250  ;;  %v6794_v11 = vmul.f32 %v10249_v43, %v14256_v41  ;;  %v7017_v36 = vrot.slane %v6790_v2, 1  ;;  %v8184_v43 = vld [vmem:[%s14356_s9 + $0x20] sm:$0xff]  }
 0xbaa   :  { %v10253_v60 = vpop.eup %10252  ;;  %v7016_v26 = vsel %vm1337_vm5, %v7015_v30, %v7014_v50  ;;  %v8183_v50 = vld [vmem:[%s14356_s9 + $0x18] sm:$0xff]   ;;  %v8186_v30 = vld [vmem:[%s14356_s9 + $0x30] sm:$0xff]  }
 0xbab   :  { %v10255_v23 = vpop.eup %10254  ;;  %v6795_v1 = vmul.f32 %v10253_v60, %v10217_v63  ;;  %v7018_v42 = vsel %vm1340_vm6, %v7017_v36, %v7016_v26  ;;  %v7023_v25 = vrot.slane %v6794_v11, 5  ;;  %8043 = vmatpush3.bf16.msra.mxu1 %v8183_v50  ;;  %v8188_v11 = vld [vmem:[%s14358_s11] sm:$0xff]   ;;  %v8189_v36 = vld [vmem:[%s14358_s11 + $0x8] sm:$0xff]   ;;  %v8190_v60 = vld [vmem:[%s14358_s11 + $0x10] sm:$0xff]  }
 0xbac   :  { %v10257_v8 = vpop.eup %10256  ;;  %v7019_v40 = vsel %vm1343_vm7, %v6791_v49, %v7018_v42  ;;  %8044 = vmatprep.subr.bf16.mxu1 %v10467_v0  ;;  %v8185_v49 = vld [vmem:[%s14356_s9 + $0x28] sm:$0xff]   ;;  %v8191_v26 = vld [vmem:[%s14358_s11 + $0x18] sm:$0xff]  }
 0xbad   :  { %v10259_v56 = vpop.eup %10258  ;;  %v6796_v21 = vmul.f32 %v10257_v8, %v10221_v16  ;;  %v7024_v53 = vsel %vm1328_vm2, %v7023_v25, %v7022_v28  ;;  %v7025_v9 = vrot.slane %v6795_v1, 4  ;;  %v7045_v44 = vpack.c.bf16 %v7019_v40, %v6783_v13  ;;  %v7961_v1 = vld [vmem:[%s14359_s8] ss:$0 sm:$0xff] }
 0xbae   :  { %v10261_v35 = vpop.eup %10260  ;;  %v6797_v33 = vmul.f32 %v10259_v56, %v10223_v38 }
 0xbaf   :  { %v10263_v41 = vpop.eup %10262  ;;  %v6798_v15 = vmul.f32 %v10261_v35, %v10251_v54  ;;  %v7026_v46 = vsel %vm1331_vm3, %v7025_v9, %v7024_v53  ;;  %v7027_v24 = vrot.slane %v6796_v21, 3  ;;  %v7090_v61 = vshrl.u32 %v7045_v44, 16  ;;  %8045 = vmatpush3.bf16.msra.mxu1 %v8184_v43  ;;  %v8187_v54 = vld [vmem:[%s14356_s9 + $0x38] sm:$0xff]  }
 0xbb0   :  { %v10265_v45 = vpop.eup %10264  ;;  %v7029_v62 = vrot.slane %v6797_v33, 2  ;;  %v7093_v57 = vshll.u32 %v7045_v44, 16  ;;  %8046 = vmatprep.subr.bf16.mxu1 %v10467_v0  ;;  %v8192_v33 = vld [vmem:[%s14358_s11 + $0x20] sm:$0xff]  }
 0xbb1   :  { %v10267_v34 = vpop.eup %10266  ;;  %v6988_v63 = vmul.f32 %v10265_v45, %v10255_v23  ;;  %v7028_v10 = vsel %vm1334_vm4, %v7027_v24, %v7026_v46  ;;  %v7031_v32 = vrot.slane %v6798_v15, 1  ;;  %v7092_v38 = vrot.slane %v7090_v61, 3  ;;  %v8194_v15 = vld [vmem:[%s14358_s11 + $0x30] sm:$0xff]   ;;  %v8195_v46 = vld [vmem:[%s14358_s11 + $0x38] sm:$0xff]   ;;  %v7978_v24 = vld [vmem:[%s14360_s10] ss:$0 sm:$0xff] }
 0xbb2   :  { %v6989_v22 = vmul.f32 %v10267_v34, %v10263_v41  ;;  %v7030_v16 = vsel %vm1337_vm5, %v7029_v62, %v7028_v10  ;;  %v7095_v29 = vrot.slane %v7093_v57, 4  ;;  %v8193_v41 = vld [vmem:[%s14358_s11 + $0x28] sm:$0xff]  }
 0xbb3   :  { %v7032_v28 = vsel %vm1340_vm6, %v7031_v32, %v7030_v16  ;;  %v7039_v51 = vrot.slane %v6988_v63, 1  ;;  %8047 = vmatpush3.bf16.msra.mxu1 %v8185_v49 }
 0xbb4   :  { %v7040_v31 = vrot.slane %v6989_v22, 1  ;;  %v7047_v55 = vpack.c.bf16 %v7032_v28, %v7032_v28  ;;  %v7096_v13 = vor.u32 %v7095_v29, %v7092_v38  ;;  %8048 = vmatprep.subr.bf16.mxu1 %v10467_v0 }
 0xbb6   :  { %v7041_v27 = vsel %vm7038_vm8, %v7039_v51, %v7040_v31  ;;  %v7048_v4 = vpack.c.bf16 %v7040_v31, %v7040_v31  ;;  %v7098_v5 = vshrl.u32 %v7047_v55, 16  ;;  %v7101_v48 = vshll.u32 %v7047_v55, 16 }
 0xbb7   :  { %v7046_v3 = vpack.c.bf16 %v7041_v27, %v7039_v51  ;;  %8049 = vmatpush3.bf16.msra.mxu1 %v8186_v30 }
 0xbb8   :  { %v7115_v7 = vshrl.u32 %v7048_v4, 16  ;;  %v7118_v59 = vshll.u32 %v7048_v4, 16  ;;  %v7100_v37 = vrot.slane %v7098_v5, 3  ;;  %v7103_v12 = vrot.slane %v7101_v48, 4  ;;  %8050 = vmatprep.subr.bf16.mxu1 %v10467_v0 }
 0xbb9   :  { %v7107_v18 = vshrl.u32 %v7046_v3, 16  ;;  %v7110_v47 = vshll.u32 %v7046_v3, 16 }
 0xbba   :  { %v7117_v14 = vrot.slane %v7115_v7, 3  ;;  %v7120_v19 = vrot.slane %v7118_v59, 4  ;;  %v7104_v17 = vor.u32 %v7103_v12, %v7100_v37 }
 0xbbb   :  { %v7109_v39 = vrot.slane %v7107_v18, 3  ;;  %v7112_v6 = vrot.slane %v7110_v47, 4  ;;  %8051 = vmatpush3.bf16.msra.mxu1 %v8187_v54 }
 0xbbc   :  { %v7121_v58 = vor.u32 %v7120_v19, %v7117_v14  ;;  %v7105_v20 = vsel %vm7088_vm9, %v7096_v13, %v7104_v17 }
 0xbbd   :  { %v7113_v52 = vor.u32 %v7112_v6, %v7109_v39 }
 0xbbf   :  { %v7122_v2 = vsel %vm7088_vm9, %v7113_v52, %v7121_v58 }
 0xbc0   :  { %7253 = vmatprep.mubr.bf16.mxu0 %v7122_v2 }
 0xbc1   :  { %7254 = vmatmul.mubr.bf16.vlgmr.msra.gmra.mrb[60].mxu0 %v7105_v20 }
 0xbc2   :  { %8072 = vmatprep.mubr.msk.bf16.mxu0 %vm10468_vm10, %v10467_v0  ;;  %8057 = vmatpush3.bf16.msra.mxu0 %v8188_v11 }
 0xbc3   :  { %8058 = vmatprep.subr.bf16.mxu0 %v10467_v0 }
 0xbc6   :  { %8059 = vmatpush3.bf16.msra.mxu0 %v8189_v36 }
 0xbc7   :  { %8060 = vmatprep.subr.bf16.mxu0 %v10467_v0 }
 0xbca   :  { %8061 = vmatpush3.bf16.msra.mxu0 %v8190_v60 }
 0xbcb   :  { %8062 = vmatprep.subr.bf16.mxu0 %v10467_v0 }
 0xbce   :  { %8063 = vmatpush3.bf16.msra.mxu0 %v8191_v26 }
 0xbcf   :  { %8064 = vmatprep.subr.bf16.mxu0 %v10467_v0 }
 0xbd2   :  { %8065 = vmatpush3.bf16.msra.mxu0 %v8192_v33 }
 0xbd3   :  { %8066 = vmatprep.subr.bf16.mxu0 %v10467_v0 }
 0xbd6   :  { %8067 = vmatpush3.bf16.msra.mxu0 %v8193_v41 }
 0xbd7   :  { %8068 = vmatprep.subr.bf16.mxu0 %v10467_v0 }
 0xbda   :  { %8069 = vmatpush3.bf16.msra.mxu0 %v8194_v15 }
 0xbdb   :  { %8070 = vmatprep.subr.bf16.mxu0 %v10467_v0  ;;  %v7987_v0 = vld [vmem:[%s14361_s12] ss:$0 sm:$0xff] }
 0xbde   :  { %8071 = vmatpush3.bf16.msra.mxu0 %v8195_v46 }
 0xc94   :  { %v8012_v23 = vpop.f32.mrb[60].mxu0 }
 0xc95   :  { %v8013_v42 = vpop.f32.mrb[61].mxu0 }
 0xc96   :  { %v8014_v25 = vadd.f32 %v8013_v42, %v8012_v23  ;;  %v8015_v8 = vpop.f32.mrb[62].mxu0 }
 0xc97   :  { %v8016_v40 = vpop.f32.mrb[63].mxu0 }
 0xc98   :  { %v7256_v56 = vadd.f32 %v8014_v25, %v7961_v1  ;;  %v8017_v21 = vadd.f32 %v8016_v40, %v8015_v8 }
 0xc9a   :  { %v7259_v53 = vadd.f32 %v8017_v21, %v7961_v1  ;;  %10268 = vtanh.f32 %v7256_v56 }
 0xc9c   :  { %10270 = vtanh.f32 %v7259_v53 }
 0xca4   :  { %v10269_v9 = vpop.eup %10268 }
 0xca6   :  { %v10271_v44 = vpop.eup %10270 }
 0xca7   :  { %v7264_v35 = vpack.c.bf16 %v10271_v44, %v10269_v9 }
 0xca9   :  { %8053 = vmatmul.mubr.bf16.vlgmr.msra.gmra.mrb[76].mxu1 %v7264_v35 }
 0xd7c   :  { %v7370_v61 = vpop.f32.mrb[76].mxu1 }
 0xd7d   :  { %v7371_v45 = vadd.f32 %v7978_v24, %v7370_v61  ;;  %v8054_v62 = vpop.f32.mrb[77].mxu1 }
 0xd7e   :  { %v7373_v57 = vpop.f32.mrb[78].mxu1 }
 0xd7f   :  { %v7374_v34 = vadd.f32 %v7978_v24, %v7373_v57  ;;  %v8055_v63 = vpop.f32.mrb[79].mxu1  ;;  %10272 = vtanh.f32 %v7371_v45 }
 0xd81   :  { %10274 = vtanh.f32 %v7374_v34 }
 0xd89   :  { %v10273_v10 = vpop.eup %10272 }
 0xd8b   :  { %v10275_v32 = vpop.eup %10274 }
 0xd8c   :  { %v7379_v22 = vpack.c.bf16 %v10275_v32, %v10273_v10 }
 0xd8e   :  { %8073 = vmatmul.mubr.bf16.vlgmr.msra.gmra.mrb[64].mxu0 %v7379_v22 }
 0xe61   :  { %v7485_v16 = vpop.f32.mrb[64].mxu0 }
 0xe62   :  { %v7486_v28 = vadd.f32 %v7987_v0, %v7485_v16  ;;  %v8074_v38 = vpop.f32.mrb[65].mxu0 }
 0xe63   :  { %v7488_v29 = vpop.f32.mrb[66].mxu0 }
 0xe64   :  { %7492 = vst [vmem:[%s14362_s13] sm:$0xff] %v7486_v28  ;;  %v7489_v51 = vadd.f32 %v7987_v0, %v7488_v29  ;;  %v8075_v31 = vpop.f32.mrb[67].mxu0 }
 0xe66   :  { %7493 = vst [vmem:[%s14362_s13 + $0x8] sm:$0xff] %v7489_v51 }

</bundles_post_ra>
